<compile_context>
chip_gen: v5e
topology: v5e:2x2
jax: 0.10.0
libtpu: 0.0.40
codegen_flags: <defaults>
</compile_context>

<pallas_src>
import functools

import jax
import jax.numpy as jnp
from jax.experimental import pallas as pl
from jax.experimental.pallas import tpu as pltpu


def _round_up(x, m):
    return (x + m - 1) // m * m


# ----------------------------------------------------------------------------
# Bilinear 2x upsample, align_corners=False (matches F.interpolate).
# TODO(synk): the gather-based spatial interpolation stays in plain JAX (it is
# cheap VPU work that XLA fuses with the pad / bf16 cast below); folding it
# into the Pallas kernel would save one more HBM pass over the big tensor.
# ----------------------------------------------------------------------------
def upsample_bilinear_2x_nhwc(x):
    def interp(arr, axis, size):
        dst = jnp.arange(2 * size, dtype=jnp.float32)
        src = jnp.clip((dst + 0.5) / 2.0 - 0.5, 0.0, float(size - 1))
        lo = jnp.floor(src).astype(jnp.int32)
        hi = jnp.minimum(lo + 1, size - 1)
        frac = src - lo.astype(jnp.float32)
        a = jnp.take(arr, lo, axis=axis)
        b = jnp.take(arr, hi, axis=axis)
        bshape = [1] * arr.ndim
        bshape[axis] = 2 * size
        frac = frac.reshape(bshape)
        return a * (1.0 - frac) + b * frac

    _, h, w, _ = x.shape
    x = interp(x, axis=1, size=h)
    x = interp(x, axis=2, size=w)
    return x


# ----------------------------------------------------------------------------
# Fused Pallas kernel: (conv3x3 + bias + ReLU) x 2 on one row-block.
# ----------------------------------------------------------------------------
def _conv3x3_bf16(x, w_ref, b_ref, rows_out, cols_out):
    """Valid 3x3 conv of bf16 `x` (R, C, cin) against flattened HWIO weights.

    w_ref: (9*cin, cout) bf16 with row index = dh*3*cin + dw*cin + c.
    b_ref: (1, cout) f32.
    The three dw taps are folded into one contraction (K = 3*cin) -> 3 MXU
    matmuls with f32 accumulation.  Returns relu(conv + bias) as
    (rows_out*cols_out, cout) f32.
    """
    cin = x.shape[-1]
    cout = w_ref.shape[1]
    acc = jnp.zeros((rows_out * cols_out, cout), jnp.float32)
    for dh in range(3):
        rows = x[dh:dh + rows_out]                       # (rows_out, C, cin)
        taps = jnp.concatenate(
            [rows[:, dw:dw + cols_out, :] for dw in range(3)],
            axis=-1)                                     # (rows_out, cols_out, 3*cin)
        acc = acc + jnp.dot(
            taps.reshape(rows_out * cols_out, 3 * cin),
            w_ref[dh * 3 * cin:(dh + 1) * 3 * cin, :],
            preferred_element_type=jnp.float32)
    return jnp.maximum(acc + b_ref[...], 0.0)


def _decoder_block_kernel(xm_ref, xh_ref, w1_ref, b1_ref, w2_ref, b2_ref,
                          o_ref):
    # xm_ref: (1, TH, Wp, Cin) bf16 -- padded-image rows [r0-2, r0+TH-2)
    # xh_ref: (1, 4,  Wp, Cin) bf16 -- bottom halo rows  [r0+TH-2, r0+TH+2)
    # w1_ref: (9*Cin, Cm) bf16 ; b1_ref: (1, Cm) f32
    # w2_ref: (9*Cm,  Co) bf16 ; b2_ref: (1, Co) f32
    # o_ref : (1, TH, Wu, Co) f32 -- final output rows [r0, r0+TH)
    th, wu, co = o_ref.shape[1], o_ref.shape[2], o_ref.shape[3]
    cm = b1_ref.shape[1]
    wp = xm_ref.shape[2]
    c1p = wp - 2                 # width of computed mid slab (multiple of 8)
    r1 = th + 2                  # rows of computed mid slab

    # Stitch main rows + bottom halo -> (TH+4, Wp, Cin).
    x = jnp.concatenate([xm_ref[0], xh_ref[0]], axis=0)

    # ---- cr1: conv3x3 + bias + ReLU -> mid rows [r0-1, r0+TH+1) ----
    mid = _conv3x3_bf16(x, w1_ref, b1_ref, r1, c1p)
    mid = mid.astype(jnp.bfloat16).reshape(r1, c1p, cm)

    # cr2 uses zero padding OF mid: mid positions outside the real image were
    # computed from the zero-padded input and must be zeroed to match the
    # reference "SAME" semantics of the second conv.
    r0 = pl.program_id(1) * th
    hu = pl.num_programs(1) * th
    row_g = r0 - 1 + jax.lax.broadcasted_iota(jnp.int32, (r1, c1p, 1), 0)
    col_g = jax.lax.broadcasted_iota(jnp.int32, (r1, c1p, 1), 1) - 1
    valid = (row_g >= 0) & (row_g < hu) & (col_g >= 0) & (col_g < wu)
    mid = mid * valid.astype(mid.dtype)

    # ---- cr2: conv3x3 + bias + ReLU -> output rows [r0, r0+TH) ----
    out = _conv3x3_bf16(mid, w2_ref, b2_ref, th, wu)
    o_ref[0] = out.reshape(th, wu, co).astype(o_ref.dtype)


# ----------------------------------------------------------------------------
# Wrapper: NCHW public API, parameter repacking, BlockSpec / grid setup.
# ----------------------------------------------------------------------------
def _pick_tile_rows(hu, max_rows=16):
    """Largest multiple-of-4 divisor of hu that is <= max_rows."""
    if hu % 4 != 0:
        # TODO(synk): support upsampled heights not divisible by 4 (odd H).
        raise ValueError(f"upsampled height {hu} must be a multiple of 4")
    best = 4
    for th in range(4, min(hu, max_rows) + 1, 4):
        if hu % th == 0:
            best = th
    return best


def _prep_conv_weights(w_hwio, b, cout_pad):
    """Zero-pad Cout to cout_pad, flatten HWIO -> (9*Cin, Cout_pad) bf16."""
    kh, kw, cin, cout = w_hwio.shape
    w = jnp.pad(w_hwio, ((0, 0), (0, 0), (0, 0), (0, cout_pad - cout)))
    wf = w.reshape(kh * kw * cin, cout_pad).astype(jnp.bfloat16)
    bf = jnp.pad(b, (0, cout_pad - cout)).astype(jnp.float32).reshape(1, cout_pad)
    return wf, bf


def decoder_block_v2(x_nchw, params):
    """DecoderBlockV2 forward: NCHW f32 in -> NCHW f32 out (like PyTorch)."""
    w1, b1, w2, b2 = params["w1"], params["b1"], params["w2"], params["b2"]
    cin, cmid = w1.shape[2], w1.shape[3]
    cout = w2.shape[3]
    n, _, h, w = x_nchw.shape
    hu, wu = 2 * h, 2 * w

    cm_p = _round_up(cmid, 128)         # lane-dense mid channels
    co_p = _round_up(cout, 128)         # lane-dense output channels
    c1p = _round_up(wu + 2, 8)          # mid slab width (sublane aligned)
    wp = c1p + 2                        # padded input width
    th = _pick_tile_rows(hu)            # output rows per grid step
    nrb = hu // th
    halo_blk = th // 4                  # block-index stride for the halo spec

    # Upsample + spatial zero pad (2 top/left, >=2 bottom/right) + bf16 cast.
    x = jnp.transpose(x_nchw, (0, 2, 3, 1))             # NCHW -> NHWC
    x = upsample_bilinear_2x_nhwc(x).astype(jnp.bfloat16)
    x = jnp.pad(x, ((0, 0), (2, 2), (2, wp - wu - 2), (0, 0)))
    # x: (N, Hu+4, Wp, Cin) bf16

    w1f, b1f = _prep_conv_weights(w1, b1, cm_p)
    # conv2: pad its *input* (mid) channels to cm_p before flattening so the
    # flattened row index matches the kernel's channel-padded mid slab.
    w2p = jnp.pad(w2, ((0, 0), (0, 0), (0, cm_p - cmid), (0, 0)))
    w2f, b2f = _prep_conv_weights(w2p, b2, co_p)

    out = pl.pallas_call(
        _decoder_block_kernel,
        out_shape=jax.ShapeDtypeStruct((n, hu, wu, co_p), jnp.float32),
        grid_spec=pltpu.PrefetchScalarGridSpec(
            num_scalar_prefetch=0,
            grid=(n, nrb),
            in_specs=[
                # main rows [r*TH, r*TH + TH) of the padded image
                pl.BlockSpec((1, th, wp, cin), lambda b, r: (b, r, 0, 0)),
                # 4-row bottom halo [(r+1)*TH, (r+1)*TH + 4)
                pl.BlockSpec((1, 4, wp, cin),
                             lambda b, r: (b, (r + 1) * halo_blk, 0, 0)),
                pl.BlockSpec((9 * cin, cm_p), lambda b, r: (0, 0)),
                pl.BlockSpec((1, cm_p), lambda b, r: (0, 0)),
                pl.BlockSpec((9 * cm_p, co_p), lambda b, r: (0, 0)),
                pl.BlockSpec((1, co_p), lambda b, r: (0, 0)),
            ],
            out_specs=pl.BlockSpec((1, th, wu, co_p),
                                   lambda b, r: (b, r, 0, 0)),
        ),
        compiler_params=pltpu.CompilerParams(
            dimension_semantics=("parallel", "parallel"),
            vmem_limit_bytes=64 * 1024 * 1024),
    )(x, x, w1f, b1f, w2f, b2f)

    out = out[..., :cout]                               # drop channel padding
    return jnp.transpose(out, (0, 3, 1, 2))             # NHWC -> NCHW


def init_params(key, in_channels, middle_channels, out_channels):
    """Deterministic init mimicking PyTorch Conv2d defaults (uniform +-1/sqrt(fan_in))."""
    k1, k2, k3, k4 = jax.random.split(key, 4)

    def conv_init(kw_key, kb_key, cin, cout):
        fan_in = cin * 9
        bound = 1.0 / jnp.sqrt(float(fan_in))
        w = jax.random.uniform(kw_key, (3, 3, cin, cout), jnp.float32,
                               -bound, bound)            # HWIO
        b = jax.random.uniform(kb_key, (cout,), jnp.float32, -bound, bound)
        return w, b

    w1, b1 = conv_init(k1, k2, in_channels, middle_channels)
    w2, b2 = conv_init(k3, k4, middle_channels, out_channels)
    return {"w1": w1, "b1": b1, "w2": w2, "b2": b2}


# ----------------------------------------------------------------------------
# Pure-JAX references for the numerical self-check.
# ----------------------------------------------------------------------------
def _ref_conv_relu_nhwc(x, w, b, *, cast_bf16):
    if cast_bf16:
        x = x.astype(jnp.bfloat16)
        w = w.astype(jnp.bfloat16)
    y = jax.lax.conv_general_dilated(
        x, w, window_strides=(1, 1), padding="SAME",
        dimension_numbers=("NHWC", "HWIO", "NHWC"),
        preferred_element_type=jnp.float32)
    return jnp.maximum(y + b[None, None, None, :], 0.0)


def _ref_decoder_block_v2(x_nchw, params, *, cast_bf16):
    x = jnp.transpose(x_nchw, (0, 2, 3, 1))
    x = upsample_bilinear_2x_nhwc(x)
    x = _ref_conv_relu_nhwc(x, params["w1"], params["b1"], cast_bf16=cast_bf16)
    x = _ref_conv_relu_nhwc(x, params["w2"], params["b2"], cast_bf16=cast_bf16)
    return jnp.transpose(x, (0, 3, 1, 2))


if __name__ == "__main__":
    in_channels, middle_channels, out_channels = 4, 8, 4
    key = jax.random.PRNGKey(0)
    kx, kp = jax.random.split(key)

    x = jax.random.normal(kx, (2, in_channels, 16, 16), jnp.float32)   # NCHW
    params = init_params(kp, in_channels, middle_channels, out_channels)

    fwd = jax.jit(functools.partial(decoder_block_v2, params=params))
    out = fwd(x)
    jax.block_until_ready(out)

    assert out.shape == (2, out_channels, 32, 32), out.shape

    # Tight check vs. a reference using the same bf16-matmul / f32-accum recipe.
    ref_bf16 = _ref_decoder_block_v2(x, params, cast_bf16=True)
    if not jnp.allclose(out, ref_bf16, atol=1e-2, rtol=1e-2):
        raise AssertionError("Pallas output does not match bf16 JAX reference")

    # Loose check vs. the pure-f32 reference (only bf16 quantization error).
    ref_f32 = _ref_decoder_block_v2(x, params, cast_bf16=False)
    if not jnp.allclose(out, ref_f32, atol=1e-1, rtol=1e-1):
        raise AssertionError("Pallas output does not match f32 JAX reference")

    print("KERNEL_OK")
</pallas_src>

<mosaic_0001>
module attributes {stable_mosaic.version = 11 : i64} {
  func.func @_decoder_block_kernel(%arg0: i32, %arg1: i32, %arg2: memref<1x16x42x4xbf16, #tpu.memory_space<vmem>>, %arg3: memref<1x4x42x4xbf16, #tpu.memory_space<vmem>>, %arg4: memref<36x128xbf16, #tpu.memory_space<vmem>>, %arg5: memref<1x128xf32, #tpu.memory_space<vmem>>, %arg6: memref<1152x128xbf16, #tpu.memory_space<vmem>>, %arg7: memref<1x128xf32, #tpu.memory_space<vmem>>, %arg8: memref<1x16x32x128xf32, #tpu.memory_space<vmem>>) attributes {dimension_semantics = [#tpu.dimension_semantics<parallel>, #tpu.dimension_semantics<parallel>], iteration_bounds = array<i64: 2, 2>, scalar_prefetch = 0 : i64, scratch_operands = 0 : i64, tpu.core_type = #tpu.core_type<tc>, window_params = [{transform_indices = @transform_0, window_bounds = array<i64: 1, 16, 42, 4>}, {transform_indices = @transform_1, window_bounds = array<i64: 1, 4, 42, 4>}, {pipeline_mode = #tpu.pipeline_mode<synchronous>, transform_indices = @transform_2, window_bounds = array<i64: 36, 128>}, {pipeline_mode = #tpu.pipeline_mode<synchronous>, transform_indices = @transform_3, window_bounds = array<i64: 1, 128>}, {pipeline_mode = #tpu.pipeline_mode<synchronous>, transform_indices = @transform_4, window_bounds = array<i64: 1152, 128>}, {pipeline_mode = #tpu.pipeline_mode<synchronous>, transform_indices = @transform_5, window_bounds = array<i64: 1, 128>}, {transform_indices = @transform_6, window_bounds = array<i64: 1, 16, 32, 128>}]} {
    %c0 = arith.constant 0 : index
    %c0_0 = arith.constant 0 : index
    %c0_1 = arith.constant 0 : index
    %c0_2 = arith.constant 0 : index
    %0 = vector.load %arg2[%c0, %c0_0, %c0_1, %c0_2] : memref<1x16x42x4xbf16, #tpu.memory_space<vmem>>, vector<1x16x42x4xbf16>
    %1 = vector.shape_cast %0 : vector<1x16x42x4xbf16> to vector<16x42x4xbf16>
    %c0_3 = arith.constant 0 : index
    %c0_4 = arith.constant 0 : index
    %c0_5 = arith.constant 0 : index
    %c0_6 = arith.constant 0 : index
    %2 = vector.load %arg3[%c0_3, %c0_4, %c0_5, %c0_6] : memref<1x4x42x4xbf16, #tpu.memory_space<vmem>>, vector<1x4x42x4xbf16>
    %3 = vector.shape_cast %2 : vector<1x4x42x4xbf16> to vector<4x42x4xbf16>
    %4 = tpu.concatenate %1, %3 in 0 : vector<16x42x4xbf16>, vector<4x42x4xbf16> -> vector<20x42x4xbf16>
    %cst = arith.constant 0.000000e+00 : f32
    %5 = vector.broadcast %cst : f32 to vector<720x128xf32>
    %6 = vector.extract_strided_slice %4 {offsets = [0, 0, 0], sizes = [18, 42, 4], strides = [1, 1, 1]} : vector<20x42x4xbf16> to vector<18x42x4xbf16>
    %7 = vector.extract_strided_slice %6 {offsets = [0, 0, 0], sizes = [18, 40, 4], strides = [1, 1, 1]} : vector<18x42x4xbf16> to vector<18x40x4xbf16>
    %8 = vector.extract_strided_slice %6 {offsets = [0, 1, 0], sizes = [18, 40, 4], strides = [1, 1, 1]} : vector<18x42x4xbf16> to vector<18x40x4xbf16>
    %9 = vector.extract_strided_slice %6 {offsets = [0, 2, 0], sizes = [18, 40, 4], strides = [1, 1, 1]} : vector<18x42x4xbf16> to vector<18x40x4xbf16>
    %10 = tpu.concatenate %7, %8, %9 in 2 : vector<18x40x4xbf16>, vector<18x40x4xbf16>, vector<18x40x4xbf16> -> vector<18x40x12xbf16>
    %11 = vector.shape_cast %10 : vector<18x40x12xbf16> to vector<720x12xbf16>
    %c0_7 = arith.constant 0 : index
    %c0_8 = arith.constant 0 : index
    %12 = vector.load %arg4[%c0_7, %c0_8] : memref<36x128xbf16, #tpu.memory_space<vmem>>, vector<12x128xbf16>
    %cst_9 = arith.constant dense<0.000000e+00> : vector<720x128xf32>
    %13 = tpu.matmul %11, %12, %cst_9 {dimension_numbers = #tpu.dot_dimension_numbers<[1], [0], [0], [1], [0, 0, 1, 1], [], []>} : vector<720x12xbf16>, vector<12x128xbf16>, vector<720x128xf32> -> vector<720x128xf32>
    %14 = arith.addf %5, %13 : vector<720x128xf32>
    %15 = vector.extract_strided_slice %4 {offsets = [1, 0, 0], sizes = [18, 42, 4], strides = [1, 1, 1]} : vector<20x42x4xbf16> to vector<18x42x4xbf16>
    %16 = vector.extract_strided_slice %15 {offsets = [0, 0, 0], sizes = [18, 40, 4], strides = [1, 1, 1]} : vector<18x42x4xbf16> to vector<18x40x4xbf16>
    %17 = vector.extract_strided_slice %15 {offsets = [0, 1, 0], sizes = [18, 40, 4], strides = [1, 1, 1]} : vector<18x42x4xbf16> to vector<18x40x4xbf16>
    %18 = vector.extract_strided_slice %15 {offsets = [0, 2, 0], sizes = [18, 40, 4], strides = [1, 1, 1]} : vector<18x42x4xbf16> to vector<18x40x4xbf16>
    %19 = tpu.concatenate %16, %17, %18 in 2 : vector<18x40x4xbf16>, vector<18x40x4xbf16>, vector<18x40x4xbf16> -> vector<18x40x12xbf16>
    %20 = vector.shape_cast %19 : vector<18x40x12xbf16> to vector<720x12xbf16>
    %c12 = arith.constant 12 : index
    %c0_10 = arith.constant 0 : index
    %21 = vector.load %arg4[%c12, %c0_10] : memref<36x128xbf16, #tpu.memory_space<vmem>>, vector<12x128xbf16>
    %cst_11 = arith.constant dense<0.000000e+00> : vector<720x128xf32>
    %22 = tpu.matmul %20, %21, %cst_11 {dimension_numbers = #tpu.dot_dimension_numbers<[1], [0], [0], [1], [0, 0, 1, 1], [], []>} : vector<720x12xbf16>, vector<12x128xbf16>, vector<720x128xf32> -> vector<720x128xf32>
    %23 = arith.addf %14, %22 : vector<720x128xf32>
    %24 = vector.extract_strided_slice %4 {offsets = [2, 0, 0], sizes = [18, 42, 4], strides = [1, 1, 1]} : vector<20x42x4xbf16> to vector<18x42x4xbf16>
    %25 = vector.extract_strided_slice %24 {offsets = [0, 0, 0], sizes = [18, 40, 4], strides = [1, 1, 1]} : vector<18x42x4xbf16> to vector<18x40x4xbf16>
    %26 = vector.extract_strided_slice %24 {offsets = [0, 1, 0], sizes = [18, 40, 4], strides = [1, 1, 1]} : vector<18x42x4xbf16> to vector<18x40x4xbf16>
    %27 = vector.extract_strided_slice %24 {offsets = [0, 2, 0], sizes = [18, 40, 4], strides = [1, 1, 1]} : vector<18x42x4xbf16> to vector<18x40x4xbf16>
    %28 = tpu.concatenate %25, %26, %27 in 2 : vector<18x40x4xbf16>, vector<18x40x4xbf16>, vector<18x40x4xbf16> -> vector<18x40x12xbf16>
    %29 = vector.shape_cast %28 : vector<18x40x12xbf16> to vector<720x12xbf16>
    %c24 = arith.constant 24 : index
    %c0_12 = arith.constant 0 : index
    %30 = vector.load %arg4[%c24, %c0_12] : memref<36x128xbf16, #tpu.memory_space<vmem>>, vector<12x128xbf16>
    %cst_13 = arith.constant dense<0.000000e+00> : vector<720x128xf32>
    %31 = tpu.matmul %29, %30, %cst_13 {dimension_numbers = #tpu.dot_dimension_numbers<[1], [0], [0], [1], [0, 0, 1, 1], [], []>} : vector<720x12xbf16>, vector<12x128xbf16>, vector<720x128xf32> -> vector<720x128xf32>
    %32 = arith.addf %23, %31 : vector<720x128xf32>
    %c0_14 = arith.constant 0 : index
    %c0_15 = arith.constant 0 : index
    %33 = vector.load %arg5[%c0_14, %c0_15] : memref<1x128xf32, #tpu.memory_space<vmem>>, vector<1x128xf32>
    %34 = vector.broadcast %33 : vector<1x128xf32> to vector<720x128xf32>
    %35 = arith.addf %32, %34 : vector<720x128xf32>
    %cst_16 = arith.constant 0.000000e+00 : f32
    %36 = vector.broadcast %cst_16 : f32 to vector<720x128xf32>
    %37 = arith.maximumf %35, %36 : vector<720x128xf32>
    %38 = arith.truncf %37 : vector<720x128xf32> to vector<720x128xbf16>
    %39 = vector.shape_cast %38 : vector<720x128xbf16> to vector<18x40x128xbf16>
    %c16_i32 = arith.constant 16 : i32
    %40 = arith.muli %arg1, %c16_i32 : i32
    %c1_i32 = arith.constant 1 : i32
    %41 = arith.subi %40, %c1_i32 : i32
    %42 = tpu.iota {dimensions = array<i32: 0>} : vector<18x40x1xi32>
    %43 = vector.broadcast %41 : i32 to vector<18x40x1xi32>
    %44 = arith.addi %43, %42 : vector<18x40x1xi32>
    %45 = tpu.iota {dimensions = array<i32: 1>} : vector<18x40x1xi32>
    %c1_i32_17 = arith.constant 1 : i32
    %46 = vector.broadcast %c1_i32_17 : i32 to vector<18x40x1xi32>
    %47 = arith.subi %45, %46 : vector<18x40x1xi32>
    %c0_i32 = arith.constant 0 : i32
    %48 = vector.broadcast %c0_i32 : i32 to vector<18x40x1xi32>
    %49 = arith.cmpi sge, %44, %48 : vector<18x40x1xi32>
    %c32_i32 = arith.constant 32 : i32
    %50 = vector.broadcast %c32_i32 : i32 to vector<18x40x1xi32>
    %51 = arith.cmpi slt, %44, %50 : vector<18x40x1xi32>
    %52 = arith.andi %49, %51 : vector<18x40x1xi1>
    %c0_i32_18 = arith.constant 0 : i32
    %53 = vector.broadcast %c0_i32_18 : i32 to vector<18x40x1xi32>
    %54 = arith.cmpi sge, %47, %53 : vector<18x40x1xi32>
    %55 = arith.andi %52, %54 : vector<18x40x1xi1>
    %c32_i32_19 = arith.constant 32 : i32
    %56 = vector.broadcast %c32_i32_19 : i32 to vector<18x40x1xi32>
    %57 = arith.cmpi slt, %47, %56 : vector<18x40x1xi32>
    %58 = arith.andi %55, %57 : vector<18x40x1xi1>
    %59 = arith.extui %58 : vector<18x40x1xi1> to vector<18x40x1xi32>
    %60 = arith.sitofp %59 : vector<18x40x1xi32> to vector<18x40x1xf32>
    %61 = arith.truncf %60 : vector<18x40x1xf32> to vector<18x40x1xbf16>
    %62 = vector.broadcast %61 : vector<18x40x1xbf16> to vector<18x40x128xbf16>
    %63 = arith.mulf %39, %62 : vector<18x40x128xbf16>
    %cst_20 = arith.constant 0.000000e+00 : f32
    %64 = vector.broadcast %cst_20 : f32 to vector<512x128xf32>
    %65 = vector.extract_strided_slice %63 {offsets = [0, 0, 0], sizes = [16, 40, 128], strides = [1, 1, 1]} : vector<18x40x128xbf16> to vector<16x40x128xbf16>
    %66 = vector.extract_strided_slice %65 {offsets = [0, 0, 0], sizes = [16, 32, 128], strides = [1, 1, 1]} : vector<16x40x128xbf16> to vector<16x32x128xbf16>
    %67 = vector.extract_strided_slice %65 {offsets = [0, 1, 0], sizes = [16, 32, 128], strides = [1, 1, 1]} : vector<16x40x128xbf16> to vector<16x32x128xbf16>
    %68 = vector.extract_strided_slice %65 {offsets = [0, 2, 0], sizes = [16, 32, 128], strides = [1, 1, 1]} : vector<16x40x128xbf16> to vector<16x32x128xbf16>
    %69 = tpu.concatenate %66, %67, %68 in 2 : vector<16x32x128xbf16>, vector<16x32x128xbf16>, vector<16x32x128xbf16> -> vector<16x32x384xbf16>
    %70 = vector.shape_cast %69 : vector<16x32x384xbf16> to vector<512x384xbf16>
    %c0_21 = arith.constant 0 : index
    %c0_22 = arith.constant 0 : index
    %71 = vector.load %arg6[%c0_21, %c0_22] : memref<1152x128xbf16, #tpu.memory_space<vmem>>, vector<384x128xbf16>
    %cst_23 = arith.constant dense<0.000000e+00> : vector<512x128xf32>
    %72 = tpu.matmul %70, %71, %cst_23 {dimension_numbers = #tpu.dot_dimension_numbers<[1], [0], [0], [1], [0, 0, 1, 1], [], []>} : vector<512x384xbf16>, vector<384x128xbf16>, vector<512x128xf32> -> vector<512x128xf32>
    %73 = arith.addf %64, %72 : vector<512x128xf32>
    %74 = vector.extract_strided_slice %63 {offsets = [1, 0, 0], sizes = [16, 40, 128], strides = [1, 1, 1]} : vector<18x40x128xbf16> to vector<16x40x128xbf16>
    %75 = vector.extract_strided_slice %74 {offsets = [0, 0, 0], sizes = [16, 32, 128], strides = [1, 1, 1]} : vector<16x40x128xbf16> to vector<16x32x128xbf16>
    %76 = vector.extract_strided_slice %74 {offsets = [0, 1, 0], sizes = [16, 32, 128], strides = [1, 1, 1]} : vector<16x40x128xbf16> to vector<16x32x128xbf16>
    %77 = vector.extract_strided_slice %74 {offsets = [0, 2, 0], sizes = [16, 32, 128], strides = [1, 1, 1]} : vector<16x40x128xbf16> to vector<16x32x128xbf16>
    %78 = tpu.concatenate %75, %76, %77 in 2 : vector<16x32x128xbf16>, vector<16x32x128xbf16>, vector<16x32x128xbf16> -> vector<16x32x384xbf16>
    %79 = vector.shape_cast %78 : vector<16x32x384xbf16> to vector<512x384xbf16>
    %c384 = arith.constant 384 : index
    %c0_24 = arith.constant 0 : index
    %80 = vector.load %arg6[%c384, %c0_24] : memref<1152x128xbf16, #tpu.memory_space<vmem>>, vector<384x128xbf16>
    %cst_25 = arith.constant dense<0.000000e+00> : vector<512x128xf32>
    %81 = tpu.matmul %79, %80, %cst_25 {dimension_numbers = #tpu.dot_dimension_numbers<[1], [0], [0], [1], [0, 0, 1, 1], [], []>} : vector<512x384xbf16>, vector<384x128xbf16>, vector<512x128xf32> -> vector<512x128xf32>
    %82 = arith.addf %73, %81 : vector<512x128xf32>
    %83 = vector.extract_strided_slice %63 {offsets = [2, 0, 0], sizes = [16, 40, 128], strides = [1, 1, 1]} : vector<18x40x128xbf16> to vector<16x40x128xbf16>
    %84 = vector.extract_strided_slice %83 {offsets = [0, 0, 0], sizes = [16, 32, 128], strides = [1, 1, 1]} : vector<16x40x128xbf16> to vector<16x32x128xbf16>
    %85 = vector.extract_strided_slice %83 {offsets = [0, 1, 0], sizes = [16, 32, 128], strides = [1, 1, 1]} : vector<16x40x128xbf16> to vector<16x32x128xbf16>
    %86 = vector.extract_strided_slice %83 {offsets = [0, 2, 0], sizes = [16, 32, 128], strides = [1, 1, 1]} : vector<16x40x128xbf16> to vector<16x32x128xbf16>
    %87 = tpu.concatenate %84, %85, %86 in 2 : vector<16x32x128xbf16>, vector<16x32x128xbf16>, vector<16x32x128xbf16> -> vector<16x32x384xbf16>
    %88 = vector.shape_cast %87 : vector<16x32x384xbf16> to vector<512x384xbf16>
    %c768 = arith.constant 768 : index
    %c0_26 = arith.constant 0 : index
    %89 = vector.load %arg6[%c768, %c0_26] : memref<1152x128xbf16, #tpu.memory_space<vmem>>, vector<384x128xbf16>
    %cst_27 = arith.constant dense<0.000000e+00> : vector<512x128xf32>
    %90 = tpu.matmul %88, %89, %cst_27 {dimension_numbers = #tpu.dot_dimension_numbers<[1], [0], [0], [1], [0, 0, 1, 1], [], []>} : vector<512x384xbf16>, vector<384x128xbf16>, vector<512x128xf32> -> vector<512x128xf32>
    %91 = arith.addf %82, %90 : vector<512x128xf32>
    %c0_28 = arith.constant 0 : index
    %c0_29 = arith.constant 0 : index
    %92 = vector.load %arg7[%c0_28, %c0_29] : memref<1x128xf32, #tpu.memory_space<vmem>>, vector<1x128xf32>
    %93 = vector.broadcast %92 : vector<1x128xf32> to vector<512x128xf32>
    %94 = arith.addf %91, %93 : vector<512x128xf32>
    %cst_30 = arith.constant 0.000000e+00 : f32
    %95 = vector.broadcast %cst_30 : f32 to vector<512x128xf32>
    %96 = arith.maximumf %94, %95 : vector<512x128xf32>
    %97 = vector.shape_cast %96 : vector<512x128xf32> to vector<16x32x128xf32>
    %c0_31 = arith.constant 0 : index
    %c0_32 = arith.constant 0 : index
    %c0_33 = arith.constant 0 : index
    %c0_34 = arith.constant 0 : index
    %98 = vector.load %arg8[%c0_31, %c0_32, %c0_33, %c0_34] : memref<1x16x32x128xf32, #tpu.memory_space<vmem>>, vector<1x16x32x128xf32>
    %99 = vector.shape_cast %98 : vector<1x16x32x128xf32> to vector<16x32x128xf32>
    %100 = vector.shape_cast %97 : vector<16x32x128xf32> to vector<1x16x32x128xf32>
    tpu.vector_store %arg8[%c0_31, %c0_32, %c0_33, %c0_34], %100 {strides = array<i32>} : memref<1x16x32x128xf32, #tpu.memory_space<vmem>>, vector<1x16x32x128xf32>,
    return
  }
  func.func @transform_0(%arg0: i32, %arg1: i32) -> (i32, i32, i32, i32) {
    %c0_i32 = arith.constant 0 : i32
    %c0_i32_0 = arith.constant 0 : i32
    %c0_i32_1 = arith.constant 0 : i32
    return %arg0, %arg1, %c0_i32, %c0_i32_0 : i32, i32, i32, i32
  }
  func.func @transform_1(%arg0: i32, %arg1: i32) -> (i32, i32, i32, i32) {
    %c1_i32 = arith.constant 1 : i32
    %0 = arith.addi %arg1, %c1_i32 : i32
    %c4_i32 = arith.constant 4 : i32
    %1 = arith.muli %0, %c4_i32 : i32
    %c0_i32 = arith.constant 0 : i32
    %c0_i32_0 = arith.constant 0 : i32
    %c0_i32_1 = arith.constant 0 : i32
    return %arg0, %1, %c0_i32, %c0_i32_0 : i32, i32, i32, i32
  }
  func.func @transform_2(%arg0: i32, %arg1: i32) -> (i32, i32) {
    %c0_i32 = arith.constant 0 : i32
    %c0_i32_0 = arith.constant 0 : i32
    %c0_i32_1 = arith.constant 0 : i32
    return %c0_i32, %c0_i32_0 : i32, i32
  }
  func.func @transform_3(%arg0: i32, %arg1: i32) -> (i32, i32) {
    %c0_i32 = arith.constant 0 : i32
    %c0_i32_0 = arith.constant 0 : i32
    %c0_i32_1 = arith.constant 0 : i32
    return %c0_i32, %c0_i32_0 : i32, i32
  }
  func.func @transform_4(%arg0: i32, %arg1: i32) -> (i32, i32) {
    %c0_i32 = arith.constant 0 : i32
    %c0_i32_0 = arith.constant 0 : i32
    %c0_i32_1 = arith.constant 0 : i32
    return %c0_i32, %c0_i32_0 : i32, i32
  }
  func.func @transform_5(%arg0: i32, %arg1: i32) -> (i32, i32) {
    %c0_i32 = arith.constant 0 : i32
    %c0_i32_0 = arith.constant 0 : i32
    %c0_i32_1 = arith.constant 0 : i32
    return %c0_i32, %c0_i32_0 : i32, i32
  }
  func.func @transform_6(%arg0: i32, %arg1: i32) -> (i32, i32, i32, i32) {
    %c0_i32 = arith.constant 0 : i32
    %c0_i32_0 = arith.constant 0 : i32
    %c0_i32_1 = arith.constant 0 : i32
    return %arg0, %arg1, %c0_i32, %c0_i32_0 : i32, i32, i32, i32
  }
}

</mosaic_0001>

<bundles_post_ra>
// kernel: decoder_block_v2.1
= control target key start
LH: loop header
LB: loop body
LE: loop exit
PB: predicated region body
PF: predicated region fallthrough
CT: control target
= control target key end

     0   :  { %s8681_s21 = smov 0   ;;  %s8683_s22 = smov 0   ;;  %s13186_s0 = inlined_call_operand.vmem [shape: bf16[2,36,42,4], index: 0, kind: input, shape index: {}, may-alias: {0,1}]   ;;  %s13187_s1 = inlined_call_operand.vmem [shape: bf16[2,36,42,4], index: 1, kind: input, shape index: {}, may-alias: {0,1}]   ;;  %s13188_s2 = inlined_call_operand.vmem [shape: bf16[36,128], index: 2, kind: input, shape index: {}]   ;;  %s13189_s3 = inlined_call_operand.vmem [shape: f32[1,128], index: 3, kind: input, shape index: {}]   ;;  %s13190_s4 = inlined_call_operand.vmem [shape: bf16[1152,128], index: 4, kind: input, shape index: {}]   ;;  %s13191_s5 = inlined_call_operand.vmem [shape: f32[1,128], index: 5, kind: input, shape index: {}]   ;;  %s13192_s6 = inlined_call_operand.vmem [shape: f32[2,32,32,128], index: 6, kind: output, shape index: {}]  }
   0x1   :  { %s8685_s23 = smov 0   ;;  %s8687_s24 = smov 0  }
   0x2   :  { %s8689_s25 = smov 0  }
   0x3 LB: > { %s25_s26 = sadd.s32 1, %s8633_s23  ;;  %s28_s27 = sadd.s32 1, %s8637_s24  ;;  %s8641_s25 = sphi %s8689_s25, %s16_s25   ;;  %s8637_s24 = sphi %s8687_s24, %s14244_s24   ;;  %s8633_s23 = sphi %s8685_s23, %s14243_s23   ;;  %s8629_s22 = sphi %s8683_s22, %s14242_s22   ;;  %s8625_s21 = sphi %s8681_s21, %s14241_s21  }
   0x4   : > { %p26_p0 = scmp.ge.s32.totalorder %s25_s26, 2  ;;  %p7698_p1 = scmp.ge.s32.totalorder %s8641_s25, 1 }
   0x5   : > { %p270_p2 = scmp.lt.s32.totalorder %s8641_s25, 5 }
   0x6   : > { %s14246_s26 = smov (%p26_p0, %s25_s26), 0  ;;  %s14248_s27 = smov (!%p26_p0, %s28_s27), %s8637_s24 }
   0x7   : > { %p271_p3 = pnand %p7698_p1, %p270_p2  ;;  %p30_p4 = scmp.ge.s32.totalorder %s14248_s27, 2 }
   0x9   : > { %s14250_s27 = smov (%p30_p4, %s14248_s27), 0  ;;  %274 = sbr.rel (%p271_p3) target bundleno = 2153 (0x869), region = 44 }
   0xe   : > { %s8711_s28 = sshll.u32 %s8625_s21, 4  ;;  %p333_p5 = scmp.lt.s32.totalorder %s8629_s22, 1  ;;  %vm1306_vm0 = vcmask 1046528   ;;  %vm783_vm1 = vsmask.f32 7424  ;;  %vm2153_vm2 = vcmask 1045504  }
   0xf   : > { %p335_p6 = scmp.lt.s32.totalorder %s8711_s28, 35  ;;  %s8643_s13 = smov 8   ;;  %vm1505_vm3 = vcmask 31744   ;;  %vm1632_vm4 = vcmask 64512   ;;  %vm2017_vm5 = vcmask 97280  }
  0x10   : > { %s14252_s22 = smov (!%p333_p5, %s8629_s22), 1  ;;  %s8644_s14 = smov 4  }
  0x11   : > { %s336_s29 = scalar_select %p335_p6, %s8711_s28, 35 }
  0x12   : > { %s8530_s30 = smul.u32 216, %s14252_s22  ;;  %s8525_s15 = sadd.s32 16, %s8711_s28 }
  0x13   : > { %s8529_s7 = smul.u32 6, %s336_s29  ;;  %p353_p7 = scmp.lt.s32.totalorder %s8525_s15, 35 }
  0x14   : > { %s8016_s20 = sadd.s32 4294967295, %s8711_s28  ;;  %p366_p8 = scmp.lt.s32.totalorder %s8711_s28, 31 }
  0x15   : > { %s339_s8 = sadd.s32 %s8530_s30, %s8529_s7  ;;  %s14254_s15 = smov (!%p353_p7, %s8525_s15), 35 }
  0x16   : > { %s7700_s9 = sshll.u32 %s339_s8, 2  ;;  %s8531_s16 = smul.u32 6, %s14254_s15 }
  0x17   : > { %s8723_s12 = scalar_lea.vmem %s13186_s0, %s7700_s9  ;;  %s14256_s28 = smov (!%p366_p8, %s8711_s28), 31 }
  0x18   : > { %v8726_v0 = vld [vmem:[%s8723_s12 + $0x30] sm:$0xff]  ;;  %v8729_v1 = vld [vmem:[%s8723_s12 + $0x38] sm:$0xff]  ;;  %v391_v2 = vld [vmem:[%s8723_s12 + $0x40] sm:$0xf]  ;;  %s357_s17 = sadd.s32 %s8531_s16, %s8530_s30  ;;  %s7705_s19 = sshll.u32 %s14256_s28, 2 }
  0x19   : > { %v392_v3 = vld [vmem:[%s8723_s12 + $0x44] sm:$0x1]  ;;  %v8733_v4 = vunpack.c.l.b16 %v391_v2  ;;  %v8739_v6 = vld [vmem:[%s8723_s12 + $0x8] sm:$0xff]  ;;  %v1317_v7 = vrot.slane %v8726_v0, 1  ;;  %v1318_v8 = vrot.slane %v8729_v1, 1  ;;  %v831_v10 = vshrl.u32 %v8726_v0, 16 }
  0x1a   : > { %v8736_v5 = vld [vmem:[%s8723_s12] sm:$0xff]  ;;  %v749_v9 = vunpack.c.l.b16 %v392_v3  ;;  %v833_v11 = vshll.u32 %v8726_v0, 16  ;;  %v838_v12 = vshll.u32 %v8729_v1, 16  ;;  %v792_v19 = vshll.u32 %v8739_v6, 16  ;;  %v8755_v20 = vld [vmem:[%s8723_s12 + $0x18] sm:$0xff]  ;;  %v8801_v2 = vld [vmem:[%s8723_s12 + $0x48] sm:$0xff] }
  0x1b   : > { %v787_v13 = vshll.u32 %v8736_v5, 16  ;;  %v1319_v14 = vsel %vm1306_vm0, %v1317_v7, %v1318_v8  ;;  %v785_v17 = vshrl.u32 %v8736_v5, 16  ;;  %v385_v24 = vld [vmem:[%s8723_s12 + $0x28] sm:$0xf]  ;;  %v386_v25 = vld [vmem:[%s8723_s12 + $0x2c] sm:$0x1] }
  0x1c   : > { %v8749_v15 = vpack.c.b16 %v749_v9, %v8733_v4  ;;  %1409 = vrot.lane.b32.xlu0 %v1319_v14, %s8643_s13  ;;  %v835_v16 = vrot.slane %v833_v11, 1  ;;  %v840_v22 = vrot.slane %v838_v12, 1  ;;  %v842_v27 = vshrl.u32 %v8729_v1, 16  ;;  %v8767_v31 = vld [vmem:[%s8723_s12 + $0x20] sm:$0xff]  ;;  %v379_v37 = vld [vmem:[%s8723_s12 + $0x10] sm:$0xf] }
  0x1d   : > { %v789_v18 = vrot.slane %v787_v13, 1  ;;  %v794_v29 = vrot.slane %v792_v19, 1  ;;  %v810_v32 = vshll.u32 %v8755_v20, 16  ;;  %v8771_v34 = vunpack.c.l.b16 %v385_v24  ;;  %v380_v38 = vld [vmem:[%s8723_s12 + $0x14] sm:$0x1]  ;;  %s7703_s18 = sshll.u32 %s357_s17, 2 }
  0x1e   : > { %v1320_v21 = vrot.slane %v8749_v15, 1  ;;  %v836_v23 = vor.u32 %v835_v16, %v831_v10  ;;  %v846_v30 = vshll.u32 %v8749_v15, 16  ;;  %v748_v35 = vunpack.c.l.b16 %v386_v25  ;;  %v8806_v10 = vld [vmem:[%s8723_s12 + $0x50] sm:$0xff]  ;;  %s8906_s21 = scalar_lea.vmem %s13187_s1, %s7703_s18 }
  0x1f   : > { %v790_v28 = vor.u32 %v789_v18, %v785_v17  ;;  %v1307_v36 = vrot.slane %v8736_v5, 1  ;;  %v1308_v39 = vrot.slane %v8739_v6, 1  ;;  %v844_v40 = vor.u32 %v842_v27, %v840_v22 }
  0x20   : > { %v1321_v26 = vsel %vm1306_vm0, %v1318_v8, %v1320_v21  ;;  %v841_v33 = vsel %vm783_vm1, %v836_v23, %v840_v22  ;;  %v808_v41 = vshrl.u32 %v8755_v20, 16  ;;  %v815_v42 = vshll.u32 %v8767_v31, 16 }
  0x21   : > { %1411 = vrot.lane.b32.xlu1 %v1321_v26, %s8643_s13  ;;  %v1309_v43 = vsel %vm1306_vm0, %v1307_v36, %v1308_v39  ;;  %v8781_v44 = vunpack.c.l.b16 %v379_v37  ;;  %v747_v45 = vunpack.c.l.b16 %v380_v38  ;;  %v795_v46 = vsel %vm783_vm1, %v790_v28, %v794_v29 }
  0x22   : > { %v848_v47 = vrot.slane %v846_v30, 1  ;;  %v812_v48 = vrot.slane %v810_v32, 1  ;;  %v8785_v49 = vpack.c.b16 %v748_v35, %v8771_v34  ;;  %1397 = vrot.lane.b32.xlu2 %v1309_v43, %s8643_s13  ;;  %v1312_v50 = vrot.slane %v8755_v20, 1  ;;  %v397_v32 = vld [vmem:[%s8723_s12 + $0x58] sm:$0xf] }
  0x23   : > { %v1313_v51 = vrot.slane %v8767_v31, 1  ;;  %v817_v52 = vrot.slane %v815_v42, 1  ;;  %v765_v53 = vpack.c.b16 %v747_v45, %v8781_v44  ;;  %v819_v56 = vshrl.u32 %v8767_v31, 16 }
  0x24   : > { %1210 = vrot.lane.b32.xlu0 %v841_v33, %s8644_s14  ;;  %v849_v54 = vsel %vm783_vm1, %v844_v40, %v848_v47  ;;  %v813_v55 = vor.u32 %v812_v48, %v808_v41  ;;  %v823_v57 = vshll.u32 %v8785_v49, 16  ;;  %v796_v59 = vshrl.u32 %v8739_v6, 16  ;;  %v398_v33 = vld [vmem:[%s8723_s12 + $0x5c] sm:$0x1]  ;;  %v8838_v40 = vld [vmem:[%s8723_s12 + $0x60] sm:$0xff] }
  0x25   : > { %v1314_v58 = vsel %vm1306_vm0, %v1312_v50, %v1313_v51  ;;  %v800_v60 = vshll.u32 %v765_v53, 16  ;;  %v821_v62 = vor.u32 %v819_v56, %v817_v52  ;;  %v1310_v9 = vrot.slane %v765_v53, 1  ;;  %v404_v50 = vld [vmem:[%s8723_s12 + $0x74] sm:$0x1] }
  0x26   : > { %v818_v61 = vsel %vm783_vm1, %v813_v55, %v817_v52  ;;  %v825_v63 = vrot.slane %v823_v57, 1  ;;  %v798_v3 = vor.u32 %v796_v59, %v794_v29  ;;  %v856_v11 = vshll.u32 %v8801_v2, 16 }
  0x27   : > { %v802_v7 = vrot.slane %v800_v60, 1  ;;  %v850_v13 = vshrl.u32 %v8749_v15, 16  ;;  %v1311_v14 = vsel %vm1306_vm0, %v1308_v39, %v1310_v9  ;;  %v854_v16 = vshrl.u32 %v8801_v2, 16 }
  0x28   : > { %v826_v8 = vsel %vm783_vm1, %v821_v62, %v825_v63  ;;  %v858_v17 = vrot.slane %v856_v11, 1  ;;  %v861_v18 = vshll.u32 %v8806_v10, 16  ;;  %v1315_v19 = vrot.slane %v8785_v49, 1 }
  0x29   : > { %1198 = vrot.lane.b32.xlu1 %v795_v46, %s8644_s14  ;;  %v803_v12 = vsel %vm783_vm1, %v798_v3, %v802_v7  ;;  %v852_v22 = vor.u32 %v850_v13, %v848_v47  ;;  %v1322_v27 = vrot.slane %v8801_v2, 1  ;;  %v1323_v28 = vrot.slane %v8806_v10, 1  ;;  %v8843_v46 = vld [vmem:[%s8723_s12 + $0x68] sm:$0xff] }
  0x2a   : > { %1403 = vrot.lane.b32.xlu2 %v1314_v58, %s8643_s13  ;;  %v859_v23 = vor.u32 %v858_v17, %v854_v16  ;;  %v863_v24 = vrot.slane %v861_v18, 1  ;;  %v1316_v25 = vsel %vm1306_vm0, %v1313_v51, %v1315_v19  ;;  %v804_v29 = vshrl.u32 %v765_v53, 16  ;;  %v8420_v18 = vld [vmem:[%s8723_s12 + $0x80] sm:$0xff] }
  0x2b   : > { %v1324_v30 = vsel %vm1306_vm0, %v1322_v27, %v1323_v28  ;;  %v8829_v36 = vunpack.c.l.b16 %v397_v32  ;;  %v750_v37 = vunpack.c.l.b16 %v398_v33  ;;  %v827_v38 = vshrl.u32 %v8785_v49, 16  ;;  %v403_v49 = vld [vmem:[%s8723_s12 + $0x70] sm:$0xf] }
  0x2c   : > { %1212 = vrot.lane.b32.xlu0 %v849_v54, %s8644_s14  ;;  %v864_v26 = vsel %vm783_vm1, %v859_v23, %v863_v24  ;;  %v806_v35 = vor.u32 %v804_v29, %v802_v7  ;;  %v865_v42 = vshrl.u32 %v8806_v10, 16  ;;  %v879_v15 = vshll.u32 %v8838_v40, 16 }
  0x2d   : > { %v768_v39 = vpack.c.b16 %v750_v37, %v8829_v36  ;;  %v829_v41 = vor.u32 %v827_v38, %v825_v63  ;;  %v877_v52 = vshrl.u32 %v8838_v40, 16  ;;  %v884_v54 = vshll.u32 %v8843_v46, 16  ;;  %v8887_v37 = vld [vmem:[%s8723_s12 + $0x90] sm:$0xff] }
  0x2e   : > { %v881_v53 = vrot.slane %v879_v15, 1  ;;  %v8854_v56 = vunpack.c.l.b16 %v403_v49  ;;  %v751_v57 = vunpack.c.l.b16 %v404_v50  ;;  %v1327_v63 = vrot.slane %v8838_v40, 1  ;;  %v8898_v15 = vld [vmem:[%s8723_s12 + $0x98] sm:$0xff] }
  0x2f   : > { %v869_v43 = vshll.u32 %v768_v39, 16  ;;  %v1325_v45 = vrot.slane %v768_v39, 1  ;;  %v873_v48 = vshrl.u32 %v768_v39, 16  ;;  %v886_v60 = vrot.slane %v884_v54, 1  ;;  %v8913_v54 = vld [vmem:[%s8906_s21 + $0x30] sm:$0xff] }
  0x30   : > { %v882_v59 = vor.u32 %v881_v53, %v877_v52  ;;  %v1328_v3 = vrot.slane %v8843_v46, 1  ;;  %v888_v7 = vshrl.u32 %v8843_v46, 16  ;;  %v907_v27 = vshll.u32 %v8420_v18, 16 }
  0x31   : > { %1204 = vrot.lane.b32.xlu1 %v818_v61, %s8644_s14  ;;  %v871_v47 = vrot.slane %v869_v43, 1  ;;  %v1326_v51 = vsel %vm1306_vm0, %v1323_v28, %v1325_v45  ;;  %v769_v61 = vpack.c.b16 %v751_v57, %v8854_v56  ;;  %v1333_v39 = vrot.slane %v8420_v18, 1  ;;  %v482_v57 = vld [vmem:[%s8906_s21 + $0x2c] sm:$0x1] }
  0x32   : > { %1200 = vrot.lane.b32.xlu2 %v803_v12, %s8644_s14  ;;  %v887_v62 = vsel %vm783_vm1, %v882_v59, %v886_v60  ;;  %v1329_v11 = vsel %vm1306_vm0, %v1327_v63, %v1328_v3  ;;  %v890_v13 = vor.u32 %v888_v7, %v886_v60  ;;  %v909_v33 = vrot.slane %v907_v27, 1  ;;  %v7968_v60 = vld [vmem:[%s13188_s2 + $0xc] sm:$0xf] }
  0x33   : > { %v875_v58 = vor.u32 %v873_v48, %v871_v47  ;;  %v1330_v12 = vrot.slane %v769_v61, 1  ;;  %v896_v17 = vshrl.u32 %v769_v61, 16  ;;  %v930_v53 = vshll.u32 %v8898_v15, 16 }
  0x34   : > { %1206 = vrot.lane.b32.xlu0 %v826_v8, %s8644_s14  ;;  %v892_v8 = vshll.u32 %v769_v61, 16  ;;  %v8451_v61 = vld [vmem:[%s13188_s2 + $0xc] sm:$0x30]  ;;  %v764_v63 = vunpack.c.l.b16 %v482_v57  ;;  %v1904_v27 = vshrl.u32 %v8913_v54, 16 }
  0x35   : > { %v1331_v23 = vsel %vm1306_vm0, %v1328_v3, %v1330_v12  ;;  %v7969_v3 = vor.u32 %v8451_v61, %v7968_v60 }
  0x36   : > { %v894_v16 = vrot.slane %v892_v8, 1 }
  0x39   : > { %1399 = vrot.lane.b32.xlu1 %v1311_v14, %s8643_s13 }
  0x3a   : > { %1405 = vrot.lane.b32.xlu2 %v1316_v25, %s8643_s13 }
  0x3c   : > { %1214 = vrot.lane.b32.xlu0 %v852_v22, %s8644_s14  ;;  %v410_v22 = vld [vmem:[%s8723_s12 + $0x8c] sm:$0x1] }
  0x3d   : > { %v752_v29 = vunpack.c.l.b16 %v410_v22  ;;  %v1337_v22 = vrot.slane %v8887_v37, 1 }
  0x41   : > { %1216 = vrot.lane.b32.xlu1 %v864_v26, %s8644_s14 }
  0x42   : > { %1413 = vrot.lane.b32.xlu2 %v1320_v21, %s8643_s13  ;;  %v867_v21 = vor.u32 %v865_v42, %v863_v24  ;;  %v895_v24 = vsel %vm783_vm1, %v890_v13, %v894_v16  ;;  %v911_v42 = vshrl.u32 %v8420_v18, 16  ;;  %v1906_v13 = vshll.u32 %v8913_v54, 16  ;;  %v7911_v18 = vld [vmem:[%s13188_s2] sm:$0xf] }
  0x44   : > { %1415 = vrot.lane.b32.xlu0 %v1324_v30, %s8643_s13  ;;  %v872_v55 = vsel %vm783_vm1, %v867_v21, %v871_v47  ;;  %v898_v30 = vor.u32 %v896_v17, %v894_v16  ;;  %v913_v48 = vor.u32 %v911_v42, %v909_v33  ;;  %v8935_v16 = vsel %vm2153_vm2, %v7969_v3, 0  ;;  %v416_v17 = vld [vmem:[%s8723_s12 + $0xa4] sm:$0x1] }
  0x45   : > { %2927 = vmatpush.bf16.msra.mxu2 %v8935_v16 }
  0x49   : > { %1202 = vrot.lane.b32.xlu1 %v806_v35, %s8644_s14 }
  0x4a   : > { %1208 = vrot.lane.b32.xlu2 %v829_v41, %s8644_s14 }
  0x4c   : > { %1401 = vrot.lane.b32.xlu0 %v1310_v9, %s8643_s13  ;;  %v8867_v9 = vld [vmem:[%s8723_s12 + $0x78] sm:$0xff] }
  0x4d   : > { %v902_v14 = vshll.u32 %v8867_v9, 16  ;;  %v900_v25 = vshrl.u32 %v8867_v9, 16  ;;  %v1332_v38 = vrot.slane %v8867_v9, 1 }
  0x4f   : > { %v904_v26 = vrot.slane %v902_v14, 1  ;;  %v1334_v21 = vsel %vm1306_vm0, %v1332_v38, %v1333_v39  ;;  %v415_v14 = vld [vmem:[%s8723_s12 + $0xa0] sm:$0xf] }
  0x51   : > { %1407 = vrot.lane.b32.xlu1 %v1315_v19, %s8643_s13  ;;  %v409_v19 = vld [vmem:[%s8723_s12 + $0x88] sm:$0xf]  ;;  %v905_v32 = vor.u32 %v904_v26, %v900_v25 }
  0x52   : > { %1218 = vrot.lane.b32.xlu2 %v872_v55, %s8644_s14  ;;  %v8879_v28 = vunpack.c.l.b16 %v409_v19  ;;  %v481_v55 = vld [vmem:[%s8906_s21 + $0x28] sm:$0xf]  ;;  %v8449_v19 = vld [vmem:[%s13188_s2] sm:$0x30] }
  0x53   : > { %v910_v41 = vsel %vm783_vm1, %v905_v32, %v909_v33  ;;  %v7912_v25 = vor.u32 %v8449_v19, %v7911_v18  ;;  %v8954_v32 = vunpack.c.l.b16 %v415_v14  ;;  %v753_v33 = vunpack.c.l.b16 %v416_v17 }
  0x54   : > { %1417 = vrot.lane.b32.xlu0 %v1326_v51, %s8643_s13  ;;  %v8884_v35 = vpack.c.b16 %v752_v29, %v8879_v28  ;;  %v923_v51 = vshrl.u32 %v8887_v37, 16  ;;  %v1908_v29 = vrot.slane %v1906_v13, 1  ;;  %v1932_v13 = vrot.slane %v8913_v54, 1 }
  0x55   : > { %v2577_v38 = vsel %vm2153_vm2, %v7912_v25, 0 }
  0x56   : > { %v915_v43 = vshll.u32 %v8884_v35, 16  ;;  %v1335_v47 = vrot.slane %v8884_v35, 1  ;;  %v919_v50 = vshrl.u32 %v8884_v35, 16  ;;  %2586 = vmatpush.bf16.msra.mxu1 %v2577_v38 }
  0x58   : > { %v917_v49 = vrot.slane %v915_v43, 1  ;;  %v7862_v43 = vld [vmem:[%s13188_s2 + $0x4] sm:$0xc] }
  0x59   : > { %1220 = vrot.lane.b32.xlu1 %v875_v58, %s8644_s14  ;;  %v1336_v58 = vsel %vm1306_vm0, %v1333_v39, %v1335_v47 }
  0x5a   : > { %1419 = vrot.lane.b32.xlu2 %v1325_v45, %s8643_s13  ;;  %v925_v45 = vshll.u32 %v8887_v37, 16  ;;  %v918_v59 = vsel %vm783_vm1, %v913_v48, %v917_v49  ;;  %v921_v7 = vor.u32 %v919_v50, %v917_v49 }
  0x5c   : > { %1222 = vrot.lane.b32.xlu0 %v887_v62, %s8644_s14  ;;  %v927_v52 = vrot.slane %v925_v45, 1  ;;  %v8925_v62 = vunpack.c.l.b16 %v481_v55  ;;  %v8450_v45 = vld [vmem:[%s13188_s2 + $0x4] sm:$0xf0] }
  0x5d   : > { %v7863_v50 = vor.u32 %v8450_v45, %v7862_v43  ;;  %v421_v45 = vld [vmem:[%s8723_s12 + $0xb8] sm:$0xf] }
  0x5e   : > { %v928_v8 = vor.u32 %v927_v52, %v923_v51 }
  0x5f   : > { %v2016_v52 = vrot.slane %v7863_v50, 2 }
  0x61   : > { %1421 = vrot.lane.b32.xlu1 %v1329_v11, %s8643_s13  ;;  %v932_v11 = vrot.slane %v930_v53, 1  ;;  %v934_v53 = vshrl.u32 %v8898_v15, 16  ;;  %v2155_v60 = vsel %vm2153_vm2, %v2016_v52, 0 }
  0x62   : > { %1224 = vrot.lane.b32.xlu2 %v895_v24, %s8644_s14  ;;  %v8948_v24 = vpack.c.b16 %v764_v63, %v8925_v62  ;;  %2164 = vmatpush.bf16.msra.mxu0 %v2155_v60 }
  0x63   : > { %v933_v26 = vsel %vm783_vm1, %v928_v8, %v932_v11  ;;  %8526 = vmatpush.bf16.msra.mxu3 %v2155_v60  ;;  %v476_v60 = vld [vmem:[%s8906_s21 + $0x14] sm:$0x1] }
  0x64   : > { %1423 = vrot.lane.b32.xlu0 %v1331_v23, %s8643_s13  ;;  %v1338_v23 = vrot.slane %v8898_v15, 1  ;;  %v1191_v35 = vshll.u32 %v8948_v24, 16  ;;  %v1195_v49 = vshrl.u32 %v8948_v24, 16  ;;  %v1395_v61 = vrot.slane %v8948_v24, 1 }
  0x66   : > { %v1339_v39 = vsel %vm1306_vm0, %v1337_v22, %v1338_v23  ;;  %v8970_v48 = vrot.slane %v1191_v35, 1 }
  0x67   : > { %8527 = vmatpush.bf16.msrb.mxu3 %v2577_v38 }
  0x69   : > { %1226 = vrot.lane.b32.xlu1 %v898_v30, %s8644_s14 }
  0x6a   : > { %1228 = vrot.lane.b32.xlu2 %v910_v41, %s8644_s14  ;;  %v1909_v41 = vor.u32 %v1908_v29, %v1904_v27  ;;  %v9005_v27 = vld [vmem:[%s8723_s12 + $0xa8] sm:$0xff] }
  0x6c   : > { %1425 = vrot.lane.b32.xlu0 %v1330_v12, %s8643_s13  ;;  %v8929_v12 = vld [vmem:[%s8906_s21 + $0x38] sm:$0xff] }
  0x6d   : > { %v1911_v30 = vshll.u32 %v8929_v12, 16  ;;  %v1933_v18 = vrot.slane %v8929_v12, 1  ;;  %v1915_v25 = vshrl.u32 %v8929_v12, 16 }
  0x6f   : > { %v1913_v42 = vrot.slane %v1911_v30, 1  ;;  %v1934_v22 = vsel %vm1306_vm0, %v1932_v13, %v1933_v18 }
  0x71   : > { %1427 = vrot.lane.b32.xlu1 %v1334_v21, %s8643_s13  ;;  %v8967_v21 = vpack.c.b16 %v753_v33, %v8954_v32  ;;  %v1914_v55 = vsel %vm783_vm1, %v1909_v41, %v1913_v42  ;;  %v1917_v35 = vor.u32 %v1915_v25, %v1913_v42  ;;  %v9023_v42 = vld [vmem:[%s8723_s12 + $0xb0] sm:$0xff] }
  0x72   : > { %1230 = vrot.lane.b32.xlu2 %v918_v59, %s8644_s14  ;;  %v488_v59 = vld [vmem:[%s8906_s21 + $0x44] sm:$0x1] }
  0x73   : > { %v938_v57 = vshll.u32 %v8967_v21, 16  ;;  %v1901_v3 = vunpack.c.l.b16 %v488_v59  ;;  %v942_v43 = vshrl.u32 %v8967_v21, 16  ;;  %v953_v59 = vshll.u32 %v9023_v42, 16 }
  0x74   : > { %1429 = vrot.lane.b32.xlu0 %v1336_v58, %s8643_s13  ;;  %v487_v58 = vld [vmem:[%s8906_s21 + $0x40] sm:$0xf] }
  0x75   : > { %v8985_v63 = vunpack.c.l.b16 %v487_v58  ;;  %v940_v8 = vrot.slane %v938_v57, 1  ;;  %v9027_v57 = vunpack.c.l.b16 %v421_v45  ;;  %v957_v45 = vshrl.u32 %v9023_v42, 16 }
  0x77   : > { %v8995_v17 = vpack.c.b16 %v1901_v3, %v8985_v63  ;;  %v944_v58 = vor.u32 %v942_v43, %v940_v8 }
  0x79   : > { %1232 = vrot.lane.b32.xlu1 %v921_v7, %s8644_s14  ;;  %v936_v7 = vor.u32 %v934_v53, %v932_v11  ;;  %v1340_v11 = vrot.slane %v8967_v21, 1  ;;  %v1935_v30 = vrot.slane %v8995_v17, 1  ;;  %v946_v53 = vshrl.u32 %v9005_v27, 16 }
  0x7a   : > { %1431 = vrot.lane.b32.xlu2 %v1335_v47, %s8643_s13  ;;  %v1197_v47 = vor.u32 %v1195_v49, %v8970_v48  ;;  %v422_v49 = vld [vmem:[%s8723_s12 + $0xbc] sm:$0x1] }
  0x7b   : > { %v941_v19 = vsel %vm783_vm1, %v936_v7, %v940_v8  ;;  %v1341_v29 = vsel %vm1306_vm0, %v1338_v23, %v1340_v11  ;;  %v1936_v23 = vsel %vm1306_vm0, %v1933_v18, %v1935_v30  ;;  %v754_v21 = vunpack.c.l.b16 %v422_v49 }
  0x7c   : > { %1234 = vrot.lane.b32.xlu0 %v933_v26, %s8644_s14  ;;  %v8973_v51 = vpop.permute.xlu2 %1397  ;;  %v1919_v26 = vshll.u32 %v8995_v17, 16 }
  0x7d   : > { %v9037_v18 = vpack.c.b16 %v754_v21, %v9027_v57 }
  0x7e   : > { %v1921_v38 = vrot.slane %v1919_v26, 1  ;;  %v763_v26 = vunpack.c.l.b16 %v476_v60 }
  0x7f   : > { %v961_v49 = vshll.u32 %v9037_v18, 16 }
  0x80   : > { %v1922_v52 = vsel %vm783_vm1, %v1917_v35, %v1921_v38 }
  0x81   : > { %1433 = vrot.lane.b32.xlu1 %v1339_v39, %s8643_s13  ;;  %v948_v39 = vshll.u32 %v9005_v27, 16  ;;  %v963_v21 = vrot.slane %v961_v49, 1 }
  0x82   : > { %1304 = vrot.lane.b32.xlu2 %v1197_v47, %s8644_s14  ;;  %v475_v47 = vld [vmem:[%s8906_s21 + $0x10] sm:$0xf] }
  0x83   : > { %v9045_v25 = vunpack.c.l.b16 %v475_v47 }
  0x84   : > { %1926 = vrot.lane.b32.xlu0 %v1914_v55, %s8644_s14  ;;  %v8989_v14 = vpop.permute.xlu2 %1403  ;;  %v950_v55 = vrot.slane %v948_v39, 1 }
  0x86   : > { %v951_v7 = vor.u32 %v950_v55, %v946_v53  ;;  %v9065_v53 = vld [vmem:[%s8906_s21 + $0x18] sm:$0xff] }
  0x87   : > { %v1178_v47 = vshll.u32 %v9065_v53, 16 }
  0x89   : > { %1503 = vrot.lane.b32.xlu1 %v1395_v61, %s8643_s13 }
  0x8a   : > { %1937 = vrot.lane.b32.xlu2 %v1934_v22, %s8643_s13  ;;  %v955_v22 = vrot.slane %v953_v59, 1  ;;  %v9072_v59 = vld [vmem:[%s8906_s21 + $0x20] sm:$0xff] }
  0x8c   : > { %1236 = vrot.lane.b32.xlu0 %v941_v19, %s8644_s14  ;;  %v9011_v41 = vpop.permute.xlu2 %1200  ;;  %v956_v39 = vsel %vm783_vm1, %v951_v7, %v955_v22 }
  0x8e   : > { %v1410_v33 = vpop.permute.xlu0 %1409 }
  0x91   : > { %1435 = vrot.lane.b32.xlu1 %v1341_v29, %s8643_s13  ;;  %v1343_v29 = vrot.slane %v9023_v42, 1 }
  0x92   : > { %1928 = vrot.lane.b32.xlu2 %v1922_v52, %s8644_s14 }
  0x93   : > { %v9020_v50 = vpop.permute.xlu1 %1411 }
  0x94   : > { %1939 = vrot.lane.b32.xlu0 %v1936_v23, %s8643_s13  ;;  %v9039_v19 = vpop.permute.xlu2 %1405  ;;  %v9060_v23 = vpack.c.b16 %v763_v26, %v9045_v25 }
  0x96   : > { %v1211_v3 = vpop.permute.xlu0 %1210  ;;  %13333 = vst [vmem:[#allocation2_spill] sm:$0xff] %v9060_v23 }
  0x97   : > { %v1521_v13 = vsel %vm1505_vm3, %v8726_v0, %v1211_v3  ;;  %v1342_v0 = vrot.slane %v9005_v27, 1 }
  0x98   : > { %v9043_v8 = vsel %vm1632_vm4, %v1521_v13, %v1410_v33 }
  0x99   : > { %1238 = vrot.lane.b32.xlu1 %v944_v58, %s8644_s14  ;;  %7970 = vmatmul.msk.bf16.vlgmr.msra.gmra.mxu2 %vm2017_vm5, %v9043_v8  ;;  %v1344_v52 = vsel %vm1306_vm0, %v1342_v0, %v1343_v29  ;;  %v1168_v58 = vshll.u32 %v9060_v23, 16  ;;  %v1172_v0 = vshrl.u32 %v9060_v23, 16 }
  0x9a   : > { %1240 = vrot.lane.b32.xlu2 %v956_v39, %s8644_s14 }
  0x9b   : > { %v1199_v35 = vpop.permute.xlu1 %1198  ;;  %v9085_v26 = vrot.slane %v1168_v58, 1 }
  0x9c   : > { %v1507_v43 = vsel %vm1505_vm3, %v8736_v5, %v1199_v35  ;;  %1437 = vrot.lane.b32.xlu0 %v1340_v11, %s8643_s13  ;;  %v1923_v5 = vshrl.u32 %v8995_v17, 16  ;;  %v1414_v55 = vpop.permute.xlu2 %1413  ;;  %v959_v11 = vor.u32 %v957_v45, %v955_v22  ;;  %v1183_v35 = vshll.u32 %v9072_v59, 16 }
  0x9d   : > { %v1634_v33 = vsel %vm1632_vm4, %v1507_v43, %v8973_v51  ;;  %13334 = vst [vmem:[#allocation3_spill] sm:$0xff] %v9085_v26  ;;  %v1509_v43 = vsel %vm1505_vm3, %v8739_v6, %v9011_v41 }
  0x9e   : > { %7913 = vmatmul.msk.bf16.vlgmr.msra.gmra.mxu1 %vm2017_vm5, %v1634_v33  ;;  %v1213_v51 = vpop.permute.xlu0 %1212  ;;  %v1925_v60 = vor.u32 %v1923_v5, %v1921_v38  ;;  %v964_v22 = vsel %vm783_vm1, %v959_v11, %v963_v21  ;;  %v1174_v33 = vor.u32 %v1172_v0, %v9085_v26  ;;  %v1185_v49 = vrot.slane %v1183_v35, 1  ;;  %v445_v26 = vld [vmem:[%s8723_s12 + $0x118] sm:$0xf] }
  0x9f   : > { %v1523_v38 = vsel %vm1505_vm3, %v8729_v1, %v1213_v51  ;;  %v1393_v51 = vrot.slane %v9072_v59, 1  ;;  %v13193_v0 = vrot.slane %v9060_v23, 1 }
  0xa0   : > { %v9104_v1 = vsel %vm1632_vm4, %v1523_v38, %v9020_v50  ;;  %v1392_v50 = vrot.slane %v9065_v53, 1  ;;  %v8425_v38 = vld [vmem:[%s8723_s12 + $0xc0] sm:$0xff] }
  0xa1   : > { %1439 = vrot.lane.b32.xlu1 %v1344_v52, %s8643_s13 }
  0xa2   : > { %1930 = vrot.lane.b32.xlu2 %v1925_v60, %s8644_s14 }
  0xa3   : > { %v1205_v3 = vpop.permute.xlu1 %1204 }
  0xa4   : > { %v1514_v7 = vsel %vm1505_vm3, %v8755_v20, %v1205_v3  ;;  %1941 = vrot.lane.b32.xlu0 %v1935_v30, %s8643_s13  ;;  %v1176_v20 = vshrl.u32 %v9065_v53, 16  ;;  %v1345_v30 = vrot.slane %v9037_v18, 1  ;;  %v9096_v39 = vpop.permute.xlu2 %1208  ;;  %v1394_v3 = vsel %vm1306_vm0, %v1392_v50, %v1393_v51 }
  0xa5   : > { %v9079_v13 = vsel %vm1632_vm4, %v1514_v7, %v8989_v14  ;;  %v1180_v14 = vrot.slane %v1178_v47, 1  ;;  %v965_v47 = vshrl.u32 %v9037_v18, 16  ;;  %v1187_v7 = vshrl.u32 %v9072_v59, 16  ;;  %v9198_v18 = vld [vmem:[%s8906_s21 + $0x50] sm:$0xff] }
  0xa6   : > { %7864 = vmatmul.msk.bf16.vlgmr.msra.gmra.mxu0 %vm2017_vm5, %v9079_v13  ;;  %v1207_v17 = vpop.permute.xlu0 %1206  ;;  %v1346_v5 = vsel %vm1306_vm0, %v1343_v29, %v1345_v30  ;;  %v683_v29 = vpack.c.b16 %v8733_v4, %v8733_v4 }
  0xa7   : > { %v1181_v45 = vor.u32 %v1180_v14, %v1176_v20  ;;  %v1516_v60 = vsel %vm1505_vm3, %v8767_v31, %v1207_v17  ;;  %v428_v14 = vld [vmem:[%s8723_s12 + $0xd4] sm:$0x1]  ;;  %v9140_v31 = vld [vmem:[%s8723_s12 + $0xc8] sm:$0xff] }
  0xa8   : > { %v9136_v35 = vsel %vm1632_vm4, %v1516_v60, %v9039_v19  ;;  %v971_v19 = vshll.u32 %v8425_v38, 16  ;;  %v677_v60 = vpack.c.b16 %v8781_v44, %v8781_v44  ;;  %v980_v44 = vshrl.u32 %v9140_v31, 16 }
  0xa9   : > { %1242 = vrot.lane.b32.xlu1 %v964_v22, %s8644_s14  ;;  %7971 = vmatmul.msk.bf16.gmra.mxu2 %vm2017_vm5, %v9104_v1  ;;  %v1186_v41 = vsel %vm783_vm1, %v1181_v45, %v1185_v49  ;;  %v427_v22 = vld [vmem:[%s8723_s12 + $0xd0] sm:$0xf]  ;;  %v1189_v45 = vor.u32 %v1187_v7, %v1185_v49  ;;  %v976_v49 = vshll.u32 %v9140_v31, 16 }
  0xaa   : > { %1441 = vrot.lane.b32.xlu2 %v1346_v5, %s8643_s13  ;;  %v9142_v17 = vunpack.c.l.b16 %v427_v22  ;;  %v680_v22 = vpack.c.b16 %v8771_v34, %v8771_v34 }
  0xab   : > { %v1400_v52 = vpop.permute.xlu1 %1399 }
  0xac   : > { %v1636_v6 = vsel %vm1632_vm4, %v1509_v43, %v1400_v52  ;;  %1298 = vrot.lane.b32.xlu0 %v1174_v33, %s8644_s14  ;;  %v9121_v58 = vpop.permute.xlu2 %1218  ;;  %v967_v43 = vor.u32 %v965_v47, %v963_v21  ;;  %13335 = vst [vmem:[#allocation4_spill] sm:$0xff] %v9142_v17  ;;  %v755_v52 = vunpack.c.l.b16 %v428_v14  ;;  %v973_v47 = vrot.slane %v971_v19, 1 }
  0xad   : > { %v1347_v14 = vrot.slane %v8425_v38, 1  ;;  %v1800_v19 = vunpack.c.l.b16 %v9079_v13 }
  0xae   : > { %7914 = vmatmul.msk.bf16.gmra.mxu1 %vm2017_vm5, %v1636_v6  ;;  %v1215_v11 = vpop.permute.xlu0 %1214 }
  0xaf   : > { %v1526_v4 = vsel %vm1505_vm3, %v683_v29, %v1215_v11  ;;  %v1194_v29 = vsel %vm783_vm1, %v1189_v45, %v8970_v48  ;;  %v9166_v11 = vpack.c.b16 %v755_v52, %v9142_v17  ;;  %v1396_v48 = vsel %vm1306_vm0, %v1393_v51, %v1395_v61  ;;  %v8447_v61 = vld [vmem:[%s8906_s21 + $0x48] sm:$0xff]  ;;  %v446_v17 = vld [vmem:[%s8723_s12 + $0x11c] sm:$0x1] }
  0xb0   : > { %v9145_v33 = vsel %vm1632_vm4, %v1526_v4, %v1414_v55  ;;  %v978_v4 = vrot.slane %v976_v49, 1 }
  0xb1   : > { %1300 = vrot.lane.b32.xlu1 %v1186_v41, %s8644_s14  ;;  %v13194_v55 = vunpack.c.l.b16 %v9145_v33 }
  0xb2   : > { %1497 = vrot.lane.b32.xlu2 %v13193_v0, %s8643_s13 }
  0xb3   : > { %v1217_v20 = vpop.permute.xlu1 %1216 }
  0xb4   : > { %1499 = vrot.lane.b32.xlu0 %v1394_v3, %s8643_s13  ;;  %v1528_v21 = vsel %vm1505_vm3, %v8801_v2, %v1217_v20  ;;  %v9157_v41 = vpop.permute.xlu2 %1419  ;;  %v969_v2 = vshrl.u32 %v8425_v38, 16  ;;  %v984_v20 = vshll.u32 %v9166_v11, 16  ;;  %v982_v38 = vor.u32 %v980_v44, %v978_v4 }
  0xb6   : > { %7865 = vmatmul.msk.bf16.gmra.mxu0 %vm2017_vm5, %v9136_v35  ;;  %v1416_v5 = vpop.permute.xlu0 %1415  ;;  %v974_v34 = vor.u32 %v973_v47, %v969_v2 }
  0xb7   : > { %v9155_v6 = vsel %vm1632_vm4, %v1528_v21, %v1416_v5  ;;  %v1519_v21 = vsel %vm1505_vm3, %v680_v22, %v9096_v39  ;;  %v1530_v22 = vsel %vm1505_vm3, %v8806_v10, %v9121_v58  ;;  %v9218_v58 = vld [vmem:[%s8723_s12 + $0xd8] sm:$0xff] }
  0xb8   : > { %v1810_v50 = vunpack.c.l.b16 %v9155_v6  ;;  %v979_v49 = vsel %vm783_vm1, %v974_v34, %v978_v4  ;;  %v1805_v4 = vunpack.c.l.b16 %v9043_v8 }
  0xb9   : > { %1244 = vrot.lane.b32.xlu1 %v967_v43, %s8644_s14  ;;  %v1348_v43 = vrot.slane %v9140_v31, 1 }
  0xba   : > { %v9172_v7 = vpack.c.b16 %v1810_v50, %v13194_v55  ;;  %1443 = vrot.lane.b32.xlu2 %v1345_v30, %s8643_s13  ;;  %v2832_v30 = vshll.u32 %v8447_v61, 16  ;;  %v986_v50 = vrot.slane %v984_v20, 1 }
  0xbb   : > { %v1203_v3 = vpop.permute.xlu1 %1202 }
  0xbc   : > { %7972 = vmatmul.msk.bf16.gmra.mxu2 %vm2017_vm5, %v9172_v7  ;;  %1302 = vrot.lane.b32.xlu0 %v1194_v29, %s8644_s14  ;;  %v1512_v24 = vsel %vm1505_vm3, %v677_v60, %v1203_v3  ;;  %v9191_v52 = vpop.permute.xlu2 %1224  ;;  %v1349_v29 = vsel %vm1306_vm0, %v1347_v14, %v1348_v43  ;;  %v2830_v60 = vshrl.u32 %v8447_v61, 16  ;;  %v2834_v3 = vrot.slane %v2832_v30, 1 }
  0xbd   : > { %v987_v44 = vsel %vm783_vm1, %v982_v38, %v986_v50  ;;  %v13196_v30 = vrot.slane %v9198_v18, 1  ;;  %v1350_v38 = vrot.slane %v9166_v11, 1 }
  0xbe   : > { %v1402_v45 = vpop.permute.xlu0 %1401  ;;  %v2835_v20 = vor.u32 %v2834_v3, %v2830_v60  ;;  %v494_v3 = vld [vmem:[%s8906_s21 + $0x5c] sm:$0x1] }
  0xbf   : > { %v1638_v51 = vsel %vm1632_vm4, %v1512_v24, %v1402_v45  ;;  %v2837_v24 = vshll.u32 %v9198_v18, 16 }
  0xc0   : > { %v1799_v5 = vunpack.c.l.b16 %v1638_v51  ;;  %v2858_v51 = vrot.slane %v8447_v61, 1  ;;  %v994_v61 = vshll.u32 %v9218_v58, 16 }
  0xc1   : > { %1501 = vrot.lane.b32.xlu1 %v1396_v48, %s8643_s13  ;;  %v2839_v34 = vrot.slane %v2837_v24, 1  ;;  %v1351_v24 = vsel %vm1306_vm0, %v1348_v43, %v1350_v38  ;;  %v2827_v43 = vunpack.c.l.b16 %v494_v3 }
  0xc2   : > { %v2393_v47 = vpack.c.b16 %v1800_v19, %v1799_v5  ;;  %1246 = vrot.lane.b32.xlu2 %v979_v49, %s8644_s14  ;;  %v9232_v49 = vld [vmem:[%s8723_s12 + $0xe0] sm:$0xff] }
  0xc3   : > { %v1408_v2 = vpop.permute.xlu1 %1407 }
  0xc4   : > { %v9204_v39 = vsel %vm1632_vm4, %v1519_v21, %v1408_v2  ;;  %7915 = vmatmul.msk.bf16.gmra.mxu1 %vm2017_vm5, %v2393_v47  ;;  %1445 = vrot.lane.b32.xlu0 %v1349_v29, %s8643_s13  ;;  %v9223_v19 = vpop.permute.xlu2 %1228  ;;  %v1811_v21 = vunpack.c.h.b16 %v9155_v6  ;;  %v493_v29 = vld [vmem:[%s8906_s21 + $0x58] sm:$0xf]  ;;  %v2840_v2 = vsel %vm783_vm1, %v2835_v20, %v2839_v34  ;;  %v2860_v20 = vsel %vm1306_vm0, %v2858_v51, %v13196_v30 }
  0xc5   : > { %v13195_v48 = vunpack.c.l.b16 %v9204_v39  ;;  %v1801_v51 = vunpack.c.h.b16 %v9079_v13  ;;  %v2841_v30 = vshrl.u32 %v9198_v18, 16 }
  0xc6   : > { %v1418_v14 = vpop.permute.xlu0 %1417 }
  0xc7   : > { %v1968_v10 = vpack.c.b16 %v1805_v4, %v13195_v48  ;;  %v9221_v45 = vsel %vm1632_vm4, %v1530_v22, %v1418_v14  ;;  %v992_v22 = vshrl.u32 %v9218_v58, 16  ;;  %v999_v4 = vshll.u32 %v9232_v49, 16 }
  0xc8   : > { %v1812_v5 = vunpack.c.l.b16 %v9221_v45  ;;  %v686_v14 = vpack.c.b16 %v8829_v36, %v8829_v36 }
  0xc9   : > { %1248 = vrot.lane.b32.xlu1 %v987_v44, %s8644_s14  ;;  %7866 = vmatmul.msk.bf16.gmra.mxu0 %vm2017_vm5, %v1968_v10  ;;  %v996_v44 = vrot.slane %v994_v61, 1  ;;  %v9250_v10 = vunpack.c.l.b16 %v493_v29  ;;  %v1001_v36 = vrot.slane %v999_v4, 1  ;;  %v1802_v61 = vunpack.c.l.b16 %v9136_v35  ;;  %v434_v4 = vld [vmem:[%s8723_s12 + $0xec] sm:$0x1] }
  0xca   : > { %v9237_v60 = vpack.c.b16 %v1812_v5, %v1811_v21  ;;  %1447 = vrot.lane.b32.xlu2 %v1351_v24, %s8643_s13  ;;  %v988_v21 = vshrl.u32 %v9166_v11, 16 }
  0xcb   : > { %v1221_v47 = vpop.permute.xlu1 %1220  ;;  %13336 = vst [vmem:[#allocation5_spill] sm:$0xff] %v9250_v10  ;;  %v997_v5 = vor.u32 %v996_v44, %v992_v22  ;;  %v9265_v3 = vpack.c.b16 %v2827_v43, %v9250_v10  ;;  %v433_v22 = vld [vmem:[%s8723_s12 + $0xe8] sm:$0xf]  ;;  %v2394_v48 = vpack.c.b16 %v1802_v61, %v1801_v51  ;;  %v1352_v51 = vrot.slane %v9218_v58, 1 }
  0xcc   : > { %7973 = vmatmul.msk.bf16.gmra.mxu2 %vm2017_vm5, %v9237_v60  ;;  %2852 = vrot.lane.b32.xlu0 %v2840_v2, %s8644_s14  ;;  %v9258_v55 = vpop.permute.xlu2 %1230  ;;  %v1533_v29 = vsel %vm1505_vm3, %v686_v14, %v1221_v47  ;;  %v1807_v2 = vunpack.c.l.b16 %v9104_v1  ;;  %v990_v11 = vor.u32 %v988_v21, %v986_v50  ;;  %v1806_v47 = vunpack.c.h.b16 %v9043_v8 }
  0xcd   : > { %v1002_v24 = vsel %vm783_vm1, %v997_v5, %v1001_v36  ;;  %v9275_v13 = vsel %vm1632_vm4, %v1533_v29, %v9157_v41  ;;  %v2845_v14 = vshll.u32 %v9265_v3, 16  ;;  %v9281_v50 = vunpack.c.l.b16 %v433_v22 }
  0xce   : > { %v9256_v0 = vpop.permute.xlu0 %1222  ;;  %v1969_v43 = vpack.c.b16 %v1807_v2, %v1806_v47  ;;  %v2843_v21 = vor.u32 %v2841_v30, %v2839_v34  ;;  %v1813_v5 = vunpack.c.h.b16 %v9221_v45  ;;  %v13198_v41 = vunpack.c.l.b16 %v9275_v13 }
  0xcf   : > { %13337 = vst [vmem:[#allocation6_spill] sm:$0xff] %v9281_v50  ;;  %v13197_v29 = vrot.slane %v9232_v49, 1  ;;  %v2861_v34 = vrot.slane %v9265_v3, 1  ;;  %v1003_v22 = vshrl.u32 %v9232_v49, 16  ;;  %v13338_v47 = vrot.slane %v9198_v18, 1 }
  0xd0   : > { %v9303_v58 = vpack.c.b16 %v13198_v41, %v1813_v5  ;;  %v1803_v5 = vunpack.c.h.b16 %v9136_v35  ;;  %v13339_v18 = vunpack.c.l.b16 %v9204_v39  ;;  %v13341_v39 = vunpack.c.l.b16 %v9145_v33 }
  0xd1   : > { %2863 = vrot.lane.b32.xlu1 %v2860_v20, %s8643_s13  ;;  %v756_v20 = vunpack.c.l.b16 %v434_v4 }
  0xd2   : > { %1250 = vrot.lane.b32.xlu2 %v990_v11, %s8644_s14 }
  0xd3   : > { %v9270_v44 = vpop.permute.xlu1 %1421  ;;  %v9295_v2 = vpack.c.b16 %v756_v20, %v9281_v50 }
  0xd4   : > { %7916 = vmatmul.msk.bf16.gmra.mxu1 %vm2017_vm5, %v2394_v48  ;;  %1252 = vrot.lane.b32.xlu0 %v1002_v24, %s8644_s14  ;;  %v2847_v48 = vrot.slane %v2845_v14, 1  ;;  %v9292_v24 = vpop.permute.xlu2 %1431  ;;  %v2862_v14 = vsel %vm1306_vm0, %v13338_v47, %v2861_v34  ;;  %v2395_v47 = vpack.c.b16 %v13339_v18, %v1803_v5 }
  0xd5   : > { %v1007_v4 = vshll.u32 %v9295_v2, 16 }
  0xd6   : > { %v9286_v61 = vpop.permute.xlu0 %1423  ;;  %v2848_v30 = vsel %vm783_vm1, %v2843_v21, %v2847_v48 }
  0xd7   : > { %v9319_v21 = vrot.slane %v1007_v4, 1  ;;  %v9338_v4 = vld [vmem:[%s8723_s12 + $0xf8] sm:$0xff] }
  0xd9   : > { %1449 = vrot.lane.b32.xlu1 %v1350_v38, %s8643_s13  ;;  %7867 = vmatmul.msk.bf16.gmra.mxu0 %vm2017_vm5, %v1969_v43  ;;  %v1354_v38 = vsel %vm1306_vm0, %v1352_v51, %v13197_v29  ;;  %v1005_v43 = vor.u32 %v1003_v22, %v1001_v36  ;;  %v2849_v51 = vshrl.u32 %v9265_v3, 16  ;;  %v439_v29 = vld [vmem:[%s8723_s12 + $0x100] sm:$0xf]  ;;  %v9333_v36 = vld [vmem:[%s8723_s12 + $0xf0] sm:$0xff]  ;;  %v1808_v22 = vunpack.c.h.b16 %v9104_v1 }
  0xda   : > { %1451 = vrot.lane.b32.xlu2 %v1354_v38, %s8643_s13  ;;  %v9340_v3 = vunpack.c.l.b16 %v439_v29 }
  0xdb   : > { %v9299_v11 = vpop.permute.xlu1 %1226  ;;  %v1010_v50 = vsel %vm783_vm1, %v1005_v43, %v9319_v21  ;;  %v2851_v35 = vor.u32 %v2849_v51, %v2847_v48  ;;  %v1970_v5 = vpack.c.b16 %v13341_v39, %v1808_v22  ;;  %v1017_v43 = vshll.u32 %v9333_v36, 16  ;;  %v9370_v39 = vld [vmem:[%s8723_s12 + $0x108] sm:$0xff] }
  0xdc   : > { %7974 = vmatmul.msk.bf16.gmra.mxu2 %vm2017_vm5, %v9303_v58  ;;  %2854 = vrot.lane.b32.xlu0 %v2848_v30, %s8644_s14  ;;  %v440_v30 = vld [vmem:[%s8723_s12 + $0x104] sm:$0x1]  ;;  %v1305_v38 = vpop.permute.xlu2 %1304  ;;  %13340 = vst [vmem:[#allocation7_spill] sm:$0xff] %v9340_v3  ;;  %v1535_v48 = vsel %vm1505_vm3, %v8838_v40, %v9256_v0  ;;  %v1015_v51 = vshrl.u32 %v9333_v36, 16  ;;  %v13205_v40 = vrot.slane %v9295_v2, 1  ;;  %v1040_v10 = vshll.u32 %v9370_v39, 16 }
  0xde   : > { %v9317_v20 = vpop.permute.xlu0 %1425 }
  0xe1   : > { %2865 = vrot.lane.b32.xlu1 %v2862_v14, %s8643_s13  ;;  %v757_v14 = vunpack.c.l.b16 %v440_v30  ;;  %v1019_v30 = vrot.slane %v1017_v43, 1 }
  0xe2   : > { %1254 = vrot.lane.b32.xlu2 %v1010_v50, %s8644_s14  ;;  %v1022_v50 = vshll.u32 %v9338_v4, 16 }
  0xe3   : > { %v9326_v41 = vpop.permute.xlu1 %1427  ;;  %v9354_v29 = vpack.c.b16 %v757_v14, %v9340_v3  ;;  %v9381_v3 = vld [vmem:[%s8723_s12 + $0x110] sm:$0xff] }
  0xe4   : > { %7917 = vmatmul.msk.bf16.gmra.mxu1 %vm2017_vm5, %v2395_v47  ;;  %v9362_v47 = vsel %vm1632_vm4, %v1535_v48, %v9270_v44  ;;  %v1024_v0 = vrot.slane %v1022_v50, 1  ;;  %v1938_v14 = vpop.permute.xlu2 %1937  ;;  %v1020_v44 = vor.u32 %v1019_v30, %v1015_v51  ;;  %v728_v30 = vpack.c.b16 %v8925_v62, %v8925_v62 }
  0xe5   : > { %v1030_v22 = vshll.u32 %v9354_v29, 16 }
  0xe6   : > { %v9345_v18 = vpop.permute.xlu0 %1429 }
  0xe7   : > { %v9378_v50 = vrot.slane %v1030_v22, 1  ;;  %v1042_v22 = vrot.slane %v1040_v10, 1  ;;  %v1537_v10 = vsel %vm1505_vm3, %v8843_v46, %v9191_v52  ;;  %v13344_v46 = vrot.slane %v9338_v4, 1 }
  0xe9   : > { %2856 = vrot.lane.b32.xlu1 %v2851_v35, %s8644_s14  ;;  %7868 = vmatmul.msk.bf16.gmra.mxu0 %vm2017_vm5, %v1970_v5  ;;  %v1026_v35 = vshrl.u32 %v9338_v4, 16 }
  0xea   : > { %2867 = vrot.lane.b32.xlu2 %v2861_v34, %s8643_s13  ;;  %v1025_v34 = vsel %vm783_vm1, %v1020_v44, %v1024_v0 }
  0xeb   : > { %v9357_v33 = vpop.permute.xlu1 %1232  ;;  %v1028_v48 = vor.u32 %v1026_v35, %v1024_v0  ;;  %v1038_v35 = vshrl.u32 %v9370_v39, 16  ;;  %v758_v0 = vunpack.c.l.b16 %v446_v17 }
  0xec   : > { %7975 = vmatmul.msk.bf16.gmra.mxu2 %vm2017_vm5, %v9362_v47  ;;  %v1929_v44 = vpop.permute.xlu2 %1928 }
  0xed   : > { %v1043_v17 = vor.u32 %v1042_v22, %v1038_v35  ;;  %v1049_v35 = vshrl.u32 %v9381_v3, 16 }
  0xee   : > { %v1235_v5 = vpop.permute.xlu0 %1234 }
  0xef   : > { %v1549_v43 = vsel %vm1505_vm3, %v8887_v37, %v1235_v5  ;;  %v1033_v37 = vsel %vm783_vm1, %v1028_v48, %v9378_v50  ;;  %v1045_v5 = vshll.u32 %v9381_v3, 16  ;;  %v1631_v48 = vsel %vm1505_vm3, %v728_v30, %v1305_v38 }
  0xf0   : > { %v9424_v38 = vsel %vm1632_vm4, %v1537_v10, %v9286_v61 }
  0xf1   : > { %1455 = vrot.lane.b32.xlu1 %v13205_v40, %s8643_s13  ;;  %v9398_v40 = vunpack.c.l.b16 %v445_v26 }
  0xf2   : > { %1258 = vrot.lane.b32.xlu2 %v1025_v34, %s8644_s14  ;;  %v1047_v34 = vrot.slane %v1045_v5, 1 }
  0xf3   : > { %v1434_v23 = vpop.permute.xlu1 %1433  ;;  %13342 = vst [vmem:[#allocation8_spill] sm:$0xff] %v9398_v40  ;;  %v9416_v62 = vpack.c.b16 %v758_v0, %v9398_v40 }
  0xf4   : > { %v9388_v51 = vsel %vm1632_vm4, %v1549_v43, %v1434_v23  ;;  %7918 = vmatmul.msk.bf16.gmra.mxu1 %vm2017_vm5, %v9043_v8  ;;  %v1360_v43 = vrot.slane %v9354_v29, 1  ;;  %v1048_v61 = vsel %vm783_vm1, %v1043_v17, %v1047_v34  ;;  %v1051_v10 = vor.u32 %v1049_v35, %v1047_v34  ;;  %v451_v17 = vld [vmem:[%s8723_s12 + $0x130] sm:$0xf] }
  0xf5   : > { %v1946_v34 = vsel %vm1505_vm3, %v8929_v12, %v1929_v44  ;;  %v13206_v35 = vrot.slane %v9381_v3, 1 }
  0xf6   : > { %v1927_v23 = vpop.permute.xlu0 %1926  ;;  %v1361_v52 = vsel %vm1306_vm0, %v13344_v46, %v1360_v43 }
  0xf7   : > { %v1944_v8 = vsel %vm1505_vm3, %v8913_v54, %v1927_v23 }
  0xf8   : > { %v9413_v26 = vsel %vm1632_vm4, %v1944_v8, %v1938_v14  ;;  %v1241_v8 = vpop.permute.xlu2 %1240 }
  0xf9   : > { %1260 = vrot.lane.b32.xlu1 %v1033_v37, %s8644_s14  ;;  %7869 = vmatmul.msk.bf16.gmra.mxu0 %vm2017_vm5, %v9155_v6  ;;  %13343 = vst [vmem:[#allocation9_spill] sm:$0xff] %v9413_v26  ;;  %v1959_v54 = vunpack.c.l.b16 %v9413_v26  ;;  %v689_v6 = vpack.c.b16 %v8854_v56, %v8854_v56  ;;  %v1542_v37 = vsel %vm1505_vm3, %v8867_v9, %v9223_v19  ;;  %v1053_v56 = vshll.u32 %v9416_v62, 16 }
  0xfa   : > { %1459 = vrot.lane.b32.xlu2 %v1361_v52, %s8643_s13  ;;  %v9447_v9 = vsel %vm1632_vm4, %v1542_v37, %v9326_v41  ;;  %v9473_v52 = vunpack.c.l.b16 %v451_v17  ;;  %v9479_v37 = vld [vmem:[%s8723_s12 + $0x128] sm:$0xff] }
  0xfb   : > { %v1504_v23 = vpop.permute.xlu1 %1503  ;;  %v1540_v0 = vsel %vm1505_vm3, %v689_v6, %v9299_v11  ;;  %v1820_v46 = vunpack.c.l.b16 %v9447_v9  ;;  %13347 = vst [vmem:[#allocation12_spill] sm:$0xff] %v9479_v37 }
  0xfc   : > { %v9429_v14 = vsel %vm1632_vm4, %v1631_v48, %v1504_v23  ;;  %7976 = vmatmul.msk.bf16.gmra.mxu2 %vm2017_vm5, %v9424_v38  ;;  %v9453_v48 = vrot.slane %v1053_v56, 1  ;;  %v9460_v41 = vsel %vm1632_vm4, %v1540_v0, %v9317_v20  ;;  %v9463_v23 = vld [vmem:[%s8723_s12 + $0x120] sm:$0xff]  ;;  %13346 = vst [vmem:[#allocation11_spill] sm:$0xff] %v9473_v52 }
  0xfd   : > { %v13207_v30 = vunpack.c.l.b16 %v9429_v14  ;;  %13345 = vst [vmem:[#allocation10_spill] sm:$0xff] %v9463_v23  ;;  %v13208_v20 = vunpack.c.l.b16 %v9460_v41  ;;  %v1063_v12 = vshll.u32 %v9463_v23, 16 }
  0xfe   : > { %v1237_v5 = vpop.permute.xlu0 %1236  ;;  %v1056_v6 = vsel %vm783_vm1, %v1051_v10, %v9453_v48 }
  0xff   : > { %v2008_v22 = vpack.c.b16 %v1959_v54, %v13207_v30  ;;  %v1551_v19 = vsel %vm1505_vm3, %v8898_v15, %v1237_v5  ;;  %v452_v54 = vld [vmem:[%s8723_s12 + $0x134] sm:$0x1]  ;;  %v9491_v56 = vpack.c.b16 %v1820_v46, %v13208_v20  ;;  %v1365_v5 = vrot.slane %v9416_v62, 1  ;;  %v458_v20 = vld [vmem:[%s8723_s12 + $0x14c] sm:$0x1] }
 0x100   : > { %v1931_v10 = vpop.permute.xlu2 %1930 }
 0x101   : > { %1264 = vrot.lane.b32.xlu1 %v1048_v61, %s8644_s14  ;;  %7906 = vmatmul.msk.bf16.vlgmr.msra.gmra.mxu3 %vm2017_vm5, %v2008_v22  ;;  %v1960_v22 = vunpack.c.h.b16 %v9413_v26  ;;  %v1366_v17 = vsel %vm1306_vm0, %v13206_v35, %v1365_v5  ;;  %v1815_v35 = vunpack.c.l.b16 %v9362_v47  ;;  %v13353_v26 = vunpack.c.l.b16 %v9275_v13 }
 0x102   : > { %8528 = vmatpush.bf16.msra.mxu3 %v8935_v16  ;;  %v759_v16 = vunpack.c.l.b16 %v452_v54  ;;  %1461 = vrot.lane.b32.xlu2 %v1360_v43, %s8643_s13  ;;  %v1061_v54 = vshrl.u32 %v9463_v23, 16 }
 0x103   : > { %v1436_v11 = vpop.permute.xlu1 %1435 }
 0x104   : > { %v9467_v15 = vsel %vm1632_vm4, %v1551_v19, %v1436_v11  ;;  %7919 = vmatmul.msk.bf16.gmra.mxu1 %vm2017_vm5, %v9104_v1  ;;  %v695_v1 = vpack.c.b16 %v8954_v32, %v8954_v32  ;;  %v9500_v0 = vpack.c.b16 %v759_v16, %v9473_v52  ;;  %v1068_v32 = vshll.u32 %v9479_v37, 16 }
 0x105   : > { %v1973_v52 = vpack.c.b16 %v1815_v35, %v13353_v26 }
 0x106   : > { %v1940_v61 = vpop.permute.xlu0 %1939  ;;  %13349 = vst [vmem:[#allocation14_spill] sm:$0xff] %v9500_v0  ;;  %v1070_v16 = vrot.slane %v1068_v32, 1 }
 0x107   : > { %v9485_v44 = vsel %vm1632_vm4, %v1946_v34, %v1940_v61  ;;  %v1076_v34 = vshll.u32 %v9500_v0, 16  ;;  %v8435_v61 = vld [vmem:[%s8723_s12 + $0x138] sm:$0xff] }
 0x108   : > { %13348 = vst [vmem:[#allocation13_spill] sm:$0xff] %v9485_v44  ;;  %v1961_v43 = vunpack.c.l.b16 %v9485_v44  ;;  %v1442_v13 = vpop.permute.xlu2 %1441  ;;  %v1084_v35 = vshrl.u32 %v8435_v61, 16 }
 0x109   : > { %1266 = vrot.lane.b32.xlu1 %v1056_v6, %s8644_s14  ;;  %7870 = vmatmul.msk.bf16.gmra.mxu0 %vm2017_vm5, %v9221_v45  ;;  %v1065_v45 = vrot.slane %v1063_v12, 1  ;;  %v1072_v6 = vshrl.u32 %v9479_v37, 16 }
 0x10a   : > { %v2009_v46 = vpack.c.b16 %v1961_v43, %v1960_v22  ;;  %1465 = vrot.lane.b32.xlu2 %v1366_v17, %s8643_s13  ;;  %v1899_v22 = vpack.c.b16 %v8985_v63, %v8985_v63  ;;  %v8577_v43 = vld [vmem:[%s8723_s12 + $0x80] sm:$0xff]  ;;  %v9527_v17 = vrot.slane %v1076_v34, 1 }
 0x10b   : > { %v1239_v19 = vpop.permute.xlu1 %1238  ;;  %v1066_v30 = vor.u32 %v1065_v45, %v1061_v54  ;;  %v1544_v32 = vsel %vm1505_vm3, %v8577_v43, %v9258_v55  ;;  %v1074_v54 = vor.u32 %v1072_v6, %v1070_v16  ;;  %v9530_v45 = vld [vmem:[%s8723_s12 + $0x140] sm:$0xff] }
 0x10c   : > { %v1554_v11 = vsel %vm1505_vm3, %v695_v1, %v1239_v19  ;;  %7977 = vmatmul.msk.bf16.gmra.mxu2 %vm2017_vm5, %v9491_v56  ;;  %v1556_v19 = vsel %vm1505_vm3, %v9005_v27, %v1241_v8  ;;  %13351 = vst [vmem:[#allocation16_spill] sm:$0xff] %v9527_v17  ;;  %v1821_v27 = vunpack.c.h.b16 %v9447_v9  ;;  %v9540_v8 = vsel %vm1632_vm4, %v1544_v32, %v9345_v18 }
 0x10d   : > { %13352 = vst [vmem:[#allocation17_spill] sm:$0xff] %v9530_v45  ;;  %v1071_v55 = vsel %vm783_vm1, %v1066_v30, %v1070_v16  ;;  %v760_v30 = vunpack.c.l.b16 %v458_v20  ;;  %v1079_v18 = vsel %vm783_vm1, %v1074_v54, %v9527_v17  ;;  %v1091_v43 = vshll.u32 %v9530_v45, 16 }
 0x10e   : > { %v1438_v12 = vpop.permute.xlu0 %1437  ;;  %v13212_v32 = vrot.slane %v9479_v37, 1  ;;  %v13214_v20 = vrot.slane %v9500_v0, 1 }
 0x10f   : > { %v9516_v1 = vsel %vm1632_vm4, %v1554_v11, %v1438_v12  ;;  %v1086_v11 = vshll.u32 %v8435_v61, 16  ;;  %v457_v12 = vld [vmem:[%s8723_s12 + $0x148] sm:$0xf]  ;;  %v1962_v61 = vunpack.c.h.b16 %v9485_v44  ;;  %v9625_v44 = vstv %s8016_s20  ;;  %s7706_s20 = sshll.u32 %s14252_s22, 7 }
 0x110   : > { %13350 = vst [vmem:[#allocation15_spill] sm:$0xff] %v9516_v1  ;;  %v13211_v34 = vunpack.c.l.b16 %v9516_v1  ;;  %v9550_v26 = vunpack.c.l.b16 %v457_v12  ;;  %vm3549_vm6 = vcmp.ge.s32.totalorder %v9625_v44, 0  ;;  %vm3567_vm7 = vcmp.lt.s32.totalorder %v9625_v44, 32  ;;  %s370_s29 = sadd.s32 %s7706_s20, %s7705_s19 }
 0x111   : > { %1467 = vrot.lane.b32.xlu1 %v1365_v5, %s8643_s13  ;;  %7907 = vmatmul.msk.bf16.gmra.mxu3 %vm2017_vm5, %v2009_v46  ;;  %v1949_v46 = vsel %vm1505_vm3, %v1899_v22, %v1931_v10  ;;  %v1088_v16 = vrot.slane %v1086_v11, 1  ;;  %v1822_v10 = vunpack.c.l.b16 %v9540_v8  ;;  %vm9686_vm9 = vmand %vm3549_vm6, %vm3567_vm7  ;;  %s7707_s22 = sshll.u32 %s370_s29, 3 }
 0x112   : > { %13355 = vst [vmem:[#allocation19_spill] sm:$0xff] %v9550_v26  ;;  %1270 = vrot.lane.b32.xlu2 %v1071_v55, %s8644_s14  ;;  %v9571_v11 = vpack.c.b16 %v760_v30, %v9550_v26  ;;  %v692_v55 = vpack.c.b16 %v8879_v28, %v8879_v28  ;;  %s12523_s8 = scalar_lea.vmem %s13192_s6, %s7707_s22 }
 0x113   : > { %v1440_v63 = vpop.permute.xlu1 %1439  ;;  %v1089_v12 = vor.u32 %v1088_v16, %v1084_v35  ;;  %v1095_v35 = vshrl.u32 %v9530_v45, 16 }
 0x114   : > { %v9543_v5 = vsel %vm1632_vm4, %v1556_v19, %v1440_v63  ;;  %7920 = vmatmul.msk.bf16.gmra.mxu1 %vm2017_vm5, %v9172_v7  ;;  %13356 = vst [vmem:[#allocation20_spill] sm:$0xff] %v9571_v11  ;;  %v1093_v63 = vrot.slane %v1091_v43, 1  ;;  %v1099_v43 = vshll.u32 %v9571_v11, 16 }
 0x115   : > { %13354 = vst [vmem:[#allocation18_spill] sm:$0xff] %v9543_v5  ;;  %v1830_v6 = vunpack.c.l.b16 %v9543_v5 }
 0x116   : > { %v1942_v7 = vpop.permute.xlu0 %1941 }
 0x117   : > { %v9559_v22 = vpack.c.b16 %v1830_v6, %v13211_v34  ;;  %v9564_v19 = vsel %vm1632_vm4, %v1949_v46, %v1942_v7  ;;  %v9575_v34 = vpack.c.b16 %v1822_v10, %v1821_v27  ;;  %v1371_v46 = vsel %vm1306_vm0, %v13212_v32, %v13214_v20 }
 0x118   : > { %v13213_v54 = vunpack.c.l.b16 %v9564_v19  ;;  %v13358_v10 = vrot.slane %v9295_v2, 1  ;;  %v13359_v7 = vrot.slane %v9232_v49, 1  ;;  %v725_v32 = vpack.c.b16 %v9045_v25, %v9045_v25  ;;  %v464_v25 = vld [vmem:[%s8723_s12 + $0x164] sm:$0x1] }
 0x119   : > { %1272 = vrot.lane.b32.xlu1 %v1079_v18, %s8644_s14  ;;  %7871 = vmatmul.msk.bf16.gmra.mxu0 %vm2017_vm5, %v1973_v52  ;;  %v1831_v52 = vunpack.c.h.b16 %v9543_v5 }
 0x11a   : > { %v2010_v27 = vpack.c.b16 %v13213_v54, %v1962_v61  ;;  %1471 = vrot.lane.b32.xlu2 %v1371_v46, %s8643_s13  ;;  %v1547_v61 = vsel %vm1505_vm3, %v692_v55, %v9357_v33  ;;  %v1498_v54 = vpop.permute.xlu2 %1497  ;;  %v1097_v46 = vor.u32 %v1095_v35, %v1093_v63  ;;  %v9614_v33 = vrot.slane %v1099_v43, 1  ;;  %v463_v55 = vld [vmem:[%s8723_s12 + $0x160] sm:$0xf]  ;;  %v9636_v43 = vld [vmem:[%s8723_s12 + $0x158] sm:$0xff] }
 0x11b   : > { %v1243_v6 = vpop.permute.xlu1 %1242  ;;  %v2588_v18 = vpop.f32.mrf.mxu1  ;;  %v1118_v5 = vshrl.u32 %v9636_v43, 16 }
 0x11c   : > { %v1558_v30 = vsel %vm1505_vm3, %v9023_v42, %v1243_v6  ;;  %v2929_v28 = vpop.f32.mrf.mxu2  ;;  %7978 = vmatmul.msk.bf16.gmra.mxu2 %vm2017_vm5, %v9575_v34  ;;  %v1356_v42 = vsel %vm1306_vm0, %v13359_v7, %v13358_v10  ;;  %v1816_v10 = vunpack.c.h.b16 %v9362_v47  ;;  %13360 = vst [vmem:[#allocation22_spill] sm:$0xff] %v9614_v33 }
 0x11d   : > { %v9587_v16 = vsel %vm1632_vm4, %v1558_v30, %v1442_v13  ;;  %v1094_v13 = vsel %vm783_vm1, %v1089_v12, %v1093_v63  ;;  %v3538_v30 = vlaneseq  ;;  %1453 = vrot.lane.b32.xlu0 %v1356_v42, %s8643_s13  ;;  %v1817_v12 = vunpack.c.l.b16 %v9424_v38  ;;  %v9633_v63 = vld [vmem:[%s13189_s3] ss:$0 sm:$0xff] }
 0x11e   : > { %13357 = vst [vmem:[#allocation21_spill] sm:$0xff] %v9587_v16  ;;  %v1832_v6 = vunpack.c.l.b16 %v9587_v16  ;;  %v1299_v49 = vpop.permute.xlu0 %1298  ;;  %v9620_v42 = vsel %vm1632_vm4, %v1547_v61, %v9292_v24  ;;  %v9638_v24 = vunpack.c.l.b16 %v463_v55  ;;  %v1833_v37 = vunpack.c.h.b16 %v9587_v16 }
 0x11f   : > { %v9622_v20 = vshrl.u32 %v3538_v30, 7  ;;  %v761_v30 = vunpack.c.l.b16 %v464_v25 }
 0x120   : > { %v9609_v7 = vpack.c.b16 %v1832_v6, %v1831_v52  ;;  %v1624_v52 = vsel %vm1505_vm3, %v725_v32, %v1299_v49  ;;  %13361 = vst [vmem:[#allocation23_spill] sm:$0xff] %v9638_v24  ;;  %v1823_v32 = vunpack.c.h.b16 %v9540_v8 }
 0x121   : > { %1276 = vrot.lane.b32.xlu1 %v1094_v13, %s8644_s14  ;;  %7908 = vmatmul.msk.bf16.gmra.mxu3 %vm2017_vm5, %v2010_v27  ;;  %v9628_v13 = vld [vmem:[%s8723_s12 + $0x150] sm:$0xff]  ;;  %v1974_v27 = vpack.c.b16 %v1817_v12, %v1816_v10  ;;  %v9649_v12 = vadd.s32 4294967295, %v9622_v20  ;;  %v9653_v25 = vsel %vm1632_vm4, %v1624_v52, %v1498_v54  ;;  %v9667_v54 = vpack.c.b16 %v761_v30, %v9638_v24 }
 0x122   : > { %13362 = vst [vmem:[#allocation24_spill] sm:$0xff] %v9653_v25  ;;  %v1114_v52 = vshll.u32 %v9636_v43, 16  ;;  %v1444_v40 = vpop.permute.xlu2 %1443  ;;  %v13364_v30 = vunpack.c.l.b16 %v9620_v42  ;;  %v13368_v23 = vunpack.c.l.b16 %v9653_v25 }
 0x123   : > { %v2166_v6 = vpop.f32.mrf.mxu0  ;;  %v1301_v35 = vpop.permute.xlu1 %1300  ;;  %vm3603_vm8 = vcmp.ge.s32.totalorder %v9649_v12, 0 }
 0x124   : > { %v2589_v26 = vadd.f32 %v2588_v18, %v2166_v6  ;;  %v1626_v49 = vsel %vm1505_vm3, %v9065_v53, %v1301_v35  ;;  %7921 = vmatmul.msk.bf16.gmra.mxu1 %vm2017_vm5, %v9237_v60  ;;  %v2931_v18 = vpop.f32.mrf.mxu2  ;;  %v1102_v6 = vsel %vm783_vm1, %v1097_v46, %v9614_v33  ;;  %v2590_v55 = vpop.f32.mrf.mxu1  ;;  %v13363_v53 = vrot.slane %v9500_v0, 1  ;;  %vm9713_vm10 = vmand %vm9686_vm9, %vm3603_vm8 }
 0x125   : > { %v1375_v35 = vrot.slane %v9571_v11, 1  ;;  %v9680_v24 = vpack.c.b16 %v13364_v30, %v1823_v32  ;;  %v1116_v0 = vrot.slane %v1114_v52, 1  ;;  %v9726_v52 = vld [vmem:[%s8723_s12 + $0x170] sm:$0xff] }
 0x126   : > { %v3154_v10 = vadd.f32 %v2929_v28, %v2589_v26  ;;  %1473 = vrot.lane.b32.xlu2 %v13363_v53, %s8643_s13  ;;  %v1500_v60 = vpop.permute.xlu0 %1499  ;;  %v1109_v28 = vshll.u32 %v9628_v13, 16  ;;  %v1107_v53 = vshrl.u32 %v9628_v13, 16 }
 0x127   : > { %v9664_v61 = vsel %vm1632_vm4, %v1626_v49, %v1500_v60  ;;  %v1011_v49 = vshrl.u32 %v9295_v2, 16  ;;  %v13367_v2 = vrot.slane %v9530_v45, 1 }
 0x128   : > { %v3248_v46 = vadd.f32 %v9633_v63, %v3154_v10  ;;  %v1880_v26 = vunpack.c.l.b16 %v9664_v61  ;;  %v698_v10 = vpack.c.b16 %v9027_v57, %v9027_v57  ;;  %v9691_v57 = vld [vmem:[%s8723_s12 + $0x168] sm:$0xff]  ;;  %v1111_v33 = vrot.slane %v1109_v28, 1 }
 0x129   : > { %1278 = vrot.lane.b32.xlu1 %v1102_v6, %s8644_s14  ;;  %7872 = vmatmul.msk.bf16.gmra.mxu0 %vm2017_vm5, %v1974_v27  ;;  %v1013_v32 = vor.u32 %v1011_v49, %v9319_v21  ;;  %v1122_v21 = vshll.u32 %v9667_v54, 16 }
 0x12a   : > { %v3338_v60 = vmax.f32 %v3248_v46, 0.0  ;;  %v1376_v46 = vsel %vm1306_vm0, %v13367_v2, %v1375_v35  ;;  %v9702_v1 = vpack.c.b16 %v1880_v26, %v13368_v23  ;;  %v8467_v26 = vld [vmem:[%s13190_s4 + $0x78] sm:$0xff]  ;;  %v1112_v49 = vor.u32 %v1111_v33, %v1107_v53  ;;  %v9745_v45 = vpop.permute.xlu2 %1246 }
 0x12b   : > { %v2168_v6 = vpop.f32.mrf.mxu0  ;;  %v1245_v17 = vpop.permute.xlu1 %1244  ;;  %1256 = vrot.lane.b32.xlu0 %v1013_v32, %s8644_s14  ;;  %6231 = vmatpush.bf16.msrb.mxu2 %v8467_v26  ;;  %v1120_v33 = vor.u32 %v1118_v5, %v1116_v0  ;;  %v9741_v53 = vrot.slane %v1122_v21, 1  ;;  %v469_v26 = vld [vmem:[%s8723_s12 + $0x178] sm:$0xf] }
 0x12c   : > { %v3428_v30 = vpack.c.bf16 %v3338_v60, %v3338_v60  ;;  %v2591_v11 = vadd.f32 %v2590_v55, %v2168_v6  ;;  %13369 = vst [vmem:[#allocation25_spill] sm:$0xff] %v9702_v1  ;;  %v1561_v2 = vsel %vm1505_vm3, %v698_v10, %v1245_v17  ;;  %7979 = vmatmul.msk.bf16.gmra.mxu2 %vm2017_vm5, %v9680_v24  ;;  %v2934_v17 = vpop.f32.mrf.mxu2  ;;  %v1132_v10 = vshll.u32 %v9691_v57, 16  ;;  %v2593_v60 = vpop.f32.mrf.mxu1 }
 0x12d   : > { %v9718_v23 = vsel %vm1632_vm4, %v1561_v2, %v1444_v40  ;;  %v9763_v16 = vunpack.c.l.b16 %v469_v26 }
 0x12e   : > { %v3155_v55 = vadd.f32 %v2931_v18, %v2591_v11  ;;  %13372 = vst [vmem:[#allocation26_spill] sm:$0xff] %v9718_v23  ;;  %1477 = vrot.lane.b32.xlu2 %v1376_v46, %s8643_s13  ;;  %v13229_v28 = vunpack.c.l.b16 %v9718_v23  ;;  %v1818_v11 = vunpack.c.h.b16 %v9424_v38  ;;  %v4063_v18 = vunpack.c.l.bf16 %v3428_v30  ;;  %v1303_v6 = vpop.permute.xlu0 %1302 }
 0x12f   : > { %v13230_v46 = vmov 0.0   ;;  %v1628_v13 = vsel %vm1505_vm3, %v9072_v59, %v1303_v6  ;;  %v1125_v59 = vsel %vm783_vm1, %v1120_v33, %v9741_v53 }
 0x130   : > { %v3249_v40 = vadd.f32 %v9633_v63, %v3155_v55  ;;  %v8022_v32 = vsel %vm9713_vm10, 1.0, %v13230_v46  ;;  %v9736_v2 = vpack.c.b16 %v13229_v28, %v1833_v37  ;;  %v1130_v55 = vshrl.u32 %v9691_v57, 16 }
 0x131   : > { %1479 = vrot.lane.b32.xlu1 %v1375_v35, %s8643_s13  ;;  %7955 = vmatmul.msk.bf16.vlgmr.msrb.gmra.mxu3 %vm2017_vm5, %v9702_v1  ;;  %v1134_v37 = vrot.slane %v1132_v10, 1  ;;  %v1137_v28 = vshll.u32 %v9726_v52, 16  ;;  %v470_v35 = vld [vmem:[%s8723_s12 + $0x17c] sm:$0x1]  ;;  %v1117_v46 = vsel %vm783_vm1, %v1112_v49, %v1116_v0  ;;  %v4243_v1 = vmul.f32 %v8022_v32, %v4063_v18 }
 0x132   : > { %v3339_v30 = vmax.f32 %v3249_v40, 0.0  ;;  %v13373_v40 = vmov 0.0   ;;  %v13374_v10 = vunpack.c.l.b16 %v9460_v41  ;;  %v762_v18 = vunpack.c.l.b16 %v470_v35  ;;  %v8459_v41 = vld [vmem:[%s13190_s4 + $0x38] sm:$0xff] }
 0x133   : > { %v2171_v25 = vpop.f32.mrf.mxu0  ;;  %v1502_v23 = vpop.permute.xlu1 %1501  ;;  %v9755_v57 = vsel %vm9686_vm9, 1.0, %v13373_v40  ;;  %v1139_v32 = vrot.slane %v1137_v28, 1  ;;  %v4333_v33 = vpack.c.bf16 %v4243_v1, %v4243_v1  ;;  %v1881_v28 = vunpack.c.h.b16 %v9664_v61  ;;  %6062 = vmatpush.bf16.msrb.mxu1 %v8459_v41 }
 0x134   : > { %v3429_v5 = vpack.c.bf16 %v3339_v30, %v3339_v30  ;;  %v2594_v21 = vadd.f32 %v2593_v60, %v2171_v25  ;;  %7922 = vmatmul.msk.bf16.gmra.mxu1 %vm2017_vm5, %v9303_v58  ;;  %v1975_v6 = vpack.c.b16 %v13374_v10, %v1818_v11  ;;  %v9766_v25 = vsel %vm1632_vm4, %v1628_v13, %v1502_v23  ;;  %v8499_v58 = vld [vmem:[%s13190_s4 + $0x178] sm:$0xff]  ;;  %v1448_v41 = vpop.permute.xlu2 %1447 }
 0x135   : > { %13375 = vst [vmem:[#allocation27_spill] sm:$0xff] %v9766_v25  ;;  %v1135_v60 = vor.u32 %v1134_v37, %v1130_v55  ;;  %v13235_v11 = vrot.slane %v9636_v43, 1  ;;  %v1882_v55 = vunpack.c.l.b16 %v9766_v25  ;;  %v2595_v37 = vpop.f32.mrf.mxu1  ;;  %5749 = vmatpush.bf16.msrb.mxu0 %v8499_v58  ;;  %v9784_v1 = vpack.c.b16 %v762_v18, %v9763_v16 }
 0x136   : > { %v4064_v0 = vunpack.c.l.bf16 %v3429_v5  ;;  %v3156_v49 = vadd.f32 %v2934_v17, %v2594_v21  ;;  %1282 = vrot.lane.b32.xlu2 %v1117_v46, %s8644_s14  ;;  %v1380_v17 = vrot.slane %v9667_v54, 1  ;;  %v2936_v46 = vpop.f32.mrf.mxu2  ;;  %v4487_v10 = vunpack.c.l.b16 %v4333_v33 }
 0x137   : > { %v1140_v5 = vsel %vm783_vm1, %v1135_v60, %v1139_v32  ;;  %v9795_v18 = vpack.c.b16 %v1882_v55, %v1881_v28  ;;  %v1141_v60 = vshrl.u32 %v9726_v52, 16 }
 0x138   : > { %v4244_v23 = vmul.f32 %v9755_v57, %v4064_v0  ;;  %v3250_v30 = vadd.f32 %v9633_v63, %v3156_v49  ;;  %v1381_v21 = vsel %vm1306_vm0, %v13235_v11, %v1380_v17 }
 0x139   : > { %1284 = vrot.lane.b32.xlu1 %v1125_v59, %s8644_s14  ;;  %7873 = vmatmul.msk.bf16.gmra.mxu0 %vm2017_vm5, %v1975_v6  ;;  %v1357_v59 = vrot.slane %v9333_v36, 1 }
 0x13a   : > { %v4334_v26 = vpack.c.bf16 %v4244_v23, %v4244_v23  ;;  %v3340_v13 = vmax.f32 %v3250_v30, 0.0  ;;  %v13376_v30 = vrot.slane %v9338_v4, 1 }
 0x13b   : > { %v2173_v35 = vpop.f32.mrf.mxu0  ;;  %v1249_v23 = vpop.permute.xlu1 %1248 }
 0x13c   : > { %v4488_v6 = vunpack.c.l.b16 %v4334_v26  ;;  %v3430_v0 = vpack.c.bf16 %v3340_v13, %v3340_v13  ;;  %v2596_v49 = vadd.f32 %v2595_v37, %v2173_v35  ;;  %v1565_v58 = vsel %vm1505_vm3, %v9140_v31, %v1249_v23  ;;  %7980 = vmatmul.msk.bf16.gmra.mxu2 %vm2017_vm5, %v9388_v51  ;;  %v13378_v23 = vld [vmem:[#allocation4_spill] sm:$0xff] }
 0x13d   : > { %v1359_v36 = vsel %vm1306_vm0, %v1357_v59, %v13376_v30  ;;  %v9804_v13 = vsel %vm1632_vm4, %v1565_v58, %v1448_v41  ;;  %v1145_v31 = vshll.u32 %v9784_v1, 16  ;;  %v1143_v35 = vor.u32 %v1141_v60, %v1139_v32  ;;  %v9826_v60 = vld [vmem:[%s8906_s21 + $0x8] sm:$0xff] }
 0x13e   : > { %v9801_v33 = vpack.c.b16 %v4488_v6, %v4487_v10  ;;  %v3157_v26 = vadd.f32 %v2936_v46, %v2596_v49  ;;  %1483 = vrot.lane.b32.xlu2 %v1381_v21, %s8643_s13  ;;  %1457 = vrot.lane.b32.xlu0 %v1359_v36, %s8643_s13  ;;  %v4065_v28 = vunpack.c.l.bf16 %v3430_v0  ;;  %v9815_v10 = vpop.permute.xlu0 %1445  ;;  %v8441_v21 = vld [vmem:[%s8906_s21] sm:$0xff]  ;;  %v701_v58 = vpack.c.b16 %v13378_v23, %v13378_v23 }
 0x13f   : > { %v2939_v37 = vpop.f32.mrf.mxu2  ;;  %v9813_v59 = vrot.slane %v1145_v31, 1  ;;  %v13236_v36 = vrot.slane %v9726_v52, 1 }
 0x140   : > { %13377 = vst [vmem:[#allocation28_spill] sm:$0xff] %v9801_v33  ;;  %v3251_v55 = vadd.f32 %v9633_v63, %v3157_v26  ;;  %v4245_v6 = vmul.f32 %v9755_v57, %v4065_v28  ;;  %v1155_v26 = vshll.u32 %v8441_v21, 16  ;;  %v4666_v27 = vshll.u32 %v9801_v33, 16 }
 0x141   : > { %1288 = vrot.lane.b32.xlu1 %v1140_v5, %s8644_s14  ;;  %7956 = vmatmul.msk.bf16.gmra.mxu3 %vm2017_vm5, %v9795_v18  ;;  %v2598_v46 = vpop.f32.mrf.mxu1  ;;  %v1148_v32 = vsel %vm783_vm1, %v1143_v35, %v9813_v59  ;;  %v1385_v35 = vrot.slane %v9784_v1, 1 }
 0x142   : > { %v3341_v4 = vmax.f32 %v3251_v55, 0.0  ;;  %v4335_v31 = vpack.c.bf16 %v4245_v6, %v4245_v6  ;;  %v1251_v55 = vpop.permute.xlu2 %1250  ;;  %v1160_v6 = vshll.u32 %v9826_v60, 16  ;;  %v1157_v23 = vrot.slane %v1155_v26, 1 }
 0x143   : > { %v2864_v49 = vpop.permute.xlu1 %2863 }
 0x144   : > { %v3431_v0 = vpack.c.bf16 %v3341_v4, %v3341_v4  ;;  %7923 = vmatmul.msk.bf16.gmra.mxu1 %vm2017_vm5, %v9362_v47  ;;  %v1162_v11 = vrot.slane %v1160_v6, 1 }
 0x146   : > { %v4066_v5 = vunpack.c.l.bf16 %v3431_v0  ;;  %v2176_v41 = vpop.f32.mrf.mxu0  ;;  %1485 = vrot.lane.b32.xlu2 %v1380_v17, %s8643_s13 }
 0x147   : > { %v2599_v30 = vadd.f32 %v2598_v46, %v2176_v41  ;;  %v9831_v47 = vpop.f32.mrf.mxu2  ;;  %v1568_v46 = vsel %vm1505_vm3, %v701_v58, %v1251_v55  ;;  %v4489_v41 = vunpack.c.l.b16 %v4335_v31 }
 0x148   : > { %v4246_v28 = vmul.f32 %v9755_v57, %v4066_v5  ;;  %v1883_v57 = vunpack.c.h.b16 %v9766_v25  ;;  %v1153_v5 = vshrl.u32 %v8441_v21, 16  ;;  %v13380_v21 = vunpack.c.l.b16 %v9429_v14 }
 0x149   : > { %v9833_v4 = vadd.f32 %v2939_v37, %v2599_v30  ;;  %1290 = vrot.lane.b32.xlu1 %v1148_v32, %s8644_s14  ;;  %7874 = vmatmul.msk.bf16.gmra.mxu0 %vm2017_vm5, %v9447_v9  ;;  %v9840_v0 = vpop.f32.mrf.mxu1  ;;  %v1386_v37 = vsel %vm1306_vm0, %v13236_v36, %v1385_v35  ;;  %v2853_v30 = vpop.permute.xlu0 %2852  ;;  %v1164_v36 = vshrl.u32 %v9826_v60, 16 }
 0x14a   : > { %v4336_v17 = vpack.c.bf16 %v4246_v28, %v4246_v28  ;;  %v9860_v26 = vpack.c.b16 %v13380_v21, %v1883_v57  ;;  %v1158_v31 = vor.u32 %v1157_v23, %v1153_v5  ;;  %v13381_v5 = vld [vmem:[#allocation3_spill] sm:$0xff] }
 0x14b   : > { %v1450_v9 = vpop.permute.xlu1 %1449  ;;  %v8481_v21 = vld [vmem:[%s13190_s4 + $0xe8] sm:$0xff] }
 0x14c   : > { %v4490_v32 = vunpack.c.l.b16 %v4336_v17  ;;  %v9848_v28 = vsel %vm1632_vm4, %v1568_v46, %v1450_v9  ;;  %7981 = vmatmul.msk.bf16.gmra.mxu2 %vm2017_vm5, %v9467_v15  ;;  %v8483_v46 = vld [vmem:[%s13190_s4 + $0xf8] sm:$0xff]  ;;  %v1163_v14 = vsel %vm783_vm1, %v1158_v31, %v1162_v11  ;;  %v13382_v31 = vld [vmem:[#allocation2_spill] sm:$0xff] }
 0x14d   : > { %5411 = vmatpush.bf16.msrb.mxu3 %v8483_v46  ;;  %v13383_v46 = vrot.slane %v13382_v31, 1  ;;  %v8579_v31 = vld [vmem:[%s8906_s21 + $0x50] sm:$0xff] }
 0x14e   : > { %v9852_v58 = vpack.c.b16 %v4490_v32, %v4489_v41  ;;  %v9854_v55 = vpop.f32.mrf.mxu0  ;;  %1489 = vrot.lane.b32.xlu2 %v1386_v37, %s8643_s13  ;;  %v1166_v41 = vor.u32 %v1164_v36, %v1162_v11  ;;  %v8578_v32 = vld [vmem:[%s8906_s21 + $0x48] sm:$0xff]  ;;  %v13237_v11 = vrot.slane %v9826_v60, 1 }
 0x14f   : > { %v9862_v17 = vpop.f32.mrf.mxu2  ;;  %v2870_v37 = vsel %vm1505_vm3, %v8578_v32, %v2853_v30  ;;  %v1034_v32 = vshrl.u32 %v9354_v29, 16 }
 0x150   : > { %13379 = vst [vmem:[#allocation4_spill] sm:$0xff] %v9852_v58  ;;  %v1171_v23 = vsel %vm783_vm1, %v1166_v41, %v13381_v5  ;;  %v2877_v9 = vsel %vm1632_vm4, %v2870_v37, %v2864_v49  ;;  %v1391_v41 = vsel %vm1306_vm0, %v13237_v11, %v13383_v46  ;;  %v13384_v37 = vunpack.c.l.b16 %v9564_v19 }
 0x151   : > { %1491 = vrot.lane.b32.xlu1 %v1385_v35, %s8643_s13  ;;  %7957 = vmatmul.msk.bf16.gmra.mxu3 %vm2017_vm5, %v9860_v26  ;;  %v2603_v6 = vpop.f32.mrf.mxu1  ;;  %v8482_v35 = vld [vmem:[%s13190_s4 + $0xf0] sm:$0xff]  ;;  %v9881_v36 = vpop.permute.xlu0 %1252 }
 0x152   : > { %5412 = vmatpush.bf16.msrb.mxu3 %v8482_v35  ;;  %v8480_v35 = vld [vmem:[%s13190_s4 + $0xe0] sm:$0xff] }
 0x154   : > { %7924 = vmatmul.msk.bf16.gmra.mxu1 %vm2017_vm5, %v9424_v38  ;;  %v2885_v38 = vunpack.c.l.b16 %v2877_v9 }
 0x156   : > { %v2181_v57 = vpop.f32.mrf.mxu0  ;;  %1294 = vrot.lane.b32.xlu2 %v1163_v14, %s8644_s14  ;;  %5413 = vmatpush.bf16.msrb.mxu3 %v8481_v21  ;;  %v1036_v14 = vor.u32 %v1034_v32, %v9378_v50  ;;  %v8479_v50 = vld [vmem:[%s13190_s4 + $0xd8] sm:$0xff]  ;;  %v1825_v21 = vunpack.c.l.b16 %v9388_v51  ;;  %v2866_v32 = vpop.permute.xlu1 %2865 }
 0x157   : > { %v9885_v30 = vpop.f32.mrf.mxu2 }
 0x158   : > { %1262 = vrot.lane.b32.xlu0 %v1036_v14, %s8644_s14 }
 0x159   : > { %1296 = vrot.lane.b32.xlu1 %v1171_v23, %s8644_s14  ;;  %7875 = vmatmul.msk.bf16.gmra.mxu0 %vm2017_vm5, %v9540_v8  ;;  %v9893_v49 = vpop.f32.mrf.mxu1  ;;  %v2894_v8 = vpack.c.b16 %v2885_v38, %v13384_v37  ;;  %v2855_v19 = vpop.permute.xlu0 %2854  ;;  %v8478_v37 = vld [vmem:[%s13190_s4 + $0xd0] sm:$0xff] }
 0x15a   : > { %5414 = vmatpush.bf16.msrb.mxu3 %v8480_v35  ;;  %v9915_v23 = vpop.permute.xlu2 %1451  ;;  %v2872_v46 = vsel %vm1505_vm3, %v8579_v31, %v2855_v19  ;;  %v13385_v35 = vrot.slane %v9381_v3, 1  ;;  %v13386_v19 = vunpack.c.l.b16 %v9620_v42  ;;  %v2601_v42 = vadd.f32 %v9840_v0, %v9854_v55 }
 0x15b   : > { %v9933_v14 = vsel %vm1632_vm4, %v2872_v46, %v2866_v32  ;;  %v8477_v46 = vld [vmem:[%s13190_s4 + $0xc8] sm:$0xff] }
 0x15c   : > { %7982 = vmatmul.msk.bf16.gmra.mxu2 %vm2017_vm5, %v9559_v22  ;;  %v2887_v31 = vunpack.c.l.b16 %v9933_v14  ;;  %v3159_v0 = vadd.f32 %v9831_v47, %v2601_v42 }
 0x15e   : > { %v9909_v5 = vpop.f32.mrf.mxu0  ;;  %1495 = vrot.lane.b32.xlu2 %v1391_v41, %s8643_s13  ;;  %5415 = vmatpush.bf16.msrb.mxu3 %v8479_v50  ;;  %v1362_v41 = vrot.slane %v9370_v39, 1  ;;  %v1978_v50 = vpack.c.b16 %v1825_v21, %v13386_v19  ;;  %v8476_v21 = vld [vmem:[%s13190_s4 + $0xc0] sm:$0xff] }
 0x15f   : > { %v9913_v29 = vpop.f32.mrf.mxu2 }
 0x160   : > { %v1364_v11 = vsel %vm1306_vm0, %v1362_v41, %v13385_v35  ;;  %v2604_v41 = vadd.f32 %v2603_v6, %v2181_v57  ;;  %v13387_v6 = vld [vmem:[#allocation5_spill] sm:$0xff] }
 0x161   : > { %8012 = vmatmul.msk.bf16.vlgmr.msra.gmra.mxu3 %vm2017_vm5, %v2894_v8  ;;  %v9921_v38 = vpop.f32.mrf.mxu1  ;;  %1463 = vrot.lane.b32.xlu0 %v1364_v11, %s8643_s13  ;;  %v3543_v11 = vadd.s32 32, %v9622_v20  ;;  %v2825_v57 = vpack.c.b16 %v13387_v6, %v13387_v6 }
 0x162   : > { %5416 = vmatpush.bf16.msrb.mxu3 %v8478_v37  ;;  %v9946_v3 = vpop.permute.xlu2 %1254  ;;  %v3521_v37 = vadd.s32 1, %v9625_v44  ;;  %v3160_v19 = vadd.f32 %v9862_v17, %v2604_v41  ;;  %v1826_v17 = vunpack.c.h.b16 %v9388_v51  ;;  %v1827_v41 = vunpack.c.l.b16 %v9467_v15 }
 0x164   : > { %7925 = vmatmul.msk.bf16.gmra.mxu1 %vm2017_vm5, %v9491_v56  ;;  %v2886_v56 = vunpack.c.h.b16 %v2877_v9  ;;  %vm3550_vm11 = vcmp.ge.s32.totalorder %v3521_v37, 0  ;;  %vm3568_vm12 = vcmp.lt.s32.totalorder %v3521_v37, 32  ;;  %v1979_v6 = vpack.c.b16 %v1827_v41, %v1826_v17 }
 0x165   : > { %vm9975_vm14 = vmand %vm3550_vm11, %vm3568_vm12 }
 0x166   : > { %v2186_v8 = vpop.f32.mrf.mxu0  ;;  %5417 = vmatpush.bf16.msrb.mxu3 %v8477_v46  ;;  %v2895_v9 = vpack.c.b16 %v2887_v31, %v2886_v56  ;;  %v2857_v56 = vpop.permute.xlu1 %2856  ;;  %vm3613_vm2 = vmand %vm9975_vm14, %vm3603_vm8 }
 0x167   : > { %v2951_v39 = vpop.f32.mrf.mxu2  ;;  %v2875_v47 = vsel %vm1505_vm3, %v2825_v57, %v2857_v56  ;;  %v2609_v58 = vadd.f32 %v9921_v38, %v2186_v8 }
 0x169   : > { %7876 = vmatmul.msk.bf16.gmra.mxu0 %vm2017_vm5, %v1978_v50  ;;  %v2610_v32 = vpop.f32.mrf.mxu1  ;;  %v9963_v50 = vadd.s32 4294967295, %v3543_v11  ;;  %v3162_v38 = vadd.f32 %v9913_v29, %v2609_v58  ;;  %v8580_v11 = vld [vmem:[%s8723_s12 + $0xd8] sm:$0xff] }
 0x16a   : > { %5418 = vmatpush.bf16.msrb.mxu3 %v8476_v21  ;;  %v3254_v21 = vadd.f32 %v9633_v63, %v3160_v19 }
 0x16b   : > { %vm3702_vm13 = vcmp.lt.s32.totalorder %v9963_v50, 32  ;;  %v3256_v29 = vadd.f32 %v9633_v63, %v3162_v38  ;;  %v8508_v50 = vld [vmem:[%s13190_s4 + $0x1c0] sm:$0xff] }
 0x16c   : > { %7983 = vmatmul.msk.bf16.gmra.mxu2 %vm2017_vm5, %v9609_v7  ;;  %vm3712_vm15 = vmand %vm9975_vm14, %vm3702_vm13  ;;  %v3344_v19 = vmax.f32 %v3254_v21, 0.0 }
 0x16e   : > { %v2188_v35 = vpop.f32.mrf.mxu0  ;;  %v3434_v25 = vpack.c.bf16 %v3344_v19, %v3344_v19 }
 0x16f   : > { %v2611_v20 = vadd.f32 %v2610_v32, %v2188_v35  ;;  %v9961_v55 = vpop.f32.mrf.mxu2  ;;  %v3253_v32 = vadd.f32 %v9633_v63, %v3159_v0 }
 0x171   : > { %8013 = vmatmul.msk.bf16.gmra.mxu3 %vm2017_vm5, %v2895_v9  ;;  %v3163_v31 = vadd.f32 %v2951_v39, %v2611_v20  ;;  %v9966_v46 = vpop.f32.mrf.mxu1  ;;  %v2868_v39 = vpop.permute.xlu2 %2867  ;;  %v3343_v57 = vmax.f32 %v3253_v32, 0.0  ;;  %v2606_v32 = vadd.f32 %v9893_v49, %v9909_v5  ;;  %v10011_v49 = vsel %vm9975_vm14, 1.0, %v13373_v40 }
 0x172   : > { %v2881_v9 = vsel %vm1632_vm4, %v2875_v47, %v2868_v39  ;;  %v1057_v47 = vshrl.u32 %v9416_v62, 16 }
 0x173   : > { %v3257_v42 = vadd.f32 %v9633_v63, %v3163_v31  ;;  %v2889_v56 = vunpack.c.l.b16 %v2881_v9  ;;  %v2888_v31 = vunpack.c.h.b16 %v9933_v14  ;;  %v3433_v21 = vpack.c.bf16 %v3343_v57, %v3343_v57 }
 0x174   : > { %7926 = vmatmul.msk.bf16.gmra.mxu1 %vm2017_vm5, %v9575_v34  ;;  %v8031_v34 = vsel %vm3712_vm15, 1.0, %v13373_v40  ;;  %v1059_v17 = vor.u32 %v1057_v47, %v9453_v48  ;;  %v4069_v48 = vunpack.c.l.bf16 %v3434_v25  ;;  %v3161_v9 = vadd.f32 %v9885_v30, %v2606_v32  ;;  %v13391_v47 = vld [vmem:[#allocation15_spill] sm:$0xff] }
 0x175   : > { %v3347_v37 = vmax.f32 %v3257_v42, 0.0  ;;  %v2896_v14 = vpack.c.b16 %v2889_v56, %v2888_v31  ;;  %v4068_v8 = vunpack.c.l.bf16 %v3433_v21  ;;  %v1828_v25 = vunpack.c.h.b16 %v9467_v15  ;;  %v8466_v56 = vld [vmem:[%s13190_s4 + $0x70] sm:$0xff] }
 0x176   : > { %v9986_v35 = vpop.f32.mrf.mxu0  ;;  %1268 = vrot.lane.b32.xlu0 %v1059_v17, %s8644_s14  ;;  %v4249_v58 = vmul.f32 %v10011_v49, %v4069_v48  ;;  %v8498_v31 = vld [vmem:[%s13190_s4 + $0x170] sm:$0xff]  ;;  %v3346_v32 = vmax.f32 %v3256_v29, 0.0  ;;  %6232 = vmatpush.bf16.msrb.mxu2 %v8466_v56  ;;  %v8581_v48 = vld [vmem:[%s8723_s12 + $0xc0] sm:$0xff]  ;;  %v13240_v56 = vunpack.c.l.b16 %v9848_v28 }
 0x177   : > { %v3437_v0 = vpack.c.bf16 %v3347_v37, %v3347_v37  ;;  %v9988_v20 = vpop.f32.mrf.mxu2  ;;  %v8027_v37 = vsel %vm3613_vm2, 1.0, %v13373_v40  ;;  %5750 = vmatpush.bf16.msrb.mxu0 %v8498_v31  ;;  %v1563_v38 = vsel %vm1505_vm3, %v8581_v48, %v9745_v45 }
 0x178   : > { %v4248_v30 = vmul.f32 %v8027_v37, %v4068_v8  ;;  %v4339_v21 = vpack.c.bf16 %v4249_v58, %v4249_v58  ;;  %v3436_v58 = vpack.c.bf16 %v3346_v32, %v3346_v32  ;;  %v10059_v31 = vsel %vm1632_vm4, %v1563_v38, %v9815_v10 }
 0x179   : > { %7877 = vmatmul.msk.bf16.gmra.mxu0 %vm2017_vm5, %v1979_v6  ;;  %v4072_v42 = vunpack.c.l.bf16 %v3437_v0  ;;  %v2615_v39 = vpop.f32.mrf.mxu1  ;;  %v1570_v6 = vsel %vm1505_vm3, %v8580_v11, %v9881_v36  ;;  %v3255_v0 = vadd.f32 %v9633_v63, %v3161_v9  ;;  %v8458_v36 = vld [vmem:[%s13190_s4 + $0x30] sm:$0xff]  ;;  %v13393_v11 = vld [vmem:[#allocation10_spill] sm:$0xff] }
 0x17a   : > { %6063 = vmatpush.bf16.msrb.mxu1 %v8458_v36  ;;  %v4338_v8 = vpack.c.bf16 %v4248_v30, %v4248_v30  ;;  %v2614_v36 = vadd.f32 %v9966_v46, %v9986_v35  ;;  %v4071_v46 = vunpack.c.l.bf16 %v3436_v58 }
 0x17b   : > { %v9996_v41 = vmul.f32 %v8031_v34, %v4072_v42  ;;  %v13392_v42 = vunpack.c.l.b16 %v13391_v47  ;;  %v3345_v9 = vmax.f32 %v3255_v0, 0.0  ;;  %v13394_v47 = vld [vmem:[#allocation12_spill] sm:$0xff] }
 0x17c   : > { %7984 = vmatmul.msk.bf16.gmra.mxu2 %vm2017_vm5, %v9736_v2  ;;  %v4491_v30 = vunpack.c.l.b16 %v4338_v8 }
 0x17d   : > { %13390 = vst [vmem:[#allocation3_spill] sm:$0xff] %v9996_v41  ;;  %v1980_v17 = vpack.c.b16 %v13392_v42, %v1828_v25  ;;  %v3435_v0 = vpack.c.bf16 %v3345_v9, %v3345_v9  ;;  %v3164_v9 = vadd.f32 %v9961_v55, %v2614_v36 }
 0x17e   : > { %v2193_v62 = vpop.f32.mrf.mxu0 }
 0x17f   : > { %v10013_v5 = vpop.f32.mrf.mxu2  ;;  %v2616_v29 = vadd.f32 %v2615_v39, %v2193_v62  ;;  %v13395_v39 = vrot.slane %v13394_v47, 1  ;;  %v4070_v38 = vunpack.c.l.bf16 %v3435_v0  ;;  %v3258_v55 = vadd.f32 %v9633_v63, %v3164_v9 }
 0x181   : > { %8014 = vmatmul.msk.bf16.gmra.mxu3 %vm2017_vm5, %v2896_v14  ;;  %v10018_v19 = vpop.f32.mrf.mxu1  ;;  %v3165_v35 = vadd.f32 %v9988_v20, %v2616_v29  ;;  %v3522_v20 = vadd.s32 2, %v9625_v44 }
 0x183   : > { %vm3551_vm6 = vcmp.ge.s32.totalorder %v3522_v20, 0  ;;  %vm3569_vm7 = vcmp.lt.s32.totalorder %v3522_v20, 32 }
 0x184   : > { %v10026_v57 = vpop.f32.mrf.mxu3  ;;  %7927 = vmatmul.msk.bf16.gmra.mxu1 %vm2017_vm5, %v9680_v24  ;;  %v10046_v24 = vsel %vm1632_vm4, %v1570_v6, %v9915_v23  ;;  %v4492_v23 = vunpack.c.l.b16 %v4339_v21  ;;  %v1367_v6 = vrot.slane %v13393_v11, 1  ;;  %vm3587_vm10 = vmand %vm3551_vm6, %vm3569_vm7 }
 0x185   : > { %v1840_v37 = vunpack.c.l.b16 %v10046_v24  ;;  %v1841_v8 = vunpack.c.h.b16 %v10046_v24  ;;  %vm3717_vm11 = vmand %vm3587_vm10, %vm3702_vm13 }
 0x186   : > { %v10040_v34 = vpop.f32.mrf.mxu0  ;;  %v1369_v62 = vsel %vm1306_vm0, %v1367_v6, %v13395_v39  ;;  %v10078_v32 = vpack.c.b16 %v4492_v23, %v4491_v30  ;;  %v3259_v23 = vadd.f32 %v9633_v63, %v3165_v35  ;;  %v4250_v30 = vmul.f32 %v10011_v49, %v4070_v38  ;;  %vm3618_vm12 = vmand %vm3587_vm10, %vm3603_vm8 }
 0x187   : > { %v10048_v14 = vpop.f32.mrf.mxu2  ;;  %1469 = vrot.lane.b32.xlu0 %v1369_v62, %s8643_s13  ;;  %v10073_v10 = vpack.c.b16 %v1840_v37, %v13240_v56 }
 0x188   : > { %13396 = vst [vmem:[#allocation2_spill] sm:$0xff] %v10078_v32  ;;  %v3349_v39 = vmax.f32 %v3259_v23, 0.0 }
 0x189   : > { %7878 = vmatmul.msk.bf16.gmra.mxu0 %vm2017_vm5, %v1980_v17  ;;  %v2620_v25 = vpop.f32.mrf.mxu1  ;;  %v8582_v17 = vld [vmem:[%s8723_s12 + $0xe0] sm:$0xff] }
 0x18a   : > { %v1572_v21 = vsel %vm1505_vm3, %v8582_v17, %v9946_v3  ;;  %v4251_v3 = vmul.f32 %v10011_v49, %v4071_v46  ;;  %v3348_v46 = vmax.f32 %v3258_v55, 0.0  ;;  %v3439_v9 = vpack.c.bf16 %v3349_v39, %v3349_v39 }
 0x18c   : > { %v10061_v45 = vpop.f32.mrf.mxu3  ;;  %7985 = vmatmul.msk.bf16.gmra.mxu2 %vm2017_vm5, %v10059_v31  ;;  %v4341_v47 = vpack.c.bf16 %v4251_v3, %v4251_v3  ;;  %v3438_v23 = vpack.c.bf16 %v3348_v46, %v3348_v46 }
 0x18e   : > { %v2198_v42 = vpop.f32.mrf.mxu0  ;;  %v4494_v38 = vunpack.c.l.b16 %v4341_v47  ;;  %v4073_v47 = vunpack.c.l.bf16 %v3438_v23 }
 0x18f   : > { %v2964_v48 = vpop.f32.mrf.mxu2  ;;  %v1454_v11 = vpop.permute.xlu0 %1453 }
 0x190   : > { %v10085_v6 = vsel %vm1632_vm4, %v1572_v21, %v1454_v11  ;;  %v4340_v21 = vpack.c.bf16 %v4250_v30, %v4250_v30  ;;  %v13397_v11 = vld [vmem:[#allocation18_spill] sm:$0xff] }
 0x191   : > { %5419 = vmatmul.bf16.vlgmr.msrb.gmra.mxu3 %v10078_v32  ;;  %v2623_v37 = vpop.f32.mrf.mxu1  ;;  %v1842_v58 = vunpack.c.l.b16 %v10085_v6 }
 0x193   : > { %v10097_v0 = vpack.c.b16 %v1842_v58, %v1841_v8  ;;  %v2619_v58 = vadd.f32 %v10018_v19, %v10040_v34  ;;  %v8036_v19 = vsel %vm3717_vm11, 1.0, %v13373_v40 }
 0x194   : > { %v10091_v29 = vpop.f32.mrf.mxu3  ;;  %7928 = vmatmul.msk.bf16.gmra.mxu1 %vm2017_vm5, %v9388_v51  ;;  %v2621_v51 = vadd.f32 %v2620_v25, %v2198_v42  ;;  %v4074_v25 = vunpack.c.l.bf16 %v3439_v9 }
 0x195   : > { %v3166_v39 = vadd.f32 %v10013_v5, %v2619_v58 }
 0x196   : > { %v2201_v36 = vpop.f32.mrf.mxu0  ;;  %v3167_v42 = vadd.f32 %v10048_v14, %v2621_v51 }
 0x197   : > { %v2624_v62 = vadd.f32 %v2623_v37, %v2201_v36  ;;  %v10099_v17 = vpop.f32.mrf.mxu2  ;;  %v4493_v37 = vunpack.c.l.b16 %v4340_v21  ;;  %v8033_v36 = vsel %vm3587_vm10, 1.0, %v13373_v40  ;;  %v8032_v21 = vsel %vm3618_vm12, 1.0, %v13373_v40 }
 0x198   : > { %v4253_v9 = vmul.f32 %v8032_v21, %v4073_v47  ;;  %v3260_v51 = vadd.f32 %v9633_v63, %v3166_v39  ;;  %v13400_v47 = vld [vmem:[#allocation14_spill] sm:$0xff] }
 0x199   : > { %v3168_v35 = vadd.f32 %v2964_v48, %v2624_v62  ;;  %7879 = vmatmul.msk.bf16.gmra.mxu0 %vm2017_vm5, %v13397_v11  ;;  %v2625_v49 = vpop.f32.mrf.mxu1  ;;  %v10112_v20 = vpack.c.b16 %v4494_v38, %v4493_v37  ;;  %v3261_v11 = vadd.f32 %v9633_v63, %v3167_v42  ;;  %v1080_v21 = vshrl.u32 %v13400_v47, 16 }
 0x19a   : > { %v4343_v58 = vpack.c.bf16 %v4253_v9, %v4253_v9 }
 0x19b   : > { %v3262_v8 = vadd.f32 %v9633_v63, %v3168_v35  ;;  %v4254_v35 = vmul.f32 %v8033_v36, %v4074_v25  ;;  %v3351_v37 = vmax.f32 %v3261_v11, 0.0  ;;  %v13399_v25 = vld [vmem:[#allocation21_spill] sm:$0xff] }
 0x19c   : > { %v10104_v3 = vpop.f32.mrf.mxu3  ;;  %7986 = vmatmul.msk.bf16.gmra.mxu2 %vm2017_vm5, %v9804_v13  ;;  %v4495_v56 = vunpack.c.l.b16 %v4343_v58 }
 0x19d   : > { %v3352_v30 = vmax.f32 %v3262_v8, 0.0  ;;  %v4344_v8 = vpack.c.bf16 %v4254_v35, %v4254_v35  ;;  %v13401_v35 = vld [vmem:[#allocation16_spill] sm:$0xff] }
 0x19e   : > { %v2203_v48 = vpop.f32.mrf.mxu0  ;;  %v1082_v11 = vor.u32 %v1080_v21, %v13401_v35  ;;  %v10148_v21 = vld [vmem:[%s8723_s12 + $0x138] sm:$0xff] }
 0x19f   : > { %v3442_v55 = vpack.c.bf16 %v3352_v30, %v3352_v30  ;;  %v2969_v34 = vpop.f32.mrf.mxu2  ;;  %v3350_v30 = vmax.f32 %v3260_v51, 0.0 }
 0x1a0   : > { %1274 = vrot.lane.b32.xlu0 %v1082_v11, %s8644_s14 }
 0x1a1   : > { %v4077_v62 = vunpack.c.l.bf16 %v3442_v55  ;;  %5424 = vmatmul.bf16.gmra.mxu3 %v10112_v20  ;;  %v2628_v46 = vpop.f32.mrf.mxu1  ;;  %v4496_v55 = vunpack.c.l.b16 %v4344_v8 }
 0x1a3   : > { %v10123_v38 = vmul.f32 %v8036_v19, %v4077_v62  ;;  %v3441_v19 = vpack.c.bf16 %v3351_v37, %v3351_v37  ;;  %v10140_v51 = vpack.c.b16 %v4496_v55, %v4495_v56  ;;  %v1372_v56 = vrot.slane %v10148_v21, 1 }
 0x1a4   : > { %v10125_v14 = vpop.f32.mrf.mxu3  ;;  %7929 = vmatmul.msk.bf16.gmra.mxu1 %vm2017_vm5, %v9467_v15  ;;  %v3440_v15 = vpack.c.bf16 %v3350_v30, %v3350_v30 }
 0x1a5   : > { %13398 = vst [vmem:[#allocation5_spill] sm:$0xff] %v10123_v38  ;;  %v2626_v38 = vadd.f32 %v2625_v49, %v2203_v48  ;;  %v1835_v48 = vunpack.c.l.b16 %v10059_v31 }
 0x1a6   : > { %v2206_v5 = vpop.f32.mrf.mxu0  ;;  %13402 = vst [vmem:[#allocation15_spill] sm:$0xff] %v10140_v51 }
 0x1a7   : > { %v10130_v23 = vpop.f32.mrf.mxu2  ;;  %v2629_v62 = vadd.f32 %v2628_v46, %v2206_v5  ;;  %v4075_v5 = vunpack.c.l.bf16 %v3440_v15  ;;  %v3169_v37 = vadd.f32 %v10099_v17, %v2626_v38 }
 0x1a9   : > { %7880 = vmatmul.msk.bf16.gmra.mxu0 %vm2017_vm5, %v13399_v25  ;;  %v2630_v42 = vpop.f32.mrf.mxu1  ;;  %v4076_v25 = vunpack.c.l.bf16 %v3441_v19  ;;  %v3170_v8 = vadd.f32 %v2969_v34, %v2629_v62  ;;  %v4255_v34 = vmul.f32 %v8033_v36, %v4075_v5  ;;  %v3263_v55 = vadd.f32 %v9633_v63, %v3169_v37  ;;  %v13403_v62 = vld [vmem:[#allocation17_spill] sm:$0xff] }
 0x1aa   : > { %v3523_v19 = vadd.s32 3, %v9625_v44  ;;  %v13404_v15 = vrot.slane %v13403_v62, 1 }
 0x1ab   : > { %v4256_v58 = vmul.f32 %v8033_v36, %v4076_v25  ;;  %v3264_v30 = vadd.f32 %v9633_v63, %v3170_v8  ;;  %v13405_v8 = vld [vmem:[#allocation26_spill] sm:$0xff]  ;;  %v4345_v5 = vpack.c.bf16 %v4255_v34, %v4255_v34  ;;  %v3353_v37 = vmax.f32 %v3263_v55, 0.0 }
 0x1ac   : > { %v10135_v39 = vpop.f32.mrf.mxu3  ;;  %7987 = vmatmul.msk.bf16.gmra.mxu2 %vm2017_vm5, %v10073_v10  ;;  %v1374_v35 = vsel %vm1306_vm0, %v1372_v56, %v13404_v15  ;;  %vm3552_vm14 = vcmp.ge.s32.totalorder %v3523_v19, 0  ;;  %vm3570_vm15 = vcmp.lt.s32.totalorder %v3523_v19, 32  ;;  %v1257_v19 = vpop.permute.xlu0 %1256 }
 0x1ad   : > { %v4346_v11 = vpack.c.bf16 %v4256_v58, %v4256_v58  ;;  %v3354_v25 = vmax.f32 %v3264_v30, 0.0  ;;  %1475 = vrot.lane.b32.xlu0 %v1374_v35, %s8643_s13  ;;  %vm10165_vm2 = vmand %vm3552_vm14, %vm3570_vm15  ;;  %v13409_v30 = vld [vmem:[#allocation6_spill] sm:$0xff]  ;;  %v3443_v15 = vpack.c.bf16 %v3353_v37, %v3353_v37  ;;  %v1837_v37 = vunpack.c.l.b16 %v9804_v13 }
 0x1ae   : > { %v2208_v9 = vpop.f32.mrf.mxu0  ;;  %vm3623_vm6 = vmand %vm10165_vm2, %vm3603_vm8 }
 0x1af   : > { %v2974_v46 = vpop.f32.mrf.mxu2  ;;  %v2631_v34 = vadd.f32 %v2630_v42, %v2208_v9  ;;  %vm3722_vm7 = vmand %vm10165_vm2, %vm3702_vm13 }
 0x1b1   : > { %5429 = vmatmul.bf16.gmra.mxu3 %v10140_v51  ;;  %v2633_v49 = vpop.f32.mrf.mxu1  ;;  %v13406_v51 = vunpack.c.l.b16 %v13405_v8  ;;  %v4078_v8 = vunpack.c.l.bf16 %v3443_v15 }
 0x1b3   : > { %v1983_v36 = vpack.c.b16 %v1835_v48, %v13406_v51  ;;  %v704_v51 = vpack.c.b16 %v13409_v30, %v13409_v30  ;;  %v4497_v48 = vunpack.c.l.b16 %v4345_v5 }
 0x1b4   : > { %v2798_v47 = vpop.f32.mrf.mxu3  ;;  %7930 = vmatmul.msk.bf16.gmra.mxu1 %vm2017_vm5, %v9559_v22 }
 0x1b5   : > { %v10154_v17 = vadd.f32 %v2798_v47, %v10026_v57  ;;  %v4498_v57 = vunpack.c.l.b16 %v4346_v11  ;;  %v3444_v47 = vpack.c.bf16 %v3354_v25, %v3354_v25  ;;  %v1575_v42 = vsel %vm1505_vm3, %v704_v51, %v1257_v19 }
 0x1b6   : > { %v2211_v38 = vpop.f32.mrf.mxu0 }
 0x1b7   : > { %v2976_v63 = vpop.f32.mrf.mxu2  ;;  %v2634_v62 = vadd.f32 %v2633_v49, %v2211_v38  ;;  %v10176_v49 = vpack.c.b16 %v4498_v57, %v4497_v48  ;;  %v4079_v38 = vunpack.c.l.bf16 %v3444_v47  ;;  %v1836_v57 = vunpack.c.h.b16 %v10059_v31 }
 0x1b9   : > { %7881 = vmatmul.msk.bf16.gmra.mxu0 %vm2017_vm5, %v1983_v36  ;;  %v2635_v22 = vpop.f32.mrf.mxu1  ;;  %13410 = vst [vmem:[#allocation10_spill] sm:$0xff] %v10176_v49  ;;  %v3172_v11 = vadd.f32 %v2974_v46, %v2634_v62  ;;  %v3171_v36 = vadd.f32 %v10130_v23, %v2631_v34  ;;  %v1456_v46 = vpop.permute.xlu1 %1455 }
 0x1bc   : > { %v2800_v58 = vpop.f32.mrf.mxu3  ;;  %7988 = vmatmul.msk.bf16.gmra.mxu2 %vm2017_vm5, %v10097_v0 }
 0x1bd   : > { %v10172_v55 = vadd.f32 %v2800_v58, %v10061_v45  ;;  %v10185_v45 = vsel %vm10165_vm2, 1.0, %v13373_v40  ;;  %v10197_v58 = vld [vmem:[%s13189_s3] ss:$0 sm:$0xff] }
 0x1be   : > { %v2213_v35 = vpop.f32.mrf.mxu0  ;;  %v4259_v62 = vmul.f32 %v10185_v45, %v4079_v38  ;;  %v3266_v23 = vadd.f32 %v10197_v58, %v3172_v11  ;;  %v3265_v15 = vadd.f32 %v10197_v58, %v3171_v36  ;;  %v1984_v36 = vpack.c.b16 %v1837_v37, %v1836_v57  ;;  %v13412_v37 = vld [vmem:[#allocation22_spill] sm:$0xff] }
 0x1bf   : > { %v2636_v25 = vadd.f32 %v2635_v22, %v2213_v35  ;;  %v2979_v9 = vpop.f32.mrf.mxu2  ;;  %v8037_v22 = vsel %vm3623_vm6, 1.0, %v13373_v40  ;;  %v1843_v35 = vunpack.c.h.b16 %v10085_v6 }
 0x1c0   : > { %v4258_v48 = vmul.f32 %v8037_v22, %v4078_v8  ;;  %v3355_v22 = vmax.f32 %v3265_v15, 0.0 }
 0x1c1   : > { %v3173_v5 = vadd.f32 %v2976_v63, %v2636_v25  ;;  %5434 = vmatmul.bf16.gmra.mxu3 %v10176_v49  ;;  %v2638_v47 = vpop.f32.mrf.mxu1  ;;  %v10201_v63 = vsel %vm1632_vm4, %v1575_v42, %v1456_v46  ;;  %v4349_v25 = vpack.c.bf16 %v4259_v62, %v4259_v62  ;;  %v3356_v42 = vmax.f32 %v3266_v23, 0.0 }
 0x1c2   : > { %v13247_v38 = vunpack.c.l.b16 %v10201_v63  ;;  %v4348_v56 = vpack.c.bf16 %v4258_v48, %v4258_v48  ;;  %v3445_v48 = vpack.c.bf16 %v3355_v22, %v3355_v22 }
 0x1c3   : > { %v3267_v30 = vadd.f32 %v10197_v58, %v3173_v5  ;;  %v8041_v5 = vsel %vm3722_vm7, 1.0, %v13373_v40  ;;  %v4500_v41 = vunpack.c.l.b16 %v4349_v25  ;;  %v3446_v62 = vpack.c.bf16 %v3356_v42, %v3356_v42 }
 0x1c4   : > { %v2803_v51 = vpop.f32.mrf.mxu3  ;;  %7931 = vmatmul.msk.bf16.gmra.mxu1 %vm2017_vm5, %v9609_v7  ;;  %v10221_v7 = vpack.c.b16 %v13247_v38, %v1843_v35  ;;  %v4499_v32 = vunpack.c.l.b16 %v4348_v56 }
 0x1c5   : > { %v3357_v34 = vmax.f32 %v3267_v30, 0.0  ;;  %v10210_v19 = vadd.f32 %v2803_v51, %v10091_v29  ;;  %v13411_v29 = vld [vmem:[#allocation20_spill] sm:$0xff]  ;;  %v4081_v25 = vunpack.c.l.bf16 %v3446_v62  ;;  %v8465_v62 = vld [vmem:[%s13190_s4 + $0x68] sm:$0xff] }
 0x1c6   : > { %v2216_v11 = vpop.f32.mrf.mxu0  ;;  %v1103_v51 = vshrl.u32 %v13411_v29, 16  ;;  %6233 = vmatpush.bf16.msrb.mxu2 %v8465_v62 }
 0x1c7   : > { %v3447_v8 = vpack.c.bf16 %v3357_v34, %v3357_v34  ;;  %v2981_v46 = vpop.f32.mrf.mxu2  ;;  %v2639_v15 = vadd.f32 %v2638_v47, %v2216_v11  ;;  %v1838_v11 = vunpack.c.h.b16 %v9804_v13  ;;  %v4261_v56 = vmul.f32 %v10185_v45, %v4081_v25 }
 0x1c8   : > { %v1105_v57 = vor.u32 %v1103_v51, %v13412_v37 }
 0x1c9   : > { %v4082_v30 = vunpack.c.l.bf16 %v3447_v8  ;;  %7882 = vmatmul.msk.bf16.gmra.mxu0 %vm2017_vm5, %v1984_v36  ;;  %v2640_v49 = vpop.f32.mrf.mxu1  ;;  %v10232_v36 = vpack.c.b16 %v4500_v41, %v4499_v32  ;;  %v3174_v29 = vadd.f32 %v2979_v9, %v2639_v15 }
 0x1ca   : > { %1280 = vrot.lane.b32.xlu0 %v1105_v57, %s8644_s14  ;;  %v13414_v57 = vunpack.c.l.b16 %v9848_v28 }
 0x1cb   : > { %v10223_v23 = vmul.f32 %v8041_v5, %v4082_v30  ;;  %13413 = vst [vmem:[#allocation12_spill] sm:$0xff] %v10232_v36  ;;  %v4080_v30 = vunpack.c.l.bf16 %v3445_v48  ;;  %v3268_v9 = vadd.f32 %v10197_v58, %v3174_v29  ;;  %v1259_v48 = vpop.permute.xlu2 %1258 }
 0x1cc   : > { %v2805_v34 = vpop.f32.mrf.mxu3  ;;  %7989 = vmatmul.msk.bf16.gmra.mxu2 %vm2017_vm5, %v10221_v7 }
 0x1cd   : > { %v10227_v8 = vadd.f32 %v2805_v34, %v10104_v3  ;;  %v8491_v3 = vld [vmem:[%s13190_s4 + $0x138] sm:$0xff]  ;;  %v1985_v34 = vpack.c.b16 %v13414_v57, %v1838_v11 }
 0x1ce   : > { %v2218_v35 = vpop.f32.mrf.mxu0  ;;  %5580 = vmatpush.bf16.msra.mxu3 %v8491_v3 }
 0x1cf   : > { %v2641_v42 = vadd.f32 %v2640_v49, %v2218_v35  ;;  %v2984_v5 = vpop.f32.mrf.mxu2  ;;  %v4260_v49 = vmul.f32 %v10185_v45, %v4080_v30  ;;  %v4351_v45 = vpack.c.bf16 %v4261_v56, %v4261_v56  ;;  %v8585_v35 = vld [vmem:[%s8723_s12 + $0xf0] sm:$0xff]  ;;  %v3358_v30 = vmax.f32 %v3268_v9, 0.0 }
 0x1d1   : > { %v3175_v51 = vadd.f32 %v2981_v46, %v2641_v42  ;;  %5439 = vmatmul.bf16.gmra.mxu3 %v10232_v36  ;;  %v2643_v47 = vpop.f32.mrf.mxu1  ;;  %v3524_v46 = vadd.s32 4, %v9625_v44  ;;  %v4350_v42 = vpack.c.bf16 %v4260_v49, %v4260_v49  ;;  %v3448_v62 = vpack.c.bf16 %v3358_v30, %v3358_v30 }
 0x1d3   : > { %v3269_v41 = vadd.f32 %v10197_v58, %v3175_v51  ;;  %vm3553_vm10 = vcmp.ge.s32.totalorder %v3524_v46, 0  ;;  %vm3571_vm11 = vcmp.lt.s32.totalorder %v3524_v46, 32  ;;  %v4502_v51 = vunpack.c.l.b16 %v4351_v45 }
 0x1d4   : > { %v2808_v32 = vpop.f32.mrf.mxu3  ;;  %7932 = vmatmul.msk.bf16.gmra.mxu1 %vm2017_vm5, %v9736_v2  ;;  %v1458_v2 = vpop.permute.xlu0 %1457  ;;  %vm10257_vm12 = vmand %vm3553_vm10, %vm3571_vm11  ;;  %v4501_v9 = vunpack.c.l.b16 %v4350_v42  ;;  %v4083_v42 = vunpack.c.l.bf16 %v3448_v62 }
 0x1d5   : > { %v10245_v22 = vadd.f32 %v2808_v32, %v10125_v14  ;;  %v3359_v15 = vmax.f32 %v3269_v41, 0.0  ;;  %v1577_v14 = vsel %vm1505_vm3, %v8585_v35, %v1259_v48  ;;  %v8586_v32 = vld [vmem:[%s8723_s12 + $0x150] sm:$0xff]  ;;  %vm3628_vm14 = vmand %vm10257_vm12, %vm3603_vm8  ;;  %v8497_v35 = vld [vmem:[%s13190_s4 + $0x168] sm:$0xff] }
 0x1d6   : > { %v2221_v37 = vpop.f32.mrf.mxu0  ;;  %v10262_v11 = vsel %vm1632_vm4, %v1577_v14, %v1458_v2  ;;  %v1377_v49 = vrot.slane %v8586_v32, 1  ;;  %v10273_v45 = vpack.c.b16 %v4502_v51, %v4501_v9  ;;  %v8457_v14 = vld [vmem:[%s13190_s4 + $0x28] sm:$0xff]  ;;  %v8042_v2 = vsel %vm3628_vm14, 1.0, %v13373_v40  ;;  %5751 = vmatpush.bf16.msrb.mxu0 %v8497_v35  ;;  %vm10314_vm15 = vmand %vm10257_vm12, %vm3702_vm13 }
 0x1d7   : > { %v2986_v25 = vpop.f32.mrf.mxu2  ;;  %v3449_v28 = vpack.c.bf16 %v3359_v15, %v3359_v15  ;;  %v2644_v56 = vadd.f32 %v2643_v47, %v2221_v37  ;;  %6064 = vmatpush.bf16.msrb.mxu1 %v8457_v14  ;;  %v4263_v32 = vmul.f32 %v8042_v2, %v4083_v42  ;;  %v1460_v14 = vpop.permute.xlu2 %1459 }
 0x1d8   : > { %13418 = vst [vmem:[#allocation18_spill] sm:$0xff] %v10273_v45 }
 0x1d9   : > { %7883 = vmatmul.msk.bf16.gmra.mxu0 %vm2017_vm5, %v1985_v34  ;;  %v2645_v29 = vpop.f32.mrf.mxu1  ;;  %v13417_v34 = vrot.slane %v9636_v43, 1  ;;  %v4084_v47 = vunpack.c.l.bf16 %v3449_v28  ;;  %v3176_v15 = vadd.f32 %v2984_v5, %v2644_v56  ;;  %v1261_v28 = vpop.permute.xlu1 %1260 }
 0x1db   : > { %v1379_v48 = vsel %vm1306_vm0, %v1377_v49, %v13417_v34  ;;  %v3270_v56 = vadd.f32 %v10197_v58, %v3176_v15  ;;  %v4353_v15 = vpack.c.bf16 %v4263_v32, %v4263_v32  ;;  %v13422_v32 = vld [vmem:[#allocation7_spill] sm:$0xff] }
 0x1dc   : > { %v2810_v41 = vpop.f32.mrf.mxu3  ;;  %7990 = vmatmul.msk.bf16.gmra.mxu2 %vm2017_vm5, %v10262_v11  ;;  %1481 = vrot.lane.b32.xlu0 %v1379_v48, %s8643_s13 }
 0x1dd   : > { %v10266_v46 = vadd.f32 %v2810_v41, %v10135_v39  ;;  %v10283_v39 = vsel %vm10257_vm12, 1.0, %v13373_v40  ;;  %v3360_v48 = vmax.f32 %v3270_v56, 0.0 }
 0x1de   : > { %v2223_v57 = vpop.f32.mrf.mxu0  ;;  %v4264_v5 = vmul.f32 %v10283_v39, %v4084_v47 }
 0x1df   : > { %v2646_v37 = vadd.f32 %v2645_v29, %v2223_v57  ;;  %v2989_v43 = vpop.f32.mrf.mxu2 }
 0x1e0   : > { %v4354_v57 = vpack.c.bf16 %v4264_v5, %v4264_v5 }
 0x1e1   : > { %v3177_v30 = vadd.f32 %v2986_v25, %v2646_v37  ;;  %5444 = vmatmul.bf16.gmra.mxu3 %v10273_v45  ;;  %v2648_v29 = vpop.f32.mrf.mxu1  ;;  %v1263_v25 = vpop.permute.xlu0 %1262  ;;  %v8587_v37 = vld [vmem:[%s8723_s12 + $0xf8] sm:$0xff] }
 0x1e2   : > { %v1579_v35 = vsel %vm1505_vm3, %v8587_v37, %v1261_v28  ;;  %v4504_v2 = vunpack.c.l.b16 %v4354_v57  ;;  %v4503_v28 = vunpack.c.l.b16 %v4353_v15 }
 0x1e3   : > { %v3271_v51 = vadd.f32 %v10197_v58, %v3177_v30 }
 0x1e4   : > { %v3139_v41 = vpop.f32.mrf.mxu3  ;;  %7933 = vmatmul.msk.bf16.gmra.mxu1 %vm2017_vm5, %v10059_v31  ;;  %v3537_v31 = vadd.s32 17, %v9625_v44  ;;  %v10325_v37 = vpack.c.b16 %v4504_v2, %v4503_v28 }
 0x1e5   : > { %v10297_v49 = vadd.f32 %v3139_v41, %v10154_v17  ;;  %v3361_v9 = vmax.f32 %v3271_v51, 0.0  ;;  %v3450_v51 = vpack.c.bf16 %v3360_v48, %v3360_v48  ;;  %v8588_v48 = vld [vmem:[%s8723_s12 + $0x108] sm:$0xff] }
 0x1e6   : > { %v2226_v62 = vpop.f32.mrf.mxu0  ;;  %vm3566_vm2 = vcmp.ge.s32.totalorder %v3537_v31, 0  ;;  %vm3584_vm6 = vcmp.lt.s32.totalorder %v3537_v31, 32  ;;  %13423 = vst [vmem:[#allocation14_spill] sm:$0xff] %v10325_v37 }
 0x1e7   : > { %13419 = vst [vmem:[#allocation21_spill] sm:$0xff] %v10297_v49  ;;  %v2649_v34 = vadd.f32 %v2648_v29, %v2226_v62  ;;  %v2991_v47 = vpop.f32.mrf.mxu2  ;;  %v3451_v17 = vpack.c.bf16 %v3361_v9, %v3361_v9  ;;  %v10308_v29 = vsel %vm1632_vm4, %v1579_v35, %v1460_v14  ;;  %v707_v9 = vpack.c.b16 %v13422_v32, %v13422_v32  ;;  %v1265_v62 = vpop.permute.xlu1 %1264  ;;  %vm10332_vm7 = vmand %vm3566_vm2, %vm3584_vm6 }
 0x1e8   : > { %v1584_v3 = vsel %vm1505_vm3, %v8588_v48, %v1265_v62  ;;  %v4085_v15 = vunpack.c.l.bf16 %v3450_v51  ;;  %vm3693_vm10 = vmand %vm10332_vm7, %vm3603_vm8 }
 0x1e9   : > { %v3178_v30 = vadd.f32 %v2989_v43, %v2649_v34  ;;  %7884 = vmatmul.msk.bf16.gmra.mxu0 %vm2017_vm5, %v10046_v24  ;;  %v2650_v42 = vpop.f32.mrf.mxu1  ;;  %v4086_v57 = vunpack.c.l.bf16 %v3451_v17  ;;  %v1582_v2 = vsel %vm1505_vm3, %v707_v9, %v1263_v25  ;;  %v3525_v9 = vadd.s32 5, %v9625_v44  ;;  %vm10456_vm2 = vmand %vm10332_vm7, %vm3702_vm13 }
 0x1ea   : > { %v4265_v31 = vmul.f32 %v10283_v39, %v4085_v15 }
 0x1eb   : > { %v3272_v5 = vadd.f32 %v10197_v58, %v3178_v30  ;;  %v8046_v30 = vsel %vm10314_vm15, 1.0, %v13373_v40  ;;  %v4266_v28 = vmul.f32 %v10283_v39, %v4086_v57  ;;  %vm3554_vm11 = vcmp.ge.s32.totalorder %v3525_v9, 0 }
 0x1ec   : > { %v3141_v56 = vpop.f32.mrf.mxu3  ;;  %7991 = vmatmul.msk.bf16.gmra.mxu2 %vm2017_vm5, %v10308_v29  ;;  %vm3572_vm12 = vcmp.lt.s32.totalorder %v3525_v9, 32  ;;  %v8111_v9 = vsel %vm10456_vm2, 1.0, %v13373_v40 }
 0x1ed   : > { %v3362_v41 = vmax.f32 %v3272_v5, 0.0  ;;  %v3239_v43 = vadd.f32 %v3141_v56, %v10172_v55  ;;  %v1464_v55 = vpop.permute.xlu0 %1463  ;;  %v4356_v48 = vpack.c.bf16 %v4266_v28, %v4266_v28  ;;  %vm10368_vm14 = vmand %vm3554_vm11, %vm3572_vm12 }
 0x1ee   : > { %v2228_v34 = vpop.f32.mrf.mxu0  ;;  %v10340_v24 = vsel %vm1632_vm4, %v1584_v3, %v1464_v55  ;;  %vm10390_vm15 = vmand %vm10368_vm14, %vm3603_vm8 }
 0x1ef   : > { %v3452_v35 = vpack.c.bf16 %v3362_v41, %v3362_v41  ;;  %v3333_v14 = vadd.f32 %v10197_v58, %v3239_v43  ;;  %v2651_v5 = vadd.f32 %v2650_v42, %v2228_v34  ;;  %v2994_v56 = vpop.f32.mrf.mxu2  ;;  %v1462_v42 = vpop.permute.xlu2 %1461  ;;  %v1850_v39 = vunpack.c.l.b16 %v10340_v24  ;;  %vm10468_vm6 = vmand %vm10368_vm14, %vm3702_vm13 }
 0x1f0   : > { %v4506_v28 = vunpack.c.l.b16 %v4356_v48 }
 0x1f1   : > { %v4087_v17 = vunpack.c.l.bf16 %v3452_v35  ;;  %v3423_v32 = vmax.f32 %v3333_v14, 0.0  ;;  %5449 = vmatmul.bf16.gmra.mxu3 %v10325_v37  ;;  %v3179_v51 = vadd.f32 %v2991_v47, %v2651_v5  ;;  %v2653_v41 = vpop.f32.mrf.mxu1  ;;  %v10352_v47 = vsel %vm1632_vm4, %v1582_v2, %v1462_v42 }
 0x1f2   : > { %v8107_v14 = vsel %vm3693_vm10, 1.0, %v13373_v40  ;;  %v13248_v55 = vunpack.c.l.b16 %v10352_v47  ;;  %v4355_v5 = vpack.c.bf16 %v4265_v31, %v4265_v31 }
 0x1f3   : > { %v10342_v43 = vmul.f32 %v8046_v30, %v4087_v17  ;;  %v3513_v62 = vpack.c.bf16 %v3423_v32, %v3423_v32  ;;  %v3273_v25 = vadd.f32 %v10197_v58, %v3179_v51 }
 0x1f4   : > { %v3144_v57 = vpop.f32.mrf.mxu3  ;;  %7934 = vmatmul.msk.bf16.gmra.mxu1 %vm2017_vm5, %v9804_v13  ;;  %v10363_v13 = vpack.c.b16 %v1850_v39, %v13248_v55  ;;  %v4505_v31 = vunpack.c.l.b16 %v4355_v5  ;;  %v13433_v55 = vrot.slane %v9726_v52, 1 }
 0x1f5   : > { %13426 = vst [vmem:[#allocation16_spill] sm:$0xff] %v10342_v43  ;;  %v3240_v34 = vadd.f32 %v3144_v57, %v10210_v19  ;;  %v4148_v3 = vunpack.c.l.bf16 %v3513_v62  ;;  %v3363_v17 = vmax.f32 %v3273_v25, 0.0 }
 0x1f6   : > { %v2231_v35 = vpop.f32.mrf.mxu0 }
 0x1f7   : > { %v3334_v15 = vadd.f32 %v10197_v58, %v3240_v34  ;;  %v2654_v30 = vadd.f32 %v2653_v41, %v2231_v35  ;;  %v2996_v32 = vpop.f32.mrf.mxu2  ;;  %v4328_v51 = vmul.f32 %v8107_v14, %v4148_v3  ;;  %v3453_v25 = vpack.c.bf16 %v3363_v17, %v3363_v17  ;;  %v1267_v34 = vpop.permute.xlu1 %1266  ;;  %v8589_v35 = vld [vmem:[%s8723_s12 + $0x110] sm:$0xff] }
 0x1f8   : > { %v1586_v14 = vsel %vm1505_vm3, %v8589_v35, %v1267_v34 }
 0x1f9   : > { %v3424_v19 = vmax.f32 %v3334_v15, 0.0  ;;  %v3180_v2 = vadd.f32 %v2994_v56, %v2654_v30  ;;  %7885 = vmatmul.msk.bf16.gmra.mxu0 %vm2017_vm5, %v10085_v6  ;;  %v2655_v42 = vpop.f32.mrf.mxu1  ;;  %v10375_v56 = vsel %vm10332_vm7, 1.0, %v13373_v40  ;;  %v1126_v6 = vshrl.u32 %v9667_v54, 16  ;;  %v13432_v54 = vld [vmem:[#allocation8_spill] sm:$0xff] }
 0x1fa   : > { %v10383_v15 = vpack.c.b16 %v4506_v28, %v4505_v31  ;;  %v4418_v30 = vpack.c.bf16 %v4328_v51, %v4328_v51  ;;  %v4088_v28 = vunpack.c.l.bf16 %v3453_v25  ;;  %v10399_v51 = vsel %vm10368_vm14, 1.0, %v13373_v40 }
 0x1fb   : > { %v3514_v62 = vpack.c.bf16 %v3424_v19, %v3424_v19  ;;  %v3274_v41 = vadd.f32 %v10197_v58, %v3180_v2  ;;  %v1128_v17 = vor.u32 %v1126_v6, %v9741_v53 }
 0x1fc   : > { %v3146_v57 = vpop.f32.mrf.mxu3  ;;  %7992 = vmatmul.msk.bf16.gmra.mxu2 %vm2017_vm5, %v10363_v13 }
 0x1fd   : > { %v4149_v39 = vunpack.c.l.bf16 %v3514_v62  ;;  %v3364_v48 = vmax.f32 %v3274_v41, 0.0  ;;  %v3241_v3 = vadd.f32 %v3146_v57, %v10227_v8  ;;  %1286 = vrot.lane.b32.xlu0 %v1128_v17, %s8644_s14  ;;  %v1466_v41 = vpop.permute.xlu2 %1465 }
 0x1fe   : > { %v2233_v5 = vpop.f32.mrf.mxu0 }
 0x1ff   : > { %v4329_v8 = vmul.f32 %v10375_v56, %v4149_v39  ;;  %v3454_v19 = vpack.c.bf16 %v3364_v48, %v3364_v48  ;;  %v3335_v2 = vadd.f32 %v10197_v58, %v3241_v3  ;;  %v2656_v62 = vadd.f32 %v2655_v42, %v2233_v5  ;;  %v2999_v53 = vpop.f32.mrf.mxu2 }
 0x200   : > { %v10404_v39 = vsel %vm1632_vm4, %v1586_v14, %v1466_v41  ;;  %v8047_v42 = vsel %vm10390_vm15, 1.0, %v13373_v40  ;;  %v1845_v48 = vunpack.c.l.b16 %v10262_v11  ;;  %v6573_v3 = vunpack.c.l.b16 %v4418_v30 }
 0x201   : > { %v4419_v31 = vpack.c.bf16 %v4329_v8, %v4329_v8  ;;  %v4089_v57 = vunpack.c.l.bf16 %v3454_v19  ;;  %v3425_v6 = vmax.f32 %v3335_v2, 0.0  ;;  %v3181_v34 = vadd.f32 %v2996_v32, %v2656_v62  ;;  %5454 = vmatmul.bf16.gmra.mxu3 %v10383_v15  ;;  %v2658_v25 = vpop.f32.mrf.mxu1  ;;  %v10412_v19 = vld [vmem:[%s8723_s12 + $0x168] sm:$0xff] }
 0x202   : > { %v1382_v32 = vrot.slane %v10412_v19, 1  ;;  %v4268_v2 = vmul.f32 %v8047_v42, %v4088_v28  ;;  %v710_v30 = vpack.c.b16 %v13432_v54, %v13432_v54  ;;  %v1852_v41 = vunpack.c.l.b16 %v10404_v39 }
 0x203   : > { %v6574_v35 = vunpack.c.l.b16 %v4419_v31  ;;  %v4269_v5 = vmul.f32 %v10399_v51, %v4089_v57  ;;  %v3515_v17 = vpack.c.bf16 %v3425_v6, %v3425_v6  ;;  %v3275_v62 = vadd.f32 %v10197_v58, %v3181_v34  ;;  %v1269_v6 = vpop.permute.xlu0 %1268 }
 0x204   : > { %v3149_v8 = vpop.f32.mrf.mxu3  ;;  %7935 = vmatmul.msk.bf16.gmra.mxu1 %vm2017_vm5, %v10073_v10  ;;  %v1384_v28 = vsel %vm1306_vm0, %v1382_v32, %v13433_v55  ;;  %v1589_v52 = vsel %vm1505_vm3, %v710_v30, %v1269_v6  ;;  %v1468_v32 = vpop.permute.xlu1 %1467  ;;  %v1846_v6 = vunpack.c.h.b16 %v10262_v11 }
 0x205   : > { %v10415_v14 = vpack.c.b16 %v6574_v35, %v6573_v3  ;;  %v3242_v31 = vadd.f32 %v3149_v8, %v10245_v22  ;;  %v4359_v42 = vpack.c.bf16 %v4269_v5, %v4269_v5  ;;  %v1851_v3 = vunpack.c.h.b16 %v10340_v24  ;;  %1487 = vrot.lane.b32.xlu0 %v1384_v28, %s8643_s13 }
 0x206   : > { %v2236_v57 = vpop.f32.mrf.mxu0  ;;  %v13434_v35 = vunpack.c.l.b16 %v10201_v63  ;;  %v4150_v49 = vunpack.c.l.bf16 %v3515_v17  ;;  %v4358_v22 = vpack.c.bf16 %v4268_v2, %v4268_v2  ;;  %v3365_v8 = vmax.f32 %v3275_v62, 0.0 }
 0x207   : > { %13431 = vst [vmem:[#allocation17_spill] sm:$0xff] %v10415_v14  ;;  %v2659_v34 = vadd.f32 %v2658_v25, %v2236_v57  ;;  %v3336_v54 = vadd.f32 %v10197_v58, %v3242_v31  ;;  %v3001_v43 = vpop.f32.mrf.mxu2  ;;  %v4508_v25 = vunpack.c.l.b16 %v4359_v42  ;;  %v10434_v57 = vpack.c.b16 %v1852_v41, %v1851_v3 }
 0x208   : > { %v1988_v10 = vpack.c.b16 %v1845_v48, %v13434_v35  ;;  %v4330_v48 = vmul.f32 %v10375_v56, %v4150_v49  ;;  %v10439_v2 = vsel %vm1632_vm4, %v1589_v52, %v1468_v32  ;;  %v3455_v62 = vpack.c.bf16 %v3365_v8, %v3365_v8 }
 0x209   : > { %v3182_v37 = vadd.f32 %v2999_v53, %v2659_v34  ;;  %v3426_v55 = vmax.f32 %v3336_v54, 0.0  ;;  %v2660_v5 = vpop.f32.mrf.mxu1  ;;  %v4507_v53 = vunpack.c.l.b16 %v4358_v22  ;;  %v1847_v41 = vunpack.c.l.b16 %v10308_v29 }
 0x20a   : > { %7886 = vmatmul.msk.bf16.gmra.mxu0 %vm2017_vm5, %v1988_v10  ;;  %v1853_v10 = vunpack.c.h.b16 %v10404_v39  ;;  %v4420_v54 = vpack.c.bf16 %v4330_v48, %v4330_v48  ;;  %v13251_v22 = vunpack.c.l.b16 %v10439_v2  ;;  %v4090_v52 = vunpack.c.l.bf16 %v3455_v62 }
 0x20b   : > { %v3276_v63 = vadd.f32 %v10197_v58, %v3182_v37  ;;  %v3516_v17 = vpack.c.bf16 %v3426_v55, %v3426_v55  ;;  %v10446_v49 = vpack.c.b16 %v4508_v25, %v4507_v53 }
 0x20c   : > { %v3151_v31 = vpop.f32.mrf.mxu3  ;;  %7993 = vmatmul.msk.bf16.gmra.mxu2 %vm2017_vm5, %v10434_v57 }
 0x20d   : > { %v3366_v28 = vmax.f32 %v3276_v63, 0.0  ;;  %v3243_v30 = vadd.f32 %v3151_v31, %v10266_v46  ;;  %v4151_v37 = vunpack.c.l.bf16 %v3516_v17  ;;  %v3526_v17 = vadd.s32 6, %v9625_v44 }
 0x20e   : > { %v2238_v42 = vpop.f32.mrf.mxu0 }
 0x20f   : > { %v3456_v3 = vpack.c.bf16 %v3366_v28, %v3366_v28  ;;  %v3337_v34 = vadd.f32 %v10197_v58, %v3243_v30  ;;  %v2661_v35 = vadd.f32 %v2660_v5, %v2238_v42  ;;  %v4331_v46 = vmul.f32 %v10375_v56, %v4151_v37  ;;  %v3004_v8 = vpop.f32.mrf.mxu2  ;;  %v8490_v56 = vld [vmem:[%s13190_s4 + $0x130] sm:$0xff] }
 0x210   : > { %v1989_v28 = vpack.c.b16 %v1847_v41, %v1846_v6  ;;  %5581 = vmatpush.bf16.msra.mxu3 %v8490_v56  ;;  %v6575_v30 = vunpack.c.l.b16 %v4420_v54  ;;  %v10481_v42 = vpack.c.b16 %v13251_v22, %v1853_v10  ;;  %v8051_v41 = vsel %vm10468_vm6, 1.0, %v13373_v40 }
 0x211   : > { %v4091_v55 = vunpack.c.l.bf16 %v3456_v3  ;;  %v3427_v32 = vmax.f32 %v3337_v34, 0.0  ;;  %v3183_v5 = vadd.f32 %v3001_v43, %v2661_v35  ;;  %5459 = vmatmul.bf16.gmra.mxu3 %v10446_v49  ;;  %v4421_v63 = vpack.c.bf16 %v4331_v46, %v4331_v46  ;;  %v2663_v38 = vpop.f32.mrf.mxu1 }
 0x212   : > { %v6587_v43 = vshll.u32 %v10415_v14, 16  ;;  %v4270_v34 = vmul.f32 %v10399_v51, %v4090_v52  ;;  %vm3555_vm7 = vcmp.ge.s32.totalorder %v3526_v17, 0  ;;  %vm3573_vm10 = vcmp.lt.s32.totalorder %v3526_v17, 32 }
 0x213   : > { %v4271_v31 = vmul.f32 %v10399_v51, %v4091_v55  ;;  %v3517_v53 = vpack.c.bf16 %v3427_v32, %v3427_v32  ;;  %v3277_v62 = vadd.f32 %v10197_v58, %v3183_v5  ;;  %v6576_v37 = vunpack.c.l.b16 %v4421_v63  ;;  %vm10515_vm11 = vmand %vm3555_vm7, %vm3573_vm10 }
 0x214   : > { %v10483_v3 = vpop.f32.mrf.mxu3  ;;  %7936 = vmatmul.msk.bf16.gmra.mxu1 %vm2017_vm5, %v10097_v0  ;;  %v6589_v10 = vrot.slane %v6587_v43, 1  ;;  %v6606_v52 = vrot.slane %v10415_v14, 1  ;;  %v6585_v63 = vshrl.u32 %v10415_v14, 16  ;;  %v4360_v0 = vpack.c.bf16 %v4270_v34, %v4270_v34  ;;  %vm3638_vm12 = vmand %vm10515_vm11, %vm3603_vm8 }
 0x215   : > { %13439 = vst [vmem:[#allocation26_spill] sm:$0xff] %v10483_v3  ;;  %v4152_v35 = vunpack.c.l.bf16 %v3517_v53  ;;  %v3367_v46 = vmax.f32 %v3277_v62, 0.0  ;;  %v10491_v6 = vpack.c.b16 %v6576_v37, %v6575_v30  ;;  %v4361_v55 = vpack.c.bf16 %v4271_v31, %v4271_v31  ;;  %vm3737_vm14 = vmand %vm10515_vm11, %vm3702_vm13 }
 0x216   : > { %v2241_v54 = vpop.f32.mrf.mxu0  ;;  %v1149_v31 = vshrl.u32 %v9784_v1, 16  ;;  %v6590_v37 = vor.u32 %v6589_v10, %v6585_v63 }
 0x217   : > { %13440 = vst [vmem:[#allocation6_spill] sm:$0xff] %v10491_v6  ;;  %v4332_v32 = vmul.f32 %v8111_v9, %v4152_v35  ;;  %v3457_v25 = vpack.c.bf16 %v3367_v46, %v3367_v46  ;;  %v2664_v5 = vadd.f32 %v2663_v38, %v2241_v54  ;;  %v3006_v51 = vpop.f32.mrf.mxu2  ;;  %v6607_v56 = vrot.slane %v10491_v6, 1 }
 0x218   : > { %v6592_v48 = vshll.u32 %v10491_v6, 16  ;;  %v4510_v35 = vunpack.c.l.b16 %v4361_v55 }
 0x219   : > { %v4422_v53 = vpack.c.bf16 %v4332_v32, %v4332_v32  ;;  %v4092_v62 = vunpack.c.l.bf16 %v3457_v25  ;;  %v3184_v30 = vadd.f32 %v3004_v8, %v2664_v5  ;;  %v2665_v43 = vpop.f32.mrf.mxu1  ;;  %v10500_v38 = vsel %vm1306_vm0, %v6606_v52, %v6607_v56 }
 0x21a   : > { %7887 = vmatmul.msk.bf16.gmra.mxu0 %vm2017_vm5, %v1989_v28  ;;  %13441 = vst [vmem:[#allocation20_spill] sm:$0xff] %v10500_v38  ;;  %v6594_v9 = vrot.slane %v6592_v48, 1  ;;  %v1151_v8 = vor.u32 %v1149_v31, %v9813_v59  ;;  %v4509_v32 = vunpack.c.l.b16 %v4360_v0 }
 0x21b   : > { %v6582_v46 = vunpack.c.l.b16 %v4422_v53  ;;  %v10502_v54 = vmul.f32 %v8051_v41, %v4092_v62  ;;  %v3278_v22 = vadd.f32 %v10197_v58, %v3184_v30  ;;  %v8056_v41 = vsel %vm3737_vm14, 1.0, %v13373_v40 }
 0x21c   : > { %v10505_v34 = vpop.f32.mrf.mxu3  ;;  %v10509_v28 = vsel %vm783_vm1, %v6590_v37, %v6594_v9  ;;  %7994 = vmatmul.msk.bf16.gmra.mxu2 %vm2017_vm5, %v10481_v42  ;;  %1292 = vrot.lane.b32.xlu0 %v1151_v8, %s8644_s14  ;;  %v10520_v25 = vpack.c.b16 %v4510_v35, %v4509_v32  ;;  %v8052_v35 = vsel %vm3638_vm12, 1.0, %v13373_v40 }
 0x21d   : > { %13442 = vst [vmem:[#allocation22_spill] sm:$0xff] %v10505_v34  ;;  %v3368_v1 = vmax.f32 %v3278_v22, 0.0  ;;  %v6583_v10 = vpack.c.b16 %v6582_v46, %v6582_v46  ;;  %v6596_v22 = vshrl.u32 %v10491_v6, 16 }
 0x21e   : > { %13443 = vst [vmem:[#allocation7_spill] sm:$0xff] %v10509_v28  ;;  %v2243_v55 = vpop.f32.mrf.mxu0 }
 0x21f   : > { %v3458_v59 = vpack.c.bf16 %v3368_v1, %v3368_v1  ;;  %v2666_v5 = vadd.f32 %v2665_v43, %v2243_v55  ;;  %v6609_v52 = vrot.slane %v6583_v10, 1  ;;  %v3009_v63 = vpop.f32.mrf.mxu2  ;;  %v6600_v48 = vshll.u32 %v6583_v10, 16 }
 0x220   : > { %v6598_v62 = vor.u32 %v6596_v22, %v6594_v9  ;;  %v1848_v43 = vunpack.c.h.b16 %v10308_v29  ;;  %v13449_v9 = vunpack.c.l.b16 %v10352_v47  ;;  %v8591_v22 = vld [vmem:[%s8723_s12 + $0x120] sm:$0xff] }
 0x221   : > { %v3185_v17 = vadd.f32 %v3006_v51, %v2666_v5  ;;  %5464 = vmatmul.bf16.gmra.mxu3 %v10520_v25  ;;  %v10529_v0 = vsel %vm1306_vm0, %v6607_v56, %v6609_v52  ;;  %v2668_v53 = vpop.f32.mrf.mxu1  ;;  %v6602_v30 = vrot.slane %v6600_v48, 1  ;;  %v4093_v31 = vunpack.c.l.bf16 %v3458_v59  ;;  %v1271_v59 = vpop.permute.xlu2 %1270 }
 0x222   : > { %13446 = vst [vmem:[#allocation8_spill] sm:$0xff] %v10529_v0  ;;  %v1990_v32 = vpack.c.b16 %v13449_v9, %v1848_v43  ;;  %v8053_v5 = vsel %vm10515_vm11, 1.0, %v13373_v40  ;;  %v1591_v48 = vsel %vm1505_vm3, %v8591_v22, %v1271_v59 }
 0x223   : > { %v3279_v37 = vadd.f32 %v10197_v58, %v3185_v17  ;;  %v10537_v51 = vsel %vm783_vm1, %v6598_v62, %v6602_v30  ;;  %v4273_v1 = vmul.f32 %v8052_v35, %v4093_v31  ;;  %v1470_v62 = vpop.permute.xlu0 %1469  ;;  %v10556_v35 = vld [vmem:[%s8906_s21] sm:$0xff] }
 0x224   : > { %v10534_v46 = vpop.f32.mrf.mxu3  ;;  %13448 = vst [vmem:[#allocation30_spill] sm:$0xff] %v10537_v51  ;;  %7937 = vmatmul.msk.bf16.gmra.mxu1 %vm2017_vm5, %v10221_v7  ;;  %v10551_v31 = vsel %vm1632_vm4, %v1591_v48, %v1470_v62  ;;  %v8464_v48 = vld [vmem:[%s13190_s4 + $0x60] sm:$0xff] }
 0x225   : > { %13447 = vst [vmem:[#allocation29_spill] sm:$0xff] %v10534_v46  ;;  %v3369_v8 = vmax.f32 %v3279_v37, 0.0  ;;  %v4363_v30 = vpack.c.bf16 %v4273_v1, %v4273_v1  ;;  %v8456_v62 = vld [vmem:[%s13190_s4 + $0x20] sm:$0xff]  ;;  %6234 = vmatpush.bf16.msrb.mxu2 %v8464_v48 }
 0x226   : > { %v2246_v56 = vpop.f32.mrf.mxu0  ;;  %6065 = vmatpush.bf16.msrb.mxu1 %v8456_v62 }
 0x227   : > { %v3459_v10 = vpack.c.bf16 %v3369_v8, %v3369_v8  ;;  %v2669_v55 = vadd.f32 %v2668_v53, %v2246_v56  ;;  %v3011_v52 = vpop.f32.mrf.mxu2  ;;  %v1387_v8 = vrot.slane %v10556_v35, 1 }
 0x229   : > { %v4094_v17 = vunpack.c.l.bf16 %v3459_v10  ;;  %v3186_v7 = vadd.f32 %v3009_v63, %v2669_v55  ;;  %v2670_v47 = vpop.f32.mrf.mxu1  ;;  %v4511_v10 = vunpack.c.l.b16 %v4363_v30 }
 0x22a   : > { %7888 = vmatmul.msk.bf16.gmra.mxu0 %vm2017_vm5, %v1990_v32  ;;  %v13451_v32 = vrot.slane %v9826_v60, 1 }
 0x22b   : > { %v4274_v43 = vmul.f32 %v8053_v5, %v4094_v17  ;;  %v3280_v53 = vadd.f32 %v10197_v58, %v3186_v7  ;;  %v8496_v17 = vld [vmem:[%s13190_s4 + $0x160] sm:$0xff] }
 0x22c   : > { %v10553_v37 = vpop.f32.mrf.mxu3  ;;  %7995 = vmatmul.msk.bf16.gmra.mxu2 %vm2017_vm5, %v10551_v31  ;;  %v1389_v1 = vsel %vm1306_vm0, %v1387_v8, %v13451_v32  ;;  %5752 = vmatpush.bf16.msrb.mxu0 %v8496_v17 }
 0x22d   : > { %13450 = vst [vmem:[#allocation31_spill] sm:$0xff] %v10553_v37  ;;  %v4364_v56 = vpack.c.bf16 %v4274_v43, %v4274_v43  ;;  %v3370_v9 = vmax.f32 %v3280_v53, 0.0  ;;  %1493 = vrot.lane.b32.xlu0 %v1389_v1, %s8643_s13  ;;  %v1273_v43 = vpop.permute.xlu1 %1272 }
 0x22e   : > { %v2248_v63 = vpop.f32.mrf.mxu0 }
 0x22f   : > { %v4512_v55 = vunpack.c.l.b16 %v4364_v56  ;;  %v3460_v59 = vpack.c.bf16 %v3370_v9, %v3370_v9  ;;  %v2671_v22 = vadd.f32 %v2670_v47, %v2248_v63  ;;  %v3014_v60 = vpop.f32.mrf.mxu2  ;;  %v1275_v63 = vpop.permute.xlu0 %1274 }
 0x231   : > { %v10574_v7 = vpack.c.b16 %v4512_v55, %v4511_v10  ;;  %v3187_v30 = vadd.f32 %v3011_v52, %v2671_v22  ;;  %v2673_v47 = vpop.f32.mrf.mxu1  ;;  %v4095_v53 = vunpack.c.l.bf16 %v3460_v59  ;;  %v8593_v22 = vld [vmem:[%s8723_s12 + $0x128] sm:$0xff]  ;;  %v1472_v59 = vpop.permute.xlu2 %1471 }
 0x232   : > { %v1593_v48 = vsel %vm1505_vm3, %v8593_v22, %v1273_v43 }
 0x233   : > { %v3281_v8 = vadd.f32 %v10197_v58, %v3187_v30  ;;  %5469 = vmatmul.bf16.gmra.mxu3 %v10574_v7  ;;  %v4275_v52 = vmul.f32 %v8053_v5, %v4095_v53  ;;  %v10588_v51 = vsel %vm1632_vm4, %v1593_v48, %v1472_v59 }
 0x234   : > { %v10578_v56 = vpop.f32.mrf.mxu3  ;;  %7938 = vmatmul.msk.bf16.gmra.mxu1 %vm2017_vm5, %v10262_v11 }
 0x235   : > { %13452 = vst [vmem:[#allocation32_spill] sm:$0xff] %v10578_v56  ;;  %v3371_v9 = vmax.f32 %v3281_v8, 0.0  ;;  %v4365_v8 = vpack.c.bf16 %v4275_v52, %v4275_v52  ;;  %v3527_v52 = vadd.s32 7, %v9625_v44 }
 0x236   : > { %v2251_v32 = vpop.f32.mrf.mxu0 }
 0x237   : > { %v3461_v1 = vpack.c.bf16 %v3371_v9, %v3371_v9  ;;  %v2674_v10 = vadd.f32 %v2673_v47, %v2251_v32  ;;  %v3016_v55 = vpop.f32.mrf.mxu2  ;;  %v1277_v47 = vpop.permute.xlu1 %1276  ;;  %vm3556_vm15 = vcmp.ge.s32.totalorder %v3527_v52, 0  ;;  %vm3574_vm2 = vcmp.lt.s32.totalorder %v3527_v52, 32 }
 0x238   : > { %v1476_v48 = vpop.permute.xlu0 %1475  ;;  %vm10622_vm6 = vmand %vm3556_vm15, %vm3574_vm2 }
 0x239   : > { %v4096_v17 = vunpack.c.l.bf16 %v3461_v1  ;;  %v3188_v62 = vadd.f32 %v3014_v60, %v2674_v10  ;;  %v2675_v30 = vpop.f32.mrf.mxu1  ;;  %v1598_v60 = vsel %vm1505_vm3, %v10148_v21, %v1277_v47  ;;  %v4513_v1 = vunpack.c.l.b16 %v4365_v8  ;;  %v1474_v47 = vpop.permute.xlu2 %1473  ;;  %vm3643_vm7 = vmand %vm10622_vm6, %vm3603_vm8 }
 0x23a   : > { %7889 = vmatmul.msk.bf16.gmra.mxu0 %vm2017_vm5, %v10340_v24  ;;  %v13454_v24 = vld [vmem:[#allocation11_spill] sm:$0xff]  ;;  %v10608_v21 = vsel %vm1632_vm4, %v1598_v60, %v1476_v48  ;;  %vm3742_vm10 = vmand %vm10622_vm6, %vm3702_vm13 }
 0x23b   : > { %v4276_v6 = vmul.f32 %v8053_v5, %v4096_v17  ;;  %v3282_v11 = vadd.f32 %v10197_v58, %v3188_v62  ;;  %v713_v5 = vpack.c.b16 %v13454_v24, %v13454_v24 }
 0x23c   : > { %v10590_v53 = vpop.f32.mrf.mxu3  ;;  %7996 = vmatmul.msk.bf16.gmra.mxu2 %vm2017_vm5, %v10588_v51 }
 0x23d   : > { %13453 = vst [vmem:[#allocation33_spill] sm:$0xff] %v10590_v53  ;;  %v4366_v9 = vpack.c.bf16 %v4276_v6, %v4276_v6  ;;  %v3372_v32 = vmax.f32 %v3282_v11, 0.0  ;;  %v1596_v24 = vsel %vm1505_vm3, %v713_v5, %v1275_v63  ;;  %v1860_v63 = vunpack.c.l.b16 %v10608_v21 }
 0x23e   : > { %v2253_v43 = vpop.f32.mrf.mxu0 }
 0x23f   : > { %v4514_v6 = vunpack.c.l.b16 %v4366_v9  ;;  %v3462_v10 = vpack.c.bf16 %v3372_v32, %v3372_v32  ;;  %v2676_v22 = vadd.f32 %v2675_v30, %v2253_v43  ;;  %v3019_v59 = vpop.f32.mrf.mxu2  ;;  %v10615_v30 = vsel %vm1632_vm4, %v1596_v24, %v1474_v47  ;;  %v1279_v24 = vpop.permute.xlu1 %1278 }
 0x240   : > { %v13254_v43 = vunpack.c.l.b16 %v10615_v30 }
 0x241   : > { %v10604_v17 = vpack.c.b16 %v4514_v6, %v4513_v1  ;;  %v4097_v62 = vunpack.c.l.bf16 %v3462_v10  ;;  %v3189_v11 = vadd.f32 %v3016_v55, %v2676_v22  ;;  %v2678_v0 = vpop.f32.mrf.mxu1 }
 0x243   : > { %v10610_v14 = vmul.f32 %v8056_v41, %v4097_v62  ;;  %v3283_v8 = vadd.f32 %v10197_v58, %v3189_v11  ;;  %5474 = vmatmul.bf16.gmra.mxu3 %v10604_v17  ;;  %v8057_v41 = vsel %vm3643_vm7, 1.0, %v13373_v40 }
 0x244   : > { %v10617_v9 = vpop.f32.mrf.mxu3  ;;  %7939 = vmatmul.msk.bf16.gmra.mxu1 %vm2017_vm5, %v10308_v29  ;;  %v10633_v29 = vpack.c.b16 %v1860_v63, %v13254_v43  ;;  %v1855_v43 = vunpack.c.l.b16 %v10551_v31 }
 0x245   : > { %13455 = vst [vmem:[#allocation11_spill] sm:$0xff] %v10617_v9  ;;  %v3373_v55 = vmax.f32 %v3283_v8, 0.0 }
 0x246   : > { %v2256_v5 = vpop.f32.mrf.mxu0 }
 0x247   : > { %v3463_v60 = vpack.c.bf16 %v3373_v55, %v3373_v55  ;;  %v2679_v52 = vadd.f32 %v2678_v0, %v2256_v5  ;;  %v3021_v1 = vpop.f32.mrf.mxu2  ;;  %v8489_v0 = vld [vmem:[%s13190_s4 + $0x128] sm:$0xff]  ;;  %v8594_v55 = vld [vmem:[%s8723_s12 + $0x140] sm:$0xff]  ;;  %v8058_v5 = vsel %vm10622_vm6, 1.0, %v13373_v40 }
 0x248   : > { %5582 = vmatpush.bf16.msra.mxu3 %v8489_v0  ;;  %v1600_v63 = vsel %vm1505_vm3, %v8594_v55, %v1279_v24  ;;  %v13460_v55 = vunpack.c.l.b16 %v10439_v2 }
 0x249   : > { %v3190_v6 = vadd.f32 %v3019_v59, %v2679_v52  ;;  %v2680_v10 = vpop.f32.mrf.mxu1  ;;  %v4098_v22 = vunpack.c.l.bf16 %v3463_v60 }
 0x24a   : > { %7890 = vmatmul.msk.bf16.gmra.mxu0 %vm2017_vm5, %v10404_v39 }
 0x24b   : > { %v3284_v48 = vadd.f32 %v10197_v58, %v3190_v6  ;;  %v4278_v39 = vmul.f32 %v8057_v41, %v4098_v22 }
 0x24c   : > { %v10642_v62 = vpop.f32.mrf.mxu3  ;;  %7997 = vmatmul.msk.bf16.gmra.mxu2 %vm2017_vm5, %v10633_v29 }
 0x24d   : > { %13458 = vst [vmem:[#allocation34_spill] sm:$0xff] %v10642_v62  ;;  %v3374_v59 = vmax.f32 %v3284_v48, 0.0  ;;  %v1478_v48 = vpop.permute.xlu2 %1477  ;;  %v4368_v22 = vpack.c.bf16 %v4278_v39, %v4278_v39  ;;  %v10672_v62 = vld [vmem:[%s13189_s3] ss:$0 sm:$0xff] }
 0x24e   : > { %v2258_v11 = vpop.f32.mrf.mxu0  ;;  %v10653_v0 = vsel %vm1632_vm4, %v1600_v63, %v1478_v48  ;;  %v1993_v63 = vpack.c.b16 %v1855_v43, %v13460_v55 }
 0x24f   : > { %v3464_v47 = vpack.c.bf16 %v3374_v59, %v3374_v59  ;;  %v2681_v8 = vadd.f32 %v2680_v10, %v2258_v11  ;;  %v3024_v60 = vpop.f32.mrf.mxu2  ;;  %v4515_v48 = vunpack.c.l.b16 %v4368_v22 }
 0x251   : > { %v4099_v52 = vunpack.c.l.bf16 %v3464_v47  ;;  %v3191_v6 = vadd.f32 %v3021_v1, %v2681_v8  ;;  %v2683_v28 = vpop.f32.mrf.mxu1  ;;  %v1862_v1 = vunpack.c.l.b16 %v10653_v0  ;;  %v1861_v47 = vunpack.c.h.b16 %v10608_v21 }
 0x253   : > { %v4279_v41 = vmul.f32 %v8058_v5, %v4099_v52  ;;  %v3285_v10 = vadd.f32 %v10197_v58, %v3191_v6 }
 0x254   : > { %v10656_v59 = vpop.f32.mrf.mxu3  ;;  %7940 = vmatmul.msk.bf16.gmra.mxu1 %vm2017_vm5, %v10363_v13  ;;  %v10667_v13 = vpack.c.b16 %v1862_v1, %v1861_v47 }
 0x255   : > { %13459 = vst [vmem:[#allocation35_spill] sm:$0xff] %v10656_v59  ;;  %v4369_v11 = vpack.c.bf16 %v4279_v41, %v4279_v41  ;;  %v3375_v24 = vmax.f32 %v3285_v10, 0.0 }
 0x256   : > { %v2261_v8 = vpop.f32.mrf.mxu0 }
 0x257   : > { %v4516_v39 = vunpack.c.l.b16 %v4369_v11  ;;  %v3465_v52 = vpack.c.bf16 %v3375_v24, %v3375_v24  ;;  %v2684_v38 = vadd.f32 %v2683_v28, %v2261_v8  ;;  %v3026_v58 = vpop.f32.mrf.mxu2  ;;  %v13461_v28 = vld [vmem:[#allocation19_spill] sm:$0xff] }
 0x258   : > { %v716_v43 = vpack.c.b16 %v13461_v28, %v13461_v28 }
 0x259   : > { %v10664_v6 = vpack.c.b16 %v4516_v39, %v4515_v48  ;;  %v3192_v41 = vadd.f32 %v3024_v60, %v2684_v38  ;;  %v2685_v10 = vpop.f32.mrf.mxu1  ;;  %v4100_v59 = vunpack.c.l.bf16 %v3465_v52  ;;  %v1281_v38 = vpop.permute.xlu0 %1280  ;;  %v1857_v39 = vunpack.c.l.b16 %v10588_v51 }
 0x25a   : > { %7891 = vmatmul.msk.bf16.gmra.mxu0 %vm2017_vm5, %v1993_v63  ;;  %v1603_v8 = vsel %vm1505_vm3, %v716_v43, %v1281_v38  ;;  %v1480_v52 = vpop.permute.xlu1 %1479  ;;  %v3528_v38 = vadd.s32 8, %v9625_v44 }
 0x25b   : > { %v3286_v2 = vadd.f32 %v10672_v62, %v3192_v41  ;;  %5479 = vmatmul.bf16.gmra.mxu3 %v10664_v6  ;;  %v4280_v24 = vmul.f32 %v8058_v5, %v4100_v59  ;;  %v1856_v41 = vunpack.c.h.b16 %v10551_v31  ;;  %v10686_v53 = vsel %vm1632_vm4, %v1603_v8, %v1480_v52 }
 0x25c   : > { %7998 = vmatmul.msk.bf16.gmra.mxu2 %vm2017_vm5, %v10667_v13  ;;  %v10680_v60 = vpop.f32.mrf.mxu3  ;;  %v13255_v43 = vunpack.c.l.b16 %v10686_v53  ;;  %v8061_v8 = vsel %vm3742_vm10, 1.0, %v13373_v40  ;;  %vm3557_vm11 = vcmp.ge.s32.totalorder %v3528_v38, 0  ;;  %vm3575_vm12 = vcmp.lt.s32.totalorder %v3528_v38, 32 }
 0x25d   : > { %v3376_v22 = vmax.f32 %v3286_v2, 0.0  ;;  %13462 = vst [vmem:[#allocation19_spill] sm:$0xff] %v10680_v60  ;;  %v4370_v28 = vpack.c.bf16 %v4280_v24, %v4280_v24  ;;  %vm10714_vm14 = vmand %vm3557_vm11, %vm3575_vm12 }
 0x25e   : > { %v2263_v11 = vpop.f32.mrf.mxu0  ;;  %vm3648_vm15 = vmand %vm10714_vm14, %vm3603_vm8 }
 0x25f   : > { %v3466_v1 = vpack.c.bf16 %v3376_v22, %v3376_v22  ;;  %v2686_v47 = vadd.f32 %v2685_v10, %v2263_v11  ;;  %v3029_v55 = vpop.f32.mrf.mxu2  ;;  %v1994_v11 = vpack.c.b16 %v1857_v39, %v1856_v41  ;;  %v4517_v24 = vunpack.c.l.b16 %v4370_v28  ;;  %vm3747_vm2 = vmand %vm10714_vm14, %vm3702_vm13 }
 0x261   : > { %v4101_v63 = vunpack.c.l.bf16 %v3466_v1  ;;  %v3193_v48 = vadd.f32 %v3026_v58, %v2686_v47  ;;  %v2688_v2 = vpop.f32.mrf.mxu1  ;;  %v1863_v58 = vunpack.c.h.b16 %v10653_v0 }
 0x263   : > { %v4281_v9 = vmul.f32 %v8058_v5, %v4101_v63  ;;  %v3287_v59 = vadd.f32 %v10672_v62, %v3193_v48 }
 0x264   : > { %7941 = vmatmul.msk.bf16.gmra.mxu1 %vm2017_vm5, %v10434_v57  ;;  %v10699_v63 = vpop.f32.mrf.mxu3 }
 0x265   : > { %v4371_v22 = vpack.c.bf16 %v4281_v9, %v4281_v9  ;;  %v3377_v10 = vmax.f32 %v3287_v59, 0.0  ;;  %13463 = vst [vmem:[#allocation36_spill] sm:$0xff] %v10699_v63  ;;  %v10706_v59 = vpack.c.b16 %v13255_v43, %v1863_v58  ;;  %v1482_v63 = vpop.permute.xlu0 %1481 }
 0x266   : > { %v2266_v5 = vpop.f32.mrf.mxu0 }
 0x267   : > { %v4518_v1 = vunpack.c.l.b16 %v4371_v22  ;;  %v3467_v9 = vpack.c.bf16 %v3377_v10, %v3377_v10  ;;  %v2689_v47 = vadd.f32 %v2688_v2, %v2266_v5  ;;  %v3031_v32 = vpop.f32.mrf.mxu2 }
 0x269   : > { %v10701_v48 = vpack.c.b16 %v4518_v1, %v4517_v24  ;;  %v4102_v57 = vunpack.c.l.bf16 %v3467_v9  ;;  %v3194_v52 = vadd.f32 %v3029_v55, %v2689_v47  ;;  %v2690_v39 = vpop.f32.mrf.mxu1  ;;  %v1858_v1 = vunpack.c.h.b16 %v10588_v51  ;;  %v8488_v55 = vld [vmem:[%s13190_s4 + $0x120] sm:$0xff] }
 0x26a   : > { %7892 = vmatmul.msk.bf16.gmra.mxu0 %vm2017_vm5, %v1994_v11  ;;  %5583 = vmatpush.bf16.msra.mxu3 %v8488_v55 }
 0x26b   : > { %v10708_v41 = vmul.f32 %v8061_v8, %v4102_v57  ;;  %v3288_v2 = vadd.f32 %v10672_v62, %v3194_v52  ;;  %5484 = vmatmul.bf16.gmra.mxu3 %v10701_v48  ;;  %v8062_v8 = vsel %vm3648_vm15, 1.0, %v13373_v40 }
 0x26c   : > { %7999 = vmatmul.msk.bf16.gmra.mxu2 %vm2017_vm5, %v10706_v59  ;;  %v10722_v11 = vpop.f32.mrf.mxu3 }
 0x26d   : > { %v3378_v28 = vmax.f32 %v3288_v2, 0.0  ;;  %13466 = vst [vmem:[#allocation37_spill] sm:$0xff] %v10722_v11 }
 0x26e   : > { %v2268_v22 = vpop.f32.mrf.mxu0 }
 0x26f   : > { %v3468_v10 = vpack.c.bf16 %v3378_v28, %v3378_v28  ;;  %v2691_v58 = vadd.f32 %v2690_v39, %v2268_v22  ;;  %v3034_v5 = vpop.f32.mrf.mxu2  ;;  %v13467_v39 = vunpack.c.l.b16 %v10615_v30 }
 0x271   : > { %v3195_v38 = vadd.f32 %v3031_v32, %v2691_v58  ;;  %v2693_v24 = vpop.f32.mrf.mxu1  ;;  %v4103_v9 = vunpack.c.l.bf16 %v3468_v10  ;;  %v1995_v2 = vpack.c.b16 %v13467_v39, %v1858_v1  ;;  %v1283_v58 = vpop.permute.xlu2 %1282  ;;  %v8063_v10 = vsel %vm10714_vm14, 1.0, %v13373_v40 }
 0x273   : > { %v3289_v47 = vadd.f32 %v10672_v62, %v3195_v38  ;;  %v4283_v32 = vmul.f32 %v8062_v8, %v4103_v9  ;;  %v8596_v38 = vld [vmem:[%s8723_s12 + $0x150] sm:$0xff] }
 0x274   : > { %7942 = vmatmul.msk.bf16.gmra.mxu1 %vm2017_vm5, %v10481_v42  ;;  %v1605_v11 = vsel %vm1505_vm3, %v8596_v38, %v1283_v58  ;;  %v10741_v8 = vpop.f32.mrf.mxu3  ;;  %v1285_v38 = vpop.permute.xlu1 %1284 }
 0x275   : > { %v3379_v57 = vmax.f32 %v3289_v47, 0.0  ;;  %v4373_v30 = vpack.c.bf16 %v4283_v32, %v4283_v32  ;;  %13468 = vst [vmem:[#allocation38_spill] sm:$0xff] %v10741_v8  ;;  %v8463_v32 = vld [vmem:[%s13190_s4 + $0x58] sm:$0xff] }
 0x276   : > { %v2271_v52 = vpop.f32.mrf.mxu0  ;;  %6235 = vmatpush.bf16.msrb.mxu2 %v8463_v32 }
 0x277   : > { %v3469_v28 = vpack.c.bf16 %v3379_v57, %v3379_v57  ;;  %v2694_v22 = vadd.f32 %v2693_v24, %v2271_v52  ;;  %v3036_v43 = vpop.f32.mrf.mxu2  ;;  %v10739_v24 = vsel %vm1632_vm4, %v1605_v11, %v1482_v63 }
 0x279   : > { %v4104_v47 = vunpack.c.l.bf16 %v3469_v28  ;;  %v3196_v60 = vadd.f32 %v3034_v5, %v2694_v22  ;;  %v2695_v42 = vpop.f32.mrf.mxu1  ;;  %v4519_v28 = vunpack.c.l.b16 %v4373_v30 }
 0x27a   : > { %7893 = vmatmul.msk.bf16.gmra.mxu0 %vm2017_vm5, %v1995_v2 }
 0x27b   : > { %v4284_v1 = vmul.f32 %v8063_v10, %v4104_v47  ;;  %v3290_v9 = vadd.f32 %v10672_v62, %v3196_v60 }
 0x27c   : > { %8000 = vmatmul.msk.bf16.gmra.mxu2 %vm2017_vm5, %v10739_v24 }
 0x27d   : > { %v4374_v57 = vpack.c.bf16 %v4284_v1, %v4284_v1  ;;  %v3380_v52 = vmax.f32 %v3290_v9, 0.0  ;;  %v10754_v9 = vpop.f32.mrf.mxu3 }
 0x27e   : > { %v2273_v39 = vpop.f32.mrf.mxu0  ;;  %13470 = vst [vmem:[#allocation40_spill] sm:$0xff] %v10754_v9 }
 0x27f   : > { %v4520_v5 = vunpack.c.l.b16 %v4374_v57  ;;  %v3470_v22 = vpack.c.bf16 %v3380_v52, %v3380_v52  ;;  %v2696_v2 = vadd.f32 %v2695_v42, %v2273_v39  ;;  %v3039_v60 = vpop.f32.mrf.mxu2  ;;  %v1287_v42 = vpop.permute.xlu0 %1286 }
 0x281   : > { %v10748_v58 = vpack.c.b16 %v4520_v5, %v4519_v28  ;;  %v3197_v63 = vadd.f32 %v3036_v43, %v2696_v2  ;;  %v2698_v11 = vpop.f32.mrf.mxu1  ;;  %v4105_v47 = vunpack.c.l.bf16 %v3470_v22  ;;  %v8597_v5 = vld [vmem:[%s8723_s12 + $0x158] sm:$0xff]  ;;  %v1484_v22 = vpop.permute.xlu2 %1483 }
 0x282   : > { %v1607_v2 = vsel %vm1505_vm3, %v8597_v5, %v1285_v38  ;;  %v1289_v38 = vpop.permute.xlu1 %1288 }
 0x283   : > { %13469 = vst [vmem:[#allocation39_spill] sm:$0xff] %v10748_v58  ;;  %v3291_v1 = vadd.f32 %v10672_v62, %v3197_v63  ;;  %5489 = vmatmul.bf16.gmra.mxu3 %v10748_v58  ;;  %v4285_v52 = vmul.f32 %v8063_v10, %v4105_v47  ;;  %v8455_v47 = vld [vmem:[%s13190_s4 + $0x18] sm:$0xff] }
 0x284   : > { %7943 = vmatmul.msk.bf16.gmra.mxu1 %vm2017_vm5, %v10551_v31  ;;  %v8495_v31 = vld [vmem:[%s13190_s4 + $0x158] sm:$0xff] }
 0x285   : > { %v3381_v30 = vmax.f32 %v3291_v1, 0.0  ;;  %5753 = vmatpush.bf16.msrb.mxu0 %v8495_v31  ;;  %6066 = vmatpush.bf16.msrb.mxu1 %v8455_v47 }
 0x287   : > { %v2276_v57 = vpop.f32.mrf.mxu0  ;;  %v3471_v39 = vpack.c.bf16 %v3381_v30, %v3381_v30  ;;  %v3041_v28 = vpop.f32.mrf.mxu2 }
 0x288   : > { %v2699_v43 = vadd.f32 %v2698_v11, %v2276_v57  ;;  %v4375_v11 = vpack.c.bf16 %v4285_v52, %v4285_v52  ;;  %v13471_v52 = vld [vmem:[#allocation23_spill] sm:$0xff]  ;;  %v1488_v47 = vpop.permute.xlu0 %1487 }
 0x289   : > { %v4106_v32 = vunpack.c.l.bf16 %v3471_v39  ;;  %v2700_v1 = vpop.f32.mrf.mxu1 }
 0x28a   : > { %v3198_v63 = vadd.f32 %v3039_v60, %v2699_v43  ;;  %7894 = vmatmul.msk.bf16.gmra.mxu0 %vm2017_vm5, %v10608_v21  ;;  %v10768_v60 = vsel %vm1632_vm4, %v1607_v2, %v1484_v22  ;;  %v1612_v43 = vsel %vm1505_vm3, %v10412_v19, %v1289_v38  ;;  %v3529_v2 = vadd.s32 9, %v9625_v44 }
 0x28b   : > { %v4286_v30 = vmul.f32 %v8063_v10, %v4106_v32  ;;  %v719_v10 = vpack.c.b16 %v13471_v52, %v13471_v52  ;;  %v4521_v22 = vunpack.c.l.b16 %v4375_v11 }
 0x28c   : > { %v3292_v57 = vadd.f32 %v10672_v62, %v3198_v63  ;;  %8001 = vmatmul.msk.bf16.gmra.mxu2 %vm2017_vm5, %v10768_v60  ;;  %vm3558_vm6 = vcmp.ge.s32.totalorder %v3529_v2, 0  ;;  %vm3576_vm7 = vcmp.lt.s32.totalorder %v3529_v2, 32 }
 0x28d   : > { %v4376_v21 = vpack.c.bf16 %v4286_v30, %v4286_v30  ;;  %v10784_v30 = vpop.f32.mrf.mxu3  ;;  %v1610_v8 = vsel %vm1505_vm3, %v719_v10, %v1287_v42  ;;  %vm10803_vm10 = vmand %vm3558_vm6, %vm3576_vm7 }
 0x28e   : > { %v3382_v39 = vmax.f32 %v3292_v57, 0.0  ;;  %13472 = vst [vmem:[#allocation23_spill] sm:$0xff] %v10784_v30  ;;  %v8066_v57 = vsel %vm3747_vm2, 1.0, %v13373_v40  ;;  %vm3653_vm11 = vmand %vm10803_vm10, %vm3603_vm8 }
 0x28f   : > { %v2278_v5 = vpop.f32.mrf.mxu0  ;;  %v4522_v32 = vunpack.c.l.b16 %v4376_v21  ;;  %v3044_v52 = vpop.f32.mrf.mxu2  ;;  %vm3752_vm12 = vmand %vm10803_vm10, %vm3702_vm13 }
 0x290   : > { %v3472_v63 = vpack.c.bf16 %v3382_v39, %v3382_v39  ;;  %v2701_v31 = vadd.f32 %v2700_v1, %v2278_v5  ;;  %v10791_v1 = vsel %vm1632_vm4, %v1612_v43, %v1488_v47  ;;  %v1486_v21 = vpop.permute.xlu2 %1485  ;;  %v8071_v10 = vsel %vm3752_vm12, 1.0, %v13373_v40 }
 0x291   : > { %v10787_v9 = vpack.c.b16 %v4522_v32, %v4521_v22  ;;  %v2703_v11 = vpop.f32.mrf.mxu1  ;;  %v10798_v22 = vsel %vm1632_vm4, %v1610_v8, %v1486_v21  ;;  %v1870_v42 = vunpack.c.l.b16 %v10791_v1  ;;  %v1291_v21 = vpop.permute.xlu1 %1290 }
 0x292   : > { %v4107_v19 = vunpack.c.l.bf16 %v3472_v63  ;;  %v3199_v38 = vadd.f32 %v3041_v28, %v2701_v31  ;;  %v13256_v63 = vunpack.c.l.b16 %v10798_v22 }
 0x293   : > { %5494 = vmatmul.bf16.gmra.mxu3 %v10787_v9 }
 0x294   : > { %v10793_v39 = vmul.f32 %v8066_v57, %v4107_v19  ;;  %v3293_v5 = vadd.f32 %v10672_v62, %v3199_v38  ;;  %7944 = vmatmul.msk.bf16.gmra.mxu1 %vm2017_vm5, %v10588_v51  ;;  %v10814_v51 = vpack.c.b16 %v1870_v42, %v13256_v63  ;;  %v8067_v38 = vsel %vm3653_vm11, 1.0, %v13373_v40 }
 0x295   : > { %v10818_v47 = vpop.f32.mrf.mxu3 }
 0x296   : > { %v3383_v28 = vmax.f32 %v3293_v5, 0.0  ;;  %13475 = vst [vmem:[#allocation41_spill] sm:$0xff] %v10818_v47 }
 0x297   : > { %v2281_v43 = vpop.f32.mrf.mxu0  ;;  %v3046_v31 = vpop.f32.mrf.mxu2 }
 0x298   : > { %v3473_v32 = vpack.c.bf16 %v3383_v28, %v3383_v28  ;;  %v2704_v2 = vadd.f32 %v2703_v11, %v2281_v43  ;;  %v8598_v43 = vld [vmem:[%s8723_s12 + $0x170] sm:$0xff]  ;;  %v1490_v47 = vpop.permute.xlu2 %1489 }
 0x299   : > { %v2705_v55 = vpop.f32.mrf.mxu1 }
 0x29a   : > { %v3200_v8 = vadd.f32 %v3044_v52, %v2704_v2  ;;  %7895 = vmatmul.msk.bf16.gmra.mxu0 %vm2017_vm5, %v10653_v0  ;;  %v4108_v57 = vunpack.c.l.bf16 %v3473_v32  ;;  %v1614_v0 = vsel %vm1505_vm3, %v8598_v43, %v1291_v21  ;;  %v8068_v32 = vsel %vm10803_vm10, 1.0, %v13373_v40 }
 0x29b   : > { %v10831_v56 = vsel %vm1632_vm4, %v1614_v0, %v1490_v47  ;;  %v13477_v43 = vunpack.c.l.b16 %v10686_v53  ;;  %v722_v53 = vpack.c.b16 %v9763_v16, %v9763_v16  ;;  %v1866_v16 = vunpack.c.h.b16 %v10739_v24 }
 0x29c   : > { %v3294_v19 = vadd.f32 %v10672_v62, %v3200_v8  ;;  %8002 = vmatmul.msk.bf16.gmra.mxu2 %vm2017_vm5, %v10814_v51  ;;  %v4288_v5 = vmul.f32 %v8067_v38, %v4108_v57 }
 0x29e   : > { %v3384_v11 = vmax.f32 %v3294_v19, 0.0  ;;  %v1865_v19 = vunpack.c.l.b16 %v10739_v24  ;;  %v4378_v57 = vpack.c.bf16 %v4288_v5, %v4288_v5 }
 0x29f   : > { %v2283_v52 = vpop.f32.mrf.mxu0  ;;  %v3049_v2 = vpop.f32.mrf.mxu2 }
 0x2a0   : > { %v3474_v28 = vpack.c.bf16 %v3384_v11, %v3384_v11  ;;  %v2706_v42 = vadd.f32 %v2705_v55, %v2283_v52  ;;  %v10834_v11 = vpop.f32.mrf.mxu3  ;;  %v1998_v47 = vpack.c.b16 %v1865_v19, %v13477_v43  ;;  %v4523_v0 = vunpack.c.l.b16 %v4378_v57  ;;  %v1293_v57 = vpop.permute.xlu0 %1292 }
 0x2a1   : > { %v2708_v30 = vpop.f32.mrf.mxu1  ;;  %13476 = vst [vmem:[#allocation42_spill] sm:$0xff] %v10834_v11 }
 0x2a2   : > { %v4109_v8 = vunpack.c.l.bf16 %v3474_v28  ;;  %v3201_v63 = vadd.f32 %v3046_v31, %v2706_v42  ;;  %v1872_v31 = vunpack.c.l.b16 %v10831_v56  ;;  %v1871_v28 = vunpack.c.h.b16 %v10791_v1 }
 0x2a4   : > { %v4289_v38 = vmul.f32 %v8068_v32, %v4109_v8  ;;  %v3295_v55 = vadd.f32 %v10672_v62, %v3201_v63  ;;  %7945 = vmatmul.msk.bf16.gmra.mxu1 %vm2017_vm5, %v10633_v29  ;;  %v10845_v29 = vpack.c.b16 %v1872_v31, %v1871_v28  ;;  %v1617_v31 = vsel %vm1505_vm3, %v722_v53, %v1293_v57 }
 0x2a5   : > { %v3530_v57 = vadd.s32 10, %v9625_v44 }
 0x2a6   : > { %v4379_v52 = vpack.c.bf16 %v4289_v38, %v4289_v38  ;;  %v3385_v21 = vmax.f32 %v3295_v55, 0.0 }
 0x2a7   : > { %v2286_v42 = vpop.f32.mrf.mxu0  ;;  %v3051_v63 = vpop.f32.mrf.mxu2  ;;  %vm3559_vm14 = vcmp.ge.s32.totalorder %v3530_v57, 0  ;;  %vm3577_vm15 = vcmp.lt.s32.totalorder %v3530_v57, 32 }
 0x2a8   : > { %v4524_v5 = vunpack.c.l.b16 %v4379_v52  ;;  %v3475_v8 = vpack.c.bf16 %v3385_v21, %v3385_v21  ;;  %v2709_v37 = vadd.f32 %v2708_v30, %v2286_v42  ;;  %v10853_v30 = vpop.f32.mrf.mxu3  ;;  %vm10887_vm2 = vmand %vm3559_vm14, %vm3577_vm15 }
 0x2a9   : > { %v2710_v55 = vpop.f32.mrf.mxu1  ;;  %13479 = vst [vmem:[#allocation44_spill] sm:$0xff] %v10853_v30  ;;  %vm3658_vm6 = vmand %vm10887_vm2, %vm3603_vm8 }
 0x2aa   : > { %v10842_v46 = vpack.c.b16 %v4524_v5, %v4523_v0  ;;  %v3202_v38 = vadd.f32 %v3049_v2, %v2709_v37  ;;  %7896 = vmatmul.msk.bf16.gmra.mxu0 %vm2017_vm5, %v1998_v47  ;;  %v4110_v11 = vunpack.c.l.bf16 %v3475_v8  ;;  %v1867_v47 = vunpack.c.l.b16 %v10768_v60  ;;  %v1492_v0 = vpop.permute.xlu1 %1491 }
 0x2ac   : > { %13478 = vst [vmem:[#allocation43_spill] sm:$0xff] %v10842_v46  ;;  %v3296_v34 = vadd.f32 %v10672_v62, %v3202_v38  ;;  %5499 = vmatmul.bf16.gmra.mxu3 %v10842_v46  ;;  %8003 = vmatmul.msk.bf16.gmra.mxu2 %vm2017_vm5, %v10845_v29  ;;  %v4290_v2 = vmul.f32 %v8068_v32, %v4110_v11 }
 0x2ad   : > { %v10859_v38 = vsel %vm1632_vm4, %v1617_v31, %v1492_v0 }
 0x2ae   : > { %v3386_v19 = vmax.f32 %v3296_v34, 0.0  ;;  %v4380_v5 = vpack.c.bf16 %v4290_v2, %v4290_v2  ;;  %v13257_v53 = vunpack.c.l.b16 %v10859_v38 }
 0x2af   : > { %v2288_v37 = vpop.f32.mrf.mxu0  ;;  %v3054_v28 = vpop.f32.mrf.mxu2 }
 0x2b0   : > { %v3476_v52 = vpack.c.bf16 %v3386_v19, %v3386_v19  ;;  %v2711_v21 = vadd.f32 %v2710_v55, %v2288_v37  ;;  %v1999_v37 = vpack.c.b16 %v1867_v47, %v1866_v16  ;;  %v4525_v2 = vunpack.c.l.b16 %v4380_v5 }
 0x2b1   : > { %v2713_v34 = vpop.f32.mrf.mxu1 }
 0x2b2   : > { %v4111_v42 = vunpack.c.l.bf16 %v3476_v52  ;;  %v3203_v43 = vadd.f32 %v3051_v63, %v2711_v21  ;;  %v1873_v63 = vunpack.c.h.b16 %v10831_v56 }
 0x2b4   : > { %v4291_v8 = vmul.f32 %v8068_v32, %v4111_v42  ;;  %v3297_v11 = vadd.f32 %v10672_v62, %v3203_v43  ;;  %7946 = vmatmul.msk.bf16.gmra.mxu1 %vm2017_vm5, %v10667_v13  ;;  %v10871_v42 = vpop.f32.mrf.mxu3 }
 0x2b5   : > { %13480 = vst [vmem:[#allocation45_spill] sm:$0xff] %v10871_v42 }
 0x2b6   : > { %v4381_v19 = vpack.c.bf16 %v4291_v8, %v4291_v8  ;;  %v3387_v55 = vmax.f32 %v3297_v11, 0.0  ;;  %v10879_v11 = vpack.c.b16 %v13257_v53, %v1873_v63 }
 0x2b7   : > { %v2291_v32 = vpop.f32.mrf.mxu0  ;;  %v3056_v43 = vpop.f32.mrf.mxu2 }
 0x2b8   : > { %v4526_v52 = vunpack.c.l.b16 %v4381_v19  ;;  %v3477_v21 = vpack.c.bf16 %v3387_v55, %v3387_v55  ;;  %v2714_v31 = vadd.f32 %v2713_v34, %v2291_v32 }
 0x2b9   : > { %v2715_v47 = vpop.f32.mrf.mxu1 }
 0x2ba   : > { %v10874_v0 = vpack.c.b16 %v4526_v52, %v4525_v2  ;;  %v4112_v13 = vunpack.c.l.bf16 %v3477_v21  ;;  %v3204_v8 = vadd.f32 %v3054_v28, %v2714_v31  ;;  %7897 = vmatmul.msk.bf16.gmra.mxu0 %vm2017_vm5, %v1999_v37  ;;  %v1868_v52 = vunpack.c.h.b16 %v10768_v60 }
 0x2bc   : > { %13481 = vst [vmem:[#allocation46_spill] sm:$0xff] %v10874_v0  ;;  %v10881_v16 = vmul.f32 %v8071_v10, %v4112_v13  ;;  %v3298_v34 = vadd.f32 %v10672_v62, %v3204_v8  ;;  %5504 = vmatmul.bf16.gmra.mxu3 %v10874_v0  ;;  %8004 = vmatmul.msk.bf16.gmra.mxu2 %vm2017_vm5, %v10879_v11  ;;  %v10895_v37 = vpop.f32.mrf.mxu3  ;;  %v8072_v10 = vsel %vm3658_vm6, 1.0, %v13373_v40 }
 0x2bd   : > { %13484 = vst [vmem:[#allocation47_spill] sm:$0xff] %v10895_v37  ;;  %v1494_v37 = vpop.permute.xlu0 %1493 }
 0x2be   : > { %v3388_v5 = vmax.f32 %v3298_v34, 0.0 }
 0x2bf   : > { %v2293_v19 = vpop.f32.mrf.mxu0  ;;  %v3059_v32 = vpop.f32.mrf.mxu2 }
 0x2c0   : > { %v3478_v55 = vpack.c.bf16 %v3388_v5, %v3388_v5  ;;  %v2716_v63 = vadd.f32 %v2715_v47, %v2293_v19  ;;  %v13485_v47 = vunpack.c.l.b16 %v10798_v22 }
 0x2c1   : > { %v2718_v2 = vpop.f32.mrf.mxu1 }
 0x2c2   : > { %v3205_v57 = vadd.f32 %v3056_v43, %v2716_v63  ;;  %v4113_v21 = vunpack.c.l.bf16 %v3478_v55  ;;  %v2000_v34 = vpack.c.b16 %v13485_v47, %v1868_v52  ;;  %v1295_v63 = vpop.permute.xlu2 %1294  ;;  %v8073_v55 = vsel %vm10887_vm2, 1.0, %v13373_v40 }
 0x2c4   : > { %v3299_v31 = vadd.f32 %v10672_v62, %v3205_v57  ;;  %7947 = vmatmul.msk.bf16.gmra.mxu1 %vm2017_vm5, %v10706_v59  ;;  %v4293_v5 = vmul.f32 %v8072_v10, %v4113_v21  ;;  %v1619_v57 = vsel %vm1505_vm3, %v10556_v35, %v1295_v63  ;;  %v10910_v59 = vpop.f32.mrf.mxu3 }
 0x2c5   : > { %13486 = vst [vmem:[#allocation48_spill] sm:$0xff] %v10910_v59  ;;  %v10914_v10 = vsel %vm1632_vm4, %v1619_v57, %v1494_v37 }
 0x2c6   : > { %v3389_v13 = vmax.f32 %v3299_v31, 0.0  ;;  %v4383_v52 = vpack.c.bf16 %v4293_v5, %v4293_v5  ;;  %v8487_v5 = vld [vmem:[%s13190_s4 + $0x118] sm:$0xff] }
 0x2c7   : > { %v2296_v8 = vpop.f32.mrf.mxu0  ;;  %v3061_v53 = vpop.f32.mrf.mxu2  ;;  %5584 = vmatpush.bf16.msra.mxu3 %v8487_v5 }
 0x2c8   : > { %v3479_v43 = vpack.c.bf16 %v3389_v13, %v3389_v13  ;;  %v2719_v19 = vadd.f32 %v2718_v2, %v2296_v8  ;;  %v4527_v47 = vunpack.c.l.b16 %v4383_v52 }
 0x2c9   : > { %v2720_v22 = vpop.f32.mrf.mxu1 }
 0x2ca   : > { %v4114_v31 = vunpack.c.l.bf16 %v3479_v43  ;;  %v3206_v42 = vadd.f32 %v3059_v32, %v2719_v19  ;;  %7898 = vmatmul.msk.bf16.gmra.mxu0 %vm2017_vm5, %v2000_v34 }
 0x2cc   : > { %v4294_v21 = vmul.f32 %v8073_v55, %v4114_v31  ;;  %v3300_v2 = vadd.f32 %v10672_v62, %v3206_v42  ;;  %8005 = vmatmul.msk.bf16.gmra.mxu2 %vm2017_vm5, %v10914_v10  ;;  %v10925_v52 = vpop.f32.mrf.mxu3 }
 0x2cd   : > { %13488 = vst [vmem:[#allocation50_spill] sm:$0xff] %v10925_v52 }
 0x2ce   : > { %v4384_v13 = vpack.c.bf16 %v4294_v21, %v4294_v21  ;;  %v3390_v8 = vmax.f32 %v3300_v2, 0.0 }
 0x2cf   : > { %v2298_v35 = vpop.f32.mrf.mxu0  ;;  %v3064_v19 = vpop.f32.mrf.mxu2 }
 0x2d0   : > { %v4528_v32 = vunpack.c.l.b16 %v4384_v13  ;;  %v3480_v43 = vpack.c.bf16 %v3390_v8, %v3390_v8  ;;  %v2721_v34 = vadd.f32 %v2720_v22, %v2298_v35  ;;  %v1297_v22 = vpop.permute.xlu1 %1296 }
 0x2d1   : > { %v2723_v37 = vpop.f32.mrf.mxu1 }
 0x2d2   : > { %v10921_v63 = vpack.c.b16 %v4528_v32, %v4527_v47  ;;  %v3207_v42 = vadd.f32 %v3061_v53, %v2721_v34  ;;  %v4115_v57 = vunpack.c.l.bf16 %v3480_v43  ;;  %v8599_v53 = vld [vmem:[%s8906_s21 + $0x8] sm:$0xff]  ;;  %v1496_v43 = vpop.permute.xlu2 %1495 }
 0x2d3   : > { %v1621_v32 = vsel %vm1505_vm3, %v8599_v53, %v1297_v22  ;;  %vm3757_vm3 = vmand %vm10887_vm2, %vm3702_vm13 }
 0x2d4   : > { %13487 = vst [vmem:[#allocation49_spill] sm:$0xff] %v10921_v63  ;;  %v3301_v31 = vadd.f32 %v10672_v62, %v3207_v42  ;;  %5509 = vmatmul.bf16.gmra.mxu3 %v10921_v63  ;;  %7948 = vmatmul.msk.bf16.gmra.mxu1 %vm2017_vm5, %v10739_v24  ;;  %v4295_v13 = vmul.f32 %v8073_v55, %v4115_v57  ;;  %v8462_v42 = vld [vmem:[%s13190_s4 + $0x50] sm:$0xff] }
 0x2d5   : > { %v8494_v24 = vld [vmem:[%s13190_s4 + $0x150] sm:$0xff]  ;;  %6236 = vmatpush.bf16.msrb.mxu2 %v8462_v42 }
 0x2d6   : > { %v3391_v21 = vmax.f32 %v3301_v31, 0.0  ;;  %v4385_v31 = vpack.c.bf16 %v4295_v13, %v4295_v13  ;;  %5754 = vmatpush.bf16.msrb.mxu0 %v8494_v24  ;;  %v10952_v13 = vpop.f32.mrf.mxu3 }
 0x2d7   : > { %v2301_v2 = vpop.f32.mrf.mxu0  ;;  %v3066_v47 = vpop.f32.mrf.mxu2  ;;  %13489 = vst [vmem:[#allocation51_spill] sm:$0xff] %v10952_v13 }
 0x2d8   : > { %v3481_v8 = vpack.c.bf16 %v3391_v21, %v3391_v21  ;;  %v2724_v35 = vadd.f32 %v2723_v37, %v2301_v2  ;;  %v8454_v37 = vld [vmem:[%s13190_s4 + $0x10] sm:$0xff] }
 0x2d9   : > { %v2725_v57 = vpop.f32.mrf.mxu1  ;;  %6067 = vmatpush.bf16.msrb.mxu1 %v8454_v37 }
 0x2da   : > { %v4116_v34 = vunpack.c.l.bf16 %v3481_v8  ;;  %v3208_v5 = vadd.f32 %v3064_v19, %v2724_v35  ;;  %7899 = vmatmul.msk.bf16.gmra.mxu0 %vm2017_vm5, %v10791_v1  ;;  %v10944_v1 = vsel %vm1632_vm4, %v1621_v32, %v1496_v43  ;;  %v3531_v8 = vadd.s32 11, %v9625_v44 }
 0x2db   : > { %v4529_v35 = vunpack.c.l.b16 %v4385_v31 }
 0x2dc   : > { %v4296_v21 = vmul.f32 %v8073_v55, %v4116_v34  ;;  %v3302_v19 = vadd.f32 %v10672_v62, %v3208_v5  ;;  %8006 = vmatmul.msk.bf16.gmra.mxu2 %vm2017_vm5, %v10944_v1  ;;  %v8076_v34 = vsel %vm3757_vm3, 1.0, %v13373_v40  ;;  %vm3560_vm4 = vcmp.ge.s32.totalorder %v3531_v8, 0 }
 0x2dd   : > { %vm3578_vm7 = vcmp.lt.s32.totalorder %v3531_v8, 32 }
 0x2de   : > { %v4386_v22 = vpack.c.bf16 %v4296_v21, %v4296_v21  ;;  %v3392_v2 = vmax.f32 %v3302_v19, 0.0  ;;  %vm10964_vm10 = vmand %vm3560_vm4, %vm3578_vm7 }
 0x2df   : > { %v2303_v55 = vpop.f32.mrf.mxu0  ;;  %v3069_v5 = vpop.f32.mrf.mxu2  ;;  %vm3663_vm11 = vmand %vm10964_vm10, %vm3603_vm8 }
 0x2e0   : > { %v4530_v53 = vunpack.c.l.b16 %v4386_v22  ;;  %v3482_v32 = vpack.c.bf16 %v3392_v2, %v3392_v2  ;;  %v2726_v43 = vadd.f32 %v2725_v57, %v2303_v55  ;;  %v10968_v55 = vpop.f32.mrf.mxu3  ;;  %vm3762_vm12 = vmand %vm10964_vm10, %vm3702_vm13 }
 0x2e1   : > { %v2728_v37 = vpop.f32.mrf.mxu1  ;;  %13493 = vst [vmem:[#allocation53_spill] sm:$0xff] %v10968_v55  ;;  %vm3707_vm4 = vmand %vm9686_vm9, %vm3702_vm13 }
 0x2e2   : > { %v10956_v42 = vpack.c.b16 %v4530_v53, %v4529_v35  ;;  %v4117_v24 = vunpack.c.l.bf16 %v3482_v32  ;;  %v3209_v28 = vadd.f32 %v3066_v47, %v2726_v43  ;;  %v8077_v43 = vsel %vm3663_vm11, 1.0, %v13373_v40 }
 0x2e4   : > { %13490 = vst [vmem:[#allocation52_spill] sm:$0xff] %v10956_v42  ;;  %v10958_v21 = vmul.f32 %v8076_v34, %v4117_v24  ;;  %v3303_v19 = vadd.f32 %v10672_v62, %v3209_v28  ;;  %5514 = vmatmul.bf16.gmra.mxu3 %v10956_v42  ;;  %7949 = vmatmul.msk.bf16.gmra.mxu1 %vm2017_vm5, %v10768_v60  ;;  %v13494_v24 = vld [vmem:[#allocation25_spill] sm:$0xff] }
 0x2e6   : > { %v3393_v31 = vmax.f32 %v3303_v19, 0.0 }
 0x2e7   : > { %v2306_v22 = vpop.f32.mrf.mxu0  ;;  %v3071_v35 = vpop.f32.mrf.mxu2 }
 0x2e8   : > { %v3483_v2 = vpack.c.bf16 %v3393_v31, %v3393_v31  ;;  %v2729_v47 = vadd.f32 %v2728_v37, %v2306_v22  ;;  %v10980_v22 = vpop.f32.mrf.mxu3 }
 0x2e9   : > { %v2730_v60 = vpop.f32.mrf.mxu1  ;;  %13495 = vst [vmem:[#allocation25_spill] sm:$0xff] %v10980_v22 }
 0x2ea   : > { %v3210_v8 = vadd.f32 %v3069_v5, %v2729_v47  ;;  %7900 = vmatmul.msk.bf16.gmra.mxu0 %vm2017_vm5, %v10831_v56  ;;  %v4118_v53 = vunpack.c.l.bf16 %v3483_v2  ;;  %v8078_v56 = vsel %vm10964_vm10, 1.0, %v13373_v40 }
 0x2ec   : > { %v3304_v32 = vadd.f32 %v10672_v62, %v3210_v8  ;;  %8007 = vmatmul.msk.bf16.gmra.mxu2 %vm2017_vm5, %v13494_v24  ;;  %v4298_v37 = vmul.f32 %v8077_v43, %v4118_v53  ;;  %v1875_v8 = vunpack.c.l.b16 %v10914_v10  ;;  %v13496_v43 = vunpack.c.l.b16 %v10859_v38 }
 0x2ee   : > { %v3394_v34 = vmax.f32 %v3304_v32, 0.0  ;;  %v4388_v32 = vpack.c.bf16 %v4298_v37, %v4298_v37 }
 0x2ef   : > { %v2308_v28 = vpop.f32.mrf.mxu0  ;;  %v3074_v5 = vpop.f32.mrf.mxu2 }
 0x2f0   : > { %v3484_v19 = vpack.c.bf16 %v3394_v34, %v3394_v34  ;;  %v2731_v31 = vadd.f32 %v2730_v60, %v2308_v28  ;;  %v2003_v34 = vpack.c.b16 %v1875_v8, %v13496_v43  ;;  %v4531_v28 = vunpack.c.l.b16 %v4388_v32 }
 0x2f1   : > { %v2733_v55 = vpop.f32.mrf.mxu1 }
 0x2f2   : > { %v4119_v2 = vunpack.c.l.bf16 %v3484_v19  ;;  %v3211_v47 = vadd.f32 %v3071_v35, %v2731_v31 }
 0x2f4   : > { %v4299_v13 = vmul.f32 %v8078_v56, %v4119_v2  ;;  %v3305_v24 = vadd.f32 %v10672_v62, %v3211_v47  ;;  %7950 = vmatmul.msk.bf16.gmra.mxu1 %vm2017_vm5, %v10814_v51  ;;  %v10994_v2 = vpop.f32.mrf.mxu3 }
 0x2f5   : > { %13498 = vst [vmem:[#allocation55_spill] sm:$0xff] %v10994_v2 }
 0x2f6   : > { %v4389_v52 = vpack.c.bf16 %v4299_v13, %v4299_v13  ;;  %v3395_v53 = vmax.f32 %v3305_v24, 0.0 }
 0x2f7   : > { %v2311_v60 = vpop.f32.mrf.mxu0  ;;  %v3076_v31 = vpop.f32.mrf.mxu2 }
 0x2f8   : > { %v4532_v22 = vunpack.c.l.b16 %v4389_v52  ;;  %v3485_v19 = vpack.c.bf16 %v3395_v53, %v3395_v53  ;;  %v2734_v35 = vadd.f32 %v2733_v55, %v2311_v60  ;;  %v1877_v53 = vunpack.c.l.b16 %v10944_v1 }
 0x2f9   : > { %v2735_v13 = vpop.f32.mrf.mxu1  ;;  %v1876_v60 = vunpack.c.h.b16 %v10914_v10 }
 0x2fa   : > { %v10991_v59 = vpack.c.b16 %v4532_v22, %v4531_v28  ;;  %v3212_v37 = vadd.f32 %v3074_v5, %v2734_v35  ;;  %7901 = vmatmul.msk.bf16.gmra.mxu0 %vm2017_vm5, %v2003_v34  ;;  %v4120_v47 = vunpack.c.l.bf16 %v3485_v19 }
 0x2fc   : > { %13497 = vst [vmem:[#allocation54_spill] sm:$0xff] %v10991_v59  ;;  %v3306_v51 = vadd.f32 %v10672_v62, %v3212_v37  ;;  %5519 = vmatmul.bf16.gmra.mxu3 %v10991_v59  ;;  %8008 = vmatmul.msk.bf16.gmra.mxu2 %vm2017_vm5, %v9795_v18  ;;  %v4300_v55 = vmul.f32 %v8078_v56, %v4120_v47  ;;  %v11003_v35 = vpop.f32.mrf.mxu3 }
 0x2fd   : > { %13499 = vst [vmem:[#allocation56_spill] sm:$0xff] %v11003_v35  ;;  %v2004_v47 = vpack.c.b16 %v1877_v53, %v1876_v60 }
 0x2fe   : > { %v3396_v38 = vmax.f32 %v3306_v51, 0.0  ;;  %v4390_v34 = vpack.c.bf16 %v4300_v55, %v4300_v55  ;;  %v8081_v55 = vsel %vm3762_vm12, 1.0, %v13373_v40 }
 0x2ff   : > { %v2313_v52 = vpop.f32.mrf.mxu0  ;;  %v3079_v32 = vpop.f32.mrf.mxu2 }
 0x300   : > { %v3486_v8 = vpack.c.bf16 %v3396_v38, %v3396_v38  ;;  %v2736_v22 = vadd.f32 %v2735_v13, %v2313_v52  ;;  %v3532_v13 = vadd.s32 12, %v9625_v44  ;;  %v4533_v51 = vunpack.c.l.b16 %v4390_v34 }
 0x301   : > { %v2738_v43 = vpop.f32.mrf.mxu1 }
 0x302   : > { %v4121_v5 = vunpack.c.l.bf16 %v3486_v8  ;;  %v3213_v24 = vadd.f32 %v3076_v31, %v2736_v22  ;;  %vm3561_vm14 = vcmp.ge.s32.totalorder %v3532_v13, 0  ;;  %vm3579_vm15 = vcmp.lt.s32.totalorder %v3532_v13, 32 }
 0x303   : > { %vm11024_vm2 = vmand %vm3561_vm14, %vm3579_vm15  ;;  %v1878_v13 = vunpack.c.h.b16 %v10944_v1 }
 0x304   : > { %v4301_v28 = vmul.f32 %v8078_v56, %v4121_v5  ;;  %v3307_v19 = vadd.f32 %v10672_v62, %v3213_v24  ;;  %7951 = vmatmul.msk.bf16.gmra.mxu1 %vm2017_vm5, %v10845_v29  ;;  %v11022_v60 = vpop.f32.mrf.mxu3  ;;  %vm3668_vm6 = vmand %vm11024_vm2, %vm3603_vm8 }
 0x305   : > { %13501 = vst [vmem:[#allocation58_spill] sm:$0xff] %v11022_v60  ;;  %vm3767_vm3 = vmand %vm11024_vm2, %vm3702_vm13 }
 0x306   : > { %v4391_v37 = vpack.c.bf16 %v4301_v28, %v4301_v28  ;;  %v3397_v18 = vmax.f32 %v3307_v19, 0.0 }
 0x307   : > { %v2316_v31 = vpop.f32.mrf.mxu0  ;;  %v3081_v8 = vpop.f32.mrf.mxu2 }
 0x308   : > { %v4534_v56 = vunpack.c.l.b16 %v4391_v37  ;;  %v3487_v38 = vpack.c.bf16 %v3397_v18, %v3397_v18  ;;  %v2739_v52 = vadd.f32 %v2738_v43, %v2316_v31 }
 0x309   : > { %v2740_v57 = vpop.f32.mrf.mxu1 }
 0x30a   : > { %v11013_v22 = vpack.c.b16 %v4534_v56, %v4533_v51  ;;  %v4122_v5 = vunpack.c.l.bf16 %v3487_v38  ;;  %v3214_v24 = vadd.f32 %v3079_v32, %v2739_v52  ;;  %7902 = vmatmul.msk.bf16.gmra.mxu0 %vm2017_vm5, %v2004_v47  ;;  %v8082_v56 = vsel %vm3668_vm6, 1.0, %v13373_v40 }
 0x30c   : > { %13500 = vst [vmem:[#allocation57_spill] sm:$0xff] %v11013_v22  ;;  %v11016_v28 = vmul.f32 %v8081_v55, %v4122_v5  ;;  %v3308_v29 = vadd.f32 %v10672_v62, %v3214_v24  ;;  %5524 = vmatmul.bf16.gmra.mxu3 %v11013_v22  ;;  %8009 = vmatmul.msk.bf16.gmra.mxu2 %vm2017_vm5, %v9860_v26  ;;  %v8486_v26 = vld [vmem:[%s13190_s4 + $0x110] sm:$0xff]  ;;  %v11040_v52 = vpop.f32.mrf.mxu3 }
 0x30d   : > { %5585 = vmatpush.bf16.msra.mxu3 %v8486_v26  ;;  %13504 = vst [vmem:[#allocation59_spill] sm:$0xff] %v11040_v52 }
 0x30e   : > { %v3398_v53 = vmax.f32 %v3308_v29, 0.0  ;;  %v13505_v29 = vld [vmem:[#allocation24_spill] sm:$0xff] }
 0x30f   : > { %v2318_v32 = vpop.f32.mrf.mxu0  ;;  %v3084_v37 = vpop.f32.mrf.mxu2 }
 0x310   : > { %v3488_v34 = vpack.c.bf16 %v3398_v53, %v3398_v53  ;;  %v2741_v19 = vadd.f32 %v2740_v57, %v2318_v32  ;;  %v13506_v53 = vunpack.c.l.b16 %v13505_v29 }
 0x311   : > { %v2743_v31 = vpop.f32.mrf.mxu1 }
 0x312   : > { %v3215_v18 = vadd.f32 %v3081_v8, %v2741_v19  ;;  %v4123_v47 = vunpack.c.l.bf16 %v3488_v34  ;;  %v8461_v8 = vld [vmem:[%s13190_s4 + $0x48] sm:$0xff]  ;;  %v2005_v32 = vpack.c.b16 %v13506_v53, %v1878_v13  ;;  %v8083_v34 = vsel %vm11024_vm2, 1.0, %v13373_v40 }
 0x313   : > { %6237 = vmatpush.bf16.msrb.mxu2 %v8461_v8 }
 0x314   : > { %v3309_v51 = vadd.f32 %v10672_v62, %v3215_v18  ;;  %7952 = vmatmul.msk.bf16.gmra.mxu1 %vm2017_vm5, %v10879_v11  ;;  %v4303_v5 = vmul.f32 %v8082_v56, %v4123_v47  ;;  %v8460_v47 = vld [vmem:[%s13190_s4 + $0x40] sm:$0xff] }
 0x316   : > { %v3399_v38 = vmax.f32 %v3309_v51, 0.0  ;;  %v4393_v51 = vpack.c.bf16 %v4303_v5, %v4303_v5 }
 0x317   : > { %v2321_v55 = vpop.f32.mrf.mxu0  ;;  %v3086_v19 = vpop.f32.mrf.mxu2  ;;  %6238 = vmatpush.bf16.msrb.mxu2 %v8460_v47  ;;  %v8493_v47 = vld [vmem:[%s13190_s4 + $0x148] sm:$0xff] }
 0x318   : > { %v3489_v24 = vpack.c.bf16 %v3399_v38, %v3399_v38  ;;  %v2744_v57 = vadd.f32 %v2743_v31, %v2321_v55  ;;  %v13507_v55 = vld [vmem:[#allocation9_spill] sm:$0xff]  ;;  %5755 = vmatpush.bf16.msrb.mxu0 %v8493_v47 }
 0x319   : > { %v2745_v26 = vpop.f32.mrf.mxu1 }
 0x31a   : > { %v4124_v11 = vunpack.c.l.bf16 %v3489_v24  ;;  %v3216_v18 = vadd.f32 %v3084_v37, %v2744_v57  ;;  %7903 = vmatmul.msk.bf16.gmra.mxu0 %vm2017_vm5, %v2005_v32  ;;  %v8453_v37 = vld [vmem:[%s13190_s4 + $0x8] sm:$0xff]  ;;  %v4535_v24 = vunpack.c.l.b16 %v4393_v51  ;;  %v11060_v32 = vpop.f32.mrf.mxu3  ;;  %v8452_v51 = vld [vmem:[%s13190_s4] sm:$0xff] }
 0x31b   : > { %13508 = vst [vmem:[#allocation24_spill] sm:$0xff] %v11060_v32  ;;  %6068 = vmatpush.bf16.msrb.mxu1 %v8453_v37 }
 0x31c   : > { %v4304_v31 = vmul.f32 %v8083_v34, %v4124_v11  ;;  %v3310_v56 = vadd.f32 %v10672_v62, %v3216_v18  ;;  %8010 = vmatmul.msk.bf16.gmra.mxu2 %vm2017_vm5, %v13507_v55 }
 0x31e   : > { %v4394_v13 = vpack.c.bf16 %v4304_v31, %v4304_v31  ;;  %v3400_v38 = vmax.f32 %v3310_v56, 0.0 }
 0x31f   : > { %v2323_v8 = vpop.f32.mrf.mxu0  ;;  %v3089_v5 = vpop.f32.mrf.mxu2  ;;  %6069 = vmatpush.bf16.msrb.mxu1 %v8452_v51 }
 0x320   : > { %v4536_v57 = vunpack.c.l.b16 %v4394_v13  ;;  %v3490_v29 = vpack.c.bf16 %v3400_v38, %v3400_v38  ;;  %v2746_v53 = vadd.f32 %v2745_v26, %v2323_v8  ;;  %v3252_v26 = vadd.f32 %v10672_v62, %v9833_v4 }
 0x321   : > { %v2748_v31 = vpop.f32.mrf.mxu1 }
 0x322   : > { %v11062_v11 = vpack.c.b16 %v4536_v57, %v4535_v24  ;;  %v3217_v18 = vadd.f32 %v3086_v19, %v2746_v53  ;;  %v4125_v56 = vunpack.c.l.bf16 %v3490_v29  ;;  %v8492_v24 = vld [vmem:[%s13190_s4 + $0x140] sm:$0xff]  ;;  %v3342_v57 = vmax.f32 %v3252_v26, 0.0  ;;  %v11081_v53 = vpop.f32.mrf.mxu3 }
 0x323   : > { %13510 = vst [vmem:[#allocation60_spill] sm:$0xff] %v11081_v53  ;;  %5756 = vmatpush.bf16.msrb.mxu0 %v8492_v24  ;;  %v8086_v24 = vsel %vm3767_vm3, 1.0, %v13373_v40 }
 0x324   : > { %13509 = vst [vmem:[#allocation9_spill] sm:$0xff] %v11062_v11  ;;  %v3311_v55 = vadd.f32 %v10672_v62, %v3217_v18  ;;  %5529 = vmatmul.bf16.gmra.mxu3 %v11062_v11  ;;  %7953 = vmatmul.msk.bf16.gmra.mxu1 %vm2017_vm5, %v10914_v10  ;;  %v4305_v38 = vmul.f32 %v8083_v34, %v4125_v56 }
 0x326   : > { %v3401_v13 = vmax.f32 %v3311_v55, 0.0  ;;  %v4395_v10 = vpack.c.bf16 %v4305_v38, %v4305_v38  ;;  %v3432_v55 = vpack.c.bf16 %v3342_v57, %v3342_v57  ;;  %v8026_v57 = vsel %vm3707_vm4, 1.0, %v13373_v40 }
 0x327   : > { %v2326_v19 = vpop.f32.mrf.mxu0  ;;  %v3091_v29 = vpop.f32.mrf.mxu2 }
 0x328   : > { %v3491_v8 = vpack.c.bf16 %v3401_v13, %v3401_v13  ;;  %v2749_v37 = vadd.f32 %v2748_v31, %v2326_v19  ;;  %v11086_v31 = vld [vmem:[%s13189_s3] ss:$0 sm:$0xff]  ;;  %v4537_v13 = vunpack.c.l.b16 %v4395_v10 }
 0x329   : > { %v2750_v18 = vpop.f32.mrf.mxu1 }
 0x32a   : > { %v4126_v4 = vunpack.c.l.bf16 %v3491_v8  ;;  %v3218_v62 = vadd.f32 %v3089_v5, %v2749_v37  ;;  %7904 = vmatmul.msk.bf16.gmra.mxu0 %vm2017_vm5, %v9664_v61  ;;  %v13511_v61 = vld [vmem:[#allocation13_spill] sm:$0xff]  ;;  %v3533_v5 = vadd.s32 13, %v9625_v44  ;;  %v4067_v37 = vunpack.c.l.bf16 %v3432_v55  ;;  %v11109_v55 = vpop.f32.mrf.mxu3 }
 0x32b   : > { %13513 = vst [vmem:[#allocation61_spill] sm:$0xff] %v11109_v55 }
 0x32c   : > { %v4306_v47 = vmul.f32 %v8083_v34, %v4126_v4  ;;  %v3312_v56 = vadd.f32 %v11086_v31, %v3218_v62  ;;  %8011 = vmatmul.msk.bf16.gmra.mxu2 %vm2017_vm5, %v13511_v61  ;;  %vm3562_vm9 = vcmp.ge.s32.totalorder %v3533_v5, 0  ;;  %vm3580_vm7 = vcmp.lt.s32.totalorder %v3533_v5, 32 }
 0x32d   : > { %vm11114_vm10 = vmand %vm3562_vm9, %vm3580_vm7 }
 0x32e   : > { %v4396_v26 = vpack.c.bf16 %v4306_v47, %v4306_v47  ;;  %v3402_v51 = vmax.f32 %v3312_v56, 0.0  ;;  %vm3673_vm11 = vmand %vm11114_vm10, %vm3603_vm8 }
 0x32f   : > { %v2328_v34 = vpop.f32.mrf.mxu0  ;;  %v3094_v43 = vpop.f32.mrf.mxu2 }
 0x330   : > { %v4538_v19 = vunpack.c.l.b16 %v4396_v26  ;;  %v3492_v38 = vpack.c.bf16 %v3402_v51, %v3402_v51  ;;  %v2751_v8 = vadd.f32 %v2750_v18, %v2328_v34  ;;  %v4247_v18 = vmul.f32 %v8026_v57, %v4067_v37  ;;  %v13514_v26 = vld [vmem:[#allocation4_spill] sm:$0xff] }
 0x331   : > { %v2753_v56 = vpop.f32.mrf.mxu1  ;;  %v4671_v51 = vshll.u32 %v13514_v26, 16  ;;  %v4664_v37 = vshrl.u32 %v9801_v33, 16  ;;  %v4675_v60 = vshrl.u32 %v13514_v26, 16 }
 0x332   : > { %v11102_v4 = vpack.c.b16 %v4538_v19, %v4537_v13  ;;  %v4127_v62 = vunpack.c.l.bf16 %v3492_v38  ;;  %v3219_v47 = vadd.f32 %v3091_v29, %v2751_v8  ;;  %v4668_v19 = vrot.slane %v4666_v27, 1 }
 0x333   : > { %v4337_v5 = vpack.c.bf16 %v4247_v18, %v4247_v18  ;;  %v4673_v57 = vrot.slane %v4671_v51, 1  ;;  %v8087_v18 = vsel %vm3673_vm11, 1.0, %v13373_v40 }
 0x334   : > { %13512 = vst [vmem:[#allocation13_spill] sm:$0xff] %v11102_v4  ;;  %v11105_v61 = vmul.f32 %v8086_v24, %v4127_v62  ;;  %v3313_v10 = vadd.f32 %v11086_v31, %v3219_v47  ;;  %5534 = vmatmul.bf16.gmra.mxu3 %v11102_v4  ;;  %7954 = vmatmul.msk.bf16.gmra.mxu1 %vm2017_vm5, %v10944_v1  ;;  %v13517_v1 = vld [vmem:[#allocation27_spill] sm:$0xff] }
 0x336   : > { %v3403_v34 = vmax.f32 %v3313_v10, 0.0  ;;  %v4669_v10 = vor.u32 %v4668_v19, %v4664_v37  ;;  %v8088_v19 = vsel %vm11114_vm10, 1.0, %v13373_v40 }
 0x337   : > { %v2331_v13 = vpop.f32.mrf.mxu0  ;;  %v3096_v24 = vpop.f32.mrf.mxu2 }
 0x338   : > { %v3493_v38 = vpack.c.bf16 %v3403_v34, %v3403_v34  ;;  %v2754_v8 = vadd.f32 %v2753_v56, %v2331_v13  ;;  %v4631_v56 = vunpack.c.l.b16 %v4337_v5  ;;  %v11127_v34 = vpop.f32.mrf.mxu3  ;;  %v4674_v51 = vsel %vm783_vm1, %v4669_v10, %v4673_v57 }
 0x339   : > { %v2755_v47 = vpop.f32.mrf.mxu1  ;;  %13518 = vst [vmem:[#allocation27_spill] sm:$0xff] %v11127_v34 }
 0x33a   : > { %v3220_v62 = vadd.f32 %v3094_v43, %v2754_v8  ;;  %7905 = vmatmul.msk.bf16.gmra.mxu0 %vm2017_vm5, %v13517_v1  ;;  %v4128_v55 = vunpack.c.l.bf16 %v3493_v38  ;;  %v11133_v37 = vpack.c.b16 %v4631_v56, %v4631_v56  ;;  %v13521_v56 = vld [vmem:[#allocation2_spill] sm:$0xff]  ;;  %vm3772_vm5 = vmand %vm11114_vm10, %vm3702_vm13 }
 0x33c   : > { %v3314_v27 = vadd.f32 %v11086_v31, %v3220_v62  ;;  %6239 = vmatmul.bf16.vlgmr.msrb.gmra.mxu2 %v4674_v51  ;;  %v4308_v32 = vmul.f32 %v8087_v18, %v4128_v55  ;;  %13519 = vst [vmem:[#allocation62_spill] sm:$0xff] %v11133_v37  ;;  %v4679_v55 = vshll.u32 %v11133_v37, 16 }
 0x33e   : > { %v3404_v13 = vmax.f32 %v3314_v27, 0.0  ;;  %v4398_v52 = vpack.c.bf16 %v4308_v32, %v4308_v32  ;;  %v5021_v27 = vrot.slane %v10112_v20, 1  ;;  %v4681_v35 = vrot.slane %v4679_v55, 1 }
 0x33f   : > { %v2333_v53 = vpop.f32.mrf.mxu0  ;;  %v3099_v38 = vpop.f32.mrf.mxu2 }
 0x340   : > { %v3494_v43 = vpack.c.bf16 %v3404_v13, %v3404_v13  ;;  %v2756_v8 = vadd.f32 %v2755_v47, %v2333_v53  ;;  %v11139_v47 = vpop.f32.mrf.mxu3  ;;  %v5020_v13 = vrot.slane %v13521_v56, 1 }
 0x341   : > { %v2758_v1 = vpop.f32.mrf.mxu1  ;;  %13520 = vst [vmem:[#allocation63_spill] sm:$0xff] %v11139_v47 }
 0x342   : > { %v4129_v5 = vunpack.c.l.bf16 %v3494_v43  ;;  %v3221_v62 = vadd.f32 %v3096_v24, %v2756_v8  ;;  %v4539_v43 = vunpack.c.l.b16 %v4398_v52  ;;  %v4677_v52 = vor.u32 %v4675_v60, %v4673_v57 }
 0x344   : > { %v4309_v34 = vmul.f32 %v8088_v19, %v4129_v5  ;;  %v3315_v10 = vadd.f32 %v11086_v31, %v3221_v62  ;;  %6070 = vmatmul.bf16.vlgmr.msrb.gmra.mxu1 %v9801_v33  ;;  %v11143_v5 = vsel %vm1306_vm0, %v5020_v13, %v5021_v27 }
 0x345   : > { %13522 = vst [vmem:[#allocation2_spill] sm:$0xff] %v11143_v5 }
 0x346   : > { %v4399_v18 = vpack.c.bf16 %v4309_v34, %v4309_v34  ;;  %v3405_v53 = vmax.f32 %v3315_v10, 0.0  ;;  %v13523_v34 = vld [vmem:[#allocation3_spill] sm:$0xff] }
 0x347   : > { %v2336_v51 = vpop.f32.mrf.mxu0  ;;  %v3101_v62 = vpop.f32.mrf.mxu2  ;;  %v4342_v10 = vpack.c.bf16 %v13523_v34, %v13523_v34 }
 0x348   : > { %v4540_v24 = vunpack.c.l.b16 %v4399_v18  ;;  %v3495_v8 = vpack.c.bf16 %v3405_v53, %v3405_v53  ;;  %v2759_v32 = vadd.f32 %v2758_v1, %v2336_v51  ;;  %v4682_v53 = vsel %vm783_vm1, %v4677_v52, %v4681_v35 }
 0x349   : > { %v2760_v30 = vpop.f32.mrf.mxu1  ;;  %v4632_v51 = vunpack.c.l.b16 %v4342_v10  ;;  %v4686_v35 = vshll.u32 %v13521_v56, 16 }
 0x34a   : > { %v11148_v2 = vpack.c.b16 %v4540_v24, %v4539_v43  ;;  %v3222_v47 = vadd.f32 %v3099_v38, %v2759_v32  ;;  %5757 = vmatmul.bf16.vlgmr.msrb.gmra.mxu0 %v11143_v5  ;;  %v4130_v18 = vunpack.c.l.bf16 %v3495_v8  ;;  %v11154_v24 = vpop.f32.mrf.mxu3 }
 0x34b   : > { %13525 = vst [vmem:[#allocation64_spill] sm:$0xff] %v11154_v24  ;;  %v11156_v32 = vpack.c.b16 %v4632_v51, %v4632_v51 }
 0x34c   : > { %13524 = vst [vmem:[#allocation3_spill] sm:$0xff] %v11148_v2  ;;  %v3316_v1 = vadd.f32 %v11086_v31, %v3222_v47  ;;  %5539 = vmatmul.bf16.gmra.mxu3 %v11148_v2  ;;  %6244 = vmatmul.bf16.gmra.mxu2 %v4682_v53  ;;  %v4310_v3 = vmul.f32 %v8088_v19, %v4130_v18  ;;  %v8485_v47 = vld [vmem:[%s13190_s4 + $0x108] sm:$0xff] }
 0x34d   : > { %5586 = vmatpush.bf16.msra.mxu3 %v8485_v47 }
 0x34e   : > { %v3406_v13 = vmax.f32 %v3316_v1, 0.0  ;;  %v4400_v10 = vpack.c.bf16 %v4310_v3, %v4310_v3  ;;  %v4691_v1 = vshll.u32 %v10112_v20, 16  ;;  %v3534_v3 = vadd.s32 14, %v9625_v44 }
 0x34f   : > { %v2338_v55 = vpop.f32.mrf.mxu0  ;;  %v3104_v38 = vpop.f32.mrf.mxu2 }
 0x350   : > { %v3496_v34 = vpack.c.bf16 %v3406_v13, %v3406_v13  ;;  %v2761_v43 = vadd.f32 %v2760_v30, %v2338_v55  ;;  %v5023_v30 = vrot.slane %v11156_v32, 1  ;;  %v4541_v13 = vunpack.c.l.b16 %v4400_v10 }
 0x351   : > { %v2763_v8 = vpop.f32.mrf.mxu1  ;;  %v4693_v29 = vrot.slane %v4691_v1, 1  ;;  %vm3563_vm12 = vcmp.ge.s32.totalorder %v3534_v3, 0  ;;  %vm3581_vm14 = vcmp.lt.s32.totalorder %v3534_v3, 32 }
 0x352   : > { %v4131_v60 = vunpack.c.l.bf16 %v3496_v34  ;;  %v3223_v57 = vadd.f32 %v3101_v62, %v2761_v43  ;;  %vm11189_vm15 = vmand %vm3563_vm12, %vm3581_vm14 }
 0x353   : > { %vm3678_vm2 = vmand %vm11189_vm15, %vm3603_vm8 }
 0x354   : > { %v4311_v52 = vmul.f32 %v8088_v19, %v4131_v60  ;;  %v3317_v18 = vadd.f32 %v11086_v31, %v3223_v57  ;;  %6075 = vmatmul.bf16.gmra.mxu1 %v13514_v26  ;;  %v4688_v19 = vrot.slane %v4686_v35, 1  ;;  %v8091_v60 = vsel %vm3772_vm5, 1.0, %v13373_v40  ;;  %v11179_v35 = vpop.f32.mrf.mxu3  ;;  %vm3777_vm6 = vmand %vm11189_vm15, %vm3702_vm13 }
 0x355   : > { %v11173_v57 = vsel %vm1306_vm0, %v5021_v27, %v5023_v30  ;;  %13527 = vst [vmem:[#allocation66_spill] sm:$0xff] %v11179_v35 }
 0x356   : > { %v4401_v53 = vpack.c.bf16 %v4311_v52, %v4311_v52  ;;  %v3407_v51 = vmax.f32 %v3317_v18, 0.0  ;;  %13526 = vst [vmem:[#allocation65_spill] sm:$0xff] %v11173_v57  ;;  %v4684_v52 = vshrl.u32 %v13521_v56, 16 }
 0x357   : > { %v2341_v62 = vpop.f32.mrf.mxu0  ;;  %v3106_v47 = vpop.f32.mrf.mxu2 }
 0x358   : > { %v4542_v55 = vunpack.c.l.b16 %v4401_v53  ;;  %v3497_v34 = vpack.c.bf16 %v3407_v51, %v3407_v51  ;;  %v2764_v43 = vadd.f32 %v2763_v8, %v2341_v62  ;;  %v4689_v53 = vor.u32 %v4688_v19, %v4684_v52 }
 0x359   : > { %v2765_v10 = vpop.f32.mrf.mxu1 }
 0x35a   : > { %v11176_v18 = vpack.c.b16 %v4542_v55, %v4541_v13  ;;  %v4132_v24 = vunpack.c.l.bf16 %v3497_v34  ;;  %v3224_v5 = vadd.f32 %v3104_v38, %v2764_v43  ;;  %5762 = vmatmul.bf16.gmra.mxu0 %v11173_v57  ;;  %v11186_v27 = vsel %vm783_vm1, %v4689_v53, %v4693_v29 }
 0x35b   : > { %v8092_v43 = vsel %vm3678_vm2, 1.0, %v13373_v40  ;;  %v4699_v53 = vshll.u32 %v11156_v32, 16  ;;  %v8093_v57 = vsel %vm11189_vm15, 1.0, %v13373_v40 }
 0x35c   : > { %v11181_v8 = vmul.f32 %v8091_v60, %v4132_v24  ;;  %v3318_v51 = vadd.f32 %v11086_v31, %v3224_v5  ;;  %5544 = vmatmul.bf16.gmra.mxu3 %v11176_v18  ;;  %6249 = vmatmul.bf16.gmra.mxu2 %v11186_v27  ;;  %v11197_v3 = vpop.f32.mrf.mxu3  ;;  %v13532_v60 = vld [vmem:[#allocation10_spill] sm:$0xff] }
 0x35d   : > { %13531 = vst [vmem:[#allocation68_spill] sm:$0xff] %v11197_v3  ;;  %v5026_v52 = vrot.slane %v13532_v60, 1  ;;  %v4695_v3 = vshrl.u32 %v10112_v20, 16 }
 0x35e   : > { %13528 = vst [vmem:[#allocation67_spill] sm:$0xff] %v11181_v8  ;;  %v3408_v30 = vmax.f32 %v3318_v51, 0.0 }
 0x35f   : > { %v2343_v1 = vpop.f32.mrf.mxu0  ;;  %v3109_v19 = vpop.f32.mrf.mxu2 }
 0x360   : > { %v3498_v62 = vpack.c.bf16 %v3408_v30, %v3408_v30  ;;  %v2766_v24 = vadd.f32 %v2765_v10, %v2343_v1  ;;  %v13533_v30 = vld [vmem:[#allocation15_spill] sm:$0xff] }
 0x361   : > { %v2768_v13 = vpop.f32.mrf.mxu1  ;;  %v5025_v1 = vrot.slane %v13533_v30, 1 }
 0x362   : > { %v3225_v5 = vadd.f32 %v3106_v47, %v2766_v24  ;;  %v4133_v55 = vunpack.c.l.bf16 %v3498_v62  ;;  %v13534_v62 = vld [vmem:[#allocation5_spill] sm:$0xff] }
 0x363   : > { %v11212_v32 = vsel %vm1306_vm0, %v5025_v1, %v5026_v52 }
 0x364   : > { %v3319_v34 = vadd.f32 %v11086_v31, %v3225_v5  ;;  %6080 = vmatmul.bf16.gmra.mxu1 %v13521_v56  ;;  %v4313_v35 = vmul.f32 %v8092_v43, %v4133_v55  ;;  %v4347_v5 = vpack.c.bf16 %v13534_v62, %v13534_v62  ;;  %13535 = vst [vmem:[#allocation5_spill] sm:$0xff] %v11212_v32  ;;  %v4701_v56 = vrot.slane %v4699_v53, 1  ;;  %v11216_v62 = vpop.f32.mrf.mxu3 }
 0x365   : > { %13536 = vst [vmem:[#allocation69_spill] sm:$0xff] %v11216_v62 }
 0x366   : > { %v3409_v10 = vmax.f32 %v3319_v34, 0.0  ;;  %v4403_v43 = vpack.c.bf16 %v4313_v35, %v4313_v35  ;;  %v4633_v8 = vunpack.c.l.b16 %v4347_v5 }
 0x367   : > { %v2346_v51 = vpop.f32.mrf.mxu0  ;;  %v3111_v34 = vpop.f32.mrf.mxu2 }
 0x368   : > { %v3499_v47 = vpack.c.bf16 %v3409_v10, %v3409_v10  ;;  %v2769_v24 = vadd.f32 %v2768_v13, %v2346_v51  ;;  %v4697_v13 = vor.u32 %v4695_v3, %v4693_v29  ;;  %v11222_v35 = vpack.c.b16 %v4633_v8, %v4633_v8 }
 0x369   : > { %v2770_v55 = vpop.f32.mrf.mxu1 }
 0x36a   : > { %v4134_v37 = vunpack.c.l.bf16 %v3499_v47  ;;  %v3226_v33 = vadd.f32 %v3109_v19, %v2769_v24  ;;  %5767 = vmatmul.bf16.gmra.mxu0 %v11212_v32  ;;  %v11219_v26 = vsel %vm783_vm1, %v4697_v13, %v4701_v56  ;;  %v4543_v19 = vunpack.c.l.b16 %v4403_v43 }
 0x36b   : > { %v4706_v56 = vshll.u32 %v13533_v30, 16  ;;  %v4711_v43 = vshll.u32 %v13532_v60, 16 }
 0x36c   : > { %v4314_v10 = vmul.f32 %v8093_v57, %v4134_v37  ;;  %v3320_v51 = vadd.f32 %v11086_v31, %v3226_v33  ;;  %6254 = vmatmul.bf16.gmra.mxu2 %v11219_v26  ;;  %v11232_v8 = vpop.f32.mrf.mxu3 }
 0x36d   : > { %13538 = vst [vmem:[#allocation71_spill] sm:$0xff] %v11232_v8 }
 0x36e   : > { %v4404_v1 = vpack.c.bf16 %v4314_v10, %v4314_v10  ;;  %v3410_v2 = vmax.f32 %v3320_v51, 0.0  ;;  %v5028_v10 = vrot.slane %v11222_v35, 1  ;;  %v4708_v51 = vrot.slane %v4706_v56, 1 }
 0x36f   : > { %v2348_v53 = vpop.f32.mrf.mxu0  ;;  %v3114_v29 = vpop.f32.mrf.mxu2 }
 0x370   : > { %v4544_v47 = vunpack.c.l.b16 %v4404_v1  ;;  %v3500_v24 = vpack.c.bf16 %v3410_v2, %v3410_v2  ;;  %v2771_v32 = vadd.f32 %v2770_v55, %v2348_v53  ;;  %v11235_v53 = vsel %vm1306_vm0, %v5026_v52, %v5028_v10 }
 0x371   : > { %v2773_v3 = vpop.f32.mrf.mxu1  ;;  %13539 = vst [vmem:[#allocation72_spill] sm:$0xff] %v11235_v53  ;;  %v3535_v10 = vadd.s32 15, %v9625_v44 }
 0x372   : > { %v11224_v37 = vpack.c.b16 %v4544_v47, %v4543_v19  ;;  %v3227_v33 = vadd.f32 %v3111_v34, %v2771_v32  ;;  %v4135_v13 = vunpack.c.l.bf16 %v3500_v24  ;;  %v4704_v47 = vshrl.u32 %v13533_v30, 16 }
 0x373   : > { %v4713_v24 = vrot.slane %v4711_v43, 1  ;;  %vm3564_vm3 = vcmp.ge.s32.totalorder %v3535_v10, 0  ;;  %vm3582_vm4 = vcmp.lt.s32.totalorder %v3535_v10, 32 }
 0x374   : > { %13537 = vst [vmem:[#allocation70_spill] sm:$0xff] %v11224_v37  ;;  %v3321_v5 = vadd.f32 %v11086_v31, %v3227_v33  ;;  %5549 = vmatmul.bf16.gmra.mxu3 %v11224_v37  ;;  %6085 = vmatmul.bf16.gmra.mxu1 %v10112_v20  ;;  %v4315_v32 = vmul.f32 %v8093_v57, %v4135_v13  ;;  %vm11261_vm9 = vmand %vm3564_vm3, %vm3582_vm4 }
 0x375   : > { %v4709_v20 = vor.u32 %v4708_v51, %v4704_v47  ;;  %v8096_v51 = vsel %vm3777_vm6, 1.0, %v13373_v40  ;;  %vm3683_vm7 = vmand %vm11261_vm9, %vm3603_vm8 }
 0x376   : > { %v3411_v2 = vmax.f32 %v3321_v5, 0.0  ;;  %v4405_v37 = vpack.c.bf16 %v4315_v32, %v4315_v32  ;;  %vm3782_vm10 = vmand %vm11261_vm9, %vm3702_vm13 }
 0x377   : > { %v2351_v55 = vpop.f32.mrf.mxu0  ;;  %v3116_v19 = vpop.f32.mrf.mxu2  ;;  %v11241_v13 = vsel %vm783_vm1, %v4709_v20, %v4713_v24 }
 0x378   : > { %v3501_v34 = vpack.c.bf16 %v3411_v2, %v3411_v2  ;;  %v2774_v1 = vadd.f32 %v2773_v3, %v2351_v55  ;;  %v4545_v43 = vunpack.c.l.b16 %v4405_v37  ;;  %v5031_v37 = vrot.slane %v10273_v45, 1 }
 0x379   : > { %v2775_v5 = vpop.f32.mrf.mxu1 }
 0x37a   : > { %v4136_v33 = vunpack.c.l.bf16 %v3501_v34  ;;  %v3228_v62 = vadd.f32 %v3114_v29, %v2774_v1  ;;  %5772 = vmatmul.bf16.gmra.mxu0 %v11235_v53 }
 0x37c   : > { %v4316_v8 = vmul.f32 %v8093_v57, %v4136_v33  ;;  %v3322_v56 = vadd.f32 %v11086_v31, %v3228_v62  ;;  %6259 = vmatmul.bf16.gmra.mxu2 %v11241_v13  ;;  %v11249_v62 = vpop.f32.mrf.mxu3 }
 0x37d   : > { %13540 = vst [vmem:[#allocation73_spill] sm:$0xff] %v11249_v62 }
 0x37e   : > { %v4406_v3 = vpack.c.bf16 %v4316_v8, %v4316_v8  ;;  %v3412_v52 = vmax.f32 %v3322_v56, 0.0 }
 0x37f   : > { %v2353_v29 = vpop.f32.mrf.mxu0  ;;  %v3119_v8 = vpop.f32.mrf.mxu2 }
 0x380   : > { %v4546_v2 = vunpack.c.l.b16 %v4406_v3  ;;  %v3502_v57 = vpack.c.bf16 %v3412_v52, %v3412_v52  ;;  %v2776_v55 = vadd.f32 %v2775_v5, %v2353_v29  ;;  %v4719_v5 = vshll.u32 %v11222_v35, 16 }
 0x381   : > { %v2778_v38 = vpop.f32.mrf.mxu1  ;;  %v5030_v3 = vrot.slane %v10232_v36, 1  ;;  %v4715_v35 = vshrl.u32 %v13532_v60, 16 }
 0x382   : > { %v11252_v32 = vpack.c.b16 %v4546_v2, %v4545_v43  ;;  %v4137_v34 = vunpack.c.l.bf16 %v3502_v57  ;;  %v3229_v1 = vadd.f32 %v3116_v19, %v2776_v55  ;;  %v4721_v57 = vrot.slane %v4719_v5, 1  ;;  %v8484_v5 = vld [vmem:[%s13190_s4 + $0x100] sm:$0xff] }
 0x383   : > { %v11269_v10 = vsel %vm1306_vm0, %v5030_v3, %v5031_v37  ;;  %v4352_v55 = vpack.c.bf16 %v10223_v23, %v10223_v23  ;;  %5587 = vmatpush.bf16.msra.mxu3 %v8484_v5 }
 0x384   : > { %13541 = vst [vmem:[#allocation74_spill] sm:$0xff] %v11252_v32  ;;  %v11254_v47 = vmul.f32 %v8096_v51, %v4137_v34  ;;  %v3323_v33 = vadd.f32 %v11086_v31, %v3229_v1  ;;  %5554 = vmatmul.bf16.gmra.mxu3 %v11252_v32  ;;  %6090 = vmatmul.bf16.gmra.mxu1 %v13533_v30  ;;  %v11266_v43 = vpop.f32.mrf.mxu3 }
 0x385   : > { %13545 = vst [vmem:[#allocation76_spill] sm:$0xff] %v11266_v43  ;;  %v4717_v1 = vor.u32 %v4715_v35, %v4713_v24  ;;  %v8098_v35 = vsel %vm11261_vm9, 1.0, %v13373_v40 }
 0x386   : > { %13542 = vst [vmem:[#allocation75_spill] sm:$0xff] %v11254_v47  ;;  %v3413_v20 = vmax.f32 %v3323_v33, 0.0 }
 0x387   : > { %v2356_v19 = vpop.f32.mrf.mxu0  ;;  %13546 = vst [vmem:[#allocation77_spill] sm:$0xff] %v11269_v10  ;;  %v3121_v2 = vpop.f32.mrf.mxu2  ;;  %v11285_v23 = vsel %vm783_vm1, %v4717_v1, %v4721_v57  ;;  %v4726_v1 = vshll.u32 %v10232_v36, 16 }
 0x388   : > { %v3503_v52 = vpack.c.bf16 %v3413_v20, %v3413_v20  ;;  %v2779_v29 = vadd.f32 %v2778_v38, %v2356_v19  ;;  %v8097_v20 = vsel %vm3683_vm7, 1.0, %v13373_v40  ;;  %v4634_v19 = vunpack.c.l.b16 %v4352_v55 }
 0x389   : > { %v2780_v34 = vpop.f32.mrf.mxu1 }
 0x38a   : > { %v3230_v51 = vadd.f32 %v3119_v8, %v2779_v29  ;;  %5777 = vmatmul.bf16.gmra.mxu0 %v11269_v10  ;;  %v4138_v38 = vunpack.c.l.bf16 %v3503_v52  ;;  %v11291_v43 = vpack.c.b16 %v4634_v19, %v4634_v19 }
 0x38c   : > { %v3324_v33 = vadd.f32 %v11086_v31, %v3230_v51  ;;  %6264 = vmatmul.bf16.gmra.mxu2 %v11285_v23  ;;  %v4318_v29 = vmul.f32 %v8097_v20, %v4138_v38  ;;  %v11293_v57 = vpop.f32.mrf.mxu3  ;;  %v4731_v20 = vshll.u32 %v10273_v45, 16 }
 0x38d   : > { %13547 = vst [vmem:[#allocation78_spill] sm:$0xff] %v11293_v57 }
 0x38e   : > { %v3414_v3 = vmax.f32 %v3324_v33, 0.0  ;;  %v4408_v33 = vpack.c.bf16 %v4318_v29, %v4318_v29  ;;  %v4733_v29 = vrot.slane %v4731_v20, 1 }
 0x38f   : > { %v2358_v8 = vpop.f32.mrf.mxu0  ;;  %v3124_v51 = vpop.f32.mrf.mxu2 }
 0x390   : > { %v3504_v24 = vpack.c.bf16 %v3414_v3, %v3414_v3  ;;  %v2781_v52 = vadd.f32 %v2780_v34, %v2358_v8  ;;  %v5033_v34 = vrot.slane %v11291_v43, 1 }
 0x391   : > { %v2783_v55 = vpop.f32.mrf.mxu1 }
 0x392   : > { %v4139_v62 = vunpack.c.l.bf16 %v3504_v24  ;;  %v3231_v10 = vadd.f32 %v3121_v2, %v2781_v52  ;;  %v4728_v24 = vrot.slane %v4726_v1, 1  ;;  %v4547_v2 = vunpack.c.l.b16 %v4408_v33 }
 0x393   : > { %v11301_v30 = vsel %vm1306_vm0, %v5031_v37, %v5033_v34 }
 0x394   : > { %v4319_v5 = vmul.f32 %v8098_v35, %v4139_v62  ;;  %v3325_v38 = vadd.f32 %v11086_v31, %v3231_v10  ;;  %6095 = vmatmul.bf16.gmra.mxu1 %v13532_v60  ;;  %13548 = vst [vmem:[#allocation79_spill] sm:$0xff] %v11301_v30  ;;  %v4724_v10 = vshrl.u32 %v10232_v36, 16 }
 0x396   : > { %v4409_v3 = vpack.c.bf16 %v4319_v5, %v4319_v5  ;;  %v3415_v8 = vmax.f32 %v3325_v38, 0.0  ;;  %v4729_v38 = vor.u32 %v4728_v24, %v4724_v10  ;;  %v4739_v10 = vshll.u32 %v11291_v43, 16 }
 0x397   : > { %v2361_v19 = vpop.f32.mrf.mxu0  ;;  %v3126_v62 = vpop.f32.mrf.mxu2 }
 0x398   : > { %v4548_v52 = vunpack.c.l.b16 %v4409_v3  ;;  %v3505_v57 = vpack.c.bf16 %v3415_v8, %v3415_v8  ;;  %v2784_v53 = vadd.f32 %v2783_v55, %v2361_v19  ;;  %v11309_v55 = vpop.f32.mrf.mxu3  ;;  %v11312_v37 = vsel %vm783_vm1, %v4729_v38, %v4733_v29 }
 0x399   : > { %v2785_v5 = vpop.f32.mrf.mxu1  ;;  %13549 = vst [vmem:[#allocation80_spill] sm:$0xff] %v11309_v55 }
 0x39a   : > { %v11304_v47 = vpack.c.b16 %v4548_v52, %v4547_v2  ;;  %v3232_v32 = vadd.f32 %v3124_v51, %v2784_v53  ;;  %5782 = vmatmul.bf16.gmra.mxu0 %v11301_v30  ;;  %v4140_v60 = vunpack.c.l.bf16 %v3505_v57  ;;  %v5036_v52 = vrot.slane %v10383_v15, 1 }
 0x39c   : > { %v3326_v1 = vadd.f32 %v11086_v31, %v3232_v32  ;;  %5559 = vmatmul.bf16.gmra.mxu3 %v11304_v47  ;;  %6269 = vmatmul.bf16.gmra.mxu2 %v11312_v37  ;;  %v4320_v20 = vmul.f32 %v8098_v35, %v4140_v60 }
 0x39e   : > { %v3416_v33 = vmax.f32 %v3326_v1, 0.0  ;;  %v4410_v24 = vpack.c.bf16 %v4320_v20, %v4320_v20 }
 0x39f   : > { %v2363_v34 = vpop.f32.mrf.mxu0  ;;  %v3129_v3 = vpop.f32.mrf.mxu2 }
 0x3a0   : > { %v3506_v53 = vpack.c.bf16 %v3416_v33, %v3416_v33  ;;  %v2786_v51 = vadd.f32 %v2785_v5, %v2363_v34  ;;  %v11323_v60 = vpop.f32.mrf.mxu3  ;;  %v13551_v5 = vld [vmem:[#allocation14_spill] sm:$0xff]  ;;  %v4735_v33 = vshrl.u32 %v10273_v45, 16  ;;  %v4549_v34 = vunpack.c.l.b16 %v4410_v24 }
 0x3a1   : > { %v2788_v57 = vpop.f32.mrf.mxu1  ;;  %13550 = vst [vmem:[#allocation81_spill] sm:$0xff] %v11323_v60  ;;  %v3536_v60 = vadd.s32 16, %v9625_v44 }
 0x3a2   : > { %v4141_v8 = vunpack.c.l.bf16 %v3506_v53  ;;  %v3233_v19 = vadd.f32 %v3126_v62, %v2786_v51  ;;  %v13552_v51 = vld [vmem:[#allocation16_spill] sm:$0xff] }
 0x3a3   : > { %vm3565_vm11 = vcmp.ge.s32.totalorder %v3536_v60, 0  ;;  %vm3583_vm5 = vcmp.lt.s32.totalorder %v3536_v60, 32 }
 0x3a4   : > { %v4321_v32 = vmul.f32 %v8098_v35, %v4141_v8  ;;  %v3327_v2 = vadd.f32 %v11086_v31, %v3233_v19  ;;  %6100 = vmatmul.bf16.gmra.mxu1 %v10232_v36  ;;  %v5035_v35 = vrot.slane %v13551_v5, 1  ;;  %v4357_v8 = vpack.c.bf16 %v13552_v51, %v13552_v51  ;;  %vm11347_vm12 = vmand %vm3565_vm11, %vm3583_vm5 }
 0x3a5   : > { %v8101_v19 = vsel %vm3782_vm10, 1.0, %v13373_v40  ;;  %vm3688_vm14 = vmand %vm11347_vm12, %vm3603_vm8 }
 0x3a6   : > { %v4411_v38 = vpack.c.bf16 %v4321_v32, %v4321_v32  ;;  %v3417_v1 = vmax.f32 %v3327_v2, 0.0  ;;  %v11331_v56 = vsel %vm1306_vm0, %v5035_v35, %v5036_v52  ;;  %v4741_v2 = vrot.slane %v4739_v10, 1  ;;  %vm3787_vm8 = vmand %vm11347_vm12, %vm3702_vm13 }
 0x3a7   : > { %v2366_v62 = vpop.f32.mrf.mxu0  ;;  %13553 = vst [vmem:[#allocation14_spill] sm:$0xff] %v11331_v56  ;;  %v3131_v32 = vpop.f32.mrf.mxu2  ;;  %v4635_v10 = vunpack.c.l.b16 %v4357_v8  ;;  %v8102_v8 = vsel %vm3688_vm14, 1.0, %v13373_v40 }
 0x3a8   : > { %v4550_v20 = vunpack.c.l.b16 %v4411_v38  ;;  %v3507_v53 = vpack.c.bf16 %v3417_v1, %v3417_v1  ;;  %v2789_v43 = vadd.f32 %v2788_v57, %v2366_v62  ;;  %v4737_v57 = vor.u32 %v4735_v33, %v4733_v29 }
 0x3a9   : > { %v2790_v24 = vpop.f32.mrf.mxu1  ;;  %v11351_v33 = vpack.c.b16 %v4635_v10, %v4635_v10 }
 0x3aa   : > { %v11334_v55 = vpack.c.b16 %v4550_v20, %v4549_v34  ;;  %v4142_v30 = vunpack.c.l.bf16 %v3507_v53  ;;  %v3234_v36 = vadd.f32 %v3129_v3, %v2789_v43  ;;  %5787 = vmatmul.bf16.gmra.mxu0 %v11331_v56  ;;  %v11342_v62 = vsel %vm783_vm1, %v4737_v57, %v4741_v2  ;;  %v11345_v3 = vpop.f32.mrf.mxu3 }
 0x3ab   : > { %13554 = vst [vmem:[#allocation16_spill] sm:$0xff] %v11345_v3  ;;  %v4746_v53 = vshll.u32 %v13551_v5, 16  ;;  %v4751_v2 = vshll.u32 %v10383_v15, 16 }
 0x3ac   : > { %v11337_v38 = vmul.f32 %v8101_v19, %v4142_v30  ;;  %v3328_v1 = vadd.f32 %v11086_v31, %v3234_v36  ;;  %5564 = vmatmul.bf16.gmra.mxu3 %v11334_v55  ;;  %6274 = vmatmul.bf16.gmra.mxu2 %v11342_v62  ;;  %v5038_v19 = vrot.slane %v11351_v33, 1 }
 0x3ad   : > { %v4748_v57 = vrot.slane %v4746_v53, 1 }
 0x3ae   : > { %v3418_v44 = vmax.f32 %v3328_v1, 0.0 }
 0x3af   : > { %v2368_v35 = vpop.f32.mrf.mxu0  ;;  %v3134_v36 = vpop.f32.mrf.mxu2 }
 0x3b0   : > { %v3508_v34 = vpack.c.bf16 %v3418_v44, %v3418_v44  ;;  %v2791_v29 = vadd.f32 %v2790_v24, %v2368_v35  ;;  %v8103_v44 = vsel %vm11347_vm12, 1.0, %v13373_v40 }
 0x3b1   : > { %v2793_v20 = vpop.f32.mrf.mxu1 }
 0x3b2   : > { %v3235_v60 = vadd.f32 %v3131_v32, %v2791_v29  ;;  %v4143_v43 = vunpack.c.l.bf16 %v3508_v34  ;;  %v11366_v35 = vpop.f32.mrf.mxu3  ;;  %v11369_v34 = vsel %vm1306_vm0, %v5036_v52, %v5038_v19 }
 0x3b3   : > { %13557 = vst [vmem:[#allocation82_spill] sm:$0xff] %v11366_v35 }
 0x3b4   : > { %v3329_v51 = vadd.f32 %v11086_v31, %v3235_v60  ;;  %6105 = vmatmul.bf16.gmra.mxu1 %v10273_v45  ;;  %v4323_v1 = vmul.f32 %v8102_v8, %v4143_v43  ;;  %13558 = vst [vmem:[#allocation83_spill] sm:$0xff] %v11369_v34  ;;  %v4744_v60 = vshrl.u32 %v13551_v5, 16 }
 0x3b6   : > { %v3419_v24 = vmax.f32 %v3329_v51, 0.0  ;;  %v4753_v51 = vrot.slane %v4751_v2, 1  ;;  %v4749_v43 = vor.u32 %v4748_v57, %v4744_v60 }
 0x3b7   : > { %v2371_v12 = vpop.f32.mrf.mxu0  ;;  %v3136_v29 = vpop.f32.mrf.mxu2 }
 0x3b8   : > { %v3509_v10 = vpack.c.bf16 %v3419_v24, %v3419_v24  ;;  %v2794_v32 = vadd.f32 %v2793_v20, %v2371_v12  ;;  %v4413_v20 = vpack.c.bf16 %v4323_v1, %v4323_v1  ;;  %v11375_v12 = vsel %vm783_vm1, %v4749_v43, %v4753_v51 }
 0x3b9   : > { %v2795_v53 = vpop.f32.mrf.mxu1 }
 0x3ba   : > { %v4144_v3 = vunpack.c.l.bf16 %v3509_v10  ;;  %v3236_v56 = vadd.f32 %v3134_v36, %v2794_v32  ;;  %5792 = vmatmul.bf16.gmra.mxu0 %v11369_v34  ;;  %v5179_v45 = vunpack.c.l.b16 %v4413_v20 }
 0x3bc   : > { %v4324_v8 = vmul.f32 %v8103_v44, %v4144_v3  ;;  %v3330_v24 = vadd.f32 %v11086_v31, %v3236_v56  ;;  %6279 = vmatmul.bf16.gmra.mxu2 %v11375_v12  ;;  %v11382_v3 = vpop.f32.mrf.mxu3 }
 0x3bd   : > { %13561 = vst [vmem:[#allocation86_spill] sm:$0xff] %v11382_v3 }
 0x3be   : > { %v4414_v35 = vpack.c.bf16 %v4324_v8, %v4324_v8  ;;  %v3420_v52 = vmax.f32 %v3330_v24, 0.0  ;;  %v8515_v8 = vld [vmem:[%s13190_s4 + $0x1f8] sm:$0xff] }
 0x3bf   : > { %v2373_v19 = vpop.f32.mrf.mxu0  ;;  %v11378_v32 = vpop.f32.mrf.mxu2  ;;  %6974 = vmatpush.bf16.msra.mxu1 %v8515_v8 }
 0x3c0   : > { %v5180_v2 = vunpack.c.l.b16 %v4414_v35  ;;  %v3510_v10 = vpack.c.bf16 %v3420_v52, %v3420_v52  ;;  %v2796_v36 = vadd.f32 %v2795_v53, %v2373_v19  ;;  %13559 = vst [vmem:[#allocation84_spill] sm:$0xff] %v11378_v32  ;;  %v8475_v35 = vld [vmem:[%s13190_s4 + $0xb8] sm:$0xff] }
 0x3c1   : > { %v11384_v56 = vpop.f32.mrf.mxu1  ;;  %v8523_v53 = vld [vmem:[%s13190_s4 + $0x238] sm:$0xff]  ;;  %6400 = vmatpush.bf16.msrb.mxu3 %v8475_v35 }
 0x3c2   : > { %v3237_v34 = vadd.f32 %v3136_v29, %v2796_v36  ;;  %v11380_v57 = vpack.c.b16 %v5180_v2, %v5179_v45  ;;  %13562 = vst [vmem:[#allocation87_spill] sm:$0xff] %v11384_v56  ;;  %v4145_v1 = vunpack.c.l.bf16 %v3510_v10  ;;  %v5041_v45 = vrot.slane %v10520_v25, 1  ;;  %7143 = vmatpush.bf16.msra.mxu2 %v8523_v53 }
 0x3c3   : > { %v4759_v29 = vshll.u32 %v11351_v33, 16  ;;  %v4755_v2 = vshrl.u32 %v10383_v15, 16  ;;  %v4362_v36 = vpack.c.bf16 %v10502_v54, %v10502_v54 }
 0x3c4   : > { %13560 = vst [vmem:[#allocation85_spill] sm:$0xff] %v11380_v57  ;;  %v3331_v60 = vadd.f32 %v11086_v31, %v3237_v34  ;;  %5569 = vmatmul.bf16.gmra.mxu3 %v11380_v57  ;;  %6110 = vmatmul.bf16.gmra.mxu1 %v13551_v5  ;;  %v5040_v31 = vrot.slane %v10446_v49, 1  ;;  %v8507_v34 = vld [vmem:[%s13190_s4 + $0x1b8] sm:$0xff]  ;;  %v4325_v24 = vmul.f32 %v8103_v44, %v4145_v1 }
 0x3c5   : > { %v4761_v10 = vrot.slane %v4759_v29, 1  ;;  %6805 = vmatpush.bf16.msra.mxu0 %v8507_v34  ;;  %v4757_v1 = vor.u32 %v4755_v2, %v4753_v51 }
 0x3c6   : > { %v3421_v43 = vmax.f32 %v3331_v60, 0.0  ;;  %v11407_v33 = vsel %vm1306_vm0, %v5040_v31, %v5041_v45  ;;  %v4415_v53 = vpack.c.bf16 %v4325_v24, %v4325_v24  ;;  %v11417_v31 = vpop.f32.mrf.mxu3 }
 0x3c7   : > { %v11397_v20 = vpop.f32.mrf.mxu0  ;;  %v11409_v19 = vpop.f32.mrf.mxu2  ;;  %13566 = vst [vmem:[#allocation91_spill] sm:$0xff] %v11417_v31  ;;  %v11420_v3 = vsel %vm783_vm1, %v4757_v1, %v4761_v10  ;;  %v4771_v10 = vshll.u32 %v10520_v25, 16 }
 0x3c8   : > { %13563 = vst [vmem:[#allocation88_spill] sm:$0xff] %v11397_v20  ;;  %v3511_v52 = vpack.c.bf16 %v3421_v43, %v3421_v43  ;;  %v5181_v34 = vunpack.c.l.b16 %v4415_v53  ;;  %v4764_v53 = vshrl.u32 %v10446_v49, 16 }
 0x3c9   : > { %13564 = vst [vmem:[#allocation89_spill] sm:$0xff] %v11409_v19  ;;  %v11415_v35 = vpop.f32.mrf.mxu1  ;;  %v4636_v19 = vunpack.c.l.b16 %v4362_v36 }
 0x3ca   : > { %v4146_v60 = vunpack.c.l.bf16 %v3511_v52  ;;  %5797 = vmatmul.bf16.gmra.mxu0 %v11407_v33  ;;  %13565 = vst [vmem:[#allocation90_spill] sm:$0xff] %v11415_v35 }
 0x3cb   : > { %v4652_v32 = vpack.c.b16 %v4636_v19, %v4636_v19 }
 0x3cc   : > { %v4326_v43 = vmul.f32 %v8103_v44, %v4146_v60  ;;  %6284 = vmatmul.bf16.gmra.mxu2 %v11420_v3  ;;  %v4766_v44 = vshll.u32 %v10446_v49, 16 }
 0x3cd   : > { %v5043_v2 = vrot.slane %v4652_v32, 1  ;;  %v4779_v31 = vshll.u32 %v4652_v32, 16 }
 0x3ce   : > { %v4416_v29 = vpack.c.bf16 %v4326_v43, %v4326_v43  ;;  %v4768_v60 = vrot.slane %v4766_v44, 1  ;;  %v4773_v43 = vrot.slane %v4771_v10, 1  ;;  %v5046_v10 = vrot.slane %v10604_v17, 1 }
 0x3cf   : > { %v11423_v54 = vpop.f32.mrf.mxu0  ;;  %v11425_v52 = vpop.f32.mrf.mxu2  ;;  %v11440_v19 = vsel %vm1306_vm0, %v5041_v45, %v5043_v2 }
 0x3d0   : > { %13567 = vst [vmem:[#allocation92_spill] sm:$0xff] %v11423_v54  ;;  %v5182_v8 = vunpack.c.l.b16 %v4416_v29  ;;  %v11433_v24 = vpop.f32.mrf.mxu3 }
 0x3d1   : > { %13568 = vst [vmem:[#allocation93_spill] sm:$0xff] %v11425_v52  ;;  %v11429_v51 = vpop.f32.mrf.mxu1 }
 0x3d2   : > { %v11427_v35 = vpack.c.b16 %v5182_v8, %v5181_v34  ;;  %13570 = vst [vmem:[#allocation95_spill] sm:$0xff] %v11429_v51  ;;  %v4769_v34 = vor.u32 %v4768_v60, %v4764_v53  ;;  %v5045_v53 = vrot.slane %v10574_v7, 1 }
 0x3d3   : > { %13571 = vst [vmem:[#allocation96_spill] sm:$0xff] %v11433_v24 }
 0x3d4   : > { %13569 = vst [vmem:[#allocation94_spill] sm:$0xff] %v11427_v35  ;;  %5574 = vmatmul.bf16.gmra.mxu3 %v11427_v35  ;;  %6115 = vmatmul.bf16.gmra.mxu1 %v10383_v15  ;;  %v11449_v8 = vsel %vm783_vm1, %v4769_v34, %v4773_v43  ;;  %v4367_v34 = vpack.c.bf16 %v10610_v14, %v10610_v14  ;;  %v5213_v30 = vrot.slane %v11427_v35, 1 }
 0x3d6   : > { %v4637_v52 = vunpack.c.l.b16 %v4367_v34 }
 0x3d7   : > { %v11437_v36 = vpop.f32.mrf.mxu0  ;;  %v11442_v1 = vpop.f32.mrf.mxu2 }
 0x3d8   : > { %13572 = vst [vmem:[#allocation97_spill] sm:$0xff] %v11437_v36  ;;  %v11452_v24 = vpop.f32.mrf.mxu3 }
 0x3d9   : > { %13573 = vst [vmem:[#allocation98_spill] sm:$0xff] %v11442_v1  ;;  %v11446_v29 = vpop.f32.mrf.mxu1  ;;  %v4781_v1 = vrot.slane %v4779_v31, 1  ;;  %v4786_v31 = vshll.u32 %v10574_v7, 16 }
 0x3da   : > { %5802 = vmatmul.bf16.gmra.mxu0 %v11440_v19  ;;  %13574 = vst [vmem:[#allocation99_spill] sm:$0xff] %v11446_v29 }
 0x3db   : > { %13575 = vst [vmem:[#allocation100_spill] sm:$0xff] %v11452_v24  ;;  %v4788_v34 = vrot.slane %v4786_v31, 1 }
 0x3dc   : > { %6289 = vmatmul.bf16.gmra.mxu2 %v11449_v8 }
 0x3df   : > { %v11454_v44 = vpop.f32.mrf.mxu0  ;;  %v11456_v45 = vpop.f32.mrf.mxu2 }
 0x3e0   : > { %13576 = vst [vmem:[#allocation101_spill] sm:$0xff] %v11454_v44  ;;  %v11468_v24 = vpop.f32.mrf.mxu3 }
 0x3e1   : > { %13577 = vst [vmem:[#allocation102_spill] sm:$0xff] %v11456_v45  ;;  %v11458_v2 = vpop.f32.mrf.mxu1  ;;  %v11471_v45 = vsel %vm1306_vm0, %v5045_v53, %v5046_v10 }
 0x3e2   : > { %13578 = vst [vmem:[#allocation103_spill] sm:$0xff] %v11458_v2 }
 0x3e3   : > { %13580 = vst [vmem:[#allocation105_spill] sm:$0xff] %v11468_v24  ;;  %v4653_v24 = vpack.c.b16 %v4637_v52, %v4637_v52 }
 0x3e4   : > { %5588 = vmatmul.bf16.vlgmr.msra.gmra.mxu3 %v11186_v27  ;;  %6120 = vmatmul.bf16.gmra.mxu1 %v10446_v49  ;;  %v4775_v27 = vshrl.u32 %v10520_v25, 16 }
 0x3e7   : > { %v11463_v60 = vpop.f32.mrf.mxu0  ;;  %v11473_v2 = vpop.f32.mrf.mxu2 }
 0x3e8   : > { %13579 = vst [vmem:[#allocation104_spill] sm:$0xff] %v11463_v60  ;;  %v4777_v60 = vor.u32 %v4775_v27, %v4773_v43  ;;  %v5048_v43 = vrot.slane %v4653_v24, 1 }
 0x3e9   : > { %13581 = vst [vmem:[#allocation106_spill] sm:$0xff] %v11473_v2  ;;  %v11477_v32 = vpop.f32.mrf.mxu1  ;;  %v11487_v2 = vpop.f32.mrf.mxu3 }
 0x3ea   : > { %5807 = vmatmul.bf16.gmra.mxu0 %v11471_v45  ;;  %13582 = vst [vmem:[#allocation107_spill] sm:$0xff] %v11477_v32  ;;  %v11480_v29 = vsel %vm783_vm1, %v4777_v60, %v4781_v1  ;;  %v4791_v1 = vshll.u32 %v10604_v17, 16  ;;  %v11498_v27 = vsel %vm1306_vm0, %v5046_v10, %v5048_v43 }
 0x3eb   : > { %13585 = vst [vmem:[#allocation110_spill] sm:$0xff] %v11487_v2  ;;  %v4784_v2 = vshrl.u32 %v10574_v7, 16 }
 0x3ec   : > { %6294 = vmatmul.bf16.gmra.mxu2 %v11480_v29 }
 0x3ed   : > { %v4789_v32 = vor.u32 %v4788_v34, %v4784_v2  ;;  %v8522_v2 = vld [vmem:[%s13190_s4 + $0x230] sm:$0xff]  ;;  %v5051_v34 = vrot.slane %v10701_v48, 1 }
 0x3ee   : > { %7144 = vmatpush.bf16.msra.mxu2 %v8522_v2 }
 0x3ef   : > { %v11483_v14 = vpop.f32.mrf.mxu0  ;;  %v11485_v53 = vpop.f32.mrf.mxu2 }
 0x3f0   : > { %13583 = vst [vmem:[#allocation108_spill] sm:$0xff] %v11483_v14 }
 0x3f1   : > { %13584 = vst [vmem:[#allocation109_spill] sm:$0xff] %v11485_v53  ;;  %v11489_v44 = vpop.f32.mrf.mxu1  ;;  %v4793_v53 = vrot.slane %v4791_v1, 1  ;;  %v8474_v1 = vld [vmem:[%s13190_s4 + $0xb0] sm:$0xff] }
 0x3f2   : > { %13586 = vst [vmem:[#allocation111_spill] sm:$0xff] %v11489_v44  ;;  %6401 = vmatpush.bf16.msrb.mxu3 %v8474_v1  ;;  %v4795_v1 = vshrl.u32 %v10604_v17, 16 }
 0x3f3   : > { %v11509_v14 = vsel %vm783_vm1, %v4789_v32, %v4793_v53 }
 0x3f4   : > { %5593 = vmatmul.bf16.gmra.mxu3 %v11219_v26  ;;  %6125 = vmatmul.bf16.gmra.mxu1 %v10520_v25 }
 0x3f7   : > { %v11495_v60 = vpop.f32.mrf.mxu0  ;;  %v11500_v52 = vpop.f32.mrf.mxu2 }
 0x3f8   : > { %13587 = vst [vmem:[#allocation112_spill] sm:$0xff] %v11495_v60  ;;  %v11504_v44 = vpop.f32.mrf.mxu3  ;;  %v4797_v60 = vor.u32 %v4795_v1, %v4793_v53 }
 0x3f9   : > { %13588 = vst [vmem:[#allocation113_spill] sm:$0xff] %v11500_v52  ;;  %v11506_v26 = vpop.f32.mrf.mxu1  ;;  %v8506_v52 = vld [vmem:[%s13190_s4 + $0x1b0] sm:$0xff] }
 0x3fa   : > { %5812 = vmatmul.bf16.gmra.mxu0 %v11498_v27  ;;  %13589 = vst [vmem:[#allocation114_spill] sm:$0xff] %v11504_v44  ;;  %v4799_v44 = vshll.u32 %v4653_v24, 16 }
 0x3fb   : > { %13590 = vst [vmem:[#allocation115_spill] sm:$0xff] %v11506_v26  ;;  %v8514_v26 = vld [vmem:[%s13190_s4 + $0x1f0] sm:$0xff]  ;;  %6806 = vmatpush.bf16.msra.mxu0 %v8506_v52 }
 0x3fc   : > { %6299 = vmatmul.bf16.gmra.mxu2 %v11509_v14  ;;  %6975 = vmatpush.bf16.msra.mxu1 %v8514_v26  ;;  %v4806_v26 = vshll.u32 %v10664_v6, 16 }
 0x3ff   : > { %v11512_v31 = vpop.f32.mrf.mxu0  ;;  %v11514_v10 = vpop.f32.mrf.mxu2 }
 0x400   : > { %13591 = vst [vmem:[#allocation116_spill] sm:$0xff] %v11512_v31  ;;  %v11525_v32 = vpop.f32.mrf.mxu3  ;;  %v4801_v31 = vrot.slane %v4799_v44, 1 }
 0x401   : > { %13592 = vst [vmem:[#allocation117_spill] sm:$0xff] %v11514_v10  ;;  %v11516_v43 = vpop.f32.mrf.mxu1 }
 0x402   : > { %13593 = vst [vmem:[#allocation118_spill] sm:$0xff] %v11516_v43  ;;  %v5050_v43 = vrot.slane %v10664_v6, 1  ;;  %v11550_v51 = vsel %vm783_vm1, %v4797_v60, %v4801_v31  ;;  %v4811_v60 = vshll.u32 %v10701_v48, 16 }
 0x403   : > { %13594 = vst [vmem:[#allocation119_spill] sm:$0xff] %v11525_v32 }
 0x404   : > { %5598 = vmatmul.bf16.gmra.mxu3 %v11241_v13  ;;  %6130 = vmatmul.bf16.gmra.mxu1 %v10574_v7  ;;  %v11539_v32 = vsel %vm1306_vm0, %v5050_v43, %v5051_v34 }
 0x407   : > { %v11529_v10 = vpop.f32.mrf.mxu0  ;;  %v11541_v24 = vpop.f32.mrf.mxu2 }
 0x408   : > { %13595 = vst [vmem:[#allocation120_spill] sm:$0xff] %v11529_v10  ;;  %v4372_v10 = vpack.c.bf16 %v10708_v41, %v10708_v41 }
 0x409   : > { %13596 = vst [vmem:[#allocation121_spill] sm:$0xff] %v11541_v24  ;;  %v11547_v2 = vpop.f32.mrf.mxu1  ;;  %v11553_v24 = vpop.f32.mrf.mxu3 }
 0x40a   : > { %5817 = vmatmul.bf16.gmra.mxu0 %v11539_v32  ;;  %13597 = vst [vmem:[#allocation122_spill] sm:$0xff] %v11547_v2  ;;  %v4638_v43 = vunpack.c.l.b16 %v4372_v10  ;;  %v4808_v10 = vrot.slane %v4806_v26, 1 }
 0x40b   : > { %13598 = vst [vmem:[#allocation123_spill] sm:$0xff] %v11553_v24 }
 0x40c   : > { %6304 = vmatmul.bf16.gmra.mxu2 %v11550_v51  ;;  %v4654_v41 = vpack.c.b16 %v4638_v43, %v4638_v43 }
 0x40e   : > { %v5053_v53 = vrot.slane %v4654_v41, 1 }
 0x40f   : > { %v11555_v36 = vpop.f32.mrf.mxu0  ;;  %v11557_v44 = vpop.f32.mrf.mxu2 }
 0x410   : > { %13599 = vst [vmem:[#allocation124_spill] sm:$0xff] %v11555_v36  ;;  %v11570_v24 = vsel %vm1306_vm0, %v5051_v34, %v5053_v53 }
 0x411   : > { %13600 = vst [vmem:[#allocation125_spill] sm:$0xff] %v11557_v44  ;;  %v11559_v52 = vpop.f32.mrf.mxu1  ;;  %v11567_v1 = vpop.f32.mrf.mxu3  ;;  %v4804_v44 = vshrl.u32 %v10664_v6, 16 }
 0x412   : > { %13601 = vst [vmem:[#allocation126_spill] sm:$0xff] %v11559_v52  ;;  %v4813_v52 = vrot.slane %v4811_v60, 1  ;;  %v5056_v60 = vrot.slane %v10787_v9, 1 }
 0x413   : > { %13603 = vst [vmem:[#allocation128_spill] sm:$0xff] %v11567_v1  ;;  %v4809_v36 = vor.u32 %v4808_v10, %v4804_v44  ;;  %v4377_v10 = vpack.c.bf16 %v10793_v39, %v10793_v39 }
 0x414   : > { %5603 = vmatmul.bf16.gmra.mxu3 %v11285_v23  ;;  %6135 = vmatmul.bf16.gmra.mxu1 %v10604_v17 }
 0x415   : > { %v11579_v54 = vsel %vm783_vm1, %v4809_v36, %v4813_v52  ;;  %v5055_v36 = vrot.slane %v10748_v58, 1  ;;  %v4639_v56 = vunpack.c.l.b16 %v4377_v10 }
 0x417   : > { %v11565_v31 = vpop.f32.mrf.mxu0  ;;  %v11572_v43 = vpop.f32.mrf.mxu2 }
 0x418   : > { %13602 = vst [vmem:[#allocation127_spill] sm:$0xff] %v11565_v31 }
 0x419   : > { %13604 = vst [vmem:[#allocation129_spill] sm:$0xff] %v11572_v43  ;;  %v11576_v2 = vpop.f32.mrf.mxu1  ;;  %v4819_v43 = vshll.u32 %v4654_v41, 16 }
 0x41a   : > { %5822 = vmatmul.bf16.gmra.mxu0 %v11570_v24  ;;  %13605 = vst [vmem:[#allocation130_spill] sm:$0xff] %v11576_v2 }
 0x41b   : > { %v4821_v2 = vrot.slane %v4819_v43, 1  ;;  %v4826_v43 = vshll.u32 %v10748_v58, 16 }
 0x41c   : > { %6309 = vmatmul.bf16.gmra.mxu2 %v11579_v54 }
 0x41f   : > { %v11582_v26 = vpop.f32.mrf.mxu0  ;;  %v11584_v1 = vpop.f32.mrf.mxu3 }
 0x420   : > { %13606 = vst [vmem:[#allocation131_spill] sm:$0xff] %v11582_v26  ;;  %v11586_v34 = vpop.f32.mrf.mxu2 }
 0x421   : > { %13607 = vst [vmem:[#allocation132_spill] sm:$0xff] %v11584_v1  ;;  %v11588_v53 = vpop.f32.mrf.mxu1  ;;  %v11599_v1 = vsel %vm1306_vm0, %v5055_v36, %v5056_v60 }
 0x422   : > { %13608 = vst [vmem:[#allocation133_spill] sm:$0xff] %v11586_v34 }
 0x423   : > { %13609 = vst [vmem:[#allocation134_spill] sm:$0xff] %v11588_v53  ;;  %v4815_v53 = vshrl.u32 %v10701_v48, 16 }
 0x424   : > { %5608 = vmatmul.bf16.gmra.mxu3 %v11312_v37  ;;  %6140 = vmatmul.bf16.gmra.mxu1 %v10664_v6  ;;  %13611 = vst [vmem:[#allocation136_spill] sm:$0xff] %v11599_v1 }
 0x427   : > { %v11593_v44 = vpop.f32.mrf.mxu0  ;;  %v11605_v41 = vpop.f32.mrf.mxu3 }
 0x428   : > { %13610 = vst [vmem:[#allocation135_spill] sm:$0xff] %v11593_v44  ;;  %v11601_v34 = vpop.f32.mrf.mxu2  ;;  %v4817_v44 = vor.u32 %v4815_v53, %v4813_v52 }
 0x429   : > { %13612 = vst [vmem:[#allocation137_spill] sm:$0xff] %v11601_v34  ;;  %v11607_v26 = vpop.f32.mrf.mxu1  ;;  %v4655_v34 = vpack.c.b16 %v4639_v56, %v4639_v56 }
 0x42a   : > { %5827 = vmatmul.bf16.gmra.mxu0 %v11599_v1  ;;  %13613 = vst [vmem:[#allocation138_spill] sm:$0xff] %v11605_v41  ;;  %v11610_v31 = vsel %vm783_vm1, %v4817_v44, %v4821_v2  ;;  %v4831_v2 = vshll.u32 %v10787_v9, 16  ;;  %v4828_v44 = vrot.slane %v4826_v43, 1 }
 0x42b   : > { %13614 = vst [vmem:[#allocation139_spill] sm:$0xff] %v11607_v26  ;;  %v5058_v52 = vrot.slane %v4655_v34, 1 }
 0x42c   : > { %6314 = vmatmul.bf16.gmra.mxu2 %v11610_v31 }
 0x42d   : > { %v11628_v10 = vsel %vm1306_vm0, %v5056_v60, %v5058_v52 }
 0x42e   : > { %13620 = vst [vmem:[#allocation145_spill] sm:$0xff] %v11628_v10 }
 0x42f   : > { %v11613_v39 = vpop.f32.mrf.mxu0  ;;  %v11621_v41 = vpop.f32.mrf.mxu3 }
 0x430   : > { %13615 = vst [vmem:[#allocation140_spill] sm:$0xff] %v11613_v39  ;;  %v11615_v36 = vpop.f32.mrf.mxu2 }
 0x431   : > { %13616 = vst [vmem:[#allocation141_spill] sm:$0xff] %v11615_v36  ;;  %v11617_v20 = vpop.f32.mrf.mxu1  ;;  %v4824_v36 = vshrl.u32 %v10748_v58, 16 }
 0x432   : > { %13617 = vst [vmem:[#allocation142_spill] sm:$0xff] %v11617_v20  ;;  %v4833_v20 = vrot.slane %v4831_v2, 1  ;;  %v8473_v2 = vld [vmem:[%s13190_s4 + $0xa8] sm:$0xff] }
 0x433   : > { %13618 = vst [vmem:[#allocation143_spill] sm:$0xff] %v11621_v41  ;;  %v4829_v41 = vor.u32 %v4828_v44, %v4824_v36  ;;  %v5061_v36 = vrot.slane %v10874_v0, 1  ;;  %v4839_v44 = vshll.u32 %v4655_v34, 16  ;;  %6402 = vmatpush.bf16.msrb.mxu3 %v8473_v2  ;;  %v4382_v34 = vpack.c.bf16 %v10881_v16, %v10881_v16  ;;  %v8505_v2 = vld [vmem:[%s13190_s4 + $0x1a8] sm:$0xff] }
 0x434   : > { %5613 = vmatmul.bf16.gmra.mxu3 %v11342_v62  ;;  %6145 = vmatmul.bf16.gmra.mxu1 %v10701_v48 }
 0x435   : > { %v11637_v39 = vsel %vm783_vm1, %v4829_v41, %v4833_v20  ;;  %v8521_v41 = vld [vmem:[%s13190_s4 + $0x228] sm:$0xff]  ;;  %6807 = vmatpush.bf16.msra.mxu0 %v8505_v2 }
 0x436   : > { %7145 = vmatpush.bf16.msra.mxu2 %v8521_v41  ;;  %v8513_v41 = vld [vmem:[%s13190_s4 + $0x1e8] sm:$0xff] }
 0x437   : > { %v11625_v53 = vpop.f32.mrf.mxu0  ;;  %6976 = vmatpush.bf16.msra.mxu1 %v8513_v41  ;;  %v4844_v41 = vshrl.u32 %v10842_v46, 16 }
 0x438   : > { %13619 = vst [vmem:[#allocation144_spill] sm:$0xff] %v11625_v53  ;;  %v11630_v56 = vpop.f32.mrf.mxu2  ;;  %v11640_v53 = vpop.f32.mrf.mxu3 }
 0x439   : > { %13621 = vst [vmem:[#allocation146_spill] sm:$0xff] %v11630_v56  ;;  %v11634_v26 = vpop.f32.mrf.mxu1 }
 0x43a   : > { %5832 = vmatmul.bf16.gmra.mxu0 %v11628_v10  ;;  %13622 = vst [vmem:[#allocation147_spill] sm:$0xff] %v11634_v26  ;;  %v4841_v10 = vrot.slane %v4839_v44, 1 }
 0x43b   : > { %13623 = vst [vmem:[#allocation148_spill] sm:$0xff] %v11640_v53 }
 0x43c   : > { %6319 = vmatmul.bf16.gmra.mxu2 %v11637_v39 }
 0x43f   : > { %v11642_v43 = vpop.f32.mrf.mxu0 }
 0x440   : > { %13624 = vst [vmem:[#allocation149_spill] sm:$0xff] %v11642_v43  ;;  %v11644_v60 = vpop.f32.mrf.mxu2  ;;  %v4835_v43 = vshrl.u32 %v10787_v9, 16 }
 0x441   : > { %13625 = vst [vmem:[#allocation150_spill] sm:$0xff] %v11644_v60  ;;  %v11646_v52 = vpop.f32.mrf.mxu1 }
 0x442   : > { %13626 = vst [vmem:[#allocation151_spill] sm:$0xff] %v11646_v52  ;;  %v5060_v52 = vrot.slane %v10842_v46, 1 }
 0x444   : > { %5618 = vmatmul.bf16.gmra.mxu3 %v11375_v12  ;;  %6150 = vmatmul.bf16.gmra.mxu1 %v10748_v58  ;;  %v11663_v56 = vsel %vm1306_vm0, %v5060_v52, %v5061_v36 }
 0x445   : > { %13629 = vst [vmem:[#allocation154_spill] sm:$0xff] %v11663_v56 }
 0x447   : > { %v11657_v53 = vpop.f32.mrf.mxu3  ;;  %v11659_v60 = vpop.f32.mrf.mxu0 }
 0x448   : > { %13627 = vst [vmem:[#allocation152_spill] sm:$0xff] %v11657_v53  ;;  %v11665_v26 = vpop.f32.mrf.mxu2  ;;  %v4837_v53 = vor.u32 %v4835_v43, %v4833_v20 }
 0x449   : > { %13628 = vst [vmem:[#allocation153_spill] sm:$0xff] %v11659_v60  ;;  %v11677_v52 = vpop.f32.mrf.mxu1 }
 0x44a   : > { %13630 = vst [vmem:[#allocation155_spill] sm:$0xff] %v11665_v26  ;;  %5837 = vmatmul.bf16.gmra.mxu0 %v11663_v56  ;;  %v11680_v44 = vsel %vm783_vm1, %v4837_v53, %v4841_v10  ;;  %v4640_v26 = vunpack.c.l.b16 %v4382_v34  ;;  %v4851_v53 = vshll.u32 %v10874_v0, 16 }
 0x44b   : > { %13631 = vst [vmem:[#allocation156_spill] sm:$0xff] %v11677_v52  ;;  %v4846_v52 = vshll.u32 %v10842_v46, 16 }
 0x44c   : > { %6324 = vmatmul.bf16.gmra.mxu2 %v11680_v44  ;;  %v4656_v58 = vpack.c.b16 %v4640_v26, %v4640_v26 }
 0x44d   : > { %v4848_v34 = vrot.slane %v4846_v52, 1 }
 0x44e   : > { %v5063_v20 = vrot.slane %v4656_v58, 1 }
 0x44f   : > { %v11683_v16 = vpop.f32.mrf.mxu3  ;;  %v11685_v60 = vpop.f32.mrf.mxu0 }
 0x450   : > { %13632 = vst [vmem:[#allocation157_spill] sm:$0xff] %v11683_v16  ;;  %v11687_v56 = vpop.f32.mrf.mxu2  ;;  %v11700_v2 = vsel %vm1306_vm0, %v5061_v36, %v5063_v20  ;;  %v4853_v16 = vrot.slane %v4851_v53, 1  ;;  %v5066_v53 = vrot.slane %v10956_v42, 1 }
 0x451   : > { %13633 = vst [vmem:[#allocation158_spill] sm:$0xff] %v11685_v60  ;;  %v11689_v1 = vpop.f32.mrf.mxu1 }
 0x452   : > { %13634 = vst [vmem:[#allocation159_spill] sm:$0xff] %v11687_v56 }
 0x453   : > { %13635 = vst [vmem:[#allocation160_spill] sm:$0xff] %v11689_v1  ;;  %v4849_v1 = vor.u32 %v4848_v34, %v4844_v41  ;;  %v5065_v41 = vrot.slane %v10921_v63, 1 }
 0x454   : > { %5623 = vmatmul.bf16.gmra.mxu3 %v11420_v3  ;;  %6155 = vmatmul.bf16.gmra.mxu1 %v10787_v9  ;;  %13638 = vst [vmem:[#allocation163_spill] sm:$0xff] %v11700_v2 }
 0x455   : > { %v11709_v60 = vsel %vm783_vm1, %v4849_v1, %v4853_v16 }
 0x456   : > { %13641 = vst [vmem:[#allocation166_spill] sm:$0xff] %v11709_v60 }
 0x457   : > { %v11695_v10 = vpop.f32.mrf.mxu3  ;;  %v11697_v43 = vpop.f32.mrf.mxu0 }
 0x458   : > { %13636 = vst [vmem:[#allocation161_spill] sm:$0xff] %v11695_v10  ;;  %v11702_v26 = vpop.f32.mrf.mxu2 }
 0x459   : > { %13637 = vst [vmem:[#allocation162_spill] sm:$0xff] %v11697_v43  ;;  %v11706_v56 = vpop.f32.mrf.mxu1 }
 0x45a   : > { %13639 = vst [vmem:[#allocation164_spill] sm:$0xff] %v11702_v26  ;;  %5842 = vmatmul.bf16.gmra.mxu0 %v11700_v2  ;;  %v4859_v26 = vshll.u32 %v4656_v58, 16 }
 0x45b   : > { %13640 = vst [vmem:[#allocation165_spill] sm:$0xff] %v11706_v56  ;;  %v4855_v56 = vshrl.u32 %v10874_v0, 16 }
 0x45c   : > { %6329 = vmatmul.bf16.gmra.mxu2 %v11709_v60 }
 0x45d   : > { %v4857_v43 = vor.u32 %v4855_v56, %v4853_v16  ;;  %v4871_v16 = vshll.u32 %v10956_v42, 16 }
 0x45f   : > { %v11712_v10 = vpop.f32.mrf.mxu3  ;;  %v11714_v52 = vpop.f32.mrf.mxu0 }
 0x460   : > { %13642 = vst [vmem:[#allocation167_spill] sm:$0xff] %v11712_v10  ;;  %v11716_v36 = vpop.f32.mrf.mxu2  ;;  %v4387_v10 = vpack.c.bf16 %v10958_v21, %v10958_v21 }
 0x461   : > { %13643 = vst [vmem:[#allocation168_spill] sm:$0xff] %v11714_v52  ;;  %v11718_v20 = vpop.f32.mrf.mxu1  ;;  %v4861_v52 = vrot.slane %v4859_v26, 1  ;;  %v4866_v26 = vshll.u32 %v10921_v63, 16 }
 0x462   : > { %13644 = vst [vmem:[#allocation169_spill] sm:$0xff] %v11716_v36  ;;  %v11731_v36 = vsel %vm1306_vm0, %v5065_v41, %v5066_v53 }
 0x463   : > { %13645 = vst [vmem:[#allocation170_spill] sm:$0xff] %v11718_v20 }
 0x464   : > { %5628 = vmatmul.bf16.gmra.mxu3 %v11449_v8  ;;  %6160 = vmatmul.bf16.gmra.mxu1 %v10842_v46  ;;  %13648 = vst [vmem:[#allocation173_spill] sm:$0xff] %v11731_v36 }
 0x467   : > { %v11723_v34 = vpop.f32.mrf.mxu3  ;;  %v11725_v1 = vpop.f32.mrf.mxu0 }
 0x468   : > { %13646 = vst [vmem:[#allocation171_spill] sm:$0xff] %v11723_v34  ;;  %v11733_v20 = vpop.f32.mrf.mxu2  ;;  %v4641_v34 = vunpack.c.l.b16 %v4387_v10 }
 0x469   : > { %13647 = vst [vmem:[#allocation172_spill] sm:$0xff] %v11725_v1  ;;  %v11737_v58 = vpop.f32.mrf.mxu1  ;;  %v11740_v1 = vsel %vm783_vm1, %v4857_v43, %v4861_v52  ;;  %v4868_v52 = vrot.slane %v4866_v26, 1 }
 0x46a   : > { %13649 = vst [vmem:[#allocation174_spill] sm:$0xff] %v11733_v20  ;;  %5847 = vmatmul.bf16.gmra.mxu0 %v11731_v36  ;;  %v4657_v20 = vpack.c.b16 %v4641_v34, %v4641_v34 }
 0x46b   : > { %13650 = vst [vmem:[#allocation175_spill] sm:$0xff] %v11737_v58 }
 0x46c   : > { %6334 = vmatmul.bf16.gmra.mxu2 %v11740_v1  ;;  %v5068_v56 = vrot.slane %v4657_v20, 1 }
 0x46e   : > { %v11760_v58 = vsel %vm1306_vm0, %v5066_v53, %v5068_v56 }
 0x46f   : > { %v11743_v21 = vpop.f32.mrf.mxu3  ;;  %v11745_v41 = vpop.f32.mrf.mxu0  ;;  %13657 = vst [vmem:[#allocation182_spill] sm:$0xff] %v11760_v58 }
 0x470   : > { %13651 = vst [vmem:[#allocation176_spill] sm:$0xff] %v11743_v21  ;;  %v11747_v2 = vpop.f32.mrf.mxu2 }
 0x471   : > { %13652 = vst [vmem:[#allocation177_spill] sm:$0xff] %v11745_v41  ;;  %v11749_v46 = vpop.f32.mrf.mxu1 }
 0x472   : > { %13653 = vst [vmem:[#allocation178_spill] sm:$0xff] %v11747_v2  ;;  %v4864_v2 = vshrl.u32 %v10921_v63, 16 }
 0x473   : > { %13654 = vst [vmem:[#allocation179_spill] sm:$0xff] %v11749_v46  ;;  %v4873_v46 = vrot.slane %v4871_v16, 1  ;;  %v8472_v16 = vld [vmem:[%s13190_s4 + $0xa0] sm:$0xff] }
 0x474   : > { %5633 = vmatmul.bf16.gmra.mxu3 %v11480_v29  ;;  %6165 = vmatmul.bf16.gmra.mxu1 %v10874_v0  ;;  %v4869_v21 = vor.u32 %v4868_v52, %v4864_v2  ;;  %v8520_v2 = vld [vmem:[%s13190_s4 + $0x220] sm:$0xff]  ;;  %v4879_v52 = vshll.u32 %v4657_v20, 16  ;;  %v4392_v20 = vpack.c.bf16 %v11016_v28, %v11016_v28 }
 0x475   : > { %6403 = vmatpush.bf16.msrb.mxu3 %v8472_v16  ;;  %7146 = vmatpush.bf16.msra.mxu2 %v8520_v2  ;;  %v8504_v16 = vld [vmem:[%s13190_s4 + $0x1a0] sm:$0xff] }
 0x476   : > { %v11769_v36 = vsel %vm783_vm1, %v4869_v21, %v4873_v46  ;;  %v5071_v21 = vrot.slane %v11013_v22, 1  ;;  %v8512_v2 = vld [vmem:[%s13190_s4 + $0x1e0] sm:$0xff]  ;;  %6808 = vmatpush.bf16.msra.mxu0 %v8504_v16 }
 0x477   : > { %v11755_v10 = vpop.f32.mrf.mxu3  ;;  %v11757_v43 = vpop.f32.mrf.mxu0  ;;  %6977 = vmatpush.bf16.msra.mxu1 %v8512_v2  ;;  %v4884_v2 = vshrl.u32 %v10991_v59, 16 }
 0x478   : > { %13655 = vst [vmem:[#allocation180_spill] sm:$0xff] %v11755_v10  ;;  %v11762_v34 = vpop.f32.mrf.mxu2  ;;  %v4881_v10 = vrot.slane %v4879_v52, 1 }
 0x479   : > { %13656 = vst [vmem:[#allocation181_spill] sm:$0xff] %v11757_v43  ;;  %v11766_v41 = vpop.f32.mrf.mxu1 }
 0x47a   : > { %13658 = vst [vmem:[#allocation183_spill] sm:$0xff] %v11762_v34  ;;  %5852 = vmatmul.bf16.gmra.mxu0 %v11760_v58 }
 0x47b   : > { %13659 = vst [vmem:[#allocation184_spill] sm:$0xff] %v11766_v41 }
 0x47c   : > { %6339 = vmatmul.bf16.gmra.mxu2 %v11769_v36 }
 0x47f   : > { %v11772_v43 = vpop.f32.mrf.mxu3  ;;  %v11774_v26 = vpop.f32.mrf.mxu0 }
 0x480   : > { %13660 = vst [vmem:[#allocation185_spill] sm:$0xff] %v11772_v43  ;;  %v11776_v53 = vpop.f32.mrf.mxu2  ;;  %v4875_v43 = vshrl.u32 %v10956_v42, 16 }
 0x481   : > { %13661 = vst [vmem:[#allocation186_spill] sm:$0xff] %v11774_v26  ;;  %v11778_v56 = vpop.f32.mrf.mxu1 }
 0x482   : > { %13662 = vst [vmem:[#allocation187_spill] sm:$0xff] %v11776_v53 }
 0x483   : > { %13663 = vst [vmem:[#allocation188_spill] sm:$0xff] %v11778_v56  ;;  %v5070_v56 = vrot.slane %v10991_v59, 1 }
 0x484   : > { %5638 = vmatmul.bf16.gmra.mxu3 %v11509_v14  ;;  %6170 = vmatmul.bf16.gmra.mxu1 %v10921_v63 }
 0x485   : > { %v11795_v41 = vsel %vm1306_vm0, %v5070_v56, %v5071_v21 }
 0x486   : > { %13666 = vst [vmem:[#allocation191_spill] sm:$0xff] %v11795_v41 }
 0x487   : > { %v11789_v34 = vpop.f32.mrf.mxu3  ;;  %v11791_v53 = vpop.f32.mrf.mxu0 }
 0x488   : > { %13664 = vst [vmem:[#allocation189_spill] sm:$0xff] %v11789_v34  ;;  %v11797_v26 = vpop.f32.mrf.mxu2 }
 0x489   : > { %13665 = vst [vmem:[#allocation190_spill] sm:$0xff] %v11791_v53  ;;  %v11809_v56 = vpop.f32.mrf.mxu1  ;;  %v4877_v53 = vor.u32 %v4875_v43, %v4873_v46 }
 0x48a   : > { %13667 = vst [vmem:[#allocation192_spill] sm:$0xff] %v11797_v26  ;;  %5857 = vmatmul.bf16.gmra.mxu0 %v11795_v41  ;;  %v4642_v26 = vunpack.c.l.b16 %v4392_v20 }
 0x48b   : > { %13668 = vst [vmem:[#allocation193_spill] sm:$0xff] %v11809_v56  ;;  %v11812_v52 = vsel %vm783_vm1, %v4877_v53, %v4881_v10  ;;  %v4886_v56 = vshll.u32 %v10991_v59, 16  ;;  %v4891_v10 = vshll.u32 %v11013_v22, 16 }
 0x48c   : > { %6344 = vmatmul.bf16.gmra.mxu2 %v11812_v52  ;;  %v4658_v58 = vpack.c.b16 %v4642_v26, %v4642_v26 }
 0x48d   : > { %v4888_v20 = vrot.slane %v4886_v56, 1 }
 0x48e   : > { %v5073_v46 = vrot.slane %v4658_v58, 1 }
 0x48f   : > { %v11815_v28 = vpop.f32.mrf.mxu3  ;;  %v11817_v34 = vpop.f32.mrf.mxu0 }
 0x490   : > { %13669 = vst [vmem:[#allocation194_spill] sm:$0xff] %v11815_v28  ;;  %v11819_v41 = vpop.f32.mrf.mxu2  ;;  %v11832_v16 = vsel %vm1306_vm0, %v5071_v21, %v5073_v46 }
 0x491   : > { %13670 = vst [vmem:[#allocation195_spill] sm:$0xff] %v11817_v34  ;;  %v11821_v63 = vpop.f32.mrf.mxu1  ;;  %v4889_v34 = vor.u32 %v4888_v20, %v4884_v2  ;;  %v5075_v2 = vrot.slane %v11062_v11, 1 }
 0x492   : > { %13671 = vst [vmem:[#allocation196_spill] sm:$0xff] %v11819_v41  ;;  %v4893_v41 = vrot.slane %v4891_v10, 1  ;;  %v5076_v10 = vrot.slane %v11102_v4, 1 }
 0x493   : > { %13672 = vst [vmem:[#allocation197_spill] sm:$0xff] %v11821_v63 }
 0x494   : > { %5643 = vmatmul.bf16.gmra.mxu3 %v11550_v51  ;;  %6175 = vmatmul.bf16.gmra.mxu1 %v10956_v42  ;;  %13675 = vst [vmem:[#allocation200_spill] sm:$0xff] %v11832_v16  ;;  %v11841_v28 = vsel %vm783_vm1, %v4889_v34, %v4893_v41 }
 0x497   : > { %v11827_v43 = vpop.f32.mrf.mxu3  ;;  %v11829_v53 = vpop.f32.mrf.mxu0 }
 0x498   : > { %13673 = vst [vmem:[#allocation198_spill] sm:$0xff] %v11827_v43  ;;  %v11834_v26 = vpop.f32.mrf.mxu2 }
 0x499   : > { %13674 = vst [vmem:[#allocation199_spill] sm:$0xff] %v11829_v53  ;;  %v11838_v63 = vpop.f32.mrf.mxu1 }
 0x49a   : > { %13676 = vst [vmem:[#allocation201_spill] sm:$0xff] %v11834_v26  ;;  %5862 = vmatmul.bf16.gmra.mxu0 %v11832_v16  ;;  %v4899_v26 = vshll.u32 %v4658_v58, 16 }
 0x49b   : > { %13677 = vst [vmem:[#allocation202_spill] sm:$0xff] %v11838_v63  ;;  %v4397_v63 = vpack.c.bf16 %v11105_v61, %v11105_v61 }
 0x49c   : > { %6349 = vmatmul.bf16.gmra.mxu2 %v11841_v28 }
 0x49d   : > { %v4643_v43 = vunpack.c.l.b16 %v4397_v63 }
 0x49f   : > { %v11844_v53 = vpop.f32.mrf.mxu3  ;;  %v11846_v56 = vpop.f32.mrf.mxu0 }
 0x4a0   : > { %13678 = vst [vmem:[#allocation203_spill] sm:$0xff] %v11844_v53  ;;  %v11848_v21 = vpop.f32.mrf.mxu2  ;;  %v4901_v53 = vrot.slane %v4899_v26, 1  ;;  %v4906_v26 = vshll.u32 %v11062_v11, 16 }
 0x4a1   : > { %13679 = vst [vmem:[#allocation204_spill] sm:$0xff] %v11846_v56  ;;  %v11850_v46 = vpop.f32.mrf.mxu1  ;;  %v4895_v56 = vshrl.u32 %v11013_v22, 16 }
 0x4a2   : > { %13680 = vst [vmem:[#allocation205_spill] sm:$0xff] %v11848_v21  ;;  %v11863_v21 = vsel %vm1306_vm0, %v5075_v2, %v5076_v10 }
 0x4a3   : > { %13681 = vst [vmem:[#allocation206_spill] sm:$0xff] %v11850_v46 }
 0x4a4   : > { %5648 = vmatmul.bf16.gmra.mxu3 %v11579_v54  ;;  %6180 = vmatmul.bf16.gmra.mxu1 %v10991_v59  ;;  %13684 = vst [vmem:[#allocation209_spill] sm:$0xff] %v11863_v21 }
 0x4a7   : > { %v11855_v20 = vpop.f32.mrf.mxu3  ;;  %v11857_v34 = vpop.f32.mrf.mxu0 }
 0x4a8   : > { %13682 = vst [vmem:[#allocation207_spill] sm:$0xff] %v11855_v20  ;;  %v11865_v46 = vpop.f32.mrf.mxu2  ;;  %v4897_v20 = vor.u32 %v4895_v56, %v4893_v41 }
 0x4a9   : > { %13683 = vst [vmem:[#allocation208_spill] sm:$0xff] %v11857_v34  ;;  %v11869_v58 = vpop.f32.mrf.mxu1 }
 0x4aa   : > { %13685 = vst [vmem:[#allocation210_spill] sm:$0xff] %v11865_v46  ;;  %5867 = vmatmul.bf16.gmra.mxu0 %v11863_v21  ;;  %v11872_v34 = vsel %vm783_vm1, %v4897_v20, %v4901_v53  ;;  %v4659_v46 = vpack.c.b16 %v4643_v43, %v4643_v43  ;;  %v4911_v53 = vshll.u32 %v11102_v4, 16  ;;  %v4908_v20 = vrot.slane %v4906_v26, 1 }
 0x4ab   : > { %13686 = vst [vmem:[#allocation211_spill] sm:$0xff] %v11869_v58 }
 0x4ac   : > { %6354 = vmatmul.bf16.gmra.mxu2 %v11872_v34  ;;  %v5078_v41 = vrot.slane %v4659_v46, 1 }
 0x4ae   : > { %v11892_v58 = vsel %vm1306_vm0, %v5076_v10, %v5078_v41 }
 0x4af   : > { %v11875_v61 = vpop.f32.mrf.mxu3  ;;  %v11877_v2 = vpop.f32.mrf.mxu0  ;;  %13693 = vst [vmem:[#allocation218_spill] sm:$0xff] %v11892_v58 }
 0x4b0   : > { %13687 = vst [vmem:[#allocation212_spill] sm:$0xff] %v11875_v61  ;;  %v11879_v16 = vpop.f32.mrf.mxu2 }
 0x4b1   : > { %13688 = vst [vmem:[#allocation213_spill] sm:$0xff] %v11877_v2  ;;  %v11881_v59 = vpop.f32.mrf.mxu1 }
 0x4b2   : > { %13689 = vst [vmem:[#allocation214_spill] sm:$0xff] %v11879_v16  ;;  %v4904_v16 = vshrl.u32 %v11062_v11, 16 }
 0x4b3   : > { %13690 = vst [vmem:[#allocation215_spill] sm:$0xff] %v11881_v59  ;;  %v4913_v59 = vrot.slane %v4911_v53, 1  ;;  %v8471_v53 = vld [vmem:[%s13190_s4 + $0x98] sm:$0xff] }
 0x4b4   : > { %5653 = vmatmul.bf16.gmra.mxu3 %v11610_v31  ;;  %6185 = vmatmul.bf16.gmra.mxu1 %v11013_v22  ;;  %v4909_v61 = vor.u32 %v4908_v20, %v4904_v16  ;;  %v8519_v16 = vld [vmem:[%s13190_s4 + $0x218] sm:$0xff]  ;;  %v4919_v20 = vshll.u32 %v4659_v46, 16  ;;  %v13705_v22 = vld [vmem:[#allocation67_spill] sm:$0xff] }
 0x4b5   : > { %6404 = vmatpush.bf16.msrb.mxu3 %v8471_v53  ;;  %7147 = vmatpush.bf16.msra.mxu2 %v8519_v16  ;;  %v4402_v46 = vpack.c.bf16 %v13705_v22, %v13705_v22  ;;  %v8503_v53 = vld [vmem:[%s13190_s4 + $0x198] sm:$0xff] }
 0x4b6   : > { %v11901_v21 = vsel %vm783_vm1, %v4909_v61, %v4913_v59  ;;  %v5081_v61 = vrot.slane %v11176_v18, 1  ;;  %v8511_v16 = vld [vmem:[%s13190_s4 + $0x1d8] sm:$0xff]  ;;  %6809 = vmatpush.bf16.msra.mxu0 %v8503_v53 }
 0x4b7   : > { %v11887_v63 = vpop.f32.mrf.mxu3  ;;  %v11889_v56 = vpop.f32.mrf.mxu0  ;;  %6978 = vmatpush.bf16.msra.mxu1 %v8511_v16 }
 0x4b8   : > { %13691 = vst [vmem:[#allocation216_spill] sm:$0xff] %v11887_v63  ;;  %v11894_v43 = vpop.f32.mrf.mxu2  ;;  %v4915_v63 = vshrl.u32 %v11102_v4, 16 }
 0x4b9   : > { %13692 = vst [vmem:[#allocation217_spill] sm:$0xff] %v11889_v56  ;;  %v11898_v2 = vpop.f32.mrf.mxu1 }
 0x4ba   : > { %13694 = vst [vmem:[#allocation219_spill] sm:$0xff] %v11894_v43  ;;  %5872 = vmatmul.bf16.gmra.mxu0 %v11892_v58  ;;  %v4921_v58 = vrot.slane %v4919_v20, 1 }
 0x4bb   : > { %13695 = vst [vmem:[#allocation220_spill] sm:$0xff] %v11898_v2 }
 0x4bc   : > { %6359 = vmatmul.bf16.gmra.mxu2 %v11901_v21 }
 0x4bf   : > { %v11904_v56 = vpop.f32.mrf.mxu3  ;;  %v11906_v26 = vpop.f32.mrf.mxu0 }
 0x4c0   : > { %13696 = vst [vmem:[#allocation221_spill] sm:$0xff] %v11904_v56  ;;  %v11908_v10 = vpop.f32.mrf.mxu2 }
 0x4c1   : > { %13697 = vst [vmem:[#allocation222_spill] sm:$0xff] %v11906_v26  ;;  %v11910_v41 = vpop.f32.mrf.mxu1 }
 0x4c2   : > { %13698 = vst [vmem:[#allocation223_spill] sm:$0xff] %v11908_v10 }
 0x4c3   : > { %13699 = vst [vmem:[#allocation224_spill] sm:$0xff] %v11910_v41  ;;  %v13702_v41 = vld [vmem:[#allocation3_spill] sm:$0xff] }
 0x4c4   : > { %5658 = vmatmul.bf16.gmra.mxu3 %v11637_v39  ;;  %6190 = vmatmul.bf16.gmra.mxu1 %v11062_v11  ;;  %v5080_v2 = vrot.slane %v13702_v41, 1  ;;  %v4924_v16 = vshrl.u32 %v13702_v41, 16 }
 0x4c6   : > { %v11927_v26 = vsel %vm1306_vm0, %v5080_v2, %v5081_v61 }
 0x4c7   : > { %v11921_v43 = vpop.f32.mrf.mxu3  ;;  %v11923_v10 = vpop.f32.mrf.mxu0  ;;  %13703 = vst [vmem:[#allocation227_spill] sm:$0xff] %v11927_v26 }
 0x4c8   : > { %13700 = vst [vmem:[#allocation225_spill] sm:$0xff] %v11921_v43  ;;  %v11929_v56 = vpop.f32.mrf.mxu2 }
 0x4c9   : > { %13701 = vst [vmem:[#allocation226_spill] sm:$0xff] %v11923_v10  ;;  %v11941_v2 = vpop.f32.mrf.mxu1  ;;  %v4917_v10 = vor.u32 %v4915_v63, %v4913_v59 }
 0x4ca   : > { %13704 = vst [vmem:[#allocation228_spill] sm:$0xff] %v11929_v56  ;;  %5877 = vmatmul.bf16.gmra.mxu0 %v11927_v26  ;;  %v4644_v56 = vunpack.c.l.b16 %v4402_v46 }
 0x4cb   : > { %13706 = vst [vmem:[#allocation67_spill] sm:$0xff] %v11941_v2  ;;  %v11944_v20 = vsel %vm783_vm1, %v4917_v10, %v4921_v58  ;;  %v4926_v2 = vshll.u32 %v13702_v41, 16  ;;  %v4931_v58 = vshll.u32 %v11176_v18, 16 }
 0x4cc   : > { %6364 = vmatmul.bf16.gmra.mxu2 %v11944_v20  ;;  %v4660_v11 = vpack.c.b16 %v4644_v56, %v4644_v56 }
 0x4cd   : > { %v4928_v46 = vrot.slane %v4926_v2, 1 }
 0x4ce   : > { %v5083_v59 = vrot.slane %v4660_v11, 1 }
 0x4cf   : > { %v11947_v22 = vpop.f32.mrf.mxu3  ;;  %v11949_v43 = vpop.f32.mrf.mxu0 }
 0x4d0   : > { %13707 = vst [vmem:[#allocation229_spill] sm:$0xff] %v11947_v22  ;;  %v11951_v26 = vpop.f32.mrf.mxu2  ;;  %v11964_v53 = vsel %vm1306_vm0, %v5081_v61, %v5083_v59 }
 0x4d1   : > { %13708 = vst [vmem:[#allocation230_spill] sm:$0xff] %v11949_v43  ;;  %v11953_v42 = vpop.f32.mrf.mxu1  ;;  %v4929_v43 = vor.u32 %v4928_v46, %v4924_v16  ;;  %v13723_v16 = vld [vmem:[#allocation70_spill] sm:$0xff] }
 0x4d2   : > { %13709 = vst [vmem:[#allocation231_spill] sm:$0xff] %v11951_v26  ;;  %v4933_v26 = vrot.slane %v4931_v58, 1  ;;  %v13720_v58 = vld [vmem:[#allocation74_spill] sm:$0xff] }
 0x4d3   : > { %13710 = vst [vmem:[#allocation232_spill] sm:$0xff] %v11953_v42 }
 0x4d4   : > { %5663 = vmatmul.bf16.gmra.mxu3 %v11680_v44  ;;  %6195 = vmatmul.bf16.gmra.mxu1 %v11102_v4  ;;  %13713 = vst [vmem:[#allocation235_spill] sm:$0xff] %v11964_v53  ;;  %v11973_v22 = vsel %vm783_vm1, %v4929_v43, %v4933_v26 }
 0x4d7   : > { %v11959_v63 = vpop.f32.mrf.mxu3  ;;  %v11961_v10 = vpop.f32.mrf.mxu0 }
 0x4d8   : > { %13711 = vst [vmem:[#allocation233_spill] sm:$0xff] %v11959_v63  ;;  %v11966_v56 = vpop.f32.mrf.mxu2  ;;  %v4939_v63 = vshll.u32 %v4660_v11, 16 }
 0x4d9   : > { %13712 = vst [vmem:[#allocation234_spill] sm:$0xff] %v11961_v10  ;;  %v11970_v42 = vpop.f32.mrf.mxu1 }
 0x4da   : > { %13714 = vst [vmem:[#allocation236_spill] sm:$0xff] %v11966_v56  ;;  %5882 = vmatmul.bf16.gmra.mxu0 %v11964_v53  ;;  %v5086_v56 = vrot.slane %v13720_v58, 1  ;;  %v4935_v53 = vshrl.u32 %v11176_v18, 16  ;;  %v4941_v4 = vrot.slane %v4939_v63, 1  ;;  %v4946_v63 = vshll.u32 %v13723_v16, 16 }
 0x4db   : > { %13715 = vst [vmem:[#allocation237_spill] sm:$0xff] %v11970_v42  ;;  %v5085_v42 = vrot.slane %v13723_v16, 1 }
 0x4dc   : > { %6369 = vmatmul.bf16.gmra.mxu2 %v11973_v22 }
 0x4df   : > { %v11976_v10 = vpop.f32.mrf.mxu3  ;;  %v11978_v2 = vpop.f32.mrf.mxu0 }
 0x4e0   : > { %13716 = vst [vmem:[#allocation238_spill] sm:$0xff] %v11976_v10  ;;  %v11980_v61 = vpop.f32.mrf.mxu2  ;;  %v13724_v10 = vld [vmem:[#allocation75_spill] sm:$0xff] }
 0x4e1   : > { %13717 = vst [vmem:[#allocation239_spill] sm:$0xff] %v11978_v2  ;;  %v11982_v59 = vpop.f32.mrf.mxu1  ;;  %v4407_v2 = vpack.c.bf16 %v13724_v10, %v13724_v10 }
 0x4e2   : > { %13718 = vst [vmem:[#allocation240_spill] sm:$0xff] %v11980_v61  ;;  %v11995_v61 = vsel %vm1306_vm0, %v5085_v42, %v5086_v56 }
 0x4e3   : > { %13719 = vst [vmem:[#allocation241_spill] sm:$0xff] %v11982_v59 }
 0x4e4   : > { %5668 = vmatmul.bf16.gmra.mxu3 %v11709_v60  ;;  %6200 = vmatmul.bf16.gmra.mxu1 %v13702_v41  ;;  %13725 = vst [vmem:[#allocation75_spill] sm:$0xff] %v11995_v61  ;;  %v4645_v41 = vunpack.c.l.b16 %v4407_v2 }
 0x4e7   : > { %v11987_v46 = vpop.f32.mrf.mxu3  ;;  %v11989_v43 = vpop.f32.mrf.mxu0 }
 0x4e8   : > { %13721 = vst [vmem:[#allocation242_spill] sm:$0xff] %v11987_v46  ;;  %v11997_v59 = vpop.f32.mrf.mxu2  ;;  %v4937_v46 = vor.u32 %v4935_v53, %v4933_v26 }
 0x4e9   : > { %13722 = vst [vmem:[#allocation243_spill] sm:$0xff] %v11989_v43  ;;  %v12001_v11 = vpop.f32.mrf.mxu1 }
 0x4ea   : > { %13726 = vst [vmem:[#allocation244_spill] sm:$0xff] %v11997_v59  ;;  %5887 = vmatmul.bf16.gmra.mxu0 %v11995_v61  ;;  %v12004_v43 = vsel %vm783_vm1, %v4937_v46, %v4941_v4  ;;  %v4661_v59 = vpack.c.b16 %v4645_v41, %v4645_v41  ;;  %v4951_v4 = vshll.u32 %v13720_v58, 16  ;;  %v4948_v46 = vrot.slane %v4946_v63, 1 }
 0x4eb   : > { %13727 = vst [vmem:[#allocation245_spill] sm:$0xff] %v12001_v11 }
 0x4ec   : > { %6374 = vmatmul.bf16.gmra.mxu2 %v12004_v43  ;;  %v5088_v26 = vrot.slane %v4661_v59, 1 }
 0x4ee   : > { %v12024_v11 = vsel %vm1306_vm0, %v5086_v56, %v5088_v26 }
 0x4ef   : > { %v12007_v10 = vpop.f32.mrf.mxu3  ;;  %v12009_v42 = vpop.f32.mrf.mxu0  ;;  %13734 = vst [vmem:[#allocation252_spill] sm:$0xff] %v12024_v11 }
 0x4f0   : > { %13728 = vst [vmem:[#allocation246_spill] sm:$0xff] %v12007_v10  ;;  %v12011_v0 = vpop.f32.mrf.mxu2 }
 0x4f1   : > { %13729 = vst [vmem:[#allocation247_spill] sm:$0xff] %v12009_v42  ;;  %v12013_v60 = vpop.f32.mrf.mxu1 }
 0x4f2   : > { %13730 = vst [vmem:[#allocation248_spill] sm:$0xff] %v12011_v0  ;;  %v4944_v0 = vshrl.u32 %v13723_v16, 16 }
 0x4f3   : > { %13731 = vst [vmem:[#allocation249_spill] sm:$0xff] %v12013_v60  ;;  %v4953_v60 = vrot.slane %v4951_v4, 1  ;;  %v8470_v4 = vld [vmem:[%s13190_s4 + $0x90] sm:$0xff] }
 0x4f4   : > { %5673 = vmatmul.bf16.gmra.mxu3 %v11740_v1  ;;  %6205 = vmatmul.bf16.gmra.mxu1 %v11176_v18  ;;  %v4949_v10 = vor.u32 %v4948_v46, %v4944_v0  ;;  %v8518_v0 = vld [vmem:[%s13190_s4 + $0x210] sm:$0xff]  ;;  %v4959_v46 = vshll.u32 %v4661_v59, 16  ;;  %v4412_v59 = vpack.c.bf16 %v11337_v38, %v11337_v38 }
 0x4f5   : > { %6405 = vmatpush.bf16.msrb.mxu3 %v8470_v4  ;;  %7148 = vmatpush.bf16.msra.mxu2 %v8518_v0  ;;  %v8502_v4 = vld [vmem:[%s13190_s4 + $0x190] sm:$0xff] }
 0x4f6   : > { %v12033_v61 = vsel %vm783_vm1, %v4949_v10, %v4953_v60  ;;  %v5091_v10 = vrot.slane %v11334_v55, 1  ;;  %v8510_v0 = vld [vmem:[%s13190_s4 + $0x1d0] sm:$0xff]  ;;  %6810 = vmatpush.bf16.msra.mxu0 %v8502_v4 }
 0x4f7   : > { %v12019_v53 = vpop.f32.mrf.mxu3  ;;  %v12021_v2 = vpop.f32.mrf.mxu0  ;;  %6979 = vmatpush.bf16.msra.mxu1 %v8510_v0 }
 0x4f8   : > { %13732 = vst [vmem:[#allocation250_spill] sm:$0xff] %v12019_v53  ;;  %v12026_v41 = vpop.f32.mrf.mxu2  ;;  %v4961_v53 = vrot.slane %v4959_v46, 1 }
 0x4f9   : > { %13733 = vst [vmem:[#allocation251_spill] sm:$0xff] %v12021_v2  ;;  %v12030_v42 = vpop.f32.mrf.mxu1 }
 0x4fa   : > { %13735 = vst [vmem:[#allocation253_spill] sm:$0xff] %v12026_v41  ;;  %5892 = vmatmul.bf16.gmra.mxu0 %v12024_v11 }
 0x4fb   : > { %13736 = vst [vmem:[#allocation254_spill] sm:$0xff] %v12030_v42 }
 0x4fc   : > { %6379 = vmatmul.bf16.gmra.mxu2 %v12033_v61 }
 0x4ff   : > { %v12036_v2 = vpop.f32.mrf.mxu3  ;;  %v12038_v63 = vpop.f32.mrf.mxu0 }
 0x500   : > { %13737 = vst [vmem:[#allocation255_spill] sm:$0xff] %v12036_v2  ;;  %v12040_v56 = vpop.f32.mrf.mxu2  ;;  %v4955_v2 = vshrl.u32 %v13720_v58, 16 }
 0x501   : > { %13738 = vst [vmem:[#allocation256_spill] sm:$0xff] %v12038_v63  ;;  %v12042_v26 = vpop.f32.mrf.mxu1 }
 0x502   : > { %13739 = vst [vmem:[#allocation257_spill] sm:$0xff] %v12040_v56 }
 0x503   : > { %13740 = vst [vmem:[#allocation258_spill] sm:$0xff] %v12042_v26  ;;  %v5090_v26 = vrot.slane %v11304_v47, 1 }
 0x504   : > { %5678 = vmatmul.bf16.gmra.mxu3 %v11769_v36  ;;  %6210 = vmatmul.bf16.gmra.mxu1 %v13723_v16 }
 0x505   : > { %v12059_v42 = vsel %vm1306_vm0, %v5090_v26, %v5091_v10 }
 0x506   : > { %13743 = vst [vmem:[#allocation261_spill] sm:$0xff] %v12059_v42 }
 0x507   : > { %v12053_v41 = vpop.f32.mrf.mxu3  ;;  %v12055_v56 = vpop.f32.mrf.mxu0 }
 0x508   : > { %13741 = vst [vmem:[#allocation259_spill] sm:$0xff] %v12053_v41  ;;  %v12061_v63 = vpop.f32.mrf.mxu2 }
 0x509   : > { %13742 = vst [vmem:[#allocation260_spill] sm:$0xff] %v12055_v56  ;;  %v12073_v26 = vpop.f32.mrf.mxu1  ;;  %v4957_v56 = vor.u32 %v4955_v2, %v4953_v60  ;;  %v8601_v2 = vld [vmem:[%s13189_s3] ss:$0 sm:$0xff] }
 0x50a   : > { %13744 = vst [vmem:[#allocation262_spill] sm:$0xff] %v12061_v63  ;;  %5897 = vmatmul.bf16.gmra.mxu0 %v12059_v42  ;;  %v4646_v63 = vunpack.c.l.b16 %v4412_v59 }
 0x50b   : > { %13745 = vst [vmem:[#allocation263_spill] sm:$0xff] %v12073_v26  ;;  %v12076_v46 = vsel %vm783_vm1, %v4957_v56, %v4961_v53  ;;  %v4966_v26 = vshll.u32 %v11304_v47, 16  ;;  %v4971_v53 = vshll.u32 %v11334_v55, 16  ;;  %v13750_v56 = vld [vmem:[#allocation21_spill] sm:$0xff] }
 0x50c   : > { %6384 = vmatmul.bf16.gmra.mxu2 %v12076_v46  ;;  %v4662_v11 = vpack.c.b16 %v4646_v63, %v4646_v63  ;;  %v3332_v59 = vadd.f32 %v8601_v2, %v13750_v56 }
 0x50d   : > { %v4968_v0 = vrot.slane %v4966_v26, 1 }
 0x50e   : > { %v5093_v60 = vrot.slane %v4662_v11, 1  ;;  %v3422_v2 = vmax.f32 %v3332_v59, 0.0  ;;  %v8501_v59 = vld [vmem:[%s13190_s4 + $0x188] sm:$0xff] }
 0x50f   : > { %v12079_v38 = vpop.f32.mrf.mxu3  ;;  %v12081_v41 = vpop.f32.mrf.mxu0  ;;  %6811 = vmatpush.bf16.msra.mxu0 %v8501_v59 }
 0x510   : > { %13746 = vst [vmem:[#allocation264_spill] sm:$0xff] %v12079_v38  ;;  %v12083_v42 = vpop.f32.mrf.mxu2  ;;  %v4973_v38 = vrot.slane %v4971_v53, 1 }
 0x511   : > { %13747 = vst [vmem:[#allocation265_spill] sm:$0xff] %v12081_v41  ;;  %v12085_v16 = vpop.f32.mrf.mxu1  ;;  %v4964_v41 = vshrl.u32 %v11304_v47, 16 }
 0x512   : > { %13748 = vst [vmem:[#allocation266_spill] sm:$0xff] %v12083_v42  ;;  %v12100_v42 = vsel %vm1306_vm0, %v5091_v10, %v5093_v60  ;;  %v8516_v10 = vld [vmem:[%s13190_s4 + $0x200] sm:$0xff]  ;;  %v3512_v60 = vpack.c.bf16 %v3422_v2, %v3422_v2  ;;  %v8106_v2 = vsel %vm3787_vm8, 1.0, %v13373_v40 }
 0x513   : > { %13749 = vst [vmem:[#allocation267_spill] sm:$0xff] %v12085_v16  ;;  %v8500_v40 = vld [vmem:[%s13190_s4 + $0x180] sm:$0xff] }
 0x514   : > { %5683 = vmatmul.bf16.gmra.mxu3 %v11812_v52  ;;  %6215 = vmatmul.bf16.gmra.mxu1 %v13720_v58  ;;  %v8517_v58 = vld [vmem:[%s13190_s4 + $0x208] sm:$0xff] }
 0x515   : > { %7149 = vmatpush.bf16.msra.mxu2 %v8517_v58  ;;  %6812 = vmatpush.bf16.msra.mxu0 %v8500_v40 }
 0x517   : > { %v12095_v4 = vpop.f32.mrf.mxu3  ;;  %v12097_v63 = vpop.f32.mrf.mxu0 }
 0x518   : > { %13751 = vst [vmem:[#allocation21_spill] sm:$0xff] %v12095_v4  ;;  %v12102_v16 = vpop.f32.mrf.mxu2  ;;  %v4969_v4 = vor.u32 %v4968_v0, %v4964_v41  ;;  %v8509_v41 = vld [vmem:[%s13190_s4 + $0x1c8] sm:$0xff] }
 0x519   : > { %13752 = vst [vmem:[#allocation268_spill] sm:$0xff] %v12097_v63  ;;  %v12109_v56 = vpop.f32.mrf.mxu1  ;;  %7150 = vmatpush.bf16.msra.mxu2 %v8516_v10  ;;  %6980 = vmatpush.bf16.msra.mxu1 %v8509_v41  ;;  %v4979_v10 = vshll.u32 %v4662_v11, 16  ;;  %v5212_v41 = vrot.slane %v11380_v57, 1  ;;  %v4975_v11 = vshrl.u32 %v11334_v55, 16 }
 0x51a   : > { %13753 = vst [vmem:[#allocation269_spill] sm:$0xff] %v12102_v16  ;;  %5902 = vmatmul.bf16.gmra.mxu0 %v12100_v42  ;;  %v12115_v26 = vsel %vm783_vm1, %v4969_v4, %v4973_v38  ;;  %v4147_v4 = vunpack.c.l.bf16 %v3512_v60 }
 0x51b   : > { %13754 = vst [vmem:[#allocation270_spill] sm:$0xff] %v12109_v56  ;;  %v12152_v59 = vsel %vm1306_vm0, %v5212_v41, %v5213_v30 }
 0x51c   : > { %6389 = vmatmul.bf16.gmra.mxu2 %v12115_v26 }
 0x51d   : > { %6981 = vmatpush.bf16.msra.mxu1 %v8508_v50 }
 0x51f   : > { %v12118_v53 = vpop.f32.mrf.mxu3  ;;  %v12120_v16 = vpop.f32.mrf.mxu0 }
 0x520   : > { %13755 = vst [vmem:[#allocation271_spill] sm:$0xff] %v12118_v53  ;;  %v12126_v58 = vpop.f32.mrf.mxu2 }
 0x521   : > { %13756 = vst [vmem:[#allocation272_spill] sm:$0xff] %v12120_v16  ;;  %v12134_v0 = vpop.f32.mrf.mxu1  ;;  %v4981_v16 = vrot.slane %v4979_v10, 1 }
 0x522   : > { %13757 = vst [vmem:[#allocation273_spill] sm:$0xff] %v12126_v58  ;;  %v4327_v58 = vmul.f32 %v8106_v2, %v4147_v4 }
 0x523   : > { %13758 = vst [vmem:[#allocation274_spill] sm:$0xff] %v12134_v0 }
 0x524   : > { %5688 = vmatmul.bf16.gmra.mxu3 %v11841_v28  ;;  %6220 = vmatmul.bf16.gmra.mxu1 %v11304_v47  ;;  %v4417_v4 = vpack.c.bf16 %v4327_v58, %v4327_v58 }
 0x526   : > { %v5188_v63 = vunpack.c.l.b16 %v4417_v4 }
 0x527   : > { %v12143_v56 = vpop.f32.mrf.mxu3  ;;  %v12145_v60 = vpop.f32.mrf.mxu0 }
 0x528   : > { %13759 = vst [vmem:[#allocation275_spill] sm:$0xff] %v12143_v56  ;;  %v12154_v0 = vpop.f32.mrf.mxu2  ;;  %v12170_v10 = vpack.c.b16 %v5188_v63, %v5188_v63 }
 0x529   : > { %13760 = vst [vmem:[#allocation276_spill] sm:$0xff] %v12145_v60  ;;  %v12158_v2 = vpop.f32.mrf.mxu1  ;;  %v4977_v60 = vor.u32 %v4975_v11, %v4973_v38  ;;  %v13772_v11 = vld [vmem:[#allocation5_spill] sm:$0xff] }
 0x52a   : > { %13761 = vst [vmem:[#allocation277_spill] sm:$0xff] %v12154_v0  ;;  %5907 = vmatmul.bf16.gmra.mxu0 %v12152_v59  ;;  %v5215_v58 = vrot.slane %v12170_v10, 1 }
 0x52b   : > { %13762 = vst [vmem:[#allocation278_spill] sm:$0xff] %v12158_v2  ;;  %v12161_v50 = vsel %vm783_vm1, %v4977_v60, %v4981_v16 }
 0x52c   : > { %6394 = vmatmul.bf16.gmra.mxu2 %v12161_v50  ;;  %v12182_v60 = vsel %vm1306_vm0, %v5213_v30, %v5215_v58  ;;  %v8469_v30 = vld [vmem:[%s13190_s4 + $0x88] sm:$0xff] }
 0x52d   : > { %13769 = vst [vmem:[#allocation285_spill] sm:$0xff] %v12182_v60  ;;  %6406 = vmatpush.bf16.msrb.mxu3 %v8469_v30 }
 0x52f   : > { %v12164_v41 = vpop.f32.mrf.mxu3  ;;  %v12166_v56 = vpop.f32.mrf.mxu0 }
 0x530   : > { %13763 = vst [vmem:[#allocation279_spill] sm:$0xff] %v12164_v41  ;;  %v12168_v0 = vpop.f32.mrf.mxu2  ;;  %v13873_v41 = vld [vmem:[#allocation43_spill] sm:$0xff] }
 0x531   : > { %13764 = vst [vmem:[#allocation280_spill] sm:$0xff] %v12166_v56  ;;  %v12172_v53 = vpop.f32.mrf.mxu1 }
 0x532   : > { %13765 = vst [vmem:[#allocation281_spill] sm:$0xff] %v12168_v0 }
 0x533   : > { %13766 = vst [vmem:[#allocation282_spill] sm:$0xff] %v12172_v53 }
 0x534   : > { %5693 = vmatmul.bf16.gmra.mxu3 %v11872_v34  ;;  %6225 = vmatmul.bf16.gmra.mxu1 %v11334_v55 }
 0x537   : > { %v12176_v38 = vpop.f32.mrf.mxu3  ;;  %v12178_v16 = vpop.f32.mrf.mxu0 }
 0x538   : > { %13767 = vst [vmem:[#allocation283_spill] sm:$0xff] %v12176_v38  ;;  %v12184_v40 = vpop.f32.mrf.mxu2  ;;  %v13867_v38 = vld [vmem:[#allocation65_spill] sm:$0xff] }
 0x539   : > { %13768 = vst [vmem:[#allocation284_spill] sm:$0xff] %v12178_v16  ;;  %v12187_v63 = vpop.f32.mrf.mxu1 }
 0x53a   : > { %13770 = vst [vmem:[#allocation286_spill] sm:$0xff] %v12184_v40  ;;  %5912 = vmatmul.bf16.gmra.mxu0 %v12182_v60  ;;  %v13892_v60 = vld [vmem:[#allocation176_spill] sm:$0xff] }
 0x53b   : > { %13771 = vst [vmem:[#allocation287_spill] sm:$0xff] %v12187_v63 }
 0x53c   : > { %7151 = vmatmul.bf16.vlgmr.msra.gmra.mxu2 %v13772_v11 }
 0x53f   : > { %v12190_v4 = vpop.f32.mrf.mxu3  ;;  %v12192_v0 = vpop.f32.mrf.mxu0 }
 0x540   : > { %13773 = vst [vmem:[#allocation5_spill] sm:$0xff] %v12190_v4  ;;  %v12194_v53 = vpop.f32.mrf.mxu2 }
 0x541   : > { %13774 = vst [vmem:[#allocation288_spill] sm:$0xff] %v12192_v0  ;;  %v12196_v16 = vpop.f32.mrf.mxu1  ;;  %v13780_v0 = vld [vmem:[#allocation15_spill] sm:$0xff] }
 0x542   : > { %13775 = vst [vmem:[#allocation289_spill] sm:$0xff] %v12194_v53 }
 0x543   : > { %13776 = vst [vmem:[#allocation290_spill] sm:$0xff] %v12196_v16  ;;  %v13782_v16 = vld [vmem:[#allocation72_spill] sm:$0xff] }
 0x544   : > { %5698 = vmatmul.bf16.gmra.mxu3 %v11901_v21  ;;  %6982 = vmatmul.bf16.vlgmr.msra.gmra.mxu1 %v11241_v13 }
 0x547   : > { %v12203_v58 = vpop.f32.mrf.mxu3  ;;  %v12205_v40 = vpop.f32.mrf.mxu0 }
 0x548   : > { %13777 = vst [vmem:[#allocation291_spill] sm:$0xff] %v12203_v58  ;;  %v12207_v63 = vpop.f32.mrf.mxu2 }
 0x549   : > { %13778 = vst [vmem:[#allocation292_spill] sm:$0xff] %v12205_v40  ;;  %v12210_v53 = vpop.f32.mrf.mxu1 }
 0x54a   : > { %13779 = vst [vmem:[#allocation293_spill] sm:$0xff] %v12207_v63  ;;  %6813 = vmatmul.bf16.vlgmr.msra.gmra.mxu0 %v13780_v0 }
 0x54b   : > { %13781 = vst [vmem:[#allocation15_spill] sm:$0xff] %v12210_v53  ;;  %v13790_v53 = vld [vmem:[#allocation10_spill] sm:$0xff] }
 0x54c   : > { %7156 = vmatmul.bf16.gmra.mxu2 %v13782_v16 }
 0x54f   : > { %v12213_v2 = vpop.f32.mrf.mxu3  ;;  %v12215_v56 = vpop.f32.mrf.mxu0 }
 0x550   : > { %13783 = vst [vmem:[#allocation72_spill] sm:$0xff] %v12213_v2  ;;  %v12217_v4 = vpop.f32.mrf.mxu2  ;;  %v13792_v2 = vld [vmem:[#allocation77_spill] sm:$0xff] }
 0x551   : > { %13784 = vst [vmem:[#allocation294_spill] sm:$0xff] %v12215_v56  ;;  %v12219_v13 = vpop.f32.mrf.mxu1 }
 0x552   : > { %13785 = vst [vmem:[#allocation295_spill] sm:$0xff] %v12217_v4 }
 0x553   : > { %13786 = vst [vmem:[#allocation296_spill] sm:$0xff] %v12219_v13 }
 0x554   : > { %5703 = vmatmul.bf16.gmra.mxu3 %v11944_v20  ;;  %6987 = vmatmul.bf16.gmra.mxu1 %v11285_v23 }
 0x557   : > { %v12223_v30 = vpop.f32.mrf.mxu3  ;;  %v12225_v63 = vpop.f32.mrf.mxu0 }
 0x558   : > { %13787 = vst [vmem:[#allocation297_spill] sm:$0xff] %v12223_v30  ;;  %v12227_v0 = vpop.f32.mrf.mxu2 }
 0x559   : > { %13788 = vst [vmem:[#allocation298_spill] sm:$0xff] %v12225_v63  ;;  %v12230_v40 = vpop.f32.mrf.mxu1 }
 0x55a   : > { %13789 = vst [vmem:[#allocation299_spill] sm:$0xff] %v12227_v0  ;;  %6818 = vmatmul.bf16.gmra.mxu0 %v13790_v53 }
 0x55b   : > { %13791 = vst [vmem:[#allocation10_spill] sm:$0xff] %v12230_v40  ;;  %v13800_v40 = vld [vmem:[#allocation12_spill] sm:$0xff] }
 0x55c   : > { %7161 = vmatmul.bf16.gmra.mxu2 %v13792_v2 }
 0x55f   : > { %v12233_v56 = vpop.f32.mrf.mxu3  ;;  %v12235_v4 = vpop.f32.mrf.mxu0 }
 0x560   : > { %13793 = vst [vmem:[#allocation77_spill] sm:$0xff] %v12233_v56  ;;  %v12237_v13 = vpop.f32.mrf.mxu2  ;;  %v13802_v56 = vld [vmem:[#allocation79_spill] sm:$0xff] }
 0x561   : > { %13794 = vst [vmem:[#allocation300_spill] sm:$0xff] %v12235_v4  ;;  %v12239_v58 = vpop.f32.mrf.mxu1 }
 0x562   : > { %13795 = vst [vmem:[#allocation301_spill] sm:$0xff] %v12237_v13 }
 0x563   : > { %13796 = vst [vmem:[#allocation302_spill] sm:$0xff] %v12239_v58 }
 0x564   : > { %5708 = vmatmul.bf16.gmra.mxu3 %v11973_v22  ;;  %6992 = vmatmul.bf16.gmra.mxu1 %v11312_v37 }
 0x567   : > { %v12243_v23 = vpop.f32.mrf.mxu3  ;;  %v12245_v0 = vpop.f32.mrf.mxu0 }
 0x568   : > { %13797 = vst [vmem:[#allocation303_spill] sm:$0xff] %v12243_v23  ;;  %v12247_v53 = vpop.f32.mrf.mxu2 }
 0x569   : > { %13798 = vst [vmem:[#allocation304_spill] sm:$0xff] %v12245_v0  ;;  %v12250_v63 = vpop.f32.mrf.mxu1 }
 0x56a   : > { %13799 = vst [vmem:[#allocation305_spill] sm:$0xff] %v12247_v53  ;;  %6823 = vmatmul.bf16.gmra.mxu0 %v13800_v40 }
 0x56b   : > { %13801 = vst [vmem:[#allocation12_spill] sm:$0xff] %v12250_v63  ;;  %v13810_v63 = vld [vmem:[#allocation18_spill] sm:$0xff] }
 0x56c   : > { %7166 = vmatmul.bf16.gmra.mxu2 %v13802_v56 }
 0x56f   : > { %v12253_v4 = vpop.f32.mrf.mxu3  ;;  %v12255_v13 = vpop.f32.mrf.mxu0 }
 0x570   : > { %13803 = vst [vmem:[#allocation79_spill] sm:$0xff] %v12253_v4  ;;  %v12257_v58 = vpop.f32.mrf.mxu2  ;;  %v13812_v4 = vld [vmem:[#allocation14_spill] sm:$0xff] }
 0x571   : > { %13804 = vst [vmem:[#allocation306_spill] sm:$0xff] %v12255_v13  ;;  %v12259_v30 = vpop.f32.mrf.mxu1 }
 0x572   : > { %13805 = vst [vmem:[#allocation307_spill] sm:$0xff] %v12257_v58 }
 0x573   : > { %13806 = vst [vmem:[#allocation308_spill] sm:$0xff] %v12259_v30 }
 0x574   : > { %5713 = vmatmul.bf16.gmra.mxu3 %v12004_v43  ;;  %6997 = vmatmul.bf16.gmra.mxu1 %v11342_v62  ;;  %v8468_v62 = vld [vmem:[%s13190_s4 + $0x80] sm:$0xff] }
 0x575   : > { %6407 = vmatpush.bf16.msrb.mxu3 %v8468_v62 }
 0x577   : > { %v12263_v37 = vpop.f32.mrf.mxu3  ;;  %v12265_v53 = vpop.f32.mrf.mxu0 }
 0x578   : > { %13807 = vst [vmem:[#allocation309_spill] sm:$0xff] %v12263_v37  ;;  %v12267_v40 = vpop.f32.mrf.mxu2 }
 0x579   : > { %13808 = vst [vmem:[#allocation310_spill] sm:$0xff] %v12265_v53  ;;  %v12270_v0 = vpop.f32.mrf.mxu1 }
 0x57a   : > { %13809 = vst [vmem:[#allocation311_spill] sm:$0xff] %v12267_v40  ;;  %6828 = vmatmul.bf16.gmra.mxu0 %v13810_v63 }
 0x57b   : > { %13811 = vst [vmem:[#allocation18_spill] sm:$0xff] %v12270_v0 }
 0x57c   : > { %7171 = vmatmul.bf16.gmra.mxu2 %v13812_v4 }
 0x57f   : > { %v12273_v13 = vpop.f32.mrf.mxu3  ;;  %v12275_v58 = vpop.f32.mrf.mxu0 }
 0x580   : > { %13813 = vst [vmem:[#allocation14_spill] sm:$0xff] %v12273_v13  ;;  %v12277_v30 = vpop.f32.mrf.mxu2 }
 0x581   : > { %13814 = vst [vmem:[#allocation312_spill] sm:$0xff] %v12275_v58  ;;  %v12279_v23 = vpop.f32.mrf.mxu1 }
 0x582   : > { %13815 = vst [vmem:[#allocation313_spill] sm:$0xff] %v12277_v30 }
 0x583   : > { %13816 = vst [vmem:[#allocation314_spill] sm:$0xff] %v12279_v23  ;;  %v13821_v23 = vld [vmem:[#allocation83_spill] sm:$0xff] }
 0x584   : > { %5718 = vmatmul.bf16.gmra.mxu3 %v12033_v61  ;;  %7002 = vmatmul.bf16.gmra.mxu1 %v11375_v12 }
 0x587   : > { %v12286_v63 = vpop.f32.mrf.mxu3  ;;  %v12288_v40 = vpop.f32.mrf.mxu0 }
 0x588   : > { %13817 = vst [vmem:[#allocation315_spill] sm:$0xff] %v12286_v63  ;;  %v12290_v0 = vpop.f32.mrf.mxu2 }
 0x589   : > { %13818 = vst [vmem:[#allocation316_spill] sm:$0xff] %v12288_v40  ;;  %v12293_v30 = vpop.f32.mrf.mxu1 }
 0x58a   : > { %13819 = vst [vmem:[#allocation317_spill] sm:$0xff] %v12290_v0  ;;  %6833 = vmatmul.bf16.gmra.mxu0 %v13551_v5 }
 0x58b   : > { %13820 = vst [vmem:[#allocation318_spill] sm:$0xff] %v12293_v30 }
 0x58c   : > { %7176 = vmatmul.bf16.gmra.mxu2 %v13821_v23 }
 0x58f   : > { %v12296_v58 = vpop.f32.mrf.mxu3  ;;  %v12298_v53 = vpop.f32.mrf.mxu0 }
 0x590   : > { %13822 = vst [vmem:[#allocation83_spill] sm:$0xff] %v12296_v58  ;;  %v12300_v13 = vpop.f32.mrf.mxu2 }
 0x591   : > { %13823 = vst [vmem:[#allocation319_spill] sm:$0xff] %v12298_v53  ;;  %v12302_v12 = vpop.f32.mrf.mxu1 }
 0x592   : > { %13824 = vst [vmem:[#allocation320_spill] sm:$0xff] %v12300_v13 }
 0x593   : > { %13825 = vst [vmem:[#allocation321_spill] sm:$0xff] %v12302_v12 }
 0x594   : > { %5723 = vmatmul.bf16.gmra.mxu3 %v12076_v46  ;;  %7007 = vmatmul.bf16.gmra.mxu1 %v11420_v3 }
 0x597   : > { %v12306_v62 = vpop.f32.mrf.mxu3  ;;  %v12308_v0 = vpop.f32.mrf.mxu0 }
 0x598   : > { %13826 = vst [vmem:[#allocation322_spill] sm:$0xff] %v12306_v62  ;;  %v12310_v5 = vpop.f32.mrf.mxu2 }
 0x599   : > { %13827 = vst [vmem:[#allocation323_spill] sm:$0xff] %v12308_v0  ;;  %v12313_v30 = vpop.f32.mrf.mxu1 }
 0x59a   : > { %13828 = vst [vmem:[#allocation324_spill] sm:$0xff] %v12310_v5  ;;  %6838 = vmatmul.bf16.gmra.mxu0 %v10383_v15 }
 0x59b   : > { %13829 = vst [vmem:[#allocation325_spill] sm:$0xff] %v12313_v30 }
 0x59c   : > { %7181 = vmatmul.bf16.gmra.mxu2 %v11407_v33 }
 0x59f   : > { %v12316_v53 = vpop.f32.mrf.mxu3  ;;  %v12318_v13 = vpop.f32.mrf.mxu0 }
 0x5a0   : > { %13830 = vst [vmem:[#allocation326_spill] sm:$0xff] %v12316_v53  ;;  %v12320_v12 = vpop.f32.mrf.mxu2 }
 0x5a1   : > { %13831 = vst [vmem:[#allocation327_spill] sm:$0xff] %v12318_v13  ;;  %v12322_v40 = vpop.f32.mrf.mxu1 }
 0x5a2   : > { %13832 = vst [vmem:[#allocation328_spill] sm:$0xff] %v12320_v12 }
 0x5a3   : > { %13833 = vst [vmem:[#allocation329_spill] sm:$0xff] %v12322_v40 }
 0x5a4   : > { %5728 = vmatmul.bf16.gmra.mxu3 %v12115_v26  ;;  %7012 = vmatmul.bf16.gmra.mxu1 %v11449_v8 }
 0x5a7   : > { %v12326_v3 = vpop.f32.mrf.mxu3  ;;  %v12328_v5 = vpop.f32.mrf.mxu0 }
 0x5a8   : > { %13834 = vst [vmem:[#allocation330_spill] sm:$0xff] %v12326_v3  ;;  %v12330_v15 = vpop.f32.mrf.mxu2 }
 0x5a9   : > { %13835 = vst [vmem:[#allocation331_spill] sm:$0xff] %v12328_v5  ;;  %v12333_v30 = vpop.f32.mrf.mxu1 }
 0x5aa   : > { %13836 = vst [vmem:[#allocation332_spill] sm:$0xff] %v12330_v15  ;;  %6843 = vmatmul.bf16.gmra.mxu0 %v10446_v49 }
 0x5ab   : > { %13837 = vst [vmem:[#allocation333_spill] sm:$0xff] %v12333_v30  ;;  %v5193_v30 = vshll.u32 %v11380_v57, 16 }
 0x5ac   : > { %7186 = vmatmul.bf16.gmra.mxu2 %v11440_v19 }
 0x5af   : > { %v12336_v13 = vpop.f32.mrf.mxu3  ;;  %v12338_v12 = vpop.f32.mrf.mxu0 }
 0x5b0   : > { %13838 = vst [vmem:[#allocation334_spill] sm:$0xff] %v12336_v13  ;;  %v12340_v40 = vpop.f32.mrf.mxu2 }
 0x5b1   : > { %13839 = vst [vmem:[#allocation335_spill] sm:$0xff] %v12338_v12  ;;  %v12342_v0 = vpop.f32.mrf.mxu1  ;;  %v5195_v12 = vrot.slane %v5193_v30, 1 }
 0x5b2   : > { %13840 = vst [vmem:[#allocation336_spill] sm:$0xff] %v12340_v40  ;;  %v5198_v40 = vshll.u32 %v11427_v35, 16 }
 0x5b3   : > { %13841 = vst [vmem:[#allocation337_spill] sm:$0xff] %v12342_v0 }
 0x5b4   : > { %5733 = vmatmul.bf16.gmra.mxu3 %v12161_v50  ;;  %7017 = vmatmul.bf16.gmra.mxu1 %v11480_v29 }
 0x5b7   : > { %v12346_v8 = vpop.f32.mrf.mxu3  ;;  %v12348_v15 = vpop.f32.mrf.mxu0 }
 0x5b8   : > { %13842 = vst [vmem:[#allocation338_spill] sm:$0xff] %v12346_v8  ;;  %v12350_v49 = vpop.f32.mrf.mxu2  ;;  %v5191_v8 = vshrl.u32 %v11380_v57, 16 }
 0x5b9   : > { %13843 = vst [vmem:[#allocation339_spill] sm:$0xff] %v12348_v15  ;;  %v12354_v5 = vpop.f32.mrf.mxu1  ;;  %v5200_v15 = vrot.slane %v5198_v40, 1 }
 0x5ba   : > { %13844 = vst [vmem:[#allocation340_spill] sm:$0xff] %v12350_v49  ;;  %6848 = vmatmul.bf16.gmra.mxu0 %v10520_v25  ;;  %v5196_v49 = vor.u32 %v5195_v12, %v5191_v8  ;;  %v5202_v12 = vshrl.u32 %v11427_v35, 16  ;;  %v5206_v8 = vshll.u32 %v12170_v10, 16  ;;  %v13874_v35 = vld [vmem:[#allocation163_spill] sm:$0xff] }
 0x5bb   : > { %13845 = vst [vmem:[#allocation341_spill] sm:$0xff] %v12354_v5 }
 0x5bc   : > { %7191 = vmatmul.bf16.gmra.mxu2 %v11471_v45  ;;  %v12364_v3 = vsel %vm783_vm1, %v5196_v49, %v5200_v15  ;;  %v5208_v63 = vrot.slane %v5206_v8, 1 }
 0x5bd   : > { %13848 = vst [vmem:[#allocation344_spill] sm:$0xff] %v12364_v3 }
 0x5bf   : > { %v12358_v0 = vpop.f32.mrf.mxu3  ;;  %v12360_v29 = vpop.f32.mrf.mxu0 }
 0x5c0   : > { %13846 = vst [vmem:[#allocation342_spill] sm:$0xff] %v12358_v0  ;;  %v7152_v13 = vpop.f32.mrf.mxu2 }
 0x5c1   : > { %13847 = vst [vmem:[#allocation343_spill] sm:$0xff] %v12360_v29  ;;  %v6983_v25 = vpop.f32.mrf.mxu1 }
 0x5c4   : > { %5738 = vmatmul.bf16.gmra.mxu3 %v12364_v3  ;;  %7022 = vmatmul.bf16.gmra.mxu1 %v11509_v14  ;;  %v5204_v14 = vor.u32 %v5202_v12, %v5200_v15 }
 0x5c7   : > { %v12368_v30 = vpop.f32.mrf.mxu3  ;;  %v6814_v5 = vpop.f32.mrf.mxu0 }
 0x5c8   : > { %13849 = vst [vmem:[#allocation345_spill] sm:$0xff] %v12368_v30  ;;  %v6984_v53 = vadd.f32 %v6983_v25, %v6814_v5  ;;  %v7154_v0 = vpop.f32.mrf.mxu2 }
 0x5c9   : > { %v6985_v40 = vpop.f32.mrf.mxu1 }
 0x5ca   : > { %v12370_v62 = vadd.f32 %v7152_v13, %v6984_v53  ;;  %6853 = vmatmul.bf16.gmra.mxu0 %v10574_v7  ;;  %v12381_v13 = vsel %vm783_vm1, %v5204_v14, %v5208_v63  ;;  %v13854_v63 = vld [vmem:[#allocation4_spill] sm:$0xff] }
 0x5cb   : > { %13851 = vst [vmem:[#allocation347_spill] sm:$0xff] %v12381_v13 }
 0x5cc   : > { %7196 = vmatmul.bf16.gmra.mxu2 %v11498_v27 }
 0x5cf   : > { %v12376_v49 = vpop.f32.mrf.mxu3  ;;  %v6816_v29 = vpop.f32.mrf.mxu0 }
 0x5d0   : > { %13850 = vst [vmem:[#allocation346_spill] sm:$0xff] %v12376_v49  ;;  %v6986_v58 = vadd.f32 %v6985_v40, %v6816_v29  ;;  %v7157_v30 = vpop.f32.mrf.mxu2  ;;  %v5016_v29 = vrot.slane %v13854_v63, 1  ;;  %v13858_v63 = vld [vmem:[#allocation62_spill] sm:$0xff] }
 0x5d1   : > { %v6988_v7 = vpop.f32.mrf.mxu1 }
 0x5d2   : > { %v12378_v5 = vadd.f32 %v7154_v0, %v6986_v58 }
 0x5d4   : > { %5743 = vmatmul.bf16.gmra.mxu3 %v12381_v13  ;;  %7027 = vmatmul.bf16.gmra.mxu1 %v11550_v51  ;;  %v13855_v51 = vld [vmem:[#allocation28_spill] sm:$0xff]  ;;  %v13878_v13 = vld [vmem:[#allocation173_spill] sm:$0xff] }
 0x5d5   : > { %v5015_v8 = vrot.slane %v13855_v51, 1 }
 0x5d7   : > { %v12385_v10 = vpop.f32.mrf.mxu3  ;;  %v6819_v53 = vpop.f32.mrf.mxu0 }
 0x5d8   : > { %13852 = vst [vmem:[#allocation348_spill] sm:$0xff] %v12385_v10  ;;  %v6989_v25 = vadd.f32 %v6988_v7, %v6819_v53  ;;  %v7159_v49 = vpop.f32.mrf.mxu2  ;;  %v5017_v7 = vsel %vm1306_vm0, %v5015_v8, %v5016_v29 }
 0x5d9   : > { %v6990_v15 = vpop.f32.mrf.mxu1 }
 0x5da   : > { %v12387_v37 = vadd.f32 %v7157_v30, %v6989_v25  ;;  %6858 = vmatmul.bf16.gmra.mxu0 %v10604_v17 }
 0x5dc   : > { %7201 = vmatmul.bf16.gmra.mxu2 %v11539_v32 }
 0x5df   : > { %v12391_v58 = vpop.f32.mrf.mxu3  ;;  %v6821_v0 = vpop.f32.mrf.mxu0 }
 0x5e0   : > { %13853 = vst [vmem:[#allocation349_spill] sm:$0xff] %v12391_v58  ;;  %v6991_v40 = vadd.f32 %v6990_v15, %v6821_v0  ;;  %v7162_v12 = vpop.f32.mrf.mxu2 }
 0x5e1   : > { %v6993_v30 = vpop.f32.mrf.mxu1 }
 0x5e2   : > { %v12395_v14 = vadd.f32 %v7159_v49, %v6991_v40  ;;  %v5018_v40 = vrot.slane %v13858_v63, 1 }
 0x5e4   : > { %6408 = vmatmul.bf16.vlgmr.msrb.gmra.mxu3 %v5017_v7  ;;  %7032 = vmatmul.bf16.gmra.mxu1 %v11579_v54  ;;  %v5019_v7 = vsel %vm1306_vm0, %v5016_v29, %v5018_v40 }
 0x5e7   : > { %v12399_v17 = vpop.f32.mrf.mxu3  ;;  %v6824_v53 = vpop.f32.mrf.mxu0 }
 0x5e8   : > { %13856 = vst [vmem:[#allocation4_spill] sm:$0xff] %v12399_v17  ;;  %v6994_v25 = vadd.f32 %v6993_v30, %v6824_v53  ;;  %v7164_v58 = vpop.f32.mrf.mxu2 }
 0x5e9   : > { %v6995_v15 = vpop.f32.mrf.mxu1 }
 0x5ea   : > { %v12401_v10 = vadd.f32 %v7162_v12, %v6994_v25  ;;  %6863 = vmatmul.bf16.gmra.mxu0 %v10664_v6 }
 0x5ec   : > { %7206 = vmatmul.bf16.gmra.mxu2 %v11570_v24 }
 0x5ef   : > { %v12405_v49 = vpop.f32.mrf.mxu3  ;;  %v6826_v0 = vpop.f32.mrf.mxu0 }
 0x5f0   : > { %13857 = vst [vmem:[#allocation28_spill] sm:$0xff] %v12405_v49  ;;  %v6996_v51 = vadd.f32 %v6995_v15, %v6826_v0  ;;  %v7167_v8 = vpop.f32.mrf.mxu2  ;;  %v13860_v15 = vld [vmem:[#allocation136_spill] sm:$0xff]  ;;  %v13865_v49 = vld [vmem:[#allocation145_spill] sm:$0xff] }
 0x5f1   : > { %v6998_v30 = vpop.f32.mrf.mxu1 }
 0x5f2   : > { %v12408_v54 = vadd.f32 %v7164_v58, %v6996_v51 }
 0x5f4   : > { %6413 = vmatmul.bf16.gmra.mxu3 %v5019_v7  ;;  %7037 = vmatmul.bf16.gmra.mxu1 %v11610_v31  ;;  %v13862_v7 = vld [vmem:[#allocation2_spill] sm:$0xff] }
 0x5f7   : > { %v12412_v12 = vpop.f32.mrf.mxu3  ;;  %v6829_v6 = vpop.f32.mrf.mxu0 }
 0x5f8   : > { %13859 = vst [vmem:[#allocation62_spill] sm:$0xff] %v12412_v12  ;;  %v6999_v53 = vadd.f32 %v6998_v30, %v6829_v6  ;;  %v7169_v25 = vpop.f32.mrf.mxu2  ;;  %v13864_v12 = vld [vmem:[#allocation39_spill] sm:$0xff] }
 0x5f9   : > { %v7000_v63 = vpop.f32.mrf.mxu1 }
 0x5fa   : > { %v12414_v17 = vadd.f32 %v7167_v8, %v6999_v53  ;;  %6868 = vmatmul.bf16.gmra.mxu0 %v10701_v48 }
 0x5fc   : > { %7211 = vmatmul.bf16.gmra.mxu2 %v13860_v15 }
 0x5ff   : > { %v12418_v58 = vpop.f32.mrf.mxu3  ;;  %v6831_v0 = vpop.f32.mrf.mxu0 }
 0x600   : > { %13861 = vst [vmem:[#allocation136_spill] sm:$0xff] %v12418_v58  ;;  %v7001_v29 = vadd.f32 %v7000_v63, %v6831_v0  ;;  %v7172_v40 = vpop.f32.mrf.mxu2 }
 0x601   : > { %v7003_v31 = vpop.f32.mrf.mxu1 }
 0x602   : > { %v12420_v51 = vadd.f32 %v7169_v25, %v7001_v29 }
 0x604   : > { %6418 = vmatmul.bf16.gmra.mxu3 %v13862_v7  ;;  %7042 = vmatmul.bf16.gmra.mxu1 %v11637_v39 }
 0x607   : > { %v12424_v30 = vpop.f32.mrf.mxu3  ;;  %v6834_v8 = vpop.f32.mrf.mxu0 }
 0x608   : > { %13863 = vst [vmem:[#allocation2_spill] sm:$0xff] %v12424_v30  ;;  %v7004_v6 = vadd.f32 %v7003_v31, %v6834_v8  ;;  %v7174_v48 = vpop.f32.mrf.mxu2  ;;  %v13869_v30 = vld [vmem:[#allocation154_spill] sm:$0xff] }
 0x609   : > { %v7005_v58 = vpop.f32.mrf.mxu1 }
 0x60a   : > { %v12426_v53 = vadd.f32 %v7172_v40, %v7004_v6  ;;  %6873 = vmatmul.bf16.gmra.mxu0 %v13864_v12 }
 0x60c   : > { %7216 = vmatmul.bf16.gmra.mxu2 %v13865_v49 }
 0x60f   : > { %v12430_v63 = vpop.f32.mrf.mxu3  ;;  %v6836_v25 = vpop.f32.mrf.mxu0 }
 0x610   : > { %13866 = vst [vmem:[#allocation39_spill] sm:$0xff] %v12430_v63  ;;  %v7006_v0 = vadd.f32 %v7005_v58, %v6836_v25  ;;  %v7177_v29 = vpop.f32.mrf.mxu2 }
 0x611   : > { %v7008_v39 = vpop.f32.mrf.mxu1 }
 0x612   : > { %v12432_v7 = vadd.f32 %v7174_v48, %v7006_v0 }
 0x614   : > { %6423 = vmatmul.bf16.gmra.mxu3 %v13867_v38  ;;  %7047 = vmatmul.bf16.gmra.mxu1 %v11680_v44 }
 0x617   : > { %v12436_v31 = vpop.f32.mrf.mxu3  ;;  %v6839_v40 = vpop.f32.mrf.mxu0 }
 0x618   : > { %13868 = vst [vmem:[#allocation145_spill] sm:$0xff] %v12436_v31  ;;  %v7009_v8 = vadd.f32 %v7008_v39, %v6839_v40  ;;  %v7179_v12 = vpop.f32.mrf.mxu2  ;;  %v13871_v31 = vld [vmem:[#allocation166_spill] sm:$0xff] }
 0x619   : > { %v7010_v63 = vpop.f32.mrf.mxu1 }
 0x61a   : > { %v12438_v6 = vadd.f32 %v7177_v29, %v7009_v8  ;;  %6878 = vmatmul.bf16.gmra.mxu0 %v10787_v9 }
 0x61c   : > { %7221 = vmatmul.bf16.gmra.mxu2 %v13869_v30 }
 0x61f   : > { %v12442_v58 = vpop.f32.mrf.mxu3  ;;  %v6841_v48 = vpop.f32.mrf.mxu0 }
 0x620   : > { %13870 = vst [vmem:[#allocation65_spill] sm:$0xff] %v12442_v58  ;;  %v7011_v25 = vadd.f32 %v7010_v63, %v6841_v48  ;;  %v7182_v0 = vpop.f32.mrf.mxu2 }
 0x621   : > { %v7013_v44 = vpop.f32.mrf.mxu1 }
 0x622   : > { %v12444_v38 = vadd.f32 %v7179_v12, %v7011_v25 }
 0x624   : > { %6428 = vmatmul.bf16.gmra.mxu3 %v13772_v11  ;;  %7052 = vmatmul.bf16.gmra.mxu1 %v13871_v31 }
 0x627   : > { %v12448_v39 = vpop.f32.mrf.mxu3  ;;  %v6844_v29 = vpop.f32.mrf.mxu0 }
 0x628   : > { %13872 = vst [vmem:[#allocation166_spill] sm:$0xff] %v12448_v39  ;;  %v7014_v40 = vadd.f32 %v7013_v44, %v6844_v29  ;;  %v7184_v9 = vpop.f32.mrf.mxu2  ;;  %v13877_v39 = vld [vmem:[#allocation46_spill] sm:$0xff] }
 0x629   : > { %v7015_v58 = vpop.f32.mrf.mxu1 }
 0x62a   : > { %v12450_v8 = vadd.f32 %v7182_v0, %v7014_v40  ;;  %6883 = vmatmul.bf16.gmra.mxu0 %v13873_v41 }
 0x62c   : > { %7226 = vmatmul.bf16.gmra.mxu2 %v13874_v35 }
 0x62f   : > { %v12454_v63 = vpop.f32.mrf.mxu3  ;;  %v6846_v12 = vpop.f32.mrf.mxu0 }
 0x630   : > { %13875 = vst [vmem:[#allocation43_spill] sm:$0xff] %v12454_v63  ;;  %v7016_v48 = vadd.f32 %v7015_v58, %v6846_v12  ;;  %v7187_v25 = vpop.f32.mrf.mxu2 }
 0x631   : > { %v7018_v31 = vpop.f32.mrf.mxu1 }
 0x632   : > { %v12456_v11 = vadd.f32 %v7184_v9, %v7016_v48 }
 0x634   : > { %6433 = vmatmul.bf16.gmra.mxu3 %v13782_v16  ;;  %7057 = vmatmul.bf16.gmra.mxu1 %v11740_v1 }
 0x637   : > { %v12460_v44 = vpop.f32.mrf.mxu3  ;;  %v6849_v0 = vpop.f32.mrf.mxu0 }
 0x638   : > { %13876 = vst [vmem:[#allocation350_spill] sm:$0xff] %v12460_v44  ;;  %v7019_v29 = vadd.f32 %v7018_v31, %v6849_v0  ;;  %v7189_v41 = vpop.f32.mrf.mxu2  ;;  %v13881_v44 = vld [vmem:[#allocation49_spill] sm:$0xff] }
 0x639   : > { %v7020_v63 = vpop.f32.mrf.mxu1 }
 0x63a   : > { %v12462_v40 = vadd.f32 %v7187_v25, %v7019_v29  ;;  %6888 = vmatmul.bf16.gmra.mxu0 %v13877_v39 }
 0x63c   : > { %7231 = vmatmul.bf16.gmra.mxu2 %v13878_v13  ;;  %v13882_v13 = vld [vmem:[#allocation182_spill] sm:$0xff] }
 0x63f   : > { %v12466_v58 = vpop.f32.mrf.mxu3  ;;  %v6851_v9 = vpop.f32.mrf.mxu0 }
 0x640   : > { %13879 = vst [vmem:[#allocation46_spill] sm:$0xff] %v12466_v58  ;;  %v7021_v12 = vadd.f32 %v7020_v63, %v6851_v9  ;;  %v7192_v48 = vpop.f32.mrf.mxu2 }
 0x641   : > { %v7023_v1 = vpop.f32.mrf.mxu1 }
 0x642   : > { %v12468_v16 = vadd.f32 %v7189_v41, %v7021_v12 }
 0x644   : > { %6438 = vmatmul.bf16.gmra.mxu3 %v13792_v2  ;;  %7062 = vmatmul.bf16.gmra.mxu1 %v11769_v36 }
 0x647   : > { %v12472_v31 = vpop.f32.mrf.mxu3  ;;  %v6854_v25 = vpop.f32.mrf.mxu0 }
 0x648   : > { %13880 = vst [vmem:[#allocation351_spill] sm:$0xff] %v12472_v31  ;;  %v7024_v0 = vadd.f32 %v7023_v1, %v6854_v25  ;;  %v7194_v39 = vpop.f32.mrf.mxu2  ;;  %v13886_v31 = vld [vmem:[#allocation171_spill] sm:$0xff] }
 0x649   : > { %v7025_v58 = vpop.f32.mrf.mxu1 }
 0x64a   : > { %v12474_v29 = vadd.f32 %v7192_v48, %v7024_v0  ;;  %6893 = vmatmul.bf16.gmra.mxu0 %v13881_v44  ;;  %v13885_v0 = vld [vmem:[#allocation26_spill] sm:$0xff] }
 0x64c   : > { %7236 = vmatmul.bf16.gmra.mxu2 %v13882_v13 }
 0x64f   : > { %v12478_v63 = vpop.f32.mrf.mxu3  ;;  %v6856_v41 = vpop.f32.mrf.mxu0 }
 0x650   : > { %13883 = vst [vmem:[#allocation49_spill] sm:$0xff] %v12478_v63  ;;  %v7026_v9 = vadd.f32 %v7025_v58, %v6856_v41  ;;  %v7197_v2 = vpop.f32.mrf.mxu2  ;;  %v5590_v63 = vadd.f32 %v13886_v31, %v13885_v0  ;;  %v13887_v58 = vld [vmem:[#allocation52_spill] sm:$0xff] }
 0x651   : > { %v7028_v36 = vpop.f32.mrf.mxu1  ;;  %v13888_v41 = vld [vmem:[#allocation88_spill] sm:$0xff] }
 0x652   : > { %v12480_v12 = vadd.f32 %v7194_v39, %v7026_v9  ;;  %v13889_v9 = vld [vmem:[#allocation191_spill] sm:$0xff] }
 0x654   : > { %6443 = vmatmul.bf16.gmra.mxu3 %v13802_v56  ;;  %7067 = vmatmul.bf16.gmra.mxu1 %v11812_v52  ;;  %v5759_v56 = vadd.f32 %v13888_v41, %v5590_v63  ;;  %v13894_v63 = vld [vmem:[#allocation92_spill] sm:$0xff] }
 0x657   : > { %v12484_v48 = vpop.f32.mrf.mxu3  ;;  %v6859_v44 = vpop.f32.mrf.mxu0 }
 0x658   : > { %13884 = vst [vmem:[#allocation352_spill] sm:$0xff] %v12484_v48  ;;  %v7029_v1 = vadd.f32 %v7028_v36, %v6859_v44  ;;  %v7199_v25 = vpop.f32.mrf.mxu2  ;;  %v13891_v44 = vld [vmem:[#allocation22_spill] sm:$0xff] }
 0x659   : > { %v7030_v39 = vpop.f32.mrf.mxu1  ;;  %v5592_v31 = vadd.f32 %v13892_v60, %v13891_v44 }
 0x65a   : > { %v12488_v13 = vadd.f32 %v7197_v2, %v7029_v1  ;;  %6898 = vmatmul.bf16.gmra.mxu0 %v13887_v58  ;;  %v13893_v1 = vld [vmem:[#allocation87_spill] sm:$0xff] }
 0x65b   : > { %v6072_v0 = vadd.f32 %v13893_v1, %v5759_v56  ;;  %v5761_v41 = vadd.f32 %v13894_v63, %v5592_v31  ;;  %v13897_v56 = vld [vmem:[#allocation180_spill] sm:$0xff]  ;;  %v13900_v1 = vld [vmem:[#allocation90_spill] sm:$0xff] }
 0x65c   : > { %7241 = vmatmul.bf16.gmra.mxu2 %v13889_v9  ;;  %v13895_v9 = vld [vmem:[#allocation84_spill] sm:$0xff] }
 0x65f   : > { %v12494_v52 = vpop.f32.mrf.mxu3  ;;  %v6861_v48 = vpop.f32.mrf.mxu0 }
 0x660   : > { %13890 = vst [vmem:[#allocation26_spill] sm:$0xff] %v12494_v52  ;;  %v7031_v35 = vadd.f32 %v7030_v39, %v6861_v48  ;;  %v7202_v36 = vpop.f32.mrf.mxu2  ;;  %v6241_v52 = vadd.f32 %v13895_v9, %v6072_v0  ;;  %v6074_v0 = vadd.f32 %v13900_v1, %v5761_v41  ;;  %v13905_v1 = vld [vmem:[#allocation185_spill] sm:$0xff] }
 0x661   : > { %v7033_v58 = vpop.f32.mrf.mxu1 }
 0x662   : > { %v12499_v2 = vadd.f32 %v7199_v25, %v7031_v35  ;;  %v12510_v35 = vld [vmem:[%s13191_s5] ss:$0 sm:$0xff] }
 0x664   : > { %6448 = vmatmul.bf16.gmra.mxu3 %v13812_v4  ;;  %7072 = vmatmul.bf16.gmra.mxu1 %v11841_v28  ;;  %v13896_v4 = vld [vmem:[#allocation29_spill] sm:$0xff]  ;;  %v13899_v28 = vld [vmem:[#allocation54_spill] sm:$0xff] }
 0x665   : > { %v5595_v44 = vadd.f32 %v13897_v56, %v13896_v4  ;;  %v13902_v4 = vld [vmem:[#allocation89_spill] sm:$0xff] }
 0x667   : > { %v6409_v48 = vpop.f32.mrf.mxu3  ;;  %v6864_v39 = vpop.f32.mrf.mxu0 }
 0x668   : > { %v6410_v57 = vadd.f32 %v6409_v48, %v6241_v52  ;;  %v7034_v60 = vadd.f32 %v7033_v58, %v6864_v39  ;;  %v7204_v25 = vpop.f32.mrf.mxu2  ;;  %v13901_v58 = vld [vmem:[#allocation97_spill] sm:$0xff] }
 0x669   : > { %v7035_v52 = vpop.f32.mrf.mxu1  ;;  %v5764_v48 = vadd.f32 %v13901_v58, %v5595_v44  ;;  %v13906_v44 = vld [vmem:[#allocation95_spill] sm:$0xff] }
 0x66a   : > { %v7312_v31 = vadd.f32 %v12370_v62, %v6410_v57  ;;  %v12515_v9 = vadd.f32 %v7202_v36, %v7034_v60  ;;  %6903 = vmatmul.bf16.gmra.mxu0 %v13899_v28  ;;  %v6243_v57 = vadd.f32 %v13902_v4, %v6074_v0  ;;  %v13903_v62 = vld [vmem:[#allocation200_spill] sm:$0xff]  ;;  %v13904_v28 = vld [vmem:[#allocation31_spill] sm:$0xff]  ;;  %v13907_v4 = vld [vmem:[#allocation101_spill] sm:$0xff] }
 0x66c   : > { %13898 = vst [vmem:[#allocation171_spill] sm:$0xff] %v12515_v9  ;;  %v7380_v63 = vadd.f32 %v12510_v35, %v7312_v31  ;;  %7246 = vmatmul.bf16.gmra.mxu2 %v13903_v62  ;;  %v5597_v9 = vadd.f32 %v13905_v1, %v13904_v28 }
 0x66e   : > { %v7444_v39 = vmax.f32 %v7380_v63, 0.0  ;;  %v6077_v63 = vadd.f32 %v13906_v44, %v5764_v48  ;;  %v13909_v48 = vld [vmem:[#allocation32_spill] sm:$0xff]  ;;  %v13912_v44 = vld [vmem:[#allocation99_spill] sm:$0xff] }
 0x66f   : > { %v6411_v36 = vpop.f32.mrf.mxu3  ;;  %v6866_v60 = vpop.f32.mrf.mxu0 }
 0x670   : > { %7508 = vst [vmem:[%s12523_s8] sm:$0xff] %v7444_v39  ;;  %v6412_v41 = vadd.f32 %v6411_v36, %v6243_v57  ;;  %v7036_v56 = vadd.f32 %v7035_v52, %v6866_v60  ;;  %v7207_v31 = vpop.f32.mrf.mxu2  ;;  %v5766_v39 = vadd.f32 %v13907_v4, %v5597_v9  ;;  %v13908_v36 = vld [vmem:[#allocation93_spill] sm:$0xff]  ;;  %v13913_v4 = vld [vmem:[#allocation104_spill] sm:$0xff] }
 0x671   : > { %v7038_v58 = vpop.f32.mrf.mxu1  ;;  %v6246_v52 = vadd.f32 %v13908_v36, %v6077_v63  ;;  %v13911_v9 = vld [vmem:[#allocation57_spill] sm:$0xff] }
 0x672   : > { %v7313_v3 = vadd.f32 %v12378_v5, %v6412_v41  ;;  %v12532_v30 = vadd.f32 %v7204_v25, %v7036_v56  ;;  %v13910_v56 = vld [vmem:[#allocation189_spill] sm:$0xff]  ;;  %v6079_v63 = vadd.f32 %v13912_v44, %v5766_v39 }
 0x673   : > { %v5600_v1 = vadd.f32 %v13910_v56, %v13909_v48  ;;  %v13917_v56 = vld [vmem:[#allocation194_spill] sm:$0xff] }
 0x674   : > { %v7381_v0 = vadd.f32 %v12510_v35, %v7313_v3  ;;  %6453 = vmatmul.bf16.gmra.mxu3 %v13821_v23  ;;  %7077 = vmatmul.bf16.gmra.mxu1 %v11872_v34 }
 0x676   : > { %v7445_v57 = vmax.f32 %v7381_v0, 0.0 }
 0x677   : > { %v6414_v60 = vpop.f32.mrf.mxu3  ;;  %v6869_v28 = vpop.f32.mrf.mxu0 }
 0x678   : > { %7509 = vst [vmem:[%s12523_s8 + $0x8] sm:$0xff] %v7445_v57  ;;  %v6415_v5 = vadd.f32 %v6414_v60, %v6246_v52  ;;  %v7039_v25 = vadd.f32 %v7038_v58, %v6869_v28  ;;  %v7209_v41 = vpop.f32.mrf.mxu2  ;;  %v5769_v57 = vadd.f32 %v13913_v4, %v5600_v1  ;;  %v13914_v52 = vld [vmem:[#allocation98_spill] sm:$0xff]  ;;  %v13915_v60 = vld [vmem:[#allocation209_spill] sm:$0xff]  ;;  %v13918_v1 = vld [vmem:[#allocation103_spill] sm:$0xff] }
 0x679   : > { %v7040_v0 = vpop.f32.mrf.mxu1  ;;  %v6248_v58 = vadd.f32 %v13914_v52, %v6079_v63  ;;  %v13919_v4 = vld [vmem:[#allocation108_spill] sm:$0xff] }
 0x67a   : > { %v7314_v3 = vadd.f32 %v12387_v37, %v6415_v5  ;;  %v12544_v23 = vadd.f32 %v7207_v31, %v7039_v25  ;;  %6908 = vmatmul.bf16.gmra.mxu0 %v13911_v9  ;;  %v13916_v25 = vld [vmem:[#allocation33_spill] sm:$0xff]  ;;  %v6082_v44 = vadd.f32 %v13918_v1, %v5769_v57  ;;  %v13921_v57 = vld [vmem:[#allocation11_spill] sm:$0xff] }
 0x67b   : > { %v5602_v39 = vadd.f32 %v13917_v56, %v13916_v25 }
 0x67c   : > { %v7382_v34 = vadd.f32 %v12510_v35, %v7314_v3  ;;  %7251 = vmatmul.bf16.gmra.mxu2 %v13915_v60 }
 0x67e   : > { %v7446_v36 = vmax.f32 %v7382_v34, 0.0 }
 0x67f   : > { %v6416_v28 = vpop.f32.mrf.mxu3  ;;  %v6871_v48 = vpop.f32.mrf.mxu0 }
 0x680   : > { %7510 = vst [vmem:[%s12523_s8 + $0x10] sm:$0xff] %v7446_v36  ;;  %v6417_v37 = vadd.f32 %v6416_v28, %v6248_v58  ;;  %v7041_v31 = vadd.f32 %v7040_v0, %v6871_v48  ;;  %v7212_v5 = vpop.f32.mrf.mxu2  ;;  %v5771_v36 = vadd.f32 %v13919_v4, %v5602_v39  ;;  %v13920_v58 = vld [vmem:[#allocation102_spill] sm:$0xff]  ;;  %v13923_v39 = vld [vmem:[#allocation9_spill] sm:$0xff] }
 0x681   : > { %v7043_v34 = vpop.f32.mrf.mxu1  ;;  %v6251_v0 = vadd.f32 %v13920_v58, %v6082_v44  ;;  %v13926_v58 = vld [vmem:[#allocation106_spill] sm:$0xff] }
 0x682   : > { %v7315_v9 = vadd.f32 %v12395_v14, %v6417_v37  ;;  %v12556_v3 = vadd.f32 %v7209_v41, %v7041_v31  ;;  %v13922_v31 = vld [vmem:[#allocation198_spill] sm:$0xff] }
 0x683   : > { %v5605_v25 = vadd.f32 %v13922_v31, %v13921_v57  ;;  %v13929_v57 = vld [vmem:[#allocation203_spill] sm:$0xff] }
 0x684   : > { %v7383_v63 = vadd.f32 %v12510_v35, %v7315_v9  ;;  %6458 = vmatmul.bf16.gmra.mxu3 %v11407_v33  ;;  %7082 = vmatmul.bf16.gmra.mxu1 %v11901_v21  ;;  %v13924_v9 = vld [vmem:[#allocation107_spill] sm:$0xff] }
 0x685   : > { %v6084_v1 = vadd.f32 %v13924_v9, %v5771_v36 }
 0x686   : > { %v7447_v52 = vmax.f32 %v7383_v63, 0.0  ;;  %v13925_v63 = vld [vmem:[#allocation112_spill] sm:$0xff] }
 0x687   : > { %v6419_v28 = vpop.f32.mrf.mxu3  ;;  %v6874_v48 = vpop.f32.mrf.mxu0  ;;  %v5774_v4 = vadd.f32 %v13925_v63, %v5605_v25  ;;  %v13930_v25 = vld [vmem:[#allocation111_spill] sm:$0xff] }
 0x688   : > { %7511 = vst [vmem:[%s12523_s8 + $0x18] sm:$0xff] %v7447_v52  ;;  %v6420_v14 = vadd.f32 %v6419_v28, %v6251_v0  ;;  %v7044_v41 = vadd.f32 %v7043_v34, %v6874_v48  ;;  %v7214_v37 = vpop.f32.mrf.mxu2  ;;  %v6253_v34 = vadd.f32 %v13926_v58, %v6084_v1  ;;  %v13927_v0 = vld [vmem:[#allocation218_spill] sm:$0xff]  ;;  %v13932_v58 = vld [vmem:[#allocation109_spill] sm:$0xff] }
 0x689   : > { %v7045_v44 = vpop.f32.mrf.mxu1 }
 0x68a   : > { %v7316_v56 = vadd.f32 %v12401_v10, %v6420_v14  ;;  %v12568_v33 = vadd.f32 %v7212_v5, %v7044_v41  ;;  %6913 = vmatmul.bf16.gmra.mxu0 %v13923_v39  ;;  %v13928_v41 = vld [vmem:[#allocation34_spill] sm:$0xff]  ;;  %v6087_v39 = vadd.f32 %v13930_v25, %v5774_v4  ;;  %v13933_v4 = vld [vmem:[#allocation35_spill] sm:$0xff] }
 0x68b   : > { %v5607_v36 = vadd.f32 %v13929_v57, %v13928_v41  ;;  %v13935_v57 = vld [vmem:[#allocation13_spill] sm:$0xff] }
 0x68c   : > { %v7384_v21 = vadd.f32 %v12510_v35, %v7316_v56  ;;  %7256 = vmatmul.bf16.gmra.mxu2 %v13927_v0 }
 0x68e   : > { %v7448_v52 = vmax.f32 %v7384_v21, 0.0  ;;  %v13931_v21 = vld [vmem:[#allocation116_spill] sm:$0xff] }
 0x68f   : > { %v6421_v28 = vpop.f32.mrf.mxu3  ;;  %v6876_v48 = vpop.f32.mrf.mxu0  ;;  %v5776_v63 = vadd.f32 %v13931_v21, %v5607_v36  ;;  %v13936_v36 = vld [vmem:[#allocation115_spill] sm:$0xff] }
 0x690   : > { %7512 = vst [vmem:[%s12523_s8 + $0x20] sm:$0xff] %v7448_v52  ;;  %v6422_v10 = vadd.f32 %v6421_v28, %v6253_v34  ;;  %v7046_v5 = vadd.f32 %v7045_v44, %v6876_v48  ;;  %v7217_v14 = vpop.f32.mrf.mxu2  ;;  %v6256_v44 = vadd.f32 %v13932_v58, %v6087_v39  ;;  %v13937_v39 = vld [vmem:[#allocation120_spill] sm:$0xff]  ;;  %v13939_v58 = vld [vmem:[#allocation227_spill] sm:$0xff] }
 0x691   : > { %v7048_v9 = vpop.f32.mrf.mxu1 }
 0x692   : > { %v7317_v31 = vadd.f32 %v12408_v54, %v6422_v10  ;;  %v12580_v56 = vadd.f32 %v7214_v37, %v7046_v5  ;;  %v13934_v10 = vld [vmem:[#allocation207_spill] sm:$0xff] }
 0x693   : > { %v5610_v5 = vadd.f32 %v13934_v10, %v13933_v4 }
 0x694   : > { %v7385_v1 = vadd.f32 %v12510_v35, %v7317_v31  ;;  %6463 = vmatmul.bf16.gmra.mxu3 %v11440_v19  ;;  %7087 = vmatmul.bf16.gmra.mxu1 %v11944_v20  ;;  %v6089_v31 = vadd.f32 %v13936_v36, %v5776_v63 }
 0x696   : > { %v7449_v52 = vmax.f32 %v7385_v1, 0.0  ;;  %v5779_v1 = vadd.f32 %v13937_v39, %v5610_v5  ;;  %v13942_v5 = vld [vmem:[#allocation118_spill] sm:$0xff] }
 0x697   : > { %v6424_v34 = vpop.f32.mrf.mxu3  ;;  %v6879_v28 = vpop.f32.mrf.mxu0 }
 0x698   : > { %7513 = vst [vmem:[%s12523_s8 + $0x28] sm:$0xff] %v7449_v52  ;;  %v6425_v54 = vadd.f32 %v6424_v34, %v6256_v44  ;;  %v7049_v37 = vadd.f32 %v7048_v9, %v6879_v28  ;;  %v7219_v48 = vpop.f32.mrf.mxu2  ;;  %v13938_v52 = vld [vmem:[#allocation113_spill] sm:$0xff] }
 0x699   : > { %v7050_v25 = vpop.f32.mrf.mxu1  ;;  %v6258_v9 = vadd.f32 %v13938_v52, %v6089_v31  ;;  %v13943_v31 = vld [vmem:[#allocation124_spill] sm:$0xff] }
 0x69a   : > { %v7318_v41 = vadd.f32 %v12414_v17, %v6425_v54  ;;  %v12592_v19 = vadd.f32 %v7217_v14, %v7049_v37  ;;  %6918 = vmatmul.bf16.gmra.mxu0 %v13935_v57  ;;  %v13940_v54 = vld [vmem:[#allocation19_spill] sm:$0xff]  ;;  %v13941_v37 = vld [vmem:[#allocation212_spill] sm:$0xff] }
 0x69b   : > { %v5612_v63 = vadd.f32 %v13941_v37, %v13940_v54  ;;  %v13947_v54 = vld [vmem:[#allocation3_spill] sm:$0xff]  ;;  %v13948_v37 = vld [vmem:[#allocation122_spill] sm:$0xff] }
 0x69c   : > { %v7386_v20 = vadd.f32 %v12510_v35, %v7318_v41  ;;  %7261 = vmatmul.bf16.gmra.mxu2 %v13939_v58  ;;  %v6092_v41 = vadd.f32 %v13942_v5, %v5779_v1  ;;  %v13945_v1 = vld [vmem:[#allocation36_spill] sm:$0xff]  ;;  %v13949_v5 = vld [vmem:[#allocation127_spill] sm:$0xff] }
 0x69e   : > { %v7450_v21 = vmax.f32 %v7386_v20, 0.0  ;;  %v5781_v20 = vadd.f32 %v13943_v31, %v5612_v63  ;;  %v13950_v31 = vld [vmem:[#allocation121_spill] sm:$0xff] }
 0x69f   : > { %v6426_v44 = vpop.f32.mrf.mxu3  ;;  %v6881_v34 = vpop.f32.mrf.mxu0 }
 0x6a0   : > { %7514 = vst [vmem:[%s12523_s8 + $0x30] sm:$0xff] %v7450_v21  ;;  %v6427_v17 = vadd.f32 %v6426_v44, %v6258_v9  ;;  %v7051_v14 = vadd.f32 %v7050_v25, %v6881_v34  ;;  %v7222_v28 = vpop.f32.mrf.mxu2  ;;  %v13944_v21 = vld [vmem:[#allocation117_spill] sm:$0xff]  ;;  %v13946_v34 = vld [vmem:[#allocation216_spill] sm:$0xff]  ;;  %v6094_v63 = vadd.f32 %v13948_v37, %v5781_v20  ;;  %v13955_v37 = vld [vmem:[#allocation131_spill] sm:$0xff] }
 0x6a1   : > { %v7053_v57 = vpop.f32.mrf.mxu1  ;;  %v6261_v25 = vadd.f32 %v13944_v21, %v6092_v41 }
 0x6a2   : > { %v7319_v4 = vadd.f32 %v12420_v51, %v6427_v17  ;;  %v12604_v10 = vadd.f32 %v7219_v48, %v7051_v14  ;;  %v5615_v17 = vadd.f32 %v13946_v34, %v13945_v1  ;;  %v13954_v34 = vld [vmem:[#allocation126_spill] sm:$0xff] }
 0x6a4   : > { %v7387_v36 = vadd.f32 %v12510_v35, %v7319_v4  ;;  %6468 = vmatmul.bf16.gmra.mxu3 %v11471_v45  ;;  %7092 = vmatmul.bf16.gmra.mxu1 %v11973_v22  ;;  %v5784_v41 = vadd.f32 %v13949_v5, %v5615_v17  ;;  %v13956_v5 = vld [vmem:[#allocation125_spill] sm:$0xff] }
 0x6a6   : > { %v7451_v39 = vmax.f32 %v7387_v36, 0.0  ;;  %v6097_v17 = vadd.f32 %v13954_v34, %v5784_v41  ;;  %v13957_v41 = vld [vmem:[#allocation38_spill] sm:$0xff] }
 0x6a7   : > { %v6429_v52 = vpop.f32.mrf.mxu3  ;;  %v6884_v9 = vpop.f32.mrf.mxu0 }
 0x6a8   : > { %7515 = vst [vmem:[%s12523_s8 + $0x38] sm:$0xff] %v7451_v39  ;;  %v6430_v51 = vadd.f32 %v6429_v52, %v6261_v25  ;;  %v7054_v48 = vadd.f32 %v7053_v57, %v6884_v9  ;;  %v7224_v44 = vpop.f32.mrf.mxu2  ;;  %v6263_v57 = vadd.f32 %v13950_v31, %v6094_v63  ;;  %v13951_v39 = vld [vmem:[#allocation235_spill] sm:$0xff]  ;;  %v13952_v9 = vld [vmem:[#allocation37_spill] sm:$0xff] }
 0x6a9   : > { %v7055_v4 = vpop.f32.mrf.mxu1 }
 0x6aa   : > { %v7320_v14 = vadd.f32 %v12426_v53, %v6430_v51  ;;  %v12616_v45 = vadd.f32 %v7222_v28, %v7054_v48  ;;  %6923 = vmatmul.bf16.gmra.mxu0 %v13947_v54  ;;  %v13953_v51 = vld [vmem:[#allocation221_spill] sm:$0xff] }
 0x6ab   : > { %v5617_v20 = vadd.f32 %v13953_v51, %v13952_v9 }
 0x6ac   : > { %v7388_v22 = vadd.f32 %v12510_v35, %v7320_v14  ;;  %7266 = vmatmul.bf16.gmra.mxu2 %v13951_v39 }
 0x6ad   : > { %v5786_v63 = vadd.f32 %v13955_v37, %v5617_v20  ;;  %v13960_v20 = vld [vmem:[#allocation135_spill] sm:$0xff] }
 0x6ae   : > { %v7452_v36 = vmax.f32 %v7388_v22, 0.0 }
 0x6af   : > { %v6431_v21 = vpop.f32.mrf.mxu3  ;;  %v6886_v25 = vpop.f32.mrf.mxu0 }
 0x6b0   : > { %7516 = vst [vmem:[%s12523_s8 + $0x40] sm:$0xff] %v7452_v36  ;;  %v6432_v53 = vadd.f32 %v6431_v21, %v6263_v57  ;;  %v7056_v28 = vadd.f32 %v7055_v4, %v6886_v25  ;;  %v7227_v52 = vpop.f32.mrf.mxu2  ;;  %v6266_v4 = vadd.f32 %v13956_v5, %v6097_v17  ;;  %v13958_v21 = vld [vmem:[#allocation225_spill] sm:$0xff] }
 0x6b1   : > { %v7058_v14 = vpop.f32.mrf.mxu1  ;;  %v5620_v25 = vadd.f32 %v13958_v21, %v13957_v41  ;;  %v13961_v17 = vld [vmem:[#allocation129_spill] sm:$0xff] }
 0x6b2   : > { %v7321_v48 = vadd.f32 %v12432_v7, %v6432_v53  ;;  %v12628_v1 = vadd.f32 %v7224_v44, %v7056_v28  ;;  %v13959_v28 = vld [vmem:[#allocation130_spill] sm:$0xff] }
 0x6b3   : > { %v6099_v9 = vadd.f32 %v13959_v28, %v5786_v63 }
 0x6b4   : > { %v7389_v54 = vadd.f32 %v12510_v35, %v7321_v48  ;;  %6473 = vmatmul.bf16.gmra.mxu3 %v11498_v27  ;;  %7097 = vmatmul.bf16.gmra.mxu1 %v12004_v43  ;;  %v5789_v48 = vadd.f32 %v13960_v20, %v5620_v25  ;;  %v13966_v25 = vld [vmem:[#allocation140_spill] sm:$0xff] }
 0x6b6   : > { %v7453_v22 = vmax.f32 %v7389_v54, 0.0  ;;  %v13962_v54 = vld [vmem:[#allocation75_spill] sm:$0xff] }
 0x6b7   : > { %v6434_v36 = vpop.f32.mrf.mxu3  ;;  %v6889_v31 = vpop.f32.mrf.mxu0 }
 0x6b8   : > { %7517 = vst [vmem:[%s12523_s8 + $0x48] sm:$0xff] %v7453_v22  ;;  %v6435_v7 = vadd.f32 %v6434_v36, %v6266_v4  ;;  %v7059_v44 = vadd.f32 %v7058_v14, %v6889_v31  ;;  %v7229_v57 = vpop.f32.mrf.mxu2  ;;  %v6268_v14 = vadd.f32 %v13961_v17, %v6099_v9  ;;  %v13964_v4 = vld [vmem:[#allocation229_spill] sm:$0xff] }
 0x6b9   : > { %v7060_v51 = vpop.f32.mrf.mxu1  ;;  %v13967_v9 = vld [vmem:[#allocation133_spill] sm:$0xff] }
 0x6ba   : > { %v7322_v53 = vadd.f32 %v12438_v6, %v6435_v7  ;;  %v12640_v27 = vadd.f32 %v7227_v52, %v7059_v44  ;;  %6928 = vmatmul.bf16.gmra.mxu0 %v11176_v18  ;;  %v13963_v18 = vld [vmem:[#allocation40_spill] sm:$0xff]  ;;  %v13965_v7 = vld [vmem:[#allocation134_spill] sm:$0xff]  ;;  %v13969_v17 = vld [vmem:[#allocation233_spill] sm:$0xff] }
 0x6bb   : > { %v5622_v63 = vadd.f32 %v13964_v4, %v13963_v18  ;;  %v6102_v44 = vadd.f32 %v13965_v7, %v5789_v48  ;;  %v13968_v48 = vld [vmem:[#allocation23_spill] sm:$0xff]  ;;  %v13972_v4 = vld [vmem:[#allocation144_spill] sm:$0xff]  ;;  %v13973_v7 = vld [vmem:[#allocation137_spill] sm:$0xff] }
 0x6bc   : > { %v7390_v43 = vadd.f32 %v12510_v35, %v7322_v53  ;;  %7271 = vmatmul.bf16.gmra.mxu2 %v13962_v54 }
 0x6bd   : > { %v5791_v53 = vadd.f32 %v13966_v25, %v5622_v63 }
 0x6be   : > { %v7454_v34 = vmax.f32 %v7390_v43, 0.0 }
 0x6bf   : > { %v6436_v37 = vpop.f32.mrf.mxu3  ;;  %v6891_v22 = vpop.f32.mrf.mxu0 }
 0x6c0   : > { %7518 = vst [vmem:[%s12523_s8 + $0x50] sm:$0xff] %v7454_v34  ;;  %v6437_v6 = vadd.f32 %v6436_v37, %v6268_v14  ;;  %v7061_v52 = vadd.f32 %v7060_v51, %v6891_v22  ;;  %v7232_v5 = vpop.f32.mrf.mxu2  ;;  %v6271_v51 = vadd.f32 %v13967_v9, %v6102_v44  ;;  %v5625_v14 = vadd.f32 %v13969_v17, %v13968_v48  ;;  %v13970_v22 = vld [vmem:[#allocation70_spill] sm:$0xff]  ;;  %v13975_v9 = vld [vmem:[#allocation41_spill] sm:$0xff] }
 0x6c1   : > { %v7063_v41 = vpop.f32.mrf.mxu1 }
 0x6c2   : > { %v7323_v36 = vadd.f32 %v12444_v38, %v6437_v6  ;;  %v12652_v31 = vadd.f32 %v7229_v57, %v7061_v52  ;;  %v13971_v6 = vld [vmem:[#allocation139_spill] sm:$0xff]  ;;  %v5794_v63 = vadd.f32 %v13972_v4, %v5625_v14  ;;  %v13978_v14 = vld [vmem:[#allocation149_spill] sm:$0xff] }
 0x6c3   : > { %v6104_v52 = vadd.f32 %v13971_v6, %v5791_v53  ;;  %v13979_v6 = vld [vmem:[#allocation141_spill] sm:$0xff] }
 0x6c4   : > { %v7391_v21 = vadd.f32 %v12510_v35, %v7323_v36  ;;  %6478 = vmatmul.bf16.gmra.mxu3 %v11539_v32  ;;  %7102 = vmatmul.bf16.gmra.mxu1 %v12033_v61 }
 0x6c5   : > { %v6273_v44 = vadd.f32 %v13973_v7, %v6104_v52 }
 0x6c6   : > { %v7455_v28 = vmax.f32 %v7391_v21, 0.0 }
 0x6c7   : > { %v6439_v43 = vpop.f32.mrf.mxu3  ;;  %v6894_v20 = vpop.f32.mrf.mxu0 }
 0x6c8   : > { %7519 = vst [vmem:[%s12523_s8 + $0x58] sm:$0xff] %v7455_v28  ;;  %v6440_v38 = vadd.f32 %v6439_v43, %v6271_v51  ;;  %v7064_v57 = vadd.f32 %v7063_v41, %v6894_v20  ;;  %v7234_v34 = vpop.f32.mrf.mxu2  ;;  %v13974_v41 = vld [vmem:[#allocation252_spill] sm:$0xff]  ;;  %v13976_v51 = vld [vmem:[#allocation238_spill] sm:$0xff] }
 0x6c9   : > { %v7065_v18 = vpop.f32.mrf.mxu1  ;;  %v5627_v53 = vadd.f32 %v13976_v51, %v13975_v9  ;;  %v13984_v9 = vld [vmem:[#allocation153_spill] sm:$0xff] }
 0x6ca   : > { %v7324_v37 = vadd.f32 %v12450_v8, %v6440_v38  ;;  %v12664_v32 = vadd.f32 %v7232_v5, %v7064_v57  ;;  %6933 = vmatmul.bf16.gmra.mxu0 %v13970_v22  ;;  %v13977_v38 = vld [vmem:[#allocation142_spill] sm:$0xff] }
 0x6cb   : > { %v6107_v57 = vadd.f32 %v13977_v38, %v5794_v63  ;;  %v13980_v63 = vld [vmem:[#allocation42_spill] sm:$0xff] }
 0x6cc   : > { %v7392_v61 = vadd.f32 %v12510_v35, %v7324_v37  ;;  %7276 = vmatmul.bf16.gmra.mxu2 %v13974_v41  ;;  %v5796_v37 = vadd.f32 %v13978_v14, %v5627_v53  ;;  %v13987_v14 = vld [vmem:[#allocation44_spill] sm:$0xff] }
 0x6cd   : > { %v6276_v52 = vadd.f32 %v13979_v6, %v6107_v57  ;;  %v13986_v57 = vld [vmem:[#allocation261_spill] sm:$0xff] }
 0x6ce   : > { %v7456_v36 = vmax.f32 %v7392_v61, 0.0 }
 0x6cf   : > { %v6441_v21 = vpop.f32.mrf.mxu3  ;;  %v6896_v25 = vpop.f32.mrf.mxu0 }
 0x6d0   : > { %7520 = vst [vmem:[%s12523_s8 + $0x60] sm:$0xff] %v7456_v36  ;;  %v6442_v8 = vadd.f32 %v6441_v21, %v6273_v44  ;;  %v7066_v5 = vadd.f32 %v7065_v18, %v6896_v25  ;;  %v7237_v28 = vpop.f32.mrf.mxu2  ;;  %v13981_v36 = vld [vmem:[#allocation242_spill] sm:$0xff]  ;;  %v13983_v25 = vld [vmem:[#allocation147_spill] sm:$0xff] }
 0x6d1   : > { %v7068_v48 = vpop.f32.mrf.mxu1  ;;  %v5630_v7 = vadd.f32 %v13981_v36, %v13980_v63  ;;  %v13982_v21 = vld [vmem:[#allocation74_spill] sm:$0xff] }
 0x6d2   : > { %v7325_v43 = vadd.f32 %v12456_v11, %v6442_v8  ;;  %v12676_v20 = vadd.f32 %v7234_v34, %v7066_v5  ;;  %v6109_v8 = vadd.f32 %v13983_v25, %v5796_v37  ;;  %v13990_v36 = vld [vmem:[#allocation158_spill] sm:$0xff] }
 0x6d3   : > { %v5799_v51 = vadd.f32 %v13984_v9, %v5630_v7  ;;  %v13993_v9 = vld [vmem:[#allocation250_spill] sm:$0xff] }
 0x6d4   : > { %v7393_v17 = vadd.f32 %v12510_v35, %v7325_v43  ;;  %6483 = vmatmul.bf16.gmra.mxu3 %v11570_v24  ;;  %7107 = vmatmul.bf16.gmra.mxu1 %v12076_v46  ;;  %v13985_v43 = vld [vmem:[#allocation146_spill] sm:$0xff] }
 0x6d5   : > { %v6278_v38 = vadd.f32 %v13985_v43, %v6109_v8 }
 0x6d6   : > { %v7457_v22 = vmax.f32 %v7393_v17, 0.0 }
 0x6d7   : > { %v6444_v18 = vpop.f32.mrf.mxu3  ;;  %v6899_v61 = vpop.f32.mrf.mxu0 }
 0x6d8   : > { %7521 = vst [vmem:[%s12523_s8 + $0x68] sm:$0xff] %v7457_v22  ;;  %v6445_v11 = vadd.f32 %v6444_v18, %v6276_v52  ;;  %v7069_v34 = vadd.f32 %v7068_v48, %v6899_v61  ;;  %v7239_v4 = vpop.f32.mrf.mxu2  ;;  %v13988_v22 = vld [vmem:[#allocation246_spill] sm:$0xff]  ;;  %v13989_v61 = vld [vmem:[#allocation151_spill] sm:$0xff] }
 0x6d9   : > { %v7070_v5 = vpop.f32.mrf.mxu1  ;;  %v5632_v6 = vadd.f32 %v13988_v22, %v13987_v14  ;;  %v13996_v22 = vld [vmem:[#allocation155_spill] sm:$0xff] }
 0x6da   : > { %v7326_v44 = vadd.f32 %v12462_v40, %v6445_v11  ;;  %v12688_v24 = vadd.f32 %v7237_v28, %v7069_v34  ;;  %6938 = vmatmul.bf16.gmra.mxu0 %v13982_v21  ;;  %v6112_v11 = vadd.f32 %v13989_v61, %v5799_v51  ;;  %v13991_v21 = vld [vmem:[#allocation150_spill] sm:$0xff] }
 0x6db   : > { %v5801_v7 = vadd.f32 %v13990_v36, %v5632_v6 }
 0x6dc   : > { %v7394_v46 = vadd.f32 %v12510_v35, %v7326_v44  ;;  %7281 = vmatmul.bf16.gmra.mxu2 %v13986_v57  ;;  %v6281_v25 = vadd.f32 %v13991_v21, %v6112_v11  ;;  %v13998_v11 = vld [vmem:[#allocation255_spill] sm:$0xff] }
 0x6de   : > { %v7458_v53 = vmax.f32 %v7394_v46, 0.0  ;;  %v13992_v46 = vld [vmem:[#allocation45_spill] sm:$0xff] }
 0x6df   : > { %v6446_v48 = vpop.f32.mrf.mxu3  ;;  %v6901_v17 = vpop.f32.mrf.mxu0  ;;  %v5635_v51 = vadd.f32 %v13993_v9, %v13992_v46  ;;  %v14001_v46 = vld [vmem:[#allocation159_spill] sm:$0xff] }
 0x6e0   : > { %7522 = vst [vmem:[%s12523_s8 + $0x70] sm:$0xff] %v7458_v53  ;;  %v6447_v40 = vadd.f32 %v6446_v48, %v6278_v38  ;;  %v7071_v28 = vadd.f32 %v7070_v5, %v6901_v17  ;;  %v7242_v18 = vpop.f32.mrf.mxu2 }
 0x6e1   : > { %v7073_v34 = vpop.f32.mrf.mxu1 }
 0x6e2   : > { %v7327_v37 = vadd.f32 %v12468_v16, %v6447_v40  ;;  %v12700_v52 = vadd.f32 %v7239_v4, %v7071_v28  ;;  %v13995_v40 = vld [vmem:[#allocation162_spill] sm:$0xff] }
 0x6e3   : > { %v5804_v28 = vadd.f32 %v13995_v40, %v5635_v51  ;;  %v14004_v40 = vld [vmem:[#allocation165_spill] sm:$0xff] }
 0x6e4   : > { %v7395_v63 = vadd.f32 %v12510_v35, %v7327_v37  ;;  %6488 = vmatmul.bf16.gmra.mxu3 %v13860_v15  ;;  %7112 = vmatmul.bf16.gmra.mxu1 %v12115_v26  ;;  %v13994_v15 = vld [vmem:[#allocation156_spill] sm:$0xff] }
 0x6e5   : > { %v6114_v38 = vadd.f32 %v13994_v15, %v5801_v7  ;;  %v13999_v7 = vld [vmem:[#allocation160_spill] sm:$0xff] }
 0x6e6   : > { %v7459_v44 = vmax.f32 %v7395_v63, 0.0 }
 0x6e7   : > { %v6449_v8 = vpop.f32.mrf.mxu3  ;;  %v6904_v5 = vpop.f32.mrf.mxu0  ;;  %v6283_v6 = vadd.f32 %v13996_v22, %v6114_v38  ;;  %v14002_v38 = vld [vmem:[#allocation48_spill] sm:$0xff] }
 0x6e8   : > { %7523 = vst [vmem:[%s12523_s8 + $0x78] sm:$0xff] %v7459_v44  ;;  %v6450_v16 = vadd.f32 %v6449_v8, %v6281_v25  ;;  %v7074_v4 = vadd.f32 %v7073_v34, %v6904_v5  ;;  %v7244_v17 = vpop.f32.mrf.mxu2  ;;  %v6117_v44 = vadd.f32 %v13999_v7, %v5804_v28  ;;  %v14000_v8 = vld [vmem:[#allocation168_spill] sm:$0xff] }
 0x6e9   : > { %v7075_v48 = vpop.f32.mrf.mxu1 }
 0x6ea   : > { %v7328_v53 = vadd.f32 %v12474_v29, %v6450_v16  ;;  %v12712_v43 = vadd.f32 %v7242_v18, %v7074_v4  ;;  %6943 = vmatmul.bf16.gmra.mxu0 %v11304_v47  ;;  %v13997_v47 = vld [vmem:[#allocation47_spill] sm:$0xff]  ;;  %v6286_v9 = vadd.f32 %v14001_v46, %v6117_v44 }
 0x6eb   : > { %v5637_v34 = vadd.f32 %v13998_v11, %v13997_v47 }
 0x6ec   : > { %v7396_v26 = vadd.f32 %v12510_v35, %v7328_v53  ;;  %7286 = vmatmul.bf16.gmra.mxu2 %v12100_v42 }
 0x6ed   : > { %v5806_v5 = vadd.f32 %v14000_v8, %v5637_v34 }
 0x6ee   : > { %v7460_v14 = vmax.f32 %v7396_v26, 0.0 }
 0x6ef   : > { %v6451_v37 = vpop.f32.mrf.mxu3  ;;  %v6906_v61 = vpop.f32.mrf.mxu0  ;;  %v6119_v28 = vadd.f32 %v14004_v40, %v5806_v5  ;;  %v14017_v40 = vld [vmem:[#allocation85_spill] sm:$0xff] }
 0x6f0   : > { %7524 = vst [vmem:[%s12523_s8 + $0x80] sm:$0xff] %v7460_v14  ;;  %v6452_v29 = vadd.f32 %v6451_v37, %v6283_v6  ;;  %v7076_v18 = vadd.f32 %v7075_v48, %v6906_v61  ;;  %v7247_v4 = vpop.f32.mrf.mxu2  ;;  %v14003_v48 = vld [vmem:[#allocation259_spill] sm:$0xff]  ;;  %v14006_v61 = vld [vmem:[#allocation164_spill] sm:$0xff] }
 0x6f1   : > { %v7078_v25 = vpop.f32.mrf.mxu1  ;;  %v5640_v26 = vadd.f32 %v14003_v48, %v14002_v38  ;;  %v14015_v38 = vld [vmem:[#allocation21_spill] sm:$0xff] }
 0x6f2   : > { %v7329_v63 = vadd.f32 %v12480_v12, %v6452_v29  ;;  %v12724_v36 = vadd.f32 %v7244_v17, %v7076_v18  ;;  %v6288_v29 = vadd.f32 %v14006_v61, %v6119_v28  ;;  %v14018_v28 = vld [vmem:[#allocation175_spill] sm:$0xff]  ;;  %v14020_v61 = vld [vmem:[#allocation174_spill] sm:$0xff] }
 0x6f4   : > { %v7397_v21 = vadd.f32 %v12510_v35, %v7329_v63  ;;  %6493 = vmatmul.bf16.gmra.mxu3 %v13865_v49  ;;  %7117 = vmatmul.bf16.gmra.mxu1 %v12161_v50  ;;  %v14005_v50 = vld [vmem:[#allocation172_spill] sm:$0xff] }
 0x6f5   : > { %v5809_v22 = vadd.f32 %v14005_v50, %v5640_v26  ;;  %v14008_v63 = vld [vmem:[#allocation264_spill] sm:$0xff]  ;;  %v14016_v26 = vld [vmem:[#allocation171_spill] sm:$0xff] }
 0x6f6   : > { %v7461_v16 = vmax.f32 %v7397_v21, 0.0 }
 0x6f7   : > { %v6454_v51 = vpop.f32.mrf.mxu3  ;;  %v6909_v53 = vpop.f32.mrf.mxu0 }
 0x6f8   : > { %7525 = vst [vmem:[%s12523_s8 + $0x88] sm:$0xff] %v7461_v16  ;;  %v6455_v12 = vadd.f32 %v6454_v51, %v6286_v9  ;;  %v7079_v15 = vadd.f32 %v7078_v25, %v6909_v53  ;;  %v7249_v34 = vpop.f32.mrf.mxu2  ;;  %v14009_v25 = vld [vmem:[#allocation170_spill] sm:$0xff]  ;;  %v14012_v9 = vld [vmem:[#allocation169_spill] sm:$0xff]  ;;  %v14013_v53 = vld [vmem:[#allocation344_spill] sm:$0xff] }
 0x6f9   : > { %v7080_v37 = vpop.f32.mrf.mxu1  ;;  %v6122_v8 = vadd.f32 %v14009_v25, %v5809_v22  ;;  %v14010_v16 = vld [vmem:[#allocation154_spill] sm:$0xff]  ;;  %v14019_v22 = vld [vmem:[#allocation181_spill] sm:$0xff] }
 0x6fa   : > { %v7330_v49 = vadd.f32 %v12488_v13, %v6455_v12  ;;  %v12736_v17 = vadd.f32 %v7247_v4, %v7079_v15  ;;  %6948 = vmatmul.bf16.gmra.mxu0 %v11334_v55  ;;  %v14007_v55 = vld [vmem:[#allocation50_spill] sm:$0xff] }
 0x6fb   : > { %v5642_v7 = vadd.f32 %v14008_v63, %v14007_v55  ;;  %v6291_v51 = vadd.f32 %v14012_v9, %v6122_v8  ;;  %v14025_v8 = vld [vmem:[#allocation163_spill] sm:$0xff] }
 0x6fc   : > { %v7398_v14 = vadd.f32 %v12510_v35, %v7330_v49  ;;  %7291 = vmatmul.bf16.gmra.mxu2 %v12152_v59  ;;  %v14011_v59 = vld [vmem:[#allocation177_spill] sm:$0xff]  ;;  %v14028_v9 = vld [vmem:[#allocation347_spill] sm:$0xff] }
 0x6fd   : > { %v5811_v4 = vadd.f32 %v14011_v59, %v5642_v7  ;;  %v14024_v7 = vld [vmem:[#allocation179_spill] sm:$0xff] }
 0x6fe   : > { %v7462_v6 = vmax.f32 %v7398_v14, 0.0 }
 0x6ff   : > { %v6456_v18 = vpop.f32.mrf.mxu3  ;;  %v6911_v47 = vpop.f32.mrf.mxu0  ;;  %v6124_v14 = vadd.f32 %v14018_v28, %v5811_v4  ;;  %v14027_v4 = vld [vmem:[#allocation178_spill] sm:$0xff] }
 0x700   : > { %7526 = vst [vmem:[%s12523_s8 + $0x90] sm:$0xff] %v7462_v6  ;;  %v6457_v13 = vadd.f32 %v6456_v18, %v6288_v29  ;;  %v7081_v11 = vadd.f32 %v7080_v37, %v6911_v47  ;;  %v14021_v18 = vld [vmem:[#allocation285_spill] sm:$0xff] }
 0x701   : > { %v6293_v29 = vadd.f32 %v14020_v61, %v6124_v14 }
 0x702   : > { %v7331_v44 = vadd.f32 %v12499_v2, %v6457_v13  ;;  %v12748_v21 = vadd.f32 %v7249_v34, %v7081_v11  ;;  %v14014_v2 = vld [vmem:[#allocation51_spill] sm:$0xff]  ;;  %v14022_v11 = vld [vmem:[#allocation53_spill] sm:$0xff] }
 0x703   : > { %v5645_v48 = vadd.f32 %v14015_v38, %v14014_v2  ;;  %v14023_v34 = vld [vmem:[#allocation271_spill] sm:$0xff]  ;;  %v14031_v38 = vld [vmem:[#allocation94_spill] sm:$0xff] }
 0x704   : > { %v7399_v5 = vadd.f32 %v12510_v35, %v7331_v44  ;;  %6498 = vmatmul.bf16.gmra.mxu3 %v14010_v16  ;;  %7122 = vmatmul.bf16.gmra.mxu1 %v14013_v53  ;;  %v5647_v55 = vadd.f32 %v14023_v34, %v14022_v11 }
 0x705   : > { %v5814_v6 = vadd.f32 %v14019_v22, %v5645_v48  ;;  %v14032_v48 = vld [vmem:[#allocation184_spill] sm:$0xff] }
 0x706   : > { %v7463_v46 = vmax.f32 %v7399_v5, 0.0  ;;  %v14026_v5 = vld [vmem:[#allocation186_spill] sm:$0xff] }
 0x707   : > { %v6459_v12 = vpop.f32.mrf.mxu3  ;;  %v6127_v44 = vadd.f32 %v14024_v7, %v5814_v6  ;;  %v5816_v16 = vadd.f32 %v14026_v5, %v5647_v55  ;;  %v14035_v6 = vld [vmem:[#allocation20_spill] sm:$0xff]  ;;  %v14039_v55 = vld [vmem:[#allocation173_spill] sm:$0xff]  ;;  %v14042_v5 = vld [vmem:[#allocation7_spill] sm:$0xff] }
 0x708   : > { %7527 = vst [vmem:[%s12523_s8 + $0x98] sm:$0xff] %v7463_v46  ;;  %v6460_v15 = vadd.f32 %v6459_v12, %v6291_v51  ;;  %v14029_v12 = vld [vmem:[#allocation25_spill] sm:$0xff] }
 0x709   : > { %v6296_v46 = vadd.f32 %v14027_v4, %v6127_v44  ;;  %v14043_v4 = vld [vmem:[#allocation56_spill] sm:$0xff] }
 0x70a   : > { %v7332_v49 = vadd.f32 %v14016_v26, %v6460_v15  ;;  %6953 = vmatmul.bf16.gmra.mxu0 %v14017_v40  ;;  %v14030_v15 = vld [vmem:[#allocation275_spill] sm:$0xff]  ;;  %v6129_v26 = vadd.f32 %v14032_v48, %v5816_v16  ;;  %v14033_v40 = vld [vmem:[#allocation190_spill] sm:$0xff]  ;;  %v14048_v48 = vld [vmem:[#allocation192_spill] sm:$0xff] }
 0x70c   : > { %v7400_v50 = vadd.f32 %v12510_v35, %v7332_v49  ;;  %7296 = vmatmul.bf16.gmra.mxu2 %v14021_v18  ;;  %v14037_v18 = vld [vmem:[#allocation279_spill] sm:$0xff] }
 0x70e   : > { %v7464_v37 = vmax.f32 %v7400_v50, 0.0  ;;  %v14034_v50 = vld [vmem:[#allocation183_spill] sm:$0xff] }
 0x70f   : > { %v6461_v47 = vpop.f32.mrf.mxu3  ;;  %v6298_v22 = vadd.f32 %v14034_v50, %v6129_v26  ;;  %v14051_v50 = vld [vmem:[#allocation5_spill] sm:$0xff] }
 0x710   : > { %7528 = vst [vmem:[%s12523_s8 + $0xa0] sm:$0xff] %v7464_v37  ;;  %v6462_v13 = vadd.f32 %v6461_v47, %v6293_v29  ;;  %v14036_v29 = vld [vmem:[#allocation55_spill] sm:$0xff] }
 0x712   : > { %v7333_v63 = vadd.f32 %v12532_v30, %v6462_v13  ;;  %v5650_v30 = vadd.f32 %v14030_v15, %v14029_v12  ;;  %v14038_v13 = vld [vmem:[#allocation188_spill] sm:$0xff] }
 0x714   : > { %v7401_v25 = vadd.f32 %v12510_v35, %v7333_v63  ;;  %6503 = vmatmul.bf16.gmra.mxu3 %v14025_v8  ;;  %7127 = vmatmul.bf16.gmra.mxu1 %v14028_v9  ;;  %v5819_v28 = vadd.f32 %v14033_v40, %v5650_v30  ;;  %v14040_v63 = vld [vmem:[#allocation195_spill] sm:$0xff] }
 0x715   : > { %v14047_v30 = vld [vmem:[#allocation199_spill] sm:$0xff] }
 0x716   : > { %v7465_v59 = vmax.f32 %v7401_v25, 0.0  ;;  %v6132_v11 = vadd.f32 %v14038_v13, %v5819_v28  ;;  %v14041_v25 = vld [vmem:[#allocation187_spill] sm:$0xff]  ;;  %v14055_v13 = vld [vmem:[#allocation196_spill] sm:$0xff] }
 0x717   : > { %v6464_v51 = vpop.f32.mrf.mxu3 }
 0x718   : > { %7529 = vst [vmem:[%s12523_s8 + $0xa8] sm:$0xff] %v7465_v59  ;;  %v6465_v53 = vadd.f32 %v6464_v51, %v6296_v46  ;;  %v6301_v8 = vadd.f32 %v14041_v25, %v6132_v11  ;;  %v14044_v46 = vld [vmem:[#allocation283_spill] sm:$0xff]  ;;  %v14045_v51 = vld [vmem:[#allocation17_spill] sm:$0xff] }
 0x71a   : > { %v7334_v2 = vadd.f32 %v12544_v23, %v6465_v53  ;;  %6958 = vmatmul.bf16.gmra.mxu0 %v14031_v38  ;;  %v5652_v23 = vadd.f32 %v14037_v18, %v14036_v29  ;;  %v14046_v53 = vld [vmem:[#allocation193_spill] sm:$0xff]  ;;  %v14053_v29 = vld [vmem:[#allocation182_spill] sm:$0xff]  ;;  %v14054_v18 = vld [vmem:[#allocation204_spill] sm:$0xff] }
 0x71c   : > { %v7402_v49 = vadd.f32 %v12510_v35, %v7334_v2  ;;  %7301 = vmatmul.bf16.gmra.mxu2 %v14035_v6  ;;  %v5821_v7 = vadd.f32 %v14040_v63, %v5652_v23  ;;  %v14052_v6 = vld [vmem:[#allocation197_spill] sm:$0xff] }
 0x71e   : > { %v7466_v14 = vmax.f32 %v7402_v49, 0.0  ;;  %v6134_v12 = vadd.f32 %v14046_v53, %v5821_v7  ;;  %v14049_v49 = vld [vmem:[#allocation8_spill] sm:$0xff]  ;;  %v14057_v7 = vld [vmem:[#allocation59_spill] sm:$0xff] }
 0x71f   : > { %v6466_v37 = vpop.f32.mrf.mxu3 }
 0x720   : > { %7530 = vst [vmem:[%s12523_s8 + $0xb0] sm:$0xff] %v7466_v14  ;;  %v6467_v61 = vadd.f32 %v6466_v37, %v6298_v22  ;;  %v6303_v26 = vadd.f32 %v14048_v48, %v6134_v12  ;;  %v14050_v14 = vld [vmem:[#allocation58_spill] sm:$0xff] }
 0x722   : > { %v7335_v47 = vadd.f32 %v12556_v3, %v6467_v61  ;;  %v5655_v3 = vadd.f32 %v14044_v46, %v14043_v4  ;;  %v14061_v4 = vld [vmem:[#allocation208_spill] sm:$0xff] }
 0x724   : > { %v7403_v34 = vadd.f32 %v12510_v35, %v7335_v47  ;;  %6508 = vmatmul.bf16.gmra.mxu3 %v14039_v55  ;;  %7132 = vmatmul.bf16.gmra.mxu1 %v14042_v5  ;;  %v5824_v2 = vadd.f32 %v14047_v30, %v5655_v3  ;;  %v14060_v5 = vld [vmem:[#allocation202_spill] sm:$0xff]  ;;  %v14064_v30 = vld [vmem:[#allocation72_spill] sm:$0xff] }
 0x726   : > { %v7467_v44 = vmax.f32 %v7403_v34, 0.0  ;;  %v6137_v37 = vadd.f32 %v14052_v6, %v5824_v2  ;;  %v14056_v34 = vld [vmem:[#allocation30_spill] sm:$0xff] }
 0x727   : > { %v6469_v16 = vpop.f32.mrf.mxu3 }
 0x728   : > { %7531 = vst [vmem:[%s12523_s8 + $0xb8] sm:$0xff] %v7467_v44  ;;  %v6470_v59 = vadd.f32 %v6469_v16, %v6301_v8  ;;  %v6306_v11 = vadd.f32 %v14055_v13, %v6137_v37  ;;  %v14058_v44 = vld [vmem:[#allocation291_spill] sm:$0xff]  ;;  %v14059_v8 = vld [vmem:[#allocation6_spill] sm:$0xff]  ;;  %v14069_v37 = vld [vmem:[#allocation60_spill] sm:$0xff] }
 0x729   : > { %v14072_v13 = vld [vmem:[#allocation217_spill] sm:$0xff] }
 0x72a   : > { %v7336_v9 = vadd.f32 %v12568_v33, %v6470_v59  ;;  %6963 = vmatmul.bf16.gmra.mxu0 %v14045_v51  ;;  %v5657_v33 = vadd.f32 %v14051_v50, %v14050_v14  ;;  %v14068_v50 = vld [vmem:[#allocation205_spill] sm:$0xff] }
 0x72c   : > { %v7404_v15 = vadd.f32 %v12510_v35, %v7336_v9  ;;  %7306 = vmatmul.bf16.gmra.mxu2 %v14049_v49  ;;  %v5826_v23 = vadd.f32 %v14054_v18, %v5657_v33  ;;  %v14062_v9 = vld [vmem:[#allocation201_spill] sm:$0xff]  ;;  %v14066_v49 = vld [vmem:[#allocation191_spill] sm:$0xff] }
 0x72d   : > { %v14071_v18 = vld [vmem:[#allocation211_spill] sm:$0xff] }
 0x72e   : > { %v7468_v38 = vmax.f32 %v7404_v15, 0.0  ;;  %v6139_v16 = vadd.f32 %v14060_v5, %v5826_v23  ;;  %v14063_v15 = vld [vmem:[#allocation24_spill] sm:$0xff] }
 0x72f   : > { %v6471_v40 = vpop.f32.mrf.mxu3  ;;  %v5662_v2 = vadd.f32 %v14064_v30, %v14063_v15  ;;  %v14079_v15 = vld [vmem:[#allocation27_spill] sm:$0xff] }
 0x730   : > { %7532 = vst [vmem:[%s12523_s8 + $0xc0] sm:$0xff] %v7468_v38  ;;  %v6472_v28 = vadd.f32 %v6471_v40, %v6303_v26  ;;  %v6308_v51 = vadd.f32 %v14062_v9, %v6139_v16  ;;  %v14065_v38 = vld [vmem:[#allocation206_spill] sm:$0xff]  ;;  %v14067_v40 = vld [vmem:[#allocation213_spill] sm:$0xff]  ;;  %v14076_v16 = vld [vmem:[#allocation215_spill] sm:$0xff] }
 0x731   : > { %v14078_v9 = vld [vmem:[#allocation214_spill] sm:$0xff]  ;;  %v14080_v30 = vld [vmem:[#allocation303_spill] sm:$0xff] }
 0x732   : > { %v7337_v22 = vadd.f32 %v12580_v56, %v6472_v28  ;;  %v5660_v56 = vadd.f32 %v14058_v44, %v14057_v7  ;;  %v5831_v28 = vadd.f32 %v14067_v40, %v5662_v2  ;;  %v5670_v2 = vadd.f32 %v14080_v30, %v14079_v15  ;;  %v14083_v40 = vld [vmem:[#allocation219_spill] sm:$0xff]  ;;  %v12885_v30 = vpop.f32.mrf.mxu1 }
 0x734   : > { %v7405_v61 = vadd.f32 %v12510_v35, %v7337_v22  ;;  %6513 = vmatmul.bf16.gmra.mxu3 %v14053_v29  ;;  %7137 = vmatmul.bf16.gmra.mxu1 %v14056_v34  ;;  %v5829_v46 = vadd.f32 %v14061_v4, %v5660_v56  ;;  %v6144_v23 = vadd.f32 %v14071_v18, %v5831_v28  ;;  %v14074_v56 = vld [vmem:[#allocation61_spill] sm:$0xff]  ;;  %v14077_v4 = vld [vmem:[#allocation222_spill] sm:$0xff] }
 0x736   : > { %v7469_v47 = vmax.f32 %v7405_v61, 0.0  ;;  %v6142_v48 = vadd.f32 %v14065_v38, %v5829_v46  ;;  %v14070_v61 = vld [vmem:[#allocation297_spill] sm:$0xff] }
 0x737   : > { %v6474_v55 = vpop.f32.mrf.mxu3  ;;  %v5665_v29 = vadd.f32 %v14070_v61, %v14069_v37  ;;  %v14086_v61 = vld [vmem:[#allocation224_spill] sm:$0xff] }
 0x738   : > { %7533 = vst [vmem:[%s12523_s8 + $0xc8] sm:$0xff] %v7469_v47  ;;  %v6475_v63 = vadd.f32 %v6474_v55, %v6306_v11  ;;  %v6311_v33 = vadd.f32 %v14068_v50, %v6142_v48  ;;  %v14073_v55 = vld [vmem:[#allocation210_spill] sm:$0xff] }
 0x739   : > { %v5834_v11 = vadd.f32 %v14072_v13, %v5665_v29 }
 0x73a   : > { %v7338_v25 = vadd.f32 %v12592_v19, %v6475_v63  ;;  %6968 = vmatmul.bf16.gmra.mxu0 %v14059_v8  ;;  %v6313_v63 = vadd.f32 %v14073_v55, %v6144_v23  ;;  %v14089_v55 = vld [vmem:[#allocation64_spill] sm:$0xff] }
 0x73c   : > { %v7406_v59 = vadd.f32 %v12510_v35, %v7338_v25  ;;  %v14075_v25 = vld [vmem:[#allocation77_spill] sm:$0xff] }
 0x73d   : > { %v5667_v8 = vadd.f32 %v14075_v25, %v14074_v56 }
 0x73e   : > { %v7470_v3 = vmax.f32 %v7406_v59, 0.0 }
 0x73f   : > { %v6476_v53 = vpop.f32.mrf.mxu3  ;;  %v5836_v46 = vadd.f32 %v14077_v4, %v5667_v8  ;;  %v14092_v8 = vld [vmem:[#allocation234_spill] sm:$0xff] }
 0x740   : > { %7534 = vst [vmem:[%s12523_s8 + $0xd0] sm:$0xff] %v7470_v3  ;;  %v6477_v12 = vadd.f32 %v6476_v53, %v6308_v51 }
 0x742   : > { %v7339_v19 = vadd.f32 %v12604_v10, %v6477_v12 }
 0x744   : > { %v7407_v26 = vadd.f32 %v12510_v35, %v7339_v19  ;;  %6518 = vmatmul.bf16.gmra.mxu3 %v14066_v49  ;;  %v14081_v19 = vld [vmem:[#allocation220_spill] sm:$0xff] }
 0x745   : > { %v6149_v38 = vadd.f32 %v14081_v19, %v5836_v46  ;;  %v14094_v46 = vld [vmem:[#allocation66_spill] sm:$0xff] }
 0x746   : > { %v7471_v14 = vmax.f32 %v7407_v26, 0.0  ;;  %v14082_v26 = vld [vmem:[#allocation226_spill] sm:$0xff] }
 0x747   : > { %v6479_v22 = vpop.f32.mrf.mxu3  ;;  %v6318_v28 = vadd.f32 %v14083_v40, %v6149_v38  ;;  %v14098_v38 = vld [vmem:[#allocation231_spill] sm:$0xff] }
 0x748   : > { %7535 = vst [vmem:[%s12523_s8 + $0xd8] sm:$0xff] %v7471_v14  ;;  %v6480_v6 = vadd.f32 %v6479_v22, %v6311_v33  ;;  %v14084_v33 = vld [vmem:[#allocation63_spill] sm:$0xff] }
 0x749   : > { %v14085_v22 = vld [vmem:[#allocation79_spill] sm:$0xff] }
 0x74a   : > { %v7340_v10 = vadd.f32 %v12616_v45, %v6480_v6  ;;  %v6147_v45 = vadd.f32 %v14076_v16, %v5834_v11  ;;  %v5672_v6 = vadd.f32 %v14085_v22, %v14084_v33  ;;  %v14093_v16 = vld [vmem:[#allocation228_spill] sm:$0xff]  ;;  %v14100_v40 = vld [vmem:[#allocation315_spill] sm:$0xff] }
 0x74c   : > { %v7408_v47 = vadd.f32 %v12510_v35, %v7340_v10  ;;  %v6316_v51 = vadd.f32 %v14078_v9, %v6147_v45  ;;  %v14087_v10 = vld [vmem:[#allocation230_spill] sm:$0xff] }
 0x74d   : > { %v5841_v18 = vadd.f32 %v14087_v10, %v5672_v6  ;;  %v14102_v6 = vld [vmem:[#allocation243_spill] sm:$0xff]  ;;  %v12901_v10 = vpop.f32.mrf.mxu1 }
 0x74e   : > { %v7472_v34 = vmax.f32 %v7408_v47, 0.0  ;;  %v14088_v47 = vld [vmem:[#allocation223_spill] sm:$0xff] }
 0x74f   : > { %v6481_v7 = vpop.f32.mrf.mxu3 }
 0x750   : > { %7536 = vst [vmem:[%s12523_s8 + $0xe0] sm:$0xff] %v7472_v34  ;;  %v6482_v44 = vadd.f32 %v6481_v7, %v6313_v63  ;;  %v14090_v63 = vld [vmem:[#allocation309_spill] sm:$0xff] }
 0x751   : > { %v5675_v7 = vadd.f32 %v14090_v63, %v14089_v55  ;;  %v12913_v63 = vld [vmem:[%s13191_s5] ss:$0 sm:$0xff] }
 0x752   : > { %v7341_v5 = vadd.f32 %v12628_v1, %v6482_v44  ;;  %v14091_v44 = vld [vmem:[#allocation67_spill] sm:$0xff] }
 0x753   : > { %v6154_v56 = vadd.f32 %v14091_v44, %v5841_v18 }
 0x754   : > { %v7409_v59 = vadd.f32 %v12510_v35, %v7341_v5  ;;  %6523 = vmatmul.bf16.gmra.mxu3 %v13903_v62  ;;  %v5839_v62 = vadd.f32 %v14082_v26, %v5670_v2  ;;  %v5844_v5 = vadd.f32 %v14092_v8, %v5675_v7  ;;  %v14097_v2 = vld [vmem:[#allocation239_spill] sm:$0xff] }
 0x755   : > { %v6323_v45 = vadd.f32 %v14093_v16, %v6154_v56  ;;  %v12922_v16 = vpop.f32.mrf.mxu1 }
 0x756   : > { %v7473_v3 = vmax.f32 %v7409_v59, 0.0 }
 0x757   : > { %v6484_v53 = vpop.f32.mrf.mxu3 }
 0x758   : > { %7537 = vst [vmem:[%s12523_s8 + $0xe8] sm:$0xff] %v7473_v3  ;;  %v6485_v12 = vadd.f32 %v6484_v53, %v6316_v51  ;;  %v14095_v3 = vld [vmem:[#allocation14_spill] sm:$0xff]  ;;  %v14096_v53 = vld [vmem:[#allocation232_spill] sm:$0xff] }
 0x759   : > { %v5677_v9 = vadd.f32 %v14095_v3, %v14094_v46  ;;  %v14111_v3 = vld [vmem:[#allocation245_spill] sm:$0xff] }
 0x75a   : > { %v7342_v1 = vadd.f32 %v12640_v27, %v6485_v12  ;;  %v6152_v27 = vadd.f32 %v14086_v61, %v5839_v62  ;;  %v12881_v12 = vpop.f32.mrf.mxu0 }
 0x75c   : > { %v7410_v48 = vadd.f32 %v12510_v35, %v7342_v1  ;;  %v6321_v13 = vadd.f32 %v14088_v47, %v6152_v27  ;;  %v5846_v1 = vadd.f32 %v14097_v2, %v5677_v9  ;;  %v14103_v27 = vld [vmem:[#allocation236_spill] sm:$0xff]  ;;  %v14104_v47 = vld [vmem:[#allocation69_spill] sm:$0xff] }
 0x75d   : > { %v14113_v2 = vld [vmem:[#allocation244_spill] sm:$0xff] }
 0x75e   : > { %v7474_v49 = vmax.f32 %v7410_v48, 0.0 }
 0x75f   : > { %v6486_v14 = vpop.f32.mrf.mxu3 }
 0x760   : > { %7538 = vst [vmem:[%s12523_s8 + $0xf0] sm:$0xff] %v7474_v49  ;;  %v6487_v50 = vadd.f32 %v6486_v14, %v6318_v28  ;;  %v14099_v49 = vld [vmem:[#allocation68_spill] sm:$0xff] }
 0x761   : > { %v5680_v28 = vadd.f32 %v14100_v40, %v14099_v49  ;;  %v14116_v40 = vld [vmem:[#allocation249_spill] sm:$0xff] }
 0x762   : > { %v7343_v37 = vadd.f32 %v12652_v31, %v6487_v50  ;;  %v14101_v50 = vld [vmem:[#allocation237_spill] sm:$0xff]  ;;  %v12897_v22 = vpop.f32.mrf.mxu0 }
 0x764   : > { %v7411_v29 = vadd.f32 %v12510_v35, %v7343_v37  ;;  %6528 = vmatmul.bf16.gmra.mxu3 %v13915_v60  ;;  %v5849_v37 = vadd.f32 %v14102_v6, %v5680_v28 }
 0x766   : > { %v7475_v23 = vmax.f32 %v7411_v29, 0.0 }
 0x767   : > { %v6489_v11 = vpop.f32.mrf.mxu3 }
 0x768   : > { %7539 = vst [vmem:[%s12523_s8 + $0xf8] sm:$0xff] %v7475_v23  ;;  %v6490_v34 = vadd.f32 %v6489_v11, %v6321_v13  ;;  %v14105_v13 = vld [vmem:[#allocation83_spill] sm:$0xff] }
 0x76a   : > { %v7344_v31 = vadd.f32 %v12664_v32, %v6490_v34  ;;  %v6157_v32 = vadd.f32 %v14096_v53, %v5844_v5  ;;  %v14106_v34 = vld [vmem:[#allocation241_spill] sm:$0xff]  ;;  %v14112_v53 = vld [vmem:[#allocation251_spill] sm:$0xff] }
 0x76c   : > { %v7412_v25 = vadd.f32 %v12510_v35, %v7344_v31  ;;  %v6326_v48 = vadd.f32 %v14098_v38, %v6157_v32  ;;  %v14107_v31 = vld [vmem:[#allocation247_spill] sm:$0xff] }
 0x76e   : > { %v7476_v60 = vmax.f32 %v7412_v25, 0.0  ;;  %v14108_v25 = vld [vmem:[#allocation240_spill] sm:$0xff] }
 0x76f   : > { %v6491_v59 = vpop.f32.mrf.mxu3 }
 0x770   : > { %7540 = vst [vmem:[%s12523_s8 + $0x100] sm:$0xff] %v7476_v60  ;;  %v6492_v4 = vadd.f32 %v6491_v59, %v6323_v45  ;;  %v14109_v45 = vld [vmem:[#allocation71_spill] sm:$0xff]  ;;  %v14110_v59 = vld [vmem:[#allocation322_spill] sm:$0xff] }
 0x772   : > { %v7345_v51 = vadd.f32 %v12676_v20, %v6492_v4  ;;  %v12890_v20 = vpop.f32.mrf.mxu2  ;;  %v5685_v4 = vadd.f32 %v14110_v59, %v14109_v45  ;;  %v14125_v45 = vld [vmem:[#allocation334_spill] sm:$0xff] }
 0x774   : > { %v7413_v15 = vadd.f32 %v12510_v35, %v7345_v51  ;;  %6533 = vmatmul.bf16.gmra.mxu3 %v13927_v0  ;;  %v6159_v0 = vadd.f32 %v14101_v50, %v5846_v1  ;;  %v5854_v32 = vadd.f32 %v14112_v53, %v5685_v4 }
 0x776   : > { %v7477_v19 = vmax.f32 %v7413_v15, 0.0  ;;  %v6328_v29 = vadd.f32 %v14103_v27, %v6159_v0  ;;  %v6167_v28 = vadd.f32 %v14116_v40, %v5854_v32  ;;  %v14117_v0 = vld [vmem:[#allocation256_spill] sm:$0xff]  ;;  %v14127_v32 = vld [vmem:[#allocation265_spill] sm:$0xff] }
 0x777   : > { %v6494_v26 = vpop.f32.mrf.mxu3 }
 0x778   : > { %7541 = vst [vmem:[%s12523_s8 + $0x108] sm:$0xff] %v7477_v19  ;;  %v6495_v62 = vadd.f32 %v6494_v26, %v6326_v48  ;;  %v14114_v26 = vld [vmem:[#allocation73_spill] sm:$0xff] }
 0x77a   : > { %v7346_v14 = vadd.f32 %v12688_v24, %v6495_v62  ;;  %v5682_v24 = vadd.f32 %v14105_v13, %v14104_v47  ;;  %v12908_v55 = vpop.f32.mrf.mxu2  ;;  %v14115_v62 = vld [vmem:[#allocation326_spill] sm:$0xff] }
 0x77c   : > { %v7414_v33 = vadd.f32 %v12510_v35, %v7346_v14  ;;  %v6162_v35 = vadd.f32 %v14106_v34, %v5849_v37  ;;  %v5851_v44 = vadd.f32 %v14107_v31, %v5682_v24  ;;  %v12940_v14 = vpop.f32.mrf.mxu1  ;;  %v14118_v37 = vld [vmem:[#allocation248_spill] sm:$0xff]  ;;  %v14121_v24 = vld [vmem:[#allocation254_spill] sm:$0xff] }
 0x77e   : > { %v7478_v61 = vmax.f32 %v7414_v33, 0.0  ;;  %v6331_v8 = vadd.f32 %v14108_v25, %v6162_v35 }
 0x77f   : > { %v6496_v18 = vpop.f32.mrf.mxu3 }
 0x780   : > { %7542 = vst [vmem:[%s12523_s8 + $0x110] sm:$0xff] %v7478_v61  ;;  %v6497_v23 = vadd.f32 %v6496_v18, %v6328_v29  ;;  %v6336_v61 = vadd.f32 %v14118_v37, %v6167_v28 }
 0x782   : > { %v7347_v11 = vadd.f32 %v12700_v52, %v6497_v23  ;;  %v12919_v52 = vpop.f32.mrf.mxu0  ;;  %v12929_v51 = vpop.f32.mrf.mxu2  ;;  %v14120_v23 = vld [vmem:[#allocation330_spill] sm:$0xff] }
 0x784   : > { %v7415_v7 = vadd.f32 %v12913_v63, %v7347_v11  ;;  %6538 = vmatmul.bf16.gmra.mxu3 %v13939_v58  ;;  %v6164_v58 = vadd.f32 %v14111_v3, %v5851_v44  ;;  %v12956_v35 = vpop.f32.mrf.mxu1 }
 0x786   : > { %v7479_v56 = vmax.f32 %v7415_v7, 0.0  ;;  %v6333_v1 = vadd.f32 %v14113_v2, %v6164_v58  ;;  %v14122_v7 = vld [vmem:[#allocation260_spill] sm:$0xff]  ;;  %v7084_v58 = vadd.f32 %v12885_v30, %v12881_v12  ;;  %v14130_v30 = vld [vmem:[#allocation338_spill] sm:$0xff] }
 0x787   : > { %v6499_v5 = vpop.f32.mrf.mxu3  ;;  %v14129_v12 = vld [vmem:[#allocation80_spill] sm:$0xff] }
 0x788   : > { %7543 = vst [vmem:[%s12523_s8 + $0x118] sm:$0xff] %v7479_v56  ;;  %v6500_v60 = vadd.f32 %v6499_v5, %v6331_v8  ;;  %v14123_v56 = vld [vmem:[#allocation253_spill] sm:$0xff] }
 0x78a   : > { %v7348_v46 = vadd.f32 %v12712_v43, %v6500_v60  ;;  %v12934_v48 = vpop.f32.mrf.mxu0  ;;  %v5687_v43 = vadd.f32 %v14115_v62, %v14114_v26  ;;  %v12946_v27 = vpop.f32.mrf.mxu2 }
 0x78c   : > { %v7416_v9 = vadd.f32 %v12913_v63, %v7348_v46  ;;  %v5856_v33 = vadd.f32 %v14117_v0, %v5687_v43  ;;  %v14126_v46 = vld [vmem:[#allocation258_spill] sm:$0xff]  ;;  %v5695_v43 = vadd.f32 %v14130_v30, %v14129_v12 }
 0x78e   : > { %v7480_v15 = vmax.f32 %v7416_v9, 0.0  ;;  %v6169_v11 = vadd.f32 %v14121_v24, %v5856_v33  ;;  %v14132_v33 = vld [vmem:[#allocation268_spill] sm:$0xff]  ;;  %v14135_v24 = vld [vmem:[#allocation342_spill] sm:$0xff] }
 0x78f   : > { %v6501_v19 = vpop.f32.mrf.mxu3 }
 0x790   : > { %7544 = vst [vmem:[%s12523_s8 + $0x120] sm:$0xff] %v7480_v15  ;;  %v6502_v38 = vadd.f32 %v6501_v19, %v6333_v1  ;;  %v6338_v25 = vadd.f32 %v14123_v56, %v6169_v11  ;;  %v14128_v1 = vld [vmem:[#allocation257_spill] sm:$0xff]  ;;  %v14136_v11 = vld [vmem:[#allocation267_spill] sm:$0xff] }
 0x792   : > { %v7349_v49 = vadd.f32 %v12724_v36, %v6502_v38  ;;  %v14119_v36 = vld [vmem:[#allocation76_spill] sm:$0xff]  ;;  %v12953_v34 = vpop.f32.mrf.mxu0  ;;  %v12961_v60 = vpop.f32.mrf.mxu2 }
 0x793   : > { %v5690_v47 = vadd.f32 %v14120_v23, %v14119_v36  ;;  %v12975_v38 = vpop.f32.mrf.mxu1 }
 0x794   : > { %v7417_v50 = vadd.f32 %v12913_v63, %v7349_v49  ;;  %6543 = vmatmul.bf16.gmra.mxu3 %v13951_v39 }
 0x795   : > { %v5859_v31 = vadd.f32 %v14122_v7, %v5690_v47  ;;  %v7089_v7 = vadd.f32 %v12922_v16, %v12919_v52  ;;  %v14139_v52 = vld [vmem:[#allocation16_spill] sm:$0xff]  ;;  %v14140_v16 = vld [vmem:[#allocation345_spill] sm:$0xff] }
 0x796   : > { %v7481_v6 = vmax.f32 %v7417_v50, 0.0  ;;  %v7086_v50 = vadd.f32 %v12901_v10, %v12897_v22 }
 0x797   : > { %v6504_v29 = vpop.f32.mrf.mxu3  ;;  %v6172_v3 = vadd.f32 %v14126_v46, %v5859_v31  ;;  %v5700_v46 = vadd.f32 %v14140_v16, %v14139_v52  ;;  %v14154_v52 = vld [vmem:[#allocation91_spill] sm:$0xff]  ;;  %v14155_v16 = vld [vmem:[#allocation349_spill] sm:$0xff] }
 0x798   : > { %7545 = vst [vmem:[%s12523_s8 + $0x128] sm:$0xff] %v7481_v6  ;;  %v6505_v18 = vadd.f32 %v6504_v29, %v6336_v61  ;;  %v5864_v6 = vadd.f32 %v14132_v33, %v5695_v43  ;;  %v14133_v61 = vld [vmem:[#allocation262_spill] sm:$0xff]  ;;  %v7255_v36 = vadd.f32 %v12908_v55, %v7086_v50  ;;  %v14137_v55 = vld [vmem:[#allocation272_spill] sm:$0xff] }
 0x799   : > { %v6341_v19 = vadd.f32 %v14128_v1, %v6172_v3  ;;  %v14144_v43 = vld [vmem:[#allocation82_spill] sm:$0xff] }
 0x79a   : > { %v7350_v13 = vadd.f32 %v12736_v17, %v6505_v18  ;;  %v14124_v17 = vld [vmem:[#allocation78_spill] sm:$0xff]  ;;  %v12971_v53 = vpop.f32.mrf.mxu0  ;;  %v12982_v28 = vpop.f32.mrf.mxu2 }
 0x79b   : > { %v5692_v59 = vadd.f32 %v14125_v45, %v14124_v17  ;;  %v12993_v47 = vpop.f32.mrf.mxu1  ;;  %v7258_v45 = vadd.f32 %v12929_v51, %v7089_v7  ;;  %v14146_v50 = vld [vmem:[#allocation274_spill] sm:$0xff] }
 0x79c   : > { %v7418_v39 = vadd.f32 %v12913_v63, %v7350_v13  ;;  %v14134_v13 = vld [vmem:[#allocation81_spill] sm:$0xff] }
 0x79d   : > { %v5861_v15 = vadd.f32 %v14127_v32, %v5692_v59  ;;  %v5697_v22 = vadd.f32 %v14135_v24, %v14134_v13  ;;  %v7091_v32 = vadd.f32 %v12940_v14, %v12934_v48 }
 0x79e   : > { %v7482_v44 = vmax.f32 %v7418_v39, 0.0  ;;  %v6177_v39 = vadd.f32 %v14136_v11, %v5864_v6  ;;  %v14151_v11 = vld [vmem:[#allocation278_spill] sm:$0xff] }
 0x79f   : > { %v6506_v8 = vpop.f32.mrf.mxu3  ;;  %v5866_v56 = vadd.f32 %v14137_v55, %v5697_v22  ;;  %v7260_v12 = vadd.f32 %v12946_v27, %v7091_v32  ;;  %v14149_v22 = vld [vmem:[#allocation86_spill] sm:$0xff]  ;;  %v14152_v55 = vld [vmem:[#allocation284_spill] sm:$0xff] }
 0x7a0   : > { %7546 = vst [vmem:[%s12523_s8 + $0x130] sm:$0xff] %v7482_v44  ;;  %v6507_v5 = vadd.f32 %v6506_v8, %v6338_v25  ;;  %v14138_v8 = vld [vmem:[#allocation266_spill] sm:$0xff] }
 0x7a2   : > { %v7351_v4 = vadd.f32 %v12748_v21, %v6507_v5  ;;  %v7253_v21 = vadd.f32 %v12890_v20, %v7084_v58  ;;  %v12989_v29 = vpop.f32.mrf.mxu0  ;;  %v13002_v44 = vpop.f32.mrf.mxu2  ;;  %v6346_v5 = vadd.f32 %v14138_v8, %v6177_v39 }
 0x7a4   : > { %v7419_v9 = vadd.f32 %v12913_v63, %v7351_v4  ;;  %6548 = vmatmul.bf16.gmra.mxu3 %v13962_v54  ;;  %v14131_v54 = vld [vmem:[#allocation263_spill] sm:$0xff] }
 0x7a5   : > { %v6174_v40 = vadd.f32 %v14131_v54, %v5861_v15 }
 0x7a6   : > { %v7483_v2 = vmax.f32 %v7419_v9, 0.0  ;;  %v7100_v9 = vpop.f32.mrf.mxu1 }
 0x7a7   : > { %v6509_v26 = vpop.f32.mrf.mxu3  ;;  %v6343_v20 = vadd.f32 %v14133_v61, %v6174_v40 }
 0x7a8   : > { %7547 = vst [vmem:[%s12523_s8 + $0x138] sm:$0xff] %v7483_v2  ;;  %v6510_v62 = vadd.f32 %v6509_v26, %v6341_v19  ;;  %v14142_v2 = vld [vmem:[#allocation276_spill] sm:$0xff]  ;;  %v14143_v19 = vld [vmem:[#allocation269_spill] sm:$0xff] }
 0x7a9   : > { %v5869_v1 = vadd.f32 %v14142_v2, %v5700_v46  ;;  %v5707_v46 = vadd.f32 %v14155_v16, %v14154_v52  ;;  %v14171_v16 = vld [vmem:[#allocation15_spill] sm:$0xff] }
 0x7aa   : > { %v7352_v49 = vadd.f32 %v7253_v21, %v6510_v62  ;;  %v13008_v4 = vpop.f32.mrf.mxu0  ;;  %v7269_v21 = vpop.f32.mrf.mxu2 }
 0x7ab   : > { %v6182_v48 = vadd.f32 %v14146_v50, %v5869_v1  ;;  %v14158_v1 = vld [vmem:[#allocation281_spill] sm:$0xff] }
 0x7ac   : > { %v7420_v0 = vadd.f32 %v12913_v63, %v7352_v49  ;;  %v14145_v49 = vld [vmem:[#allocation346_spill] sm:$0xff] }
 0x7ad   : > { %v5702_v54 = vadd.f32 %v14145_v49, %v14144_v43  ;;  %v14159_v43 = vld [vmem:[#allocation96_spill] sm:$0xff] }
 0x7ae   : > { %v7484_v37 = vmax.f32 %v7420_v0, 0.0  ;;  %v7094_v0 = vadd.f32 %v12956_v35, %v12953_v34  ;;  %v7103_v6 = vpop.f32.mrf.mxu1  ;;  %v14160_v49 = vld [vmem:[#allocation4_spill] sm:$0xff] }
 0x7af   : > { %v6511_v18 = vpop.f32.mrf.mxu3 }
 0x7b0   : > { %7548 = vst [vmem:[%s12523_s8 + $0x140] sm:$0xff] %v7484_v37  ;;  %v6512_v23 = vadd.f32 %v6511_v18, %v6343_v20  ;;  %v14147_v37 = vld [vmem:[#allocation280_spill] sm:$0xff]  ;;  %v14148_v20 = vld [vmem:[#allocation273_spill] sm:$0xff] }
 0x7b1   : > { %v5871_v27 = vadd.f32 %v14147_v37, %v5702_v54  ;;  %v6351_v18 = vadd.f32 %v14148_v20, %v6182_v48  ;;  %v14161_v54 = vld [vmem:[#allocation287_spill] sm:$0xff] }
 0x7b2   : > { %v7353_v10 = vadd.f32 %v7255_v36, %v6512_v23  ;;  %v6934_v14 = vpop.f32.mrf.mxu0  ;;  %v7263_v23 = vadd.f32 %v12961_v60, %v7094_v0  ;;  %v7272_v24 = vpop.f32.mrf.mxu2  ;;  %v14153_v60 = vld [vmem:[#allocation277_spill] sm:$0xff]  ;;  %v14162_v0 = vld [vmem:[#allocation292_spill] sm:$0xff] }
 0x7b3   : > { %v6184_v39 = vadd.f32 %v14151_v11, %v5871_v27  ;;  %v14163_v27 = vld [vmem:[#allocation286_spill] sm:$0xff] }
 0x7b4   : > { %v7421_v31 = vadd.f32 %v12913_v63, %v7353_v10  ;;  %6553 = vmatmul.bf16.gmra.mxu3 %v13974_v41  ;;  %v14141_v41 = vld [vmem:[#allocation270_spill] sm:$0xff]  ;;  %v14150_v10 = vld [vmem:[#allocation348_spill] sm:$0xff] }
 0x7b5   : > { %v6179_v58 = vadd.f32 %v14141_v41, %v5866_v56  ;;  %v5705_v34 = vadd.f32 %v14150_v10, %v14149_v22  ;;  %v6353_v8 = vadd.f32 %v14153_v60, %v6184_v39  ;;  %v14167_v39 = vld [vmem:[#allocation294_spill] sm:$0xff] }
 0x7b6   : > { %v7485_v25 = vmax.f32 %v7421_v31, 0.0 }
 0x7b7   : > { %v6514_v17 = vpop.f32.mrf.mxu3  ;;  %v6348_v26 = vadd.f32 %v14143_v19, %v6179_v58  ;;  %v5874_v56 = vadd.f32 %v14152_v55, %v5705_v34  ;;  %v7099_v58 = vadd.f32 %v12993_v47, %v12989_v29  ;;  %v5710_v29 = vadd.f32 %v14160_v49, %v14159_v43  ;;  %v14166_v34 = vld [vmem:[#allocation290_spill] sm:$0xff]  ;;  %v14168_v55 = vld [vmem:[#allocation289_spill] sm:$0xff]  ;;  %v14176_v49 = vld [vmem:[#allocation296_spill] sm:$0xff] }
 0x7b8   : > { %7549 = vst [vmem:[%s12523_s8 + $0x148] sm:$0xff] %v7485_v25  ;;  %v6515_v59 = vadd.f32 %v6514_v17, %v6346_v5  ;;  %v7105_v5 = vpop.f32.mrf.mxu1 }
 0x7ba   : > { %v7354_v3 = vadd.f32 %v7258_v45, %v6515_v59  ;;  %v6936_v31 = vpop.f32.mrf.mxu0  ;;  %v7274_v41 = vpop.f32.mrf.mxu2 }
 0x7bc   : > { %v7422_v15 = vadd.f32 %v12913_v63, %v7354_v3 }
 0x7be   : > { %v7486_v51 = vmax.f32 %v7422_v15, 0.0  ;;  %v14157_v15 = vld [vmem:[#allocation288_spill] sm:$0xff] }
 0x7bf   : > { %v6516_v62 = vpop.f32.mrf.mxu3  ;;  %v5876_v2 = vadd.f32 %v14157_v15, %v5707_v46  ;;  %v14173_v15 = vld [vmem:[#allocation293_spill] sm:$0xff] }
 0x7c0   : > { %7550 = vst [vmem:[%s12523_s8 + $0x150] sm:$0xff] %v7486_v51  ;;  %v6517_v30 = vadd.f32 %v6516_v62, %v6348_v26  ;;  %v7268_v62 = vadd.f32 %v13002_v44, %v7099_v58 }
 0x7c2   : > { %v7355_v40 = vadd.f32 %v7260_v12, %v6517_v30  ;;  %v6939_v19 = vpop.f32.mrf.mxu0  ;;  %v7108_v30 = vpop.f32.mrf.mxu1 }
 0x7c3   : > { %v7277_v48 = vpop.f32.mrf.mxu2 }
 0x7c4   : > { %v7423_v33 = vadd.f32 %v12913_v63, %v7355_v40  ;;  %6558 = vmatmul.bf16.gmra.mxu3 %v13986_v57  ;;  %v7096_v57 = vadd.f32 %v12975_v38, %v12971_v53  ;;  %v14156_v53 = vld [vmem:[#allocation282_spill] sm:$0xff]  ;;  %v6189_v40 = vadd.f32 %v14161_v54, %v5876_v2  ;;  %v14177_v54 = vld [vmem:[#allocation300_spill] sm:$0xff] }
 0x7c5   : > { %v6187_v38 = vadd.f32 %v14156_v53, %v5874_v56 }
 0x7c6   : > { %v7487_v61 = vmax.f32 %v7423_v33, 0.0  ;;  %v7265_v45 = vadd.f32 %v12982_v28, %v7096_v57  ;;  %v5879_v33 = vadd.f32 %v14162_v0, %v5710_v29 }
 0x7c7   : > { %v6519_v36 = vpop.f32.mrf.mxu3  ;;  %v6356_v51 = vadd.f32 %v14158_v1, %v6187_v38  ;;  %v14172_v38 = vld [vmem:[#allocation298_spill] sm:$0xff] }
 0x7c8   : > { %7551 = vst [vmem:[%s12523_s8 + $0x158] sm:$0xff] %v7487_v61  ;;  %v6520_v13 = vadd.f32 %v6519_v36, %v6351_v18  ;;  %v6358_v61 = vadd.f32 %v14163_v27, %v6189_v40 }
 0x7ca   : > { %v7356_v35 = vadd.f32 %v7263_v23, %v6520_v13  ;;  %v6941_v36 = vpop.f32.mrf.mxu0  ;;  %v14164_v23 = vld [vmem:[#allocation100_spill] sm:$0xff] }
 0x7cb   : > { %v14165_v13 = vld [vmem:[#allocation28_spill] sm:$0xff] }
 0x7cc   : > { %v7424_v7 = vadd.f32 %v12913_v63, %v7356_v35  ;;  %v5712_v22 = vadd.f32 %v14165_v13, %v14164_v23  ;;  %v7104_v35 = vadd.f32 %v7103_v6, %v6934_v14  ;;  %v7106_v6 = vadd.f32 %v7105_v5, %v6936_v31  ;;  %v14181_v23 = vld [vmem:[#allocation10_spill] sm:$0xff] }
 0x7cd   : > { %v7109_v5 = vadd.f32 %v7108_v30, %v6939_v19 }
 0x7ce   : > { %v7488_v25 = vmax.f32 %v7424_v7, 0.0  ;;  %v5881_v57 = vadd.f32 %v14167_v39, %v5712_v22  ;;  %v7273_v60 = vadd.f32 %v7272_v24, %v7104_v35  ;;  %v7275_v24 = vadd.f32 %v7274_v41, %v7106_v6  ;;  %v14183_v35 = vld [vmem:[#allocation299_spill] sm:$0xff]  ;;  %v14188_v6 = vld [vmem:[#allocation301_spill] sm:$0xff] }
 0x7cf   : > { %v6521_v17 = vpop.f32.mrf.mxu3 }
 0x7d0   : > { %7552 = vst [vmem:[%s12523_s8 + $0x160] sm:$0xff] %v7488_v25  ;;  %v6522_v59 = vadd.f32 %v6521_v17, %v6353_v8  ;;  %v14169_v17 = vld [vmem:[#allocation105_spill] sm:$0xff]  ;;  %v6194_v46 = vadd.f32 %v14171_v16, %v5881_v57 }
 0x7d2   : > { %v7357_v3 = vadd.f32 %v7265_v45, %v6522_v59  ;;  %v14170_v45 = vld [vmem:[#allocation62_spill] sm:$0xff]  ;;  %v6944_v14 = vpop.f32.mrf.mxu0  ;;  %v6363_v2 = vadd.f32 %v14173_v15, %v6194_v46  ;;  %v14189_v15 = vld [vmem:[#allocation123_spill] sm:$0xff] }
 0x7d3   : > { %v5715_v59 = vadd.f32 %v14170_v45, %v14169_v17  ;;  %v14186_v17 = vld [vmem:[#allocation302_spill] sm:$0xff] }
 0x7d4   : > { %v7425_v32 = vadd.f32 %v12913_v63, %v7357_v3  ;;  %6563 = vmatmul.bf16.gmra.mxu3 %v12100_v42  ;;  %v7101_v42 = vadd.f32 %v7100_v9, %v13008_v4  ;;  %v6192_v4 = vadd.f32 %v14166_v34, %v5879_v33  ;;  %v7110_v9 = vpop.f32.mrf.mxu1 }
 0x7d5   : > { %v5884_v58 = vadd.f32 %v14172_v38, %v5715_v59  ;;  %v7111_v13 = vadd.f32 %v7110_v9, %v6941_v36 }
 0x7d6   : > { %v7489_v28 = vmax.f32 %v7425_v32, 0.0  ;;  %v7270_v20 = vadd.f32 %v7269_v21, %v7101_v42  ;;  %v6361_v56 = vadd.f32 %v14168_v55, %v6192_v4  ;;  %v7279_v21 = vpop.f32.mrf.mxu2 }
 0x7d7   : > { %v6524_v26 = vpop.f32.mrf.mxu3  ;;  %v6197_v31 = vadd.f32 %v14176_v49, %v5884_v58 }
 0x7d8   : > { %7553 = vst [vmem:[%s12523_s8 + $0x168] sm:$0xff] %v7489_v28  ;;  %v6525_v12 = vadd.f32 %v6524_v26, %v6356_v51  ;;  %v14174_v26 = vld [vmem:[#allocation110_spill] sm:$0xff] }
 0x7da   : > { %v7358_v47 = vadd.f32 %v7268_v62, %v6525_v12  ;;  %v14175_v62 = vld [vmem:[#allocation136_spill] sm:$0xff] }
 0x7db   : > { %v5717_v12 = vadd.f32 %v14175_v62, %v14174_v26 }
 0x7dc   : > { %v7426_v50 = vadd.f32 %v12913_v63, %v7358_v47  ;;  %v7113_v53 = vpop.f32.mrf.mxu1  ;;  %v6946_v47 = vpop.f32.mrf.mxu0 }
 0x7dd   : > { %v5886_v40 = vadd.f32 %v14177_v54, %v5717_v12  ;;  %v7114_v9 = vadd.f32 %v7113_v53, %v6944_v14  ;;  %v14192_v12 = vld [vmem:[#allocation310_spill] sm:$0xff] }
 0x7de   : > { %v7490_v37 = vmax.f32 %v7426_v50, 0.0  ;;  %v7282_v51 = vpop.f32.mrf.mxu2  ;;  %v14178_v50 = vld [vmem:[#allocation295_spill] sm:$0xff] }
 0x7df   : > { %v6526_v44 = vpop.f32.mrf.mxu3  ;;  %v6366_v0 = vadd.f32 %v14178_v50, %v6197_v31  ;;  %v6199_v19 = vadd.f32 %v14181_v23, %v5886_v40  ;;  %v14193_v31 = vld [vmem:[#allocation305_spill] sm:$0xff] }
 0x7e0   : > { %7554 = vst [vmem:[%s12523_s8 + $0x170] sm:$0xff] %v7490_v37  ;;  %v6527_v18 = vadd.f32 %v6526_v44, %v6358_v61  ;;  %v7278_v37 = vadd.f32 %v7277_v48, %v7109_v5  ;;  %v14179_v61 = vld [vmem:[#allocation114_spill] sm:$0xff]  ;;  %v7280_v48 = vadd.f32 %v7279_v21, %v7111_v13  ;;  %v7283_v21 = vadd.f32 %v7282_v51, %v7114_v9  ;;  %v14195_v50 = vld [vmem:[#allocation65_spill] sm:$0xff] }
 0x7e1   : > { %v14180_v44 = vld [vmem:[#allocation2_spill] sm:$0xff] }
 0x7e2   : > { %v7359_v10 = vadd.f32 %v7270_v20, %v6527_v18  ;;  %v5720_v20 = vadd.f32 %v14180_v44, %v14179_v61 }
 0x7e4   : > { %v7427_v11 = vadd.f32 %v12913_v63, %v7359_v10  ;;  %v7115_v41 = vpop.f32.mrf.mxu1  ;;  %v14182_v10 = vld [vmem:[#allocation304_spill] sm:$0xff]  ;;  %v6949_v39 = vpop.f32.mrf.mxu0 }
 0x7e5   : > { %v5889_v34 = vadd.f32 %v14182_v10, %v5720_v20  ;;  %v7116_v26 = vadd.f32 %v7115_v41, %v6946_v47  ;;  %v14197_v20 = vld [vmem:[#allocation312_spill] sm:$0xff] }
 0x7e6   : > { %v7491_v7 = vmax.f32 %v7427_v11, 0.0  ;;  %v7284_v30 = vpop.f32.mrf.mxu2  ;;  %v6368_v11 = vadd.f32 %v14183_v35, %v6199_v19  ;;  %v14198_v19 = vld [vmem:[#allocation307_spill] sm:$0xff]  ;;  %v14200_v35 = vld [vmem:[#allocation166_spill] sm:$0xff] }
 0x7e7   : > { %v6529_v25 = vpop.f32.mrf.mxu3  ;;  %v6202_v36 = vadd.f32 %v14186_v17, %v5889_v34  ;;  %v7285_v54 = vadd.f32 %v7284_v30, %v7116_v26  ;;  %v14203_v17 = vld [vmem:[#allocation311_spill] sm:$0xff] }
 0x7e8   : > { %7555 = vst [vmem:[%s12523_s8 + $0x178] sm:$0xff] %v7491_v7  ;;  %v6530_v8 = vadd.f32 %v6529_v25, %v6361_v56  ;;  %v14184_v56 = vld [vmem:[#allocation119_spill] sm:$0xff] }
 0x7e9   : > { %v14185_v25 = vld [vmem:[#allocation39_spill] sm:$0xff] }
 0x7ea   : > { %v7360_v52 = vadd.f32 %v7273_v60, %v6530_v8  ;;  %v5722_v60 = vadd.f32 %v14185_v25, %v14184_v56  ;;  %v14202_v25 = vld [vmem:[#allocation316_spill] sm:$0xff] }
 0x7ec   : > { %v7428_v3 = vadd.f32 %v12913_v63, %v7360_v52  ;;  %v7118_v55 = vpop.f32.mrf.mxu1  ;;  %v14187_v52 = vld [vmem:[#allocation306_spill] sm:$0xff] }
 0x7ed   : > { %v5891_v16 = vadd.f32 %v14187_v52, %v5722_v60  ;;  %v7119_v41 = vadd.f32 %v7118_v55, %v6949_v39 }
 0x7ee   : > { %v7492_v32 = vmax.f32 %v7428_v3, 0.0  ;;  %v7287_v59 = vpop.f32.mrf.mxu2  ;;  %v6371_v3 = vadd.f32 %v14188_v6, %v6202_v36 }
 0x7ef   : > { %v6531_v28 = vpop.f32.mrf.mxu3  ;;  %v7288_v30 = vadd.f32 %v7287_v59, %v7119_v41 }
 0x7f0   : > { %7556 = vst [vmem:[%s12523_s8 + $0x180] sm:$0xff] %v7492_v32  ;;  %v6532_v1 = vadd.f32 %v6531_v28, %v6363_v2  ;;  %v6951_v32 = vpop.f32.mrf.mxu0  ;;  %v14190_v2 = vld [vmem:[#allocation145_spill] sm:$0xff] }
 0x7f1   : > { %v5725_v28 = vadd.f32 %v14190_v2, %v14189_v15  ;;  %v14207_v2 = vld [vmem:[#allocation319_spill] sm:$0xff] }
 0x7f2   : > { %v7361_v43 = vadd.f32 %v7275_v24, %v6532_v1  ;;  %v14191_v1 = vld [vmem:[#allocation12_spill] sm:$0xff] }
 0x7f3   : > { %v6204_v14 = vadd.f32 %v14191_v1, %v5891_v16  ;;  %v14204_v16 = vld [vmem:[#allocation138_spill] sm:$0xff]  ;;  %v14208_v1 = vld [vmem:[#allocation313_spill] sm:$0xff] }
 0x7f4   : > { %v7429_v29 = vadd.f32 %v12913_v63, %v7361_v43  ;;  %v7120_v53 = vpop.f32.mrf.mxu1  ;;  %v5894_v43 = vadd.f32 %v14192_v12, %v5725_v28 }
 0x7f5   : > { %v6373_v5 = vadd.f32 %v14193_v31, %v6204_v14  ;;  %v14210_v31 = vld [vmem:[#allocation350_spill] sm:$0xff] }
 0x7f6   : > { %v7493_v42 = vmax.f32 %v7429_v29, 0.0  ;;  %v7289_v51 = vpop.f32.mrf.mxu2 }
 0x7f7   : > { %v6534_v33 = vpop.f32.mrf.mxu3 }
 0x7f8   : > { %7557 = vst [vmem:[%s12523_s8 + $0x188] sm:$0xff] %v7493_v42  ;;  %v6535_v27 = vadd.f32 %v6534_v33, %v6366_v0  ;;  %v14194_v42 = vld [vmem:[#allocation128_spill] sm:$0xff]  ;;  %v6954_v47 = vpop.f32.mrf.mxu0 }
 0x7f9   : > { %v5727_v0 = vadd.f32 %v14195_v50, %v14194_v42 }
 0x7fa   : > { %v7362_v18 = vadd.f32 %v7278_v37, %v6535_v27  ;;  %v14196_v37 = vld [vmem:[#allocation308_spill] sm:$0xff] }
 0x7fb   : > { %v6207_v27 = vadd.f32 %v14196_v37, %v5894_v43 }
 0x7fc   : > { %v7430_v22 = vadd.f32 %v12913_v63, %v7362_v18  ;;  %v7123_v44 = vpop.f32.mrf.mxu1  ;;  %v5896_v18 = vadd.f32 %v14197_v20, %v5727_v0  ;;  %v14212_v0 = vld [vmem:[#allocation323_spill] sm:$0xff] }
 0x7fd   : > { %v6376_v13 = vadd.f32 %v14198_v19, %v6207_v27  ;;  %v14213_v27 = vld [vmem:[#allocation317_spill] sm:$0xff] }
 0x7fe   : > { %v7494_v4 = vmax.f32 %v7430_v22, 0.0  ;;  %v7292_v34 = vpop.f32.mrf.mxu2 }
 0x7ff   : > { %v6536_v57 = vpop.f32.mrf.mxu3 }
 0x800   : > { %7558 = vst [vmem:[%s12523_s8 + $0x190] sm:$0xff] %v7494_v4  ;;  %v6537_v7 = vadd.f32 %v6536_v57, %v6368_v11  ;;  %v14199_v4 = vld [vmem:[#allocation132_spill] sm:$0xff]  ;;  %v6956_v56 = vpop.f32.mrf.mxu0 }
 0x801   : > { %v5730_v11 = vadd.f32 %v14200_v35, %v14199_v4  ;;  %v14217_v35 = vld [vmem:[#allocation327_spill] sm:$0xff] }
 0x802   : > { %v7363_v8 = vadd.f32 %v7280_v48, %v6537_v7  ;;  %v14201_v48 = vld [vmem:[#allocation18_spill] sm:$0xff]  ;;  %v7121_v7 = vadd.f32 %v7120_v53, %v6951_v32  ;;  %v7124_v32 = vadd.f32 %v7123_v44, %v6954_v47 }
 0x803   : > { %v6209_v39 = vadd.f32 %v14201_v48, %v5896_v18  ;;  %v5899_v60 = vadd.f32 %v14202_v25, %v5730_v11  ;;  %v14214_v18 = vld [vmem:[#allocation148_spill] sm:$0xff] }
 0x804   : > { %v7431_v45 = vadd.f32 %v12913_v63, %v7363_v8  ;;  %v7125_v9 = vpop.f32.mrf.mxu1  ;;  %v7290_v59 = vadd.f32 %v7289_v51, %v7121_v7  ;;  %v14218_v48 = vld [vmem:[#allocation320_spill] sm:$0xff] }
 0x805   : > { %v6378_v36 = vadd.f32 %v14203_v17, %v6209_v39 }
 0x806   : > { %v7495_v46 = vmax.f32 %v7431_v45, 0.0 }
 0x807   : > { %v6539_v38 = vpop.f32.mrf.mxu3 }
 0x808   : > { %7559 = vst [vmem:[%s12523_s8 + $0x198] sm:$0xff] %v7495_v46  ;;  %v6540_v58 = vadd.f32 %v6539_v38, %v6371_v3  ;;  %v14205_v46 = vld [vmem:[#allocation43_spill] sm:$0xff]  ;;  %v14206_v38 = vld [vmem:[#allocation314_spill] sm:$0xff]  ;;  %v6959_v53 = vpop.f32.mrf.mxu0 }
 0x809   : > { %v5732_v6 = vadd.f32 %v14205_v46, %v14204_v16 }
 0x80a   : > { %v7364_v24 = vadd.f32 %v7283_v21, %v6540_v58  ;;  %v6212_v21 = vadd.f32 %v14206_v38, %v5899_v60  ;;  %v7294_v58 = vpop.f32.mrf.mxu2  ;;  %v14219_v60 = vld [vmem:[#allocation152_spill] sm:$0xff] }
 0x80b   : > { %v5901_v28 = vadd.f32 %v14207_v2, %v5732_v6  ;;  %v14222_v6 = vld [vmem:[#allocation331_spill] sm:$0xff] }
 0x80c   : > { %v7432_v62 = vadd.f32 %v12913_v63, %v7364_v24  ;;  %v6381_v14 = vadd.f32 %v14208_v1, %v6212_v21  ;;  %v7128_v43 = vpop.f32.mrf.mxu1  ;;  %v14223_v21 = vld [vmem:[#allocation324_spill] sm:$0xff]  ;;  %v14225_v1 = vld [vmem:[#allocation49_spill] sm:$0xff] }
 0x80e   : > { %v7496_v49 = vmax.f32 %v7432_v62, 0.0  ;;  %v7293_v62 = vadd.f32 %v7292_v34, %v7124_v32  ;;  %v7129_v34 = vadd.f32 %v7128_v43, %v6959_v53 }
 0x80f   : > { %v6541_v29 = vpop.f32.mrf.mxu3 }
 0x810   : > { %7560 = vst [vmem:[%s12523_s8 + $0x1a0] sm:$0xff] %v7496_v49  ;;  %v6542_v40 = vadd.f32 %v6541_v29, %v6373_v5  ;;  %v14209_v49 = vld [vmem:[#allocation143_spill] sm:$0xff]  ;;  %v14211_v29 = vld [vmem:[#allocation318_spill] sm:$0xff]  ;;  %v6961_v20 = vpop.f32.mrf.mxu0 }
 0x811   : > { %v5735_v5 = vadd.f32 %v14210_v31, %v14209_v49  ;;  %v14227_v31 = vld [vmem:[#allocation335_spill] sm:$0xff] }
 0x812   : > { %v7365_v33 = vadd.f32 %v7285_v54, %v6542_v40  ;;  %v6214_v54 = vadd.f32 %v14211_v29, %v5901_v28  ;;  %v7126_v40 = vadd.f32 %v7125_v9, %v6956_v56  ;;  %v7297_v50 = vpop.f32.mrf.mxu2  ;;  %v14221_v9 = vld [vmem:[#allocation325_spill] sm:$0xff]  ;;  %v14228_v29 = vld [vmem:[#allocation328_spill] sm:$0xff] }
 0x813   : > { %v7298_v56 = vadd.f32 %v7297_v50, %v7129_v34 }
 0x814   : > { %v7433_v61 = vadd.f32 %v12913_v63, %v7365_v33  ;;  %v5904_v33 = vadd.f32 %v14212_v0, %v5735_v5  ;;  %v6383_v47 = vadd.f32 %v14213_v27, %v6214_v54 }
 0x816   : > { %v7497_v23 = vmax.f32 %v7433_v61, 0.0  ;;  %v7295_v61 = vadd.f32 %v7294_v58, %v7126_v40 }
 0x817   : > { %v6544_v22 = vpop.f32.mrf.mxu3 }
 0x818   : > { %7561 = vst [vmem:[%s12523_s8 + $0x1a8] sm:$0xff] %v7497_v23  ;;  %v6545_v10 = vadd.f32 %v6544_v22, %v6376_v13  ;;  %v14215_v23 = vld [vmem:[#allocation46_spill] sm:$0xff]  ;;  %v14216_v22 = vld [vmem:[#allocation321_spill] sm:$0xff] }
 0x819   : > { %v5737_v19 = vadd.f32 %v14215_v23, %v14214_v18  ;;  %v14232_v23 = vld [vmem:[#allocation339_spill] sm:$0xff] }
 0x81a   : > { %v7366_v57 = vadd.f32 %v7288_v30, %v6545_v10  ;;  %v6217_v30 = vadd.f32 %v14216_v22, %v5904_v33  ;;  %v7130_v10 = vpop.f32.mrf.mxu1  ;;  %v7299_v7 = vpop.f32.mrf.mxu2  ;;  %v14229_v33 = vld [vmem:[#allocation161_spill] sm:$0xff]  ;;  %v14233_v22 = vld [vmem:[#allocation332_spill] sm:$0xff] }
 0x81b   : > { %v5906_v11 = vadd.f32 %v14217_v35, %v5737_v19 }
 0x81c   : > { %v7434_v55 = vadd.f32 %v12913_v63, %v7366_v57  ;;  %v6386_v39 = vadd.f32 %v14218_v48, %v6217_v30  ;;  %v14235_v48 = vld [vmem:[#allocation26_spill] sm:$0xff] }
 0x81e   : > { %v7498_v8 = vmax.f32 %v7434_v55, 0.0 }
 0x81f   : > { %v6546_v45 = vpop.f32.mrf.mxu3 }
 0x820   : > { %7562 = vst [vmem:[%s12523_s8 + $0x1b0] sm:$0xff] %v7498_v8  ;;  %v6547_v52 = vadd.f32 %v6546_v45, %v6378_v36  ;;  %v14220_v8 = vld [vmem:[#allocation351_spill] sm:$0xff]  ;;  %v6219_v45 = vadd.f32 %v14221_v9, %v5906_v11 }
 0x821   : > { %v5740_v17 = vadd.f32 %v14220_v8, %v14219_v60 }
 0x822   : > { %v7367_v3 = vadd.f32 %v7290_v59, %v6547_v52  ;;  %v6964_v59 = vpop.f32.mrf.mxu0  ;;  %v7131_v52 = vadd.f32 %v7130_v10, %v6961_v20  ;;  %v7133_v46 = vpop.f32.mrf.mxu1  ;;  %v6388_v58 = vadd.f32 %v14223_v21, %v6219_v45  ;;  %v14238_v45 = vld [vmem:[#allocation336_spill] sm:$0xff] }
 0x823   : > { %v7302_v28 = vpop.f32.mrf.mxu2 }
 0x824   : > { %v7435_v15 = vadd.f32 %v12913_v63, %v7367_v3  ;;  %v5909_v3 = vadd.f32 %v14222_v6, %v5740_v17  ;;  %v14237_v17 = vld [vmem:[#allocation343_spill] sm:$0xff] }
 0x826   : > { %v7499_v24 = vmax.f32 %v7435_v15, 0.0  ;;  %v7300_v15 = vadd.f32 %v7299_v7, %v7131_v52 }
 0x827   : > { %v6549_v26 = vpop.f32.mrf.mxu3 }
 0x828   : > { %7563 = vst [vmem:[%s12523_s8 + $0x1b8] sm:$0xff] %v7499_v24  ;;  %v6550_v12 = vadd.f32 %v6549_v26, %v6381_v14  ;;  %v14224_v24 = vld [vmem:[#allocation157_spill] sm:$0xff] }
 0x829   : > { %v5742_v14 = vadd.f32 %v14225_v1, %v14224_v24  ;;  %v14226_v26 = vld [vmem:[#allocation329_spill] sm:$0xff] }
 0x82a   : > { %v7368_v51 = vadd.f32 %v7293_v62, %v6550_v12  ;;  %v6222_v62 = vadd.f32 %v14226_v26, %v5909_v3  ;;  %v7134_v12 = vadd.f32 %v7133_v46, %v6964_v59  ;;  %v6966_v49 = vpop.f32.mrf.mxu0  ;;  %v7135_v40 = vpop.f32.mrf.mxu1 }
 0x82b   : > { %v5911_v5 = vadd.f32 %v14227_v31, %v5742_v14  ;;  %v7136_v20 = vadd.f32 %v7135_v40, %v6966_v49 }
 0x82c   : > { %v7436_v42 = vadd.f32 %v12913_v63, %v7368_v51  ;;  %v6391_v54 = vadd.f32 %v14228_v29, %v6222_v62  ;;  %v7303_v50 = vadd.f32 %v7302_v28, %v7134_v12  ;;  %v14240_v28 = vld [vmem:[#allocation340_spill] sm:$0xff] }
 0x82e   : > { %v7500_v37 = vmax.f32 %v7436_v42, 0.0 }
 0x82f   : > { %v6551_v41 = vpop.f32.mrf.mxu3 }
 0x830   : > { %7564 = vst [vmem:[%s12523_s8 + $0x1c0] sm:$0xff] %v7500_v37  ;;  %v6552_v44 = vadd.f32 %v6551_v41, %v6383_v47  ;;  %v14230_v37 = vld [vmem:[#allocation352_spill] sm:$0xff]  ;;  %v14231_v41 = vld [vmem:[#allocation333_spill] sm:$0xff] }
 0x831   : > { %v5745_v27 = vadd.f32 %v14230_v37, %v14229_v33 }
 0x832   : > { %v7369_v13 = vadd.f32 %v7295_v61, %v6552_v44  ;;  %v6224_v61 = vadd.f32 %v14231_v41, %v5911_v5  ;;  %v7304_v44 = vpop.f32.mrf.mxu2  ;;  %v6969_v10 = vpop.f32.mrf.mxu0 }
 0x833   : > { %v5914_v19 = vadd.f32 %v14232_v23, %v5745_v27  ;;  %v7138_v11 = vpop.f32.mrf.mxu1 }
 0x834   : > { %v7437_v4 = vadd.f32 %v12913_v63, %v7369_v13  ;;  %v6393_v30 = vadd.f32 %v14233_v22, %v6224_v61 }
 0x836   : > { %v7501_v57 = vmax.f32 %v7437_v4, 0.0  ;;  %v7305_v4 = vadd.f32 %v7304_v44, %v7136_v20 }
 0x837   : > { %v6554_v55 = vpop.f32.mrf.mxu3 }
 0x838   : > { %7565 = vst [vmem:[%s12523_s8 + $0x1c8] sm:$0xff] %v7501_v57  ;;  %v6555_v25 = vadd.f32 %v6554_v55, %v6386_v39  ;;  %v14234_v57 = vld [vmem:[#allocation167_spill] sm:$0xff]  ;;  %v14236_v55 = vld [vmem:[#allocation337_spill] sm:$0xff] }
 0x839   : > { %v5747_v39 = vadd.f32 %v14235_v48, %v14234_v57 }
 0x83a   : > { %v7370_v36 = vadd.f32 %v7298_v56, %v6555_v25  ;;  %v6227_v56 = vadd.f32 %v14236_v55, %v5914_v19  ;;  %v7139_v25 = vadd.f32 %v7138_v11, %v6969_v10  ;;  %v7307_v8 = vpop.f32.mrf.mxu2  ;;  %v6971_v6 = vpop.f32.mrf.mxu0 }
 0x83c   : > { %v7438_v16 = vadd.f32 %v12913_v63, %v7370_v36  ;;  %v5916_v36 = vadd.f32 %v14237_v17, %v5747_v39  ;;  %v6396_v59 = vadd.f32 %v14238_v45, %v6227_v56 }
 0x83e   : > { %v7502_v38 = vmax.f32 %v7438_v16, 0.0  ;;  %v7308_v16 = vadd.f32 %v7307_v8, %v7139_v25 }
 0x83f   : > { %v6556_v32 = vpop.f32.mrf.mxu3 }
 0x840   : > { %7566 = vst [vmem:[%s12523_s8 + $0x1d0] sm:$0xff] %v7502_v38  ;;  %v6557_v2 = vadd.f32 %v6556_v32, %v6388_v58  ;;  %v14239_v38 = vld [vmem:[#allocation341_spill] sm:$0xff]  ;;  %v7140_v58 = vpop.f32.mrf.mxu1 }
 0x841   : > { %v6229_v21 = vadd.f32 %v14239_v38, %v5916_v36  ;;  %v7141_v32 = vadd.f32 %v7140_v58, %v6971_v6 }
 0x842   : > { %v7371_v53 = vadd.f32 %v7300_v15, %v6557_v2  ;;  %v7309_v1 = vpop.f32.mrf.mxu2 }
 0x843   : > { %v6398_v24 = vadd.f32 %v14240_v28, %v6229_v21 }
 0x844   : > { %v7439_v43 = vadd.f32 %v12913_v63, %v7371_v53  ;;  %v7310_v53 = vadd.f32 %v7309_v1, %v7141_v32 }
 0x846   : > { %v7503_v51 = vmax.f32 %v7439_v43, 0.0 }
 0x847   : > { %v6559_v42 = vpop.f32.mrf.mxu3 }
 0x848   : > { %7567 = vst [vmem:[%s12523_s8 + $0x1d8] sm:$0xff] %v7503_v51  ;;  %v6560_v0 = vadd.f32 %v6559_v42, %v6391_v54 }
 0x84a   : > { %v7372_v47 = vadd.f32 %v7303_v50, %v6560_v0 }
 0x84c   : > { %v7440_v18 = vadd.f32 %v12913_v63, %v7372_v47 }
 0x84e   : > { %v7504_v13 = vmax.f32 %v7440_v18, 0.0 }
 0x84f   : > { %v6561_v34 = vpop.f32.mrf.mxu3 }
 0x850   : > { %7568 = vst [vmem:[%s12523_s8 + $0x1e0] sm:$0xff] %v7504_v13  ;;  %v6562_v35 = vadd.f32 %v6561_v34, %v6393_v30 }
 0x852   : > { %v7373_v7 = vadd.f32 %v7305_v4, %v6562_v35 }
 0x854   : > { %v7441_v60 = vadd.f32 %v12913_v63, %v7373_v7 }
 0x856   : > { %v7505_v9 = vmax.f32 %v7441_v60, 0.0 }
 0x857   : > { %v6564_v52 = vpop.f32.mrf.mxu3 }
 0x858   : > { %7569 = vst [vmem:[%s12523_s8 + $0x1e8] sm:$0xff] %v7505_v9  ;;  %v6565_v46 = vadd.f32 %v6564_v52, %v6396_v59 }
 0x85a   : > { %v7374_v3 = vadd.f32 %v7308_v16, %v6565_v46 }
 0x85c   : > { %v7442_v15 = vadd.f32 %v12913_v63, %v7374_v3 }
 0x85e   : > { %v7506_v2 = vmax.f32 %v7442_v15, 0.0 }
 0x85f   : > { %v6566_v14 = vpop.f32.mrf.mxu3 }
 0x860   : > { %7570 = vst [vmem:[%s12523_s8 + $0x1f0] sm:$0xff] %v7506_v2  ;;  %v6567_v26 = vadd.f32 %v6566_v14, %v6398_v24 }
 0x862   : > { %v7375_v62 = vadd.f32 %v7310_v53, %v6567_v26 }
 0x864   : > { %v7443_v12 = vadd.f32 %v12913_v63, %v7375_v62 }
 0x866   : > { %v7507_v43 = vmax.f32 %v7443_v12, 0.0 }
 0x868   : > { %7571 = vst [vmem:[%s12523_s8 + $0x1f8] sm:$0xff] %v7507_v43 }
 0x869 PF: > { %s16_s25 = sadd.s32 1, %s8641_s25   ;;  %s14241_s21 = smov %s8633_s23 }
 0x86a   : > { %p13_p9 = scmp.ge.s32.totalorder %s16_s25, 6   ;;  %s14242_s22 = smov %s8637_s24 }
 0x86b   : > { %s14243_s23 = smov %s14246_s26  ;;  %s14244_s24 = smov %s14250_s27 }
 0x86c   :  { %15 = sbr.rel (!%p13_p9) target bundleno = 3 (0x3), region = 77 }

</bundles_post_ra>
